<compile_context>
chip_gen: v6e
topology: v6e:2x2x1
jax: 0.10.0
libtpu: 0.0.40
codegen_flags: <defaults>
</compile_context>

<pallas_src>
import functools

import jax
import jax.numpy as jnp
from jax.experimental import pallas as pl
from jax.experimental.pallas import tpu as pltpu

# ----------------------------- hyper params ---------------------------------
NZ = 32      # latent dim
NGF = 16     # generator feature maps
NC = 3       # output image channels
KSIZE = 4    # all ConvTranspose2d kernels are 4x4
BN_EPS = 1e-5


# ----------------------------- Pallas kernels -------------------------------
def _matmul_bn_relu_kernel(p_ref, w_ref, g_ref, b_ref, o_ref, *, eps):
    """Fused (Cout,K)@(K,M) -> BatchNorm2d (training-mode batch stats) -> ReLU.

    p_ref: (K, M) bf16, w_ref: (Cout, K) bf16, g/b: (Cout, 1) f32.
    M = N*H*W is the lane axis, so the per-channel mean/var is a lane
    reduction and every VPU op runs on fully utilized vregs.
    """
    acc = jnp.dot(w_ref[...], p_ref[...],
                  preferred_element_type=jnp.float32)        # (Cout, M) f32
    mean = jnp.mean(acc, axis=1, keepdims=True)              # (Cout, 1)
    cent = acc - mean
    var = jnp.mean(cent * cent, axis=1, keepdims=True)       # biased variance
    y = cent * jax.lax.rsqrt(var + eps) * g_ref[...] + b_ref[...]
    o_ref[...] = jnp.maximum(y, 0.0).astype(o_ref.dtype)


def _matmul_tanh_kernel(p_ref, w_ref, o_ref):
    """One M-tile of (Cout,K)@(K,M) with fused tanh (last generator layer)."""
    acc = jnp.dot(w_ref[...], p_ref[...],
                  preferred_element_type=jnp.float32)
    o_ref[...] = jnp.tanh(acc).astype(o_ref.dtype)


def matmul_bn_relu_pallas(patches_km, w_ck, gamma, beta):
    """patches_km: (K, M) bf16, w_ck: (Cout, K) bf16, gamma/beta: (Cout,) f32
    -> (Cout, M) bf16.  The whole layer fits in VMEM -> single invocation."""
    K, M = patches_km.shape
    Cout = w_ck.shape[0]
    g2 = gamma.reshape(Cout, 1).astype(jnp.float32)
    b2 = beta.reshape(Cout, 1).astype(jnp.float32)
    vmem = pl.BlockSpec(memory_space=pltpu.MemorySpace.VMEM)
    return pl.pallas_call(
        functools.partial(_matmul_bn_relu_kernel, eps=BN_EPS),
        out_shape=jax.ShapeDtypeStruct((Cout, M), jnp.bfloat16),
        in_specs=[vmem, vmem, vmem, vmem],
        out_specs=vmem,
    )(patches_km, w_ck, g2, b2)


def matmul_tanh_pallas(patches_km, w_ck):
    """patches_km: (K, M) bf16, w_ck: (Cout, K) bf16 -> (Cout, M) f32.
    Tiled along the lane-dense M axis; "parallel" so v7x shards across TCs."""
    K, M = patches_km.shape
    Cout = w_ck.shape[0]
    tm = M
    for cand in (2048, 1024, 512, 256, 128):
        if M % cand == 0:
            tm = cand
            break
    grid = (M // tm,)
    return pl.pallas_call(
        _matmul_tanh_kernel,
        out_shape=jax.ShapeDtypeStruct((Cout, M), jnp.float32),
        grid=grid,
        in_specs=[
            pl.BlockSpec((K, tm), lambda i: (0, i)),
            pl.BlockSpec((Cout, K), lambda i: (0, 0)),
        ],
        out_specs=pl.BlockSpec((Cout, tm), lambda i: (0, i)),
        compiler_params=pltpu.CompilerParams(
            dimension_semantics=("parallel",)),
    )(patches_km, w_ck)


# --------------------------- im2col glue (JAX) -------------------------------
def _conv_transpose_patches_km(x_cnhw, stride, padding):
    """ConvTranspose2d(k=4, stride, padding) as im2col of the zero-inserted,
    padded input.  Input is CNHW; returns (patches (K=Cin*k*k, M=N*Hout*Wout)
    bf16, Hout, Wout) so the Pallas matmul output (Cout, M) is lane-dense."""
    k = KSIZE
    C, N, H, W = x_cnhw.shape
    Hz = (H - 1) * stride + 1
    Wz = (W - 1) * stride + 1
    z = jnp.zeros((C, N, Hz, Wz), x_cnhw.dtype)
    z = z.at[:, :, ::stride, ::stride].set(x_cnhw)
    pp = k - 1 - padding
    zp = jnp.pad(z, ((0, 0), (0, 0), (pp, pp), (pp, pp)))
    Hout = (H - 1) * stride - 2 * padding + k
    Wout = (W - 1) * stride - 2 * padding + k
    slabs = [zp[:, :, ky:ky + Hout, kx:kx + Wout]
             for ky in range(k) for kx in range(k)]
    p = jnp.stack(slabs, axis=0).reshape(k, k, C, N, Hout, Wout)
    # (ky, kx, C, N, Hout, Wout) -> (C, ky, kx, N, Hout, Wout) -> (K, M)
    p = p.transpose(2, 0, 1, 3, 4, 5).reshape(C * k * k, N * Hout * Wout)
    return p.astype(jnp.bfloat16), Hout, Wout


def _weight_to_mat(w):
    """PyTorch ConvTranspose2d weight (Cin, Cout, k, k) -> (Cout, Cin*k*k) bf16
    with spatial flip so correlation over the zero-inserted input matches the
    transposed-convolution semantics."""
    cin, cout, k, _ = w.shape
    wf = w[:, :, ::-1, ::-1]                              # flip kH, kW
    return (wf.transpose(1, 0, 2, 3)
              .reshape(cout, cin * k * k)
              .astype(jnp.bfloat16))


def _deconv_layer(x_cnhw, w, stride, padding, gamma=None, beta=None,
                  act="bn_relu"):
    """One generator block: ConvTranspose2d -> (BN+ReLU | Tanh). CNHW in/out."""
    N = x_cnhw.shape[1]
    cout = w.shape[1]
    patches, Hout, Wout = _conv_transpose_patches_km(x_cnhw, stride, padding)
    w_mat = _weight_to_mat(w)
    if act == "tanh":
        y = matmul_tanh_pallas(patches, w_mat)                 # (Cout, M) f32
    else:
        y = matmul_bn_relu_pallas(patches, w_mat, gamma, beta)  # (Cout, M) bf16
    return y.reshape(cout, N, Hout, Wout)


# ------------------------------ Generator ------------------------------------
def init_generator_params(key):
    specs = [
        (NZ, NGF * 8),       # ConvT(nz,   ngf*8, 4, 1, 0)
        (NGF * 8, NGF * 4),  # ConvT(ngf8, ngf*4, 4, 2, 1)
        (NGF * 4, NGF * 2),  # ConvT(ngf4, ngf*2, 4, 2, 1)
        (NGF * 2, NGF),      # ConvT(ngf2, ngf,   4, 2, 1)
        (NGF, NC),           # ConvT(ngf,  nc,    4, 2, 1)
    ]
    params = []
    for i, (cin, cout) in enumerate(specs):
        key, kw, kg, kb = jax.random.split(key, 4)
        w = 0.02 * jax.random.normal(kw, (cin, cout, KSIZE, KSIZE), jnp.float32)
        if i < 4:  # BatchNorm params for all but the last block
            gamma = 1.0 + 0.1 * jax.random.normal(kg, (cout,), jnp.float32)
            beta = 0.1 * jax.random.normal(kb, (cout,), jnp.float32)
        else:
            gamma, beta = None, None
        params.append((w, gamma, beta))
    return params


def generator_forward(params, z):
    """z: (N, nz, 1, 1) NCHW -> (N, nc, 64, 64) NCHW."""
    (w1, g1, b1), (w2, g2, b2), (w3, g3, b3), (w4, g4, b4), (w5, _, _) = params
    x = z.astype(jnp.float32).transpose(1, 0, 2, 3)               # CNHW inside
    x = _deconv_layer(x, w1, 1, 0, g1, b1)        # (ngf*8, N,  4,  4)
    x = _deconv_layer(x, w2, 2, 1, g2, b2)        # (ngf*4, N,  8,  8)
    x = _deconv_layer(x, w3, 2, 1, g3, b3)        # (ngf*2, N, 16, 16)
    x = _deconv_layer(x, w4, 2, 1, g4, b4)        # (ngf,   N, 32, 32)
    x = _deconv_layer(x, w5, 2, 1, act="tanh")    # (nc,    N, 64, 64) f32
    return x.transpose(1, 0, 2, 3)                                # back to NCHW


if __name__ == "__main__":
    key = jax.random.PRNGKey(0)
    kp, kz = jax.random.split(key)
    params = init_generator_params(kp)
    z = jax.random.normal(kz, (2, NZ, 1, 1), jnp.float32)

    out = jax.jit(generator_forward)(params, z)
    out = jax.block_until_ready(out)

    assert out.shape == (2, NC, 64, 64), out.shape
    assert bool(jnp.all(jnp.isfinite(out)))
    assert bool(jnp.all(jnp.abs(out) <= 1.0 + 1e-6))  # tanh range
    print("KERNEL_OK")
</pallas_src>

<mosaic_0001>
module attributes {stable_mosaic.version = 11 : i64} {
  func.func @_matmul_bn_relu_kernel(%arg0: memref<512x32xbf16, #tpu.memory_space<vmem>>, %arg1: memref<128x512xbf16, #tpu.memory_space<vmem>>, %arg2: memref<128x1xf32, #tpu.memory_space<vmem>>, %arg3: memref<128x1xf32, #tpu.memory_space<vmem>>, %arg4: memref<128x32xbf16, #tpu.memory_space<vmem>>) attributes {dimension_semantics = [], scalar_prefetch = 0 : i64, scratch_operands = 0 : i64, tpu.core_type = #tpu.core_type<tc>} {
    %c0 = arith.constant 0 : index
    %c0_0 = arith.constant 0 : index
    %0 = vector.load %arg1[%c0, %c0_0] : memref<128x512xbf16, #tpu.memory_space<vmem>>, vector<128x512xbf16>
    %c0_1 = arith.constant 0 : index
    %c0_2 = arith.constant 0 : index
    %1 = vector.load %arg0[%c0_1, %c0_2] : memref<512x32xbf16, #tpu.memory_space<vmem>>, vector<512x32xbf16>
    %cst = arith.constant dense<0.000000e+00> : vector<128x32xf32>
    %2 = tpu.matmul %0, %1, %cst {dimension_numbers = #tpu.dot_dimension_numbers<[1], [0], [0], [1], [0, 0, 1, 1], [], []>} : vector<128x512xbf16>, vector<512x32xbf16>, vector<128x32xf32> -> vector<128x32xf32>
    %cst_3 = arith.constant dense<0.000000e+00> : vector<128xf32>
    %3 = vector.multi_reduction <add>, %2, %cst_3 [1] : vector<128x32xf32> to vector<128xf32>
    %4 = vector.shape_cast %3 : vector<128xf32> to vector<128x1xf32>
    %cst_4 = arith.constant 3.200000e+01 : f32
    %5 = vector.broadcast %cst_4 : f32 to vector<128x1xf32>
    %6 = arith.divf %4, %5 : vector<128x1xf32>
    %7 = vector.broadcast %6 : vector<128x1xf32> to vector<128x32xf32>
    %8 = arith.subf %2, %7 : vector<128x32xf32>
    %9 = arith.mulf %8, %8 : vector<128x32xf32>
    %cst_5 = arith.constant dense<0.000000e+00> : vector<128xf32>
    %10 = vector.multi_reduction <add>, %9, %cst_5 [1] : vector<128x32xf32> to vector<128xf32>
    %11 = vector.shape_cast %10 : vector<128xf32> to vector<128x1xf32>
    %cst_6 = arith.constant 3.200000e+01 : f32
    %12 = vector.broadcast %cst_6 : f32 to vector<128x1xf32>
    %13 = arith.divf %11, %12 : vector<128x1xf32>
    %cst_7 = arith.constant 9.99999974E-6 : f32
    %14 = vector.broadcast %cst_7 : f32 to vector<128x1xf32>
    %15 = arith.addf %13, %14 : vector<128x1xf32>
    %16 = math.rsqrt %15 : vector<128x1xf32>
    %17 = vector.broadcast %16 : vector<128x1xf32> to vector<128x32xf32>
    %18 = arith.mulf %8, %17 : vector<128x32xf32>
    %c0_8 = arith.constant 0 : index
    %c0_9 = arith.constant 0 : index
    %19 = vector.load %arg2[%c0_8, %c0_9] : memref<128x1xf32, #tpu.memory_space<vmem>>, vector<128x1xf32>
    %20 = vector.broadcast %19 : vector<128x1xf32> to vector<128x32xf32>
    %21 = arith.mulf %18, %20 : vector<128x32xf32>
    %c0_10 = arith.constant 0 : index
    %c0_11 = arith.constant 0 : index
    %22 = vector.load %arg3[%c0_10, %c0_11] : memref<128x1xf32, #tpu.memory_space<vmem>>, vector<128x1xf32>
    %23 = vector.broadcast %22 : vector<128x1xf32> to vector<128x32xf32>
    %24 = arith.addf %21, %23 : vector<128x32xf32>
    %cst_12 = arith.constant 0.000000e+00 : f32
    %25 = vector.broadcast %cst_12 : f32 to vector<128x32xf32>
    %26 = arith.maximumf %24, %25 : vector<128x32xf32>
    %27 = arith.truncf %26 : vector<128x32xf32> to vector<128x32xbf16>
    %c0_13 = arith.constant 0 : index
    %c0_14 = arith.constant 0 : index
    %28 = vector.load %arg4[%c0_13, %c0_14] : memref<128x32xbf16, #tpu.memory_space<vmem>>, vector<128x32xbf16>
    tpu.vector_store %arg4[%c0_13, %c0_14], %27 {strides = array<i32>} : memref<128x32xbf16, #tpu.memory_space<vmem>>, vector<128x32xbf16>,
    return
  }
}

module attributes {stable_mosaic.version = 11 : i64} {
  func.func @_matmul_bn_relu_kernel(%arg0: memref<2048x128xbf16, #tpu.memory_space<vmem>>, %arg1: memref<64x2048xbf16, #tpu.memory_space<vmem>>, %arg2: memref<64x1xf32, #tpu.memory_space<vmem>>, %arg3: memref<64x1xf32, #tpu.memory_space<vmem>>, %arg4: memref<64x128xbf16, #tpu.memory_space<vmem>>) attributes {dimension_semantics = [], scalar_prefetch = 0 : i64, scratch_operands = 0 : i64, tpu.core_type = #tpu.core_type<tc>} {
    %c0 = arith.constant 0 : index
    %c0_0 = arith.constant 0 : index
    %0 = vector.load %arg1[%c0, %c0_0] : memref<64x2048xbf16, #tpu.memory_space<vmem>>, vector<64x2048xbf16>
    %c0_1 = arith.constant 0 : index
    %c0_2 = arith.constant 0 : index
    %1 = vector.load %arg0[%c0_1, %c0_2] : memref<2048x128xbf16, #tpu.memory_space<vmem>>, vector<2048x128xbf16>
    %cst = arith.constant dense<0.000000e+00> : vector<64x128xf32>
    %2 = tpu.matmul %0, %1, %cst {dimension_numbers = #tpu.dot_dimension_numbers<[1], [0], [0], [1], [0, 0, 1, 1], [], []>} : vector<64x2048xbf16>, vector<2048x128xbf16>, vector<64x128xf32> -> vector<64x128xf32>
    %cst_3 = arith.constant dense<0.000000e+00> : vector<64xf32>
    %3 = vector.multi_reduction <add>, %2, %cst_3 [1] : vector<64x128xf32> to vector<64xf32>
    %4 = vector.shape_cast %3 : vector<64xf32> to vector<64x1xf32>
    %cst_4 = arith.constant 1.280000e+02 : f32
    %5 = vector.broadcast %cst_4 : f32 to vector<64x1xf32>
    %6 = arith.divf %4, %5 : vector<64x1xf32>
    %7 = vector.broadcast %6 : vector<64x1xf32> to vector<64x128xf32>
    %8 = arith.subf %2, %7 : vector<64x128xf32>
    %9 = arith.mulf %8, %8 : vector<64x128xf32>
    %cst_5 = arith.constant dense<0.000000e+00> : vector<64xf32>
    %10 = vector.multi_reduction <add>, %9, %cst_5 [1] : vector<64x128xf32> to vector<64xf32>
    %11 = vector.shape_cast %10 : vector<64xf32> to vector<64x1xf32>
    %cst_6 = arith.constant 1.280000e+02 : f32
    %12 = vector.broadcast %cst_6 : f32 to vector<64x1xf32>
    %13 = arith.divf %11, %12 : vector<64x1xf32>
    %cst_7 = arith.constant 9.99999974E-6 : f32
    %14 = vector.broadcast %cst_7 : f32 to vector<64x1xf32>
    %15 = arith.addf %13, %14 : vector<64x1xf32>
    %16 = math.rsqrt %15 : vector<64x1xf32>
    %17 = vector.broadcast %16 : vector<64x1xf32> to vector<64x128xf32>
    %18 = arith.mulf %8, %17 : vector<64x128xf32>
    %c0_8 = arith.constant 0 : index
    %c0_9 = arith.constant 0 : index
    %19 = vector.load %arg2[%c0_8, %c0_9] : memref<64x1xf32, #tpu.memory_space<vmem>>, vector<64x1xf32>
    %20 = vector.broadcast %19 : vector<64x1xf32> to vector<64x128xf32>
    %21 = arith.mulf %18, %20 : vector<64x128xf32>
    %c0_10 = arith.constant 0 : index
    %c0_11 = arith.constant 0 : index
    %22 = vector.load %arg3[%c0_10, %c0_11] : memref<64x1xf32, #tpu.memory_space<vmem>>, vector<64x1xf32>
    %23 = vector.broadcast %22 : vector<64x1xf32> to vector<64x128xf32>
    %24 = arith.addf %21, %23 : vector<64x128xf32>
    %cst_12 = arith.constant 0.000000e+00 : f32
    %25 = vector.broadcast %cst_12 : f32 to vector<64x128xf32>
    %26 = arith.maximumf %24, %25 : vector<64x128xf32>
    %27 = arith.truncf %26 : vector<64x128xf32> to vector<64x128xbf16>
    %c0_13 = arith.constant 0 : index
    %c0_14 = arith.constant 0 : index
    %28 = vector.load %arg4[%c0_13, %c0_14] : memref<64x128xbf16, #tpu.memory_space<vmem>>, vector<64x128xbf16>
    tpu.vector_store %arg4[%c0_13, %c0_14], %27 {strides = array<i32>} : memref<64x128xbf16, #tpu.memory_space<vmem>>, vector<64x128xbf16>,
    return
  }
}

module attributes {stable_mosaic.version = 11 : i64} {
  func.func @_matmul_bn_relu_kernel(%arg0: memref<1024x512xbf16, #tpu.memory_space<vmem>>, %arg1: memref<32x1024xbf16, #tpu.memory_space<vmem>>, %arg2: memref<32x1xf32, #tpu.memory_space<vmem>>, %arg3: memref<32x1xf32, #tpu.memory_space<vmem>>, %arg4: memref<32x512xbf16, #tpu.memory_space<vmem>>) attributes {dimension_semantics = [], scalar_prefetch = 0 : i64, scratch_operands = 0 : i64, tpu.core_type = #tpu.core_type<tc>} {
    %c0 = arith.constant 0 : index
    %c0_0 = arith.constant 0 : index
    %0 = vector.load %arg1[%c0, %c0_0] : memref<32x1024xbf16, #tpu.memory_space<vmem>>, vector<32x1024xbf16>
    %c0_1 = arith.constant 0 : index
    %c0_2 = arith.constant 0 : index
    %1 = vector.load %arg0[%c0_1, %c0_2] : memref<1024x512xbf16, #tpu.memory_space<vmem>>, vector<1024x512xbf16>
    %cst = arith.constant dense<0.000000e+00> : vector<32x512xf32>
    %2 = tpu.matmul %0, %1, %cst {dimension_numbers = #tpu.dot_dimension_numbers<[1], [0], [0], [1], [0, 0, 1, 1], [], []>} : vector<32x1024xbf16>, vector<1024x512xbf16>, vector<32x512xf32> -> vector<32x512xf32>
    %cst_3 = arith.constant dense<0.000000e+00> : vector<32xf32>
    %3 = vector.multi_reduction <add>, %2, %cst_3 [1] : vector<32x512xf32> to vector<32xf32>
    %4 = vector.shape_cast %3 : vector<32xf32> to vector<32x1xf32>
    %cst_4 = arith.constant 5.120000e+02 : f32
    %5 = vector.broadcast %cst_4 : f32 to vector<32x1xf32>
    %6 = arith.divf %4, %5 : vector<32x1xf32>
    %7 = vector.broadcast %6 : vector<32x1xf32> to vector<32x512xf32>
    %8 = arith.subf %2, %7 : vector<32x512xf32>
    %9 = arith.mulf %8, %8 : vector<32x512xf32>
    %cst_5 = arith.constant dense<0.000000e+00> : vector<32xf32>
    %10 = vector.multi_reduction <add>, %9, %cst_5 [1] : vector<32x512xf32> to vector<32xf32>
    %11 = vector.shape_cast %10 : vector<32xf32> to vector<32x1xf32>
    %cst_6 = arith.constant 5.120000e+02 : f32
    %12 = vector.broadcast %cst_6 : f32 to vector<32x1xf32>
    %13 = arith.divf %11, %12 : vector<32x1xf32>
    %cst_7 = arith.constant 9.99999974E-6 : f32
    %14 = vector.broadcast %cst_7 : f32 to vector<32x1xf32>
    %15 = arith.addf %13, %14 : vector<32x1xf32>
    %16 = math.rsqrt %15 : vector<32x1xf32>
    %17 = vector.broadcast %16 : vector<32x1xf32> to vector<32x512xf32>
    %18 = arith.mulf %8, %17 : vector<32x512xf32>
    %c0_8 = arith.constant 0 : index
    %c0_9 = arith.constant 0 : index
    %19 = vector.load %arg2[%c0_8, %c0_9] : memref<32x1xf32, #tpu.memory_space<vmem>>, vector<32x1xf32>
    %20 = vector.broadcast %19 : vector<32x1xf32> to vector<32x512xf32>
    %21 = arith.mulf %18, %20 : vector<32x512xf32>
    %c0_10 = arith.constant 0 : index
    %c0_11 = arith.constant 0 : index
    %22 = vector.load %arg3[%c0_10, %c0_11] : memref<32x1xf32, #tpu.memory_space<vmem>>, vector<32x1xf32>
    %23 = vector.broadcast %22 : vector<32x1xf32> to vector<32x512xf32>
    %24 = arith.addf %21, %23 : vector<32x512xf32>
    %cst_12 = arith.constant 0.000000e+00 : f32
    %25 = vector.broadcast %cst_12 : f32 to vector<32x512xf32>
    %26 = arith.maximumf %24, %25 : vector<32x512xf32>
    %27 = arith.truncf %26 : vector<32x512xf32> to vector<32x512xbf16>
    %c0_13 = arith.constant 0 : index
    %c0_14 = arith.constant 0 : index
    %28 = vector.load %arg4[%c0_13, %c0_14] : memref<32x512xbf16, #tpu.memory_space<vmem>>, vector<32x512xbf16>
    tpu.vector_store %arg4[%c0_13, %c0_14], %27 {strides = array<i32>} : memref<32x512xbf16, #tpu.memory_space<vmem>>, vector<32x512xbf16>,
    return
  }
}

module attributes {stable_mosaic.version = 11 : i64} {
  func.func @_matmul_bn_relu_kernel(%arg0: memref<512x2048xbf16, #tpu.memory_space<vmem>>, %arg1: memref<16x512xbf16, #tpu.memory_space<vmem>>, %arg2: memref<16x1xf32, #tpu.memory_space<vmem>>, %arg3: memref<16x1xf32, #tpu.memory_space<vmem>>, %arg4: memref<16x2048xbf16, #tpu.memory_space<vmem>>) attributes {dimension_semantics = [], scalar_prefetch = 0 : i64, scratch_operands = 0 : i64, tpu.core_type = #tpu.core_type<tc>} {
    %c0 = arith.constant 0 : index
    %c0_0 = arith.constant 0 : index
    %0 = vector.load %arg1[%c0, %c0_0] : memref<16x512xbf16, #tpu.memory_space<vmem>>, vector<16x512xbf16>
    %c0_1 = arith.constant 0 : index
    %c0_2 = arith.constant 0 : index
    %1 = vector.load %arg0[%c0_1, %c0_2] : memref<512x2048xbf16, #tpu.memory_space<vmem>>, vector<512x2048xbf16>
    %cst = arith.constant dense<0.000000e+00> : vector<16x2048xf32>
    %2 = tpu.matmul %0, %1, %cst {dimension_numbers = #tpu.dot_dimension_numbers<[1], [0], [0], [1], [0, 0, 1, 1], [], []>} : vector<16x512xbf16>, vector<512x2048xbf16>, vector<16x2048xf32> -> vector<16x2048xf32>
    %cst_3 = arith.constant dense<0.000000e+00> : vector<16xf32>
    %3 = vector.multi_reduction <add>, %2, %cst_3 [1] : vector<16x2048xf32> to vector<16xf32>
    %4 = vector.shape_cast %3 : vector<16xf32> to vector<16x1xf32>
    %cst_4 = arith.constant 2.048000e+03 : f32
    %5 = vector.broadcast %cst_4 : f32 to vector<16x1xf32>
    %6 = arith.divf %4, %5 : vector<16x1xf32>
    %7 = vector.broadcast %6 : vector<16x1xf32> to vector<16x2048xf32>
    %8 = arith.subf %2, %7 : vector<16x2048xf32>
    %9 = arith.mulf %8, %8 : vector<16x2048xf32>
    %cst_5 = arith.constant dense<0.000000e+00> : vector<16xf32>
    %10 = vector.multi_reduction <add>, %9, %cst_5 [1] : vector<16x2048xf32> to vector<16xf32>
    %11 = vector.shape_cast %10 : vector<16xf32> to vector<16x1xf32>
    %cst_6 = arith.constant 2.048000e+03 : f32
    %12 = vector.broadcast %cst_6 : f32 to vector<16x1xf32>
    %13 = arith.divf %11, %12 : vector<16x1xf32>
    %cst_7 = arith.constant 9.99999974E-6 : f32
    %14 = vector.broadcast %cst_7 : f32 to vector<16x1xf32>
    %15 = arith.addf %13, %14 : vector<16x1xf32>
    %16 = math.rsqrt %15 : vector<16x1xf32>
    %17 = vector.broadcast %16 : vector<16x1xf32> to vector<16x2048xf32>
    %18 = arith.mulf %8, %17 : vector<16x2048xf32>
    %c0_8 = arith.constant 0 : index
    %c0_9 = arith.constant 0 : index
    %19 = vector.load %arg2[%c0_8, %c0_9] : memref<16x1xf32, #tpu.memory_space<vmem>>, vector<16x1xf32>
    %20 = vector.broadcast %19 : vector<16x1xf32> to vector<16x2048xf32>
    %21 = arith.mulf %18, %20 : vector<16x2048xf32>
    %c0_10 = arith.constant 0 : index
    %c0_11 = arith.constant 0 : index
    %22 = vector.load %arg3[%c0_10, %c0_11] : memref<16x1xf32, #tpu.memory_space<vmem>>, vector<16x1xf32>
    %23 = vector.broadcast %22 : vector<16x1xf32> to vector<16x2048xf32>
    %24 = arith.addf %21, %23 : vector<16x2048xf32>
    %cst_12 = arith.constant 0.000000e+00 : f32
    %25 = vector.broadcast %cst_12 : f32 to vector<16x2048xf32>
    %26 = arith.maximumf %24, %25 : vector<16x2048xf32>
    %27 = arith.truncf %26 : vector<16x2048xf32> to vector<16x2048xbf16>
    %c0_13 = arith.constant 0 : index
    %c0_14 = arith.constant 0 : index
    %28 = vector.load %arg4[%c0_13, %c0_14] : memref<16x2048xbf16, #tpu.memory_space<vmem>>, vector<16x2048xbf16>
    tpu.vector_store %arg4[%c0_13, %c0_14], %27 {strides = array<i32>} : memref<16x2048xbf16, #tpu.memory_space<vmem>>, vector<16x2048xbf16>,
    return
  }
}

module attributes {stable_mosaic.version = 11 : i64} {
  func.func @_matmul_tanh_kernel(%arg0: i32, %arg1: memref<256x2048xbf16, #tpu.memory_space<vmem>>, %arg2: memref<3x256xbf16, #tpu.memory_space<vmem>>, %arg3: memref<3x2048xf32, #tpu.memory_space<vmem>>) attributes {dimension_semantics = [#tpu.dimension_semantics<parallel>], iteration_bounds = array<i64: 4>, scalar_prefetch = 0 : i64, scratch_operands = 0 : i64, tpu.core_type = #tpu.core_type<tc>, window_params = [{transform_indices = @transform_0, window_bounds = array<i64: 256, 2048>}, {pipeline_mode = #tpu.pipeline_mode<synchronous>, transform_indices = @transform_1, window_bounds = array<i64: 3, 256>}, {transform_indices = @transform_2, window_bounds = array<i64: 3, 2048>}]} {
    %c0 = arith.constant 0 : index
    %c0_0 = arith.constant 0 : index
    %0 = vector.load %arg2[%c0, %c0_0] : memref<3x256xbf16, #tpu.memory_space<vmem>>, vector<3x256xbf16>
    %c0_1 = arith.constant 0 : index
    %c0_2 = arith.constant 0 : index
    %1 = vector.load %arg1[%c0_1, %c0_2] : memref<256x2048xbf16, #tpu.memory_space<vmem>>, vector<256x2048xbf16>
    %cst = arith.constant dense<0.000000e+00> : vector<3x2048xf32>
    %2 = tpu.matmul %0, %1, %cst {dimension_numbers = #tpu.dot_dimension_numbers<[1], [0], [0], [1], [0, 0, 1, 1], [], []>} : vector<3x256xbf16>, vector<256x2048xbf16>, vector<3x2048xf32> -> vector<3x2048xf32>
    %3 = math.tanh %2 : vector<3x2048xf32>
    %c0_3 = arith.constant 0 : index
    %c0_4 = arith.constant 0 : index
    %4 = vector.load %arg3[%c0_3, %c0_4] : memref<3x2048xf32, #tpu.memory_space<vmem>>, vector<3x2048xf32>
    tpu.vector_store %arg3[%c0_3, %c0_4], %3 {strides = array<i32>} : memref<3x2048xf32, #tpu.memory_space<vmem>>, vector<3x2048xf32>,
    return
  }
  func.func @transform_0(%arg0: i32) -> (i32, i32) {
    %c0_i32 = arith.constant 0 : i32
    %c0_i32_0 = arith.constant 0 : i32
    return %c0_i32, %arg0 : i32, i32
  }
  func.func @transform_1(%arg0: i32) -> (i32, i32) {
    %c0_i32 = arith.constant 0 : i32
    %c0_i32_0 = arith.constant 0 : i32
    %c0_i32_1 = arith.constant 0 : i32
    return %c0_i32, %c0_i32_0 : i32, i32
  }
  func.func @transform_2(%arg0: i32) -> (i32, i32) {
    %c0_i32 = arith.constant 0 : i32
    %c0_i32_0 = arith.constant 0 : i32
    return %c0_i32, %arg0 : i32, i32
  }
}

</mosaic_0001>

<bundles_post_ra>
// kernel: generator_forward.5
= control target key start
LH: loop header
LB: loop body
LE: loop exit
PB: predicated region body
PF: predicated region fallthrough
CT: control target
= control target key end

     0   :  { %v1534_v1 = vmov 0   ;;  %vm660_vm0 = vcmask 261120   ;;  %vm1174_vm1 = vcmask 257024   ;;  %s2178_s0 = inlined_call_operand.vmem [shape: bf16[512,32], index: 0, kind: input, shape index: {}]   ;;  %s2179_s1 = inlined_call_operand.vmem [shape: bf16[128,512], index: 1, kind: input, shape index: {}]   ;;  %s2180_s2 = inlined_call_operand.vmem [shape: f32[128,1], index: 2, kind: input, shape index: {}]   ;;  %s2181_s3 = inlined_call_operand.vmem [shape: f32[128,1], index: 3, kind: input, shape index: {}]   ;;  %s2182_s4 = inlined_call_operand.vmem [shape: bf16[128,32], index: 4, kind: output, shape index: {}]  }
   0x1   :  { %v1422_v0 = vld [vmem:[%s2178_s0 + $0x78] sm:$0xff]   ;;  %1421 = vset.pattern.permute.xlu1 %v1534_v1  ;;  %1420 = vset.pattern.permute.xlu0 %v1534_v1  ;;  %v1426_v5 = vld [vmem:[%s2178_s0 + $0x70] sm:$0xff]   ;;  %v1430_v9 = vld [vmem:[%s2178_s0 + $0x68] sm:$0xff]  }
   0x2   :  { %v1423_v2 = vld [vmem:[%s2178_s0 + $0xf8] sm:$0xff]   ;;  %1291 = vmatprep.subr.bf16.mxu0 %v1422_v0  ;;  %v1427_v6 = vld [vmem:[%s2178_s0 + $0xf0] sm:$0xff]   ;;  %v1431_v10 = vld [vmem:[%s2178_s0 + $0xe8] sm:$0xff]  }
   0x3   :  { %v1424_v3 = vld [vmem:[%s2178_s0 + $0x38] sm:$0xff]   ;;  %1355 = vmatprep.subr.bf16.mxu1 %v1423_v2  ;;  %v1428_v7 = vld [vmem:[%s2178_s0 + $0x30] sm:$0xff]   ;;  %v1432_v11 = vld [vmem:[%s2178_s0 + $0x28] sm:$0xff]  }
   0x4   :  { %v1425_v4 = vld [vmem:[%s2178_s0 + $0xb8] sm:$0xff]   ;;  %1292 = vmatpush3.bf16.msra.mxu0 %v1424_v3  ;;  %v1429_v8 = vld [vmem:[%s2178_s0 + $0xb0] sm:$0xff]   ;;  %v1433_v12 = vld [vmem:[%s2178_s0 + $0xa8] sm:$0xff]  }
   0x5   :  { %1356 = vmatpush3.bf16.msra.mxu1 %v1425_v4  ;;  %1293 = vmatprep.subr.bf16.mxu0 %v1426_v5  ;;  %v1434_v13 = vld [vmem:[%s2178_s0 + $0x60] sm:$0xff]   ;;  %v1438_v17 = vld [vmem:[%s2178_s0 + $0x58] sm:$0xff]   ;;  %v1442_v21 = vld [vmem:[%s2178_s0 + $0x50] sm:$0xff]  }
   0x6   :  { %1357 = vmatprep.subr.bf16.mxu1 %v1427_v6  ;;  %v1435_v14 = vld [vmem:[%s2178_s0 + $0xe0] sm:$0xff]   ;;  %v1439_v18 = vld [vmem:[%s2178_s0 + $0xd8] sm:$0xff]   ;;  %v1443_v22 = vld [vmem:[%s2178_s0 + $0xd0] sm:$0xff]  }
   0x7   :  { %v1436_v15 = vld [vmem:[%s2178_s0 + $0x20] sm:$0xff]   ;;  %v1440_v19 = vld [vmem:[%s2178_s0 + $0x18] sm:$0xff]   ;;  %v1444_v23 = vld [vmem:[%s2178_s0 + $0x10] sm:$0xff]  }
   0x8   :  { %1294 = vmatpush3.bf16.msra.mxu0 %v1428_v7  ;;  %v1437_v16 = vld [vmem:[%s2178_s0 + $0xa0] sm:$0xff]   ;;  %v1441_v20 = vld [vmem:[%s2178_s0 + $0x98] sm:$0xff]   ;;  %v1445_v24 = vld [vmem:[%s2178_s0 + $0x90] sm:$0xff]  }
   0x9   :  { %1358 = vmatpush3.bf16.msra.mxu1 %v1429_v8  ;;  %1295 = vmatprep.subr.bf16.mxu0 %v1430_v9  ;;  %v1446_v25 = vld [vmem:[%s2178_s0 + $0x48] sm:$0xff]   ;;  %v1450_v29 = vld [vmem:[%s2178_s0 + $0x40] sm:$0xff]   ;;  %v872_v48 = vld [vmem:[%s2180_s2 + $0x10] sm:$0xff] }
   0xa   :  { %1359 = vmatprep.subr.bf16.mxu1 %v1431_v10  ;;  %v1447_v26 = vld [vmem:[%s2178_s0 + $0xc8] sm:$0xff]   ;;  %v1451_v30 = vld [vmem:[%s2178_s0 + $0xc0] sm:$0xff]   ;;  %v873_v54 = vld [vmem:[%s2180_s2 + $0x18] sm:$0xff] }
   0xb   :  { %v1448_v27 = vld [vmem:[%s2178_s0 + $0x8] sm:$0xff]   ;;  %v1452_v31 = vld [vmem:[%s2178_s0] sm:$0xff]   ;;  %v881_v58 = vld [vmem:[%s2180_s2 + $0x58] sm:$0xff] }
   0xc   :  { %1296 = vmatpush3.bf16.msra.mxu0 %v1432_v11  ;;  %v1449_v28 = vld [vmem:[%s2178_s0 + $0x88] sm:$0xff]   ;;  %v1453_v32 = vld [vmem:[%s2178_s0 + $0x80] sm:$0xff]   ;;  %v876_v0 = vld [vmem:[%s2180_s2 + $0x30] sm:$0xff] }
   0xd   :  { %1360 = vmatpush3.bf16.msra.mxu1 %v1433_v12  ;;  %1297 = vmatprep.subr.bf16.mxu0 %v1434_v13  ;;  %v1454_v33 = vld [vmem:[%s2179_s1] ss:$16 sps:$4 sm:$0xff]   ;;  %v1456_v34 = vld [vmem:[%s2179_s1 + $0x4] ss:$16 sps:$4 sm:$0xff]   ;;  %v1457_v35 = vld [vmem:[%s2179_s1 + $0x8] ss:$16 sps:$4 sm:$0xff]  }
   0xe   :  { %1361 = vmatprep.subr.bf16.mxu1 %v1435_v14  ;;  %v1459_v36 = vld [vmem:[%s2179_s1 + $0xc] ss:$16 sps:$4 sm:$0xff]   ;;  %498 = vmatprep.mubr.bf16.mxu0 %v1456_v34  ;;  %v1460_v37 = vld [vmem:[%s2179_s1 + $0x24] ss:$16 sps:$4 sm:$0xff]   ;;  %v1464_v39 = vld [vmem:[%s2179_s1 + $0x20] ss:$16 sps:$4 sm:$0xff]  }
   0xf   :  { %595 = vmatprep.mubr.bf16.mxu1 %v1459_v36  ;;  %v1462_v38 = vld [vmem:[%s2179_s1 + $0x2c] ss:$16 sps:$4 sm:$0xff]   ;;  %v1465_v40 = vld [vmem:[%s2179_s1 + $0x28] ss:$16 sps:$4 sm:$0xff]   ;;  %v1466_v41 = vld [vmem:[%s2179_s1 + $0x44] ss:$16 sps:$4 sm:$0xff]  }
  0x10   :  { %1298 = vmatpush3.bf16.msra.mxu0 %v1436_v15  ;;  %v1468_v42 = vld [vmem:[%s2179_s1 + $0x4c] ss:$16 sps:$4 sm:$0xff]   ;;  %v1470_v43 = vld [vmem:[%s2179_s1 + $0x40] ss:$16 sps:$4 sm:$0xff]   ;;  %v1471_v44 = vld [vmem:[%s2179_s1 + $0x48] ss:$16 sps:$4 sm:$0xff]  }
  0x11   :  { %1362 = vmatpush3.bf16.msra.mxu1 %v1437_v16  ;;  %1299 = vmatprep.subr.bf16.mxu0 %v1438_v17  ;;  %v1472_v45 = vld [vmem:[%s2179_s1 + $0x64] ss:$16 sps:$4 sm:$0xff]   ;;  %v1474_v46 = vld [vmem:[%s2179_s1 + $0x6c] ss:$16 sps:$4 sm:$0xff]   ;;  %v1476_v49 = vld [vmem:[%s2179_s1 + $0x60] ss:$16 sps:$4 sm:$0xff]  }
  0x12   :  { %1363 = vmatprep.subr.bf16.mxu1 %v1439_v18  ;;  %v871_v47 = vld [vmem:[%s2180_s2 + $0x8] sm:$0xff]  ;;  %v1478_v51 = vld [vmem:[%s2179_s1 + $0x84] ss:$16 sps:$4 sm:$0xff]   ;;  %v1482_v57 = vld [vmem:[%s2179_s1 + $0x80] ss:$16 sps:$4 sm:$0xff]  }
  0x13   :  { %893 = vperm.xlu1 %1421, %v871_v47   ;;  %v1477_v50 = vld [vmem:[%s2179_s1 + $0x68] ss:$16 sps:$4 sm:$0xff]   ;;  %v870_v52 = vld [vmem:[%s2180_s2] sm:$0xff]  ;;  %v1480_v53 = vld [vmem:[%s2179_s1 + $0x8c] ss:$16 sps:$4 sm:$0xff]  }
  0x14   :  { %1300 = vmatpush3.bf16.msra.mxu0 %v1440_v19  ;;  %888 = vperm.xlu0 %1420, %v870_v52   ;;  %v879_v55 = vld [vmem:[%s2180_s2 + $0x48] sm:$0xff]  ;;  %v874_v56 = vld [vmem:[%s2180_s2 + $0x20] sm:$0xff]  ;;  %v885_v2 = vld [vmem:[%s2180_s2 + $0x78] sm:$0xff] }
  0x15   :  { %1364 = vmatpush3.bf16.msra.mxu1 %v1441_v20  ;;  %1301 = vmatprep.subr.bf16.mxu0 %v1442_v21  ;;  %v1483_v59 = vld [vmem:[%s2179_s1 + $0x88] ss:$16 sps:$4 sm:$0xff]   ;;  %v1484_v60 = vld [vmem:[%s2179_s1 + $0xa4] ss:$16 sps:$4 sm:$0xff]   ;;  %v1486_v61 = vld [vmem:[%s2179_s1 + $0xac] ss:$16 sps:$4 sm:$0xff]  }
  0x16   :  { %1365 = vmatprep.subr.bf16.mxu1 %v1443_v22  ;;  %v875_v62 = vld [vmem:[%s2180_s2 + $0x28] sm:$0xff]  ;;  %v1488_v1 = vld [vmem:[%s2179_s1 + $0xa0] ss:$16 sps:$4 sm:$0xff]   ;;  %v1490_v4 = vld [vmem:[%s2179_s1 + $0xc4] ss:$16 sps:$4 sm:$0xff]  }
  0x17   :  { %898 = vperm.xlu1 %1421, %v872_v48   ;;  %v883_v63 = vld [vmem:[%s2180_s2 + $0x68] sm:$0xff]  ;;  %v877_v6 = vld [vmem:[%s2180_s2 + $0x38] sm:$0xff]  ;;  %v878_v8 = vld [vmem:[%s2180_s2 + $0x40] sm:$0xff] }
  0x18   :  { %1302 = vmatpush3.bf16.msra.mxu0 %v1444_v23  ;;  %933 = vperm.xlu0 %1420, %v879_v55   ;;  %v1489_v3 = vld [vmem:[%s2179_s1 + $0xa8] ss:$16 sps:$4 sm:$0xff]   ;;  %v1492_v5 = vld [vmem:[%s2179_s1 + $0xcc] ss:$16 sps:$4 sm:$0xff]   ;;  %v1494_v9 = vld [vmem:[%s2179_s1 + $0xc0] ss:$16 sps:$4 sm:$0xff]  }
  0x19   :  { %1366 = vmatpush3.bf16.msra.mxu1 %v1445_v24  ;;  %1303 = vmatprep.subr.bf16.mxu0 %v1446_v25  ;;  %v983_v7 = vld [vmem:[%s2181_s3 + $0x8] sm:$0xff]  ;;  %v985_v10 = vld [vmem:[%s2181_s3 + $0x18] sm:$0xff]  ;;  %v1496_v12 = vld [vmem:[%s2179_s1 + $0xe4] ss:$16 sps:$4 sm:$0xff]  }
  0x1a   :  { %1367 = vmatprep.subr.bf16.mxu1 %v1447_v26  ;;  %v1495_v11 = vld [vmem:[%s2179_s1 + $0xc8] ss:$16 sps:$4 sm:$0xff]   ;;  %v1498_v13 = vld [vmem:[%s2179_s1 + $0xec] ss:$16 sps:$4 sm:$0xff]   ;;  %v880_v14 = vld [vmem:[%s2180_s2 + $0x50] sm:$0xff] }
  0x1b   :  { %903 = vperm.xlu1 %1421, %v873_v54   ;;  %v987_v15 = vld [vmem:[%s2181_s3 + $0x28] sm:$0xff]  ;;  %v882_v16 = vld [vmem:[%s2180_s2 + $0x60] sm:$0xff]  ;;  %v989_v18 = vld [vmem:[%s2181_s3 + $0x38] sm:$0xff] }
  0x1c   :  { %1304 = vmatpush3.bf16.msra.mxu0 %v1448_v27  ;;  %943 = vperm.xlu0 %1420, %v881_v58   ;;  %v1500_v17 = vld [vmem:[%s2179_s1 + $0xe0] ss:$16 sps:$4 sm:$0xff]   ;;  %v1501_v19 = vld [vmem:[%s2179_s1 + $0xe8] ss:$16 sps:$4 sm:$0xff]  }
  0x1d   :  { %1368 = vmatpush3.bf16.msra.mxu1 %v1449_v28  ;;  %1305 = vmatprep.subr.bf16.mxu0 %v1450_v29  ;;  %v884_v20 = vld [vmem:[%s2180_s2 + $0x70] sm:$0xff]  ;;  %v991_v21 = vld [vmem:[%s2181_s3 + $0x48] sm:$0xff]  ;;  %v982_v22 = vld [vmem:[%s2181_s3] sm:$0xff] }
  0x1e   :  { %1369 = vmatprep.subr.bf16.mxu1 %v1451_v30  ;;  %v993_v23 = vld [vmem:[%s2181_s3 + $0x58] sm:$0xff]  ;;  %v984_v24 = vld [vmem:[%s2181_s3 + $0x10] sm:$0xff]  ;;  %v986_v25 = vld [vmem:[%s2181_s3 + $0x20] sm:$0xff] }
  0x1f   :  { %908 = vperm.xlu1 %1421, %v874_v56   ;;  %v988_v26 = vld [vmem:[%s2181_s3 + $0x30] sm:$0xff]  ;;  %v990_v27 = vld [vmem:[%s2181_s3 + $0x40] sm:$0xff] }
  0x20   :  { %1306 = vmatpush3.bf16.msra.mxu0 %v1452_v31  ;;  %953 = vperm.xlu0 %1420, %v883_v63   ;;  %v992_v28 = vld [vmem:[%s2181_s3 + $0x50] sm:$0xff] }
  0x21   :  { %1370 = vmatpush3.bf16.msra.mxu1 %v1453_v32 }
  0x23   :  { %499 = vmatmul.mubr.bf16.vlgmr.msra.gmra.mxu0 %v1454_v33  ;;  %913 = vperm.xlu1 %1421, %v875_v62  }
  0x24   :  { %596 = vmatmul.mubr.bf16.vlgmr.msra.gmra.mxu1 %v1457_v35  ;;  %506 = vmatprep.mubr.bf16.mxu0 %v1460_v37 }
  0x25   :  { %603 = vmatprep.mubr.bf16.mxu1 %v1462_v38  ;;  %963 = vperm.xlu0 %1420, %v885_v2  }
  0x27   :  { %918 = vperm.xlu1 %1421, %v876_v0  }
  0x29   :  { %1005 = vperm.xlu0 %1420, %v983_v7  }
  0x2b   :  { %507 = vmatmul.mubr.bf16.gmra.mxu0 %v1464_v39  ;;  %923 = vperm.xlu1 %1421, %v877_v6  }
  0x2c   :  { %604 = vmatmul.mubr.bf16.gmra.mxu1 %v1465_v40  ;;  %514 = vmatprep.mubr.bf16.mxu0 %v1466_v41 }
  0x2d   :  { %611 = vmatprep.mubr.bf16.mxu1 %v1468_v42  ;;  %1015 = vperm.xlu0 %1420, %v985_v10  }
  0x2f   :  { %928 = vperm.xlu1 %1421, %v878_v8  }
  0x31   :  { %1025 = vperm.xlu0 %1420, %v987_v15  }
  0x33   :  { %515 = vmatmul.mubr.bf16.gmra.mxu0 %v1470_v43  ;;  %938 = vperm.xlu1 %1421, %v880_v14  }
  0x34   :  { %612 = vmatmul.mubr.bf16.gmra.mxu1 %v1471_v44  ;;  %522 = vmatprep.mubr.bf16.mxu0 %v1472_v45 }
  0x35   :  { %619 = vmatprep.mubr.bf16.mxu1 %v1474_v46  ;;  %1035 = vperm.xlu0 %1420, %v989_v18  }
  0x37   :  { %948 = vperm.xlu1 %1421, %v882_v16  }
  0x39   :  { %1045 = vperm.xlu0 %1420, %v991_v21  }
  0x3b   :  { %523 = vmatmul.mubr.bf16.gmra.mxu0 %v1476_v49  ;;  %958 = vperm.xlu1 %1421, %v884_v20  }
  0x3c   :  { %620 = vmatmul.mubr.bf16.gmra.mxu1 %v1477_v50  ;;  %530 = vmatprep.mubr.bf16.mxu0 %v1478_v51 }
  0x3d   :  { %627 = vmatprep.mubr.bf16.mxu1 %v1480_v53  ;;  %1055 = vperm.xlu0 %1420, %v993_v23  }
  0x3f   :  { %1000 = vperm.xlu1 %1421, %v982_v22  }
  0x43   :  { %531 = vmatmul.mubr.bf16.gmra.mxu0 %v1482_v57  ;;  %1010 = vperm.xlu1 %1421, %v984_v24  }
  0x44   :  { %628 = vmatmul.mubr.bf16.gmra.mxu1 %v1483_v59  ;;  %538 = vmatprep.mubr.bf16.mxu0 %v1484_v60 }
  0x45   :  { %635 = vmatprep.mubr.bf16.mxu1 %v1486_v61 }
  0x47   :  { %1020 = vperm.xlu1 %1421, %v986_v25  }
  0x4b   :  { %539 = vmatmul.mubr.bf16.gmra.mxu0 %v1488_v1  ;;  %1030 = vperm.xlu1 %1421, %v988_v26  }
  0x4c   :  { %636 = vmatmul.mubr.bf16.gmra.mxu1 %v1489_v3  ;;  %546 = vmatprep.mubr.bf16.mxu0 %v1490_v4 }
  0x4d   :  { %643 = vmatprep.mubr.bf16.mxu1 %v1492_v5 }
  0x4f   :  { %1040 = vperm.xlu1 %1421, %v990_v27  }
  0x53   :  { %547 = vmatmul.mubr.bf16.gmra.mxu0 %v1494_v9  ;;  %1050 = vperm.xlu1 %1421, %v992_v28  }
  0x54   :  { %644 = vmatmul.mubr.bf16.gmra.mxu1 %v1495_v11  ;;  %554 = vmatprep.mubr.bf16.mxu0 %v1496_v12 }
  0x55   :  { %651 = vmatprep.mubr.bf16.mxu1 %v1498_v13 }
  0x5b   :  { %555 = vmatmul.mubr.bf16.gmra.mxu0 %v1500_v17 }
  0x5c   :  { %652 = vmatmul.mubr.bf16.gmra.mxu1 %v1501_v19 }
  0xe3   :  { %v1307_v29 = vpop.f32.mrf.mxu0 }
  0xe4   :  { %v1371_v30 = vpop.f32.mrf.mxu1 }
  0xe5   :  { %v1308_v31 = vpop.f32.mrf.mxu0 }
  0xe6   :  { %v1309_v32 = vadd.f32 %v1308_v31, %v1307_v29  ;;  %v1372_v33 = vpop.f32.mrf.mxu1 }
  0xe7   :  { %v1373_v34 = vadd.f32 %v1372_v33, %v1371_v30  ;;  %v1310_v35 = vpop.f32.mrf.mxu0 }
  0xe8   :  { %v1374_v36 = vpop.f32.mrf.mxu1 }
  0xe9   :  { %v1311_v37 = vpop.f32.mrf.mxu0  ;;  %v1836_v38 = vadd.f32 %v1373_v34, %v1309_v32 }
  0xea   :  { %v1312_v39 = vadd.f32 %v1311_v37, %v1310_v35  ;;  %v1375_v40 = vpop.f32.mrf.mxu1 }
  0xeb   :  { %v1376_v41 = vadd.f32 %v1375_v40, %v1374_v36  ;;  %v1313_v42 = vpop.f32.mrf.mxu0  ;;  %v661_v43 = vsel %vm660_vm0, %v1836_v38, 0.0 }
  0xec   :  { %v1377_v44 = vpop.f32.mrf.mxu1  ;;  %662 = vadd.xlane.f32.xlu0 %v661_v43 }
  0xed   :  { %v1314_v45 = vpop.f32.mrf.mxu0  ;;  %v1840_v46 = vadd.f32 %v1376_v41, %v1312_v39 }
  0xee   :  { %v1315_v47 = vadd.f32 %v1314_v45, %v1313_v42  ;;  %v1378_v48 = vpop.f32.mrf.mxu1 }
  0xef   :  { %v1379_v49 = vadd.f32 %v1378_v48, %v1377_v44  ;;  %v1316_v50 = vpop.f32.mrf.mxu0  ;;  %v664_v51 = vsel %vm660_vm0, %v1840_v46, 0.0 }
  0xf0   :  { %v1380_v52 = vpop.f32.mrf.mxu1  ;;  %665 = vadd.xlane.f32.xlu0 %v664_v51 }
  0xf1   :  { %v1317_v53 = vpop.f32.mrf.mxu0  ;;  %v1844_v54 = vadd.f32 %v1379_v49, %v1315_v47 }
  0xf2   :  { %v1318_v55 = vadd.f32 %v1317_v53, %v1316_v50  ;;  %v1381_v56 = vpop.f32.mrf.mxu1 }
  0xf3   :  { %v1382_v57 = vadd.f32 %v1381_v56, %v1380_v52  ;;  %v1319_v58 = vpop.f32.mrf.mxu0  ;;  %v667_v59 = vsel %vm660_vm0, %v1844_v54, 0.0 }
  0xf4   :  { %v1383_v60 = vpop.f32.mrf.mxu1  ;;  %668 = vadd.xlane.f32.xlu1 %v667_v59 }
  0xf5   :  { %v1320_v61 = vpop.f32.mrf.mxu0  ;;  %v1848_v62 = vadd.f32 %v1382_v57, %v1318_v55 }
  0xf6   :  { %v1321_v63 = vadd.f32 %v1320_v61, %v1319_v58  ;;  %v1384_v0 = vpop.f32.mrf.mxu1 }
  0xf7   :  { %v1385_v1 = vadd.f32 %v1384_v0, %v1383_v60  ;;  %v1322_v2 = vpop.f32.mrf.mxu0  ;;  %v670_v3 = vsel %vm660_vm0, %v1848_v62, 0.0 }
  0xf8   :  { %v1386_v4 = vpop.f32.mrf.mxu1  ;;  %671 = vadd.xlane.f32.xlu1 %v670_v3 }
  0xf9   :  { %v1323_v5 = vpop.f32.mrf.mxu0  ;;  %v1852_v6 = vadd.f32 %v1385_v1, %v1321_v63 }
  0xfa   :  { %v1324_v7 = vadd.f32 %v1323_v5, %v1322_v2  ;;  %v1387_v8 = vpop.f32.mrf.mxu1 }
  0xfb   :  { %v1388_v9 = vadd.f32 %v1387_v8, %v1386_v4  ;;  %v1325_v10 = vpop.f32.mrf.mxu0  ;;  %v673_v11 = vsel %vm660_vm0, %v1852_v6, 0.0 }
  0xfc   :  { %v1389_v12 = vpop.f32.mrf.mxu1  ;;  %674 = vadd.xlane.f32.xlu0 %v673_v11 }
  0xfd   :  { %v1326_v13 = vpop.f32.mrf.mxu0  ;;  %v1856_v14 = vadd.f32 %v1388_v9, %v1324_v7 }
  0xfe   :  { %v1327_v15 = vadd.f32 %v1326_v13, %v1325_v10  ;;  %v1390_v16 = vpop.f32.mrf.mxu1  ;;  %v1884_v10 = vpop.permute.xlu1 %893 }
  0xff   :  { %v1391_v17 = vadd.f32 %v1390_v16, %v1389_v12  ;;  %v1328_v18 = vpop.f32.mrf.mxu0  ;;  %v676_v19 = vsel %vm660_vm0, %v1856_v14, 0.0 }
 0x100   :  { %v1392_v20 = vpop.f32.mrf.mxu1  ;;  %677 = vadd.xlane.f32.xlu1 %v676_v19 }
 0x101   :  { %v1329_v21 = vpop.f32.mrf.mxu0  ;;  %v1860_v22 = vadd.f32 %v1391_v17, %v1327_v15 }
 0x102   :  { %v1330_v23 = vadd.f32 %v1329_v21, %v1328_v18  ;;  %v1393_v24 = vpop.f32.mrf.mxu1 }
 0x103   :  { %v1394_v25 = vadd.f32 %v1393_v24, %v1392_v20  ;;  %v1331_v26 = vpop.f32.mrf.mxu0  ;;  %v679_v27 = vsel %vm660_vm0, %v1860_v22, 0.0 }
 0x104   :  { %v1395_v28 = vpop.f32.mrf.mxu1  ;;  %680 = vadd.xlane.f32.xlu0 %v679_v27 }
 0x105   :  { %v1332_v29 = vpop.f32.mrf.mxu0  ;;  %v1864_v30 = vadd.f32 %v1394_v25, %v1330_v23  ;;  %v1892_v25 = vpop.permute.xlu1 %898 }
 0x106   :  { %v1333_v31 = vadd.f32 %v1332_v29, %v1331_v26  ;;  %v1396_v32 = vpop.f32.mrf.mxu1 }
 0x107   :  { %v1397_v33 = vadd.f32 %v1396_v32, %v1395_v28  ;;  %v1334_v34 = vpop.f32.mrf.mxu0  ;;  %v682_v35 = vsel %vm660_vm0, %v1864_v30, 0.0 }
 0x108   :  { %v1398_v36 = vpop.f32.mrf.mxu1  ;;  %683 = vadd.xlane.f32.xlu1 %v682_v35 }
 0x109   :  { %v1335_v37 = vpop.f32.mrf.mxu0  ;;  %v1868_v39 = vadd.f32 %v1397_v33, %v1333_v31 }
 0x10a   :  { %v1336_v40 = vadd.f32 %v1335_v37, %v1334_v34  ;;  %v1399_v41 = vpop.f32.mrf.mxu1  ;;  %v1900_v37 = vpop.permute.xlu1 %903 }
 0x10b   :  { %v1400_v42 = vadd.f32 %v1399_v41, %v1398_v36  ;;  %v1337_v43 = vpop.f32.mrf.mxu0  ;;  %v685_v44 = vsel %vm660_vm0, %v1868_v39, 0.0 }
 0x10c   :  { %v1401_v45 = vpop.f32.mrf.mxu1  ;;  %686 = vadd.xlane.f32.xlu0 %v685_v44  ;;  %v1910_v44 = vpop.permute.xlu0 %888 }
 0x10d   :  { %v1338_v47 = vpop.f32.mrf.mxu0  ;;  %v1872_v48 = vadd.f32 %v1400_v42, %v1336_v40 }
 0x10e   :  { %v1339_v49 = vadd.f32 %v1338_v47, %v1337_v43  ;;  %v1402_v50 = vpop.f32.mrf.mxu1  ;;  %v1906_v42 = vpop.permute.xlu1 %908 }
 0x10f   :  { %v1403_v51 = vadd.f32 %v1402_v50, %v1401_v45  ;;  %v1340_v52 = vpop.f32.mrf.mxu0  ;;  %v688_v53 = vsel %vm660_vm0, %v1872_v48, 0.0  ;;  %v994_v45 = vld [vmem:[%s2181_s3 + $0x60] sm:$0xff] }
 0x110   :  { %v1404_v55 = vpop.f32.mrf.mxu1  ;;  %689 = vadd.xlane.f32.xlu1 %v688_v53  ;;  %v1920_v50 = vpop.permute.xlu0 %933 }
 0x111   :  { %v1341_v56 = vpop.f32.mrf.mxu0  ;;  %v1876_v57 = vadd.f32 %v1403_v51, %v1339_v49  ;;  %v995_v49 = vld [vmem:[%s2181_s3 + $0x68] sm:$0xff] }
 0x112   :  { %v1342_v58 = vadd.f32 %v1341_v56, %v1340_v52  ;;  %v1405_v59 = vpop.f32.mrf.mxu1  ;;  %v1908_v43 = vpop.permute.xlu1 %913 }
 0x113   :  { %v1406_v60 = vadd.f32 %v1405_v59, %v1404_v55  ;;  %v1343_v61 = vpop.f32.mrf.mxu0  ;;  %v691_v63 = vsel %vm660_vm0, %v1876_v57, 0.0 }
 0x114   :  { %v1407_v0 = vpop.f32.mrf.mxu1  ;;  %692 = vadd.xlane.f32.xlu0 %v691_v63  ;;  %v1924_v52 = vpop.permute.xlu0 %943 }
 0x115   :  { %v1344_v1 = vpop.f32.mrf.mxu0  ;;  %v1880_v2 = vadd.f32 %v1406_v60, %v1342_v58 }
 0x116   :  { %v1345_v3 = vadd.f32 %v1344_v1, %v1343_v61  ;;  %v1408_v4 = vpop.f32.mrf.mxu1  ;;  %v1915_v47 = vpop.permute.xlu1 %918 }
 0x117   :  { %v1409_v5 = vadd.f32 %v1408_v4, %v1407_v0  ;;  %v1346_v7 = vpop.f32.mrf.mxu0  ;;  %v694_v8 = vsel %vm660_vm0, %v1880_v2, 0.0 }
 0x118   :  { %v1410_v9 = vpop.f32.mrf.mxu1  ;;  %695 = vadd.xlane.f32.xlu1 %v694_v8  ;;  %v1928_v55 = vpop.permute.xlu0 %953 }
 0x119   :  { %v1347_v11 = vpop.f32.mrf.mxu0  ;;  %v1886_v12 = vadd.f32 %v1409_v5, %v1345_v3 }
 0x11a   :  { %v1348_v13 = vadd.f32 %v1347_v11, %v1346_v7  ;;  %v1411_v15 = vpop.f32.mrf.mxu1  ;;  %v1922_v51 = vpop.permute.xlu1 %923 }
 0x11b   :  { %v1412_v16 = vadd.f32 %v1411_v15, %v1410_v9  ;;  %v1349_v17 = vpop.f32.mrf.mxu0  ;;  %v697_v18 = vsel %vm660_vm0, %v1886_v12, 0.0 }
 0x11c   :  { %v1413_v19 = vpop.f32.mrf.mxu1  ;;  %698 = vadd.xlane.f32.xlu0 %v697_v18  ;;  %v1932_v58 = vpop.permute.xlu0 %963 }
 0x11d   :  { %v1350_v20 = vpop.f32.mrf.mxu0  ;;  %v1890_v21 = vadd.f32 %v1412_v16, %v1348_v13 }
 0x11e   :  { %v1351_v23 = vadd.f32 %v1350_v20, %v1349_v17  ;;  %v1414_v24 = vpop.f32.mrf.mxu1  ;;  %v1926_v53 = vpop.permute.xlu1 %928 }
 0x11f   :  { %v1415_v26 = vadd.f32 %v1414_v24, %v1413_v19  ;;  %v1352_v27 = vpop.f32.mrf.mxu0  ;;  %v700_v28 = vsel %vm660_vm0, %v1890_v21, 0.0 }
 0x120   :  { %v1416_v29 = vpop.f32.mrf.mxu1  ;;  %701 = vadd.xlane.f32.xlu1 %v700_v28  ;;  %v1936_v60 = vpop.permute.xlu0 %1005 }
 0x121   :  { %v1353_v31 = vpop.f32.mrf.mxu0  ;;  %v1896_v32 = vadd.f32 %v1415_v26, %v1351_v23 }
 0x122   :  { %v1354_v33 = vadd.f32 %v1353_v31, %v1352_v27  ;;  %v1417_v34 = vpop.f32.mrf.mxu1  ;;  %v1930_v56 = vpop.permute.xlu1 %938 }
 0x123   :  { %v1418_v35 = vadd.f32 %v1417_v34, %v1416_v29  ;;  %v703_v36 = vsel %vm660_vm0, %v1896_v32, 0.0 }
 0x124   :  { %704 = vadd.xlane.f32.xlu0 %v703_v36  ;;  %v1940_v63 = vpop.permute.xlu0 %1015 }
 0x125   :  { %v1902_v40 = vadd.f32 %v1418_v35, %v1354_v33 }
 0x126   :  { %v1934_v59 = vpop.permute.xlu1 %948 }
 0x127   :  { %v706_v41 = vsel %vm660_vm0, %v1902_v40, 0.0 }
 0x128   :  { %707 = vadd.xlane.f32.xlu1 %v706_v41  ;;  %v1944_v1 = vpop.permute.xlu0 %1025 }
 0x12a   :  { %v1938_v61 = vpop.permute.xlu1 %958 }
 0x12c   :  { %v1948_v4 = vpop.permute.xlu0 %1035 }
 0x12e   :  { %v1942_v0 = vpop.permute.xlu1 %1000 }
 0x130   :  { %v1952_v7 = vpop.permute.xlu0 %1045 }
 0x132   :  { %v1946_v3 = vpop.permute.xlu1 %1010 }
 0x134   :  { %v1956_v9 = vpop.permute.xlu0 %1055 }
 0x136   :  { %v1950_v5 = vpop.permute.xlu1 %1020 }
 0x139   :  { %1060 = vperm.xlu1 %1421, %v994_v45  }
 0x13a   :  { %1065 = vperm.xlu0 %1420, %v995_v49   ;;  %v1954_v8 = vpop.permute.xlu1 %1030 }
 0x13e   :  { %v1958_v11 = vpop.permute.xlu1 %1040 }
 0x142   :  { %v1963_v17 = vpop.permute.xlu1 %1050 }
 0x175   :  { %v663_v13 = vpop.xlane.xlu0 %662 }
 0x176   :  { %v710_v15 = vmul.f32 0.03125, %v663_v13 }
 0x178   :  { %v1961_v16 = vsub.f32 %v1836_v38, %v710_v15 }
 0x179   :  { %v666_v18 = vpop.xlane.xlu0 %665 }
 0x17a   :  { %v711_v19 = vmul.f32 0.03125, %v666_v18  ;;  %v742_v20 = vmul.f32 %v1961_v16, %v1961_v16 }
 0x17c   :  { %v1968_v23 = vsub.f32 %v1840_v46, %v711_v19  ;;  %v758_v24 = vsel %vm660_vm0, %v742_v20, 0.0 }
 0x17d   :  { %v669_v26 = vpop.xlane.xlu1 %668  ;;  %759 = vadd.xlane.f32.xlu0 %v758_v24 }
 0x17e   :  { %v712_v27 = vmul.f32 0.03125, %v669_v26  ;;  %v743_v28 = vmul.f32 %v1968_v23, %v1968_v23 }
 0x180   :  { %v1974_v38 = vsub.f32 %v1844_v54, %v712_v27  ;;  %v761_v29 = vsel %vm660_vm0, %v743_v28, 0.0 }
 0x181   :  { %v672_v31 = vpop.xlane.xlu1 %671  ;;  %762 = vadd.xlane.f32.xlu1 %v761_v29 }
 0x182   :  { %v713_v33 = vmul.f32 0.03125, %v672_v31  ;;  %v744_v46 = vmul.f32 %v1974_v38, %v1974_v38 }
 0x184   :  { %v1980_v34 = vsub.f32 %v1848_v62, %v713_v33  ;;  %v764_v35 = vsel %vm660_vm0, %v744_v46, 0.0 }
 0x185   :  { %765 = vadd.xlane.f32.xlu0 %v764_v35  ;;  %v675_v36 = vpop.xlane.xlu0 %674 }
 0x186   :  { %v714_v41 = vmul.f32 0.03125, %v675_v36  ;;  %v745_v54 = vmul.f32 %v1980_v34, %v1980_v34 }
 0x188   :  { %v1986_v45 = vsub.f32 %v1852_v6, %v714_v41  ;;  %v767_v49 = vsel %vm660_vm0, %v745_v54, 0.0 }
 0x189   :  { %v678_v13 = vpop.xlane.xlu1 %677  ;;  %768 = vadd.xlane.f32.xlu1 %v767_v49 }
 0x18a   :  { %v715_v15 = vmul.f32 0.03125, %v678_v13  ;;  %v746_v62 = vmul.f32 %v1986_v45, %v1986_v45 }
 0x18c   :  { %v1992_v18 = vsub.f32 %v1856_v14, %v715_v15  ;;  %v770_v19 = vsel %vm660_vm0, %v746_v62, 0.0 }
 0x18d   :  { %771 = vadd.xlane.f32.xlu0 %v770_v19  ;;  %v681_v20 = vpop.xlane.xlu0 %680 }
 0x18e   :  { %v716_v24 = vmul.f32 0.03125, %v681_v20  ;;  %v747_v6 = vmul.f32 %v1992_v18, %v1992_v18 }
 0x190   :  { %v1998_v26 = vsub.f32 %v1860_v22, %v716_v24  ;;  %v773_v27 = vsel %vm660_vm0, %v747_v6, 0.0 }
 0x191   :  { %v684_v28 = vpop.xlane.xlu1 %683  ;;  %774 = vadd.xlane.f32.xlu1 %v773_v27 }
 0x192   :  { %v717_v29 = vmul.f32 0.03125, %v684_v28  ;;  %v748_v14 = vmul.f32 %v1998_v26, %v1998_v26 }
 0x194   :  { %v2004_v31 = vsub.f32 %v1864_v30, %v717_v29  ;;  %v776_v33 = vsel %vm660_vm0, %v748_v14, 0.0 }
 0x195   :  { %777 = vadd.xlane.f32.xlu0 %v776_v33  ;;  %v687_v46 = vpop.xlane.xlu0 %686 }
 0x196   :  { %v718_v35 = vmul.f32 0.03125, %v687_v46  ;;  %v749_v22 = vmul.f32 %v2004_v31, %v2004_v31 }
 0x198   :  { %v2010_v36 = vsub.f32 %v1868_v39, %v718_v35  ;;  %v779_v41 = vsel %vm660_vm0, %v749_v22, 0.0 }
 0x199   :  { %v690_v54 = vpop.xlane.xlu1 %689  ;;  %780 = vadd.xlane.f32.xlu1 %v779_v41 }
 0x19a   :  { %v719_v49 = vmul.f32 0.03125, %v690_v54  ;;  %v750_v30 = vmul.f32 %v2010_v36, %v2010_v36 }
 0x19c   :  { %v2016_v13 = vsub.f32 %v1872_v48, %v719_v49  ;;  %v782_v15 = vsel %vm660_vm0, %v750_v30, 0.0 }
 0x19d   :  { %783 = vadd.xlane.f32.xlu0 %v782_v15  ;;  %v693_v62 = vpop.xlane.xlu0 %692 }
 0x19e   :  { %v720_v19 = vmul.f32 0.03125, %v693_v62  ;;  %v751_v39 = vmul.f32 %v2016_v13, %v2016_v13 }
 0x1a0   :  { %v2022_v20 = vsub.f32 %v1876_v57, %v720_v19  ;;  %v785_v24 = vsel %vm660_vm0, %v751_v39, 0.0 }
 0x1a1   :  { %v696_v6 = vpop.xlane.xlu1 %695  ;;  %786 = vadd.xlane.f32.xlu1 %v785_v24 }
 0x1a2   :  { %v721_v27 = vmul.f32 0.03125, %v696_v6  ;;  %v752_v48 = vmul.f32 %v2022_v20, %v2022_v20 }
 0x1a4   :  { %v2028_v28 = vsub.f32 %v1880_v2, %v721_v27  ;;  %v788_v29 = vsel %vm660_vm0, %v752_v48, 0.0 }
 0x1a5   :  { %789 = vadd.xlane.f32.xlu0 %v788_v29  ;;  %v699_v14 = vpop.xlane.xlu0 %698  ;;  %v996_v29 = vld [vmem:[%s2181_s3 + $0x70] sm:$0xff] }
 0x1a6   :  { %v722_v33 = vmul.f32 0.03125, %v699_v14  ;;  %v753_v57 = vmul.f32 %v2028_v28, %v2028_v28  ;;  %v997_v14 = vld [vmem:[%s2181_s3 + $0x78] sm:$0xff] }
 0x1a8   :  { %v2034_v46 = vsub.f32 %v1886_v12, %v722_v33  ;;  %v791_v35 = vsel %vm660_vm0, %v753_v57, 0.0 }
 0x1a9   :  { %v702_v22 = vpop.xlane.xlu1 %701  ;;  %792 = vadd.xlane.f32.xlu1 %v791_v35 }
 0x1aa   :  { %v723_v41 = vmul.f32 0.03125, %v702_v22  ;;  %v754_v2 = vmul.f32 %v2034_v46, %v2034_v46 }
 0x1ac   :  { %v2040_v54 = vsub.f32 %v1890_v21, %v723_v41  ;;  %v794_v49 = vsel %vm660_vm0, %v754_v2, 0.0 }
 0x1ad   :  { %795 = vadd.xlane.f32.xlu0 %v794_v49  ;;  %v705_v30 = vpop.xlane.xlu0 %704 }
 0x1ae   :  { %v724_v15 = vmul.f32 0.03125, %v705_v30  ;;  %v755_v12 = vmul.f32 %v2040_v54, %v2040_v54 }
 0x1b0   :  { %v2046_v62 = vsub.f32 %v1896_v32, %v724_v15  ;;  %v797_v19 = vsel %vm660_vm0, %v755_v12, 0.0 }
 0x1b1   :  { %v708_v39 = vpop.xlane.xlu1 %707  ;;  %798 = vadd.xlane.f32.xlu1 %v797_v19 }
 0x1b2   :  { %v725_v24 = vmul.f32 0.03125, %v708_v39  ;;  %v756_v21 = vmul.f32 %v2046_v62, %v2046_v62 }
 0x1b4   :  { %v2052_v6 = vsub.f32 %v1902_v40, %v725_v24  ;;  %v800_v27 = vsel %vm660_vm0, %v756_v21, 0.0 }
 0x1b5   :  { %801 = vadd.xlane.f32.xlu0 %v800_v27  ;;  %v2064_v40 = vpop.permute.xlu0 %1065  ;;  %v2066_v33 = vpop.permute.xlu1 %1060 }
 0x1b6   :  { %v757_v48 = vmul.f32 %v2052_v6, %v2052_v6 }
 0x1b8   :  { %v803_v32 = vsel %vm660_vm0, %v757_v48, 0.0 }
 0x1b9   :  { %804 = vadd.xlane.f32.xlu1 %v803_v32 }
 0x1ca   :  { %1070 = vperm.xlu1 %1421, %v996_v29  }
 0x1cb   :  { %1075 = vperm.xlu0 %1420, %v997_v14  }
 0x206   :  { %v760_v57 = vpop.xlane.xlu0 %759 }
 0x207   :  { %v806_v35 = vmul.f32 0.03125, %v760_v57 }
 0x209   :  { %v822_v22 = vadd.f32 1e-05, %v806_v35 }
 0x20a   :  { %v763_v41 = vpop.xlane.xlu1 %762 }
 0x20b   :  { %1502 = vrsqrt.f32 %v822_v22  ;;  %v807_v2 = vmul.f32 0.03125, %v763_v41 }
 0x20d   :  { %v823_v49 = vadd.f32 1e-05, %v807_v2 }
 0x20e   :  { %v766_v30 = vpop.xlane.xlu0 %765 }
 0x20f   :  { %1504 = vrsqrt.f32 %v823_v49  ;;  %v808_v15 = vmul.f32 0.03125, %v766_v30 }
 0x211   :  { %v824_v12 = vadd.f32 1e-05, %v808_v15 }
 0x212   :  { %v769_v19 = vpop.xlane.xlu1 %768 }
 0x213   :  { %1506 = vrsqrt.f32 %v824_v12  ;;  %v809_v39 = vmul.f32 0.03125, %v769_v19 }
 0x215   :  { %v825_v24 = vadd.f32 1e-05, %v809_v39 }
 0x216   :  { %v772_v21 = vpop.xlane.xlu0 %771 }
 0x217   :  { %1508 = vrsqrt.f32 %v825_v24  ;;  %v810_v27 = vmul.f32 0.03125, %v772_v21 }
 0x218   :  { %v1503_v48 = vpop.eup %1502 }
 0x219   :  { %v854_v32 = vmul.f32 %v1503_v48, %v1961_v16  ;;  %v826_v29 = vadd.f32 1e-05, %v810_v27 }
 0x21a   :  { %v775_v14 = vpop.xlane.xlu1 %774 }
 0x21b   :  { %v966_v57 = vmul.f32 %v1910_v44, %v854_v32  ;;  %1510 = vrsqrt.f32 %v826_v29  ;;  %v811_v35 = vmul.f32 0.03125, %v775_v14 }
 0x21c   :  { %v1505_v22 = vpop.eup %1504 }
 0x21d   :  { %v1078_v41 = vadd.f32 %v1942_v0, %v966_v57  ;;  %v855_v2 = vmul.f32 %v1505_v22, %v1968_v23  ;;  %v827_v49 = vadd.f32 1e-05, %v811_v35 }
 0x21e   :  { %v778_v30 = vpop.xlane.xlu0 %777 }
 0x21f   :  { %v1094_v15 = vmax.f32 %v1078_v41, 0.0  ;;  %v967_v12 = vmul.f32 %v1884_v10, %v855_v2  ;;  %1512 = vrsqrt.f32 %v827_v49  ;;  %v812_v19 = vmul.f32 0.03125, %v778_v30 }
 0x220   :  { %v1507_v39 = vpop.eup %1506 }
 0x221   :  { %v1275_v16 = vpack.c.bf16 %v1094_v15, %v1094_v15  ;;  %v1079_v24 = vadd.f32 %v1936_v60, %v967_v12  ;;  %v856_v44 = vmul.f32 %v1507_v39, %v1974_v38  ;;  %v828_v21 = vadd.f32 1e-05, %v812_v19 }
 0x222   :  { %v781_v27 = vpop.xlane.xlu1 %780 }
 0x223   :  { %1175 = vst.msk [vmem:[%s2182_s4] sm:$0xf] %vm1174_vm1, %v1275_v16  ;;  %v1095_v0 = vmax.f32 %v1079_v24, 0.0  ;;  %v968_v23 = vmul.f32 %v1892_v25, %v856_v44  ;;  %1514 = vrsqrt.f32 %v828_v21  ;;  %v813_v10 = vmul.f32 0.03125, %v781_v27 }
 0x224   :  { %v1509_v48 = vpop.eup %1508 }
 0x225   :  { %v1276_v32 = vpack.c.bf16 %v1095_v0, %v1095_v0  ;;  %v1080_v29 = vadd.f32 %v1946_v3, %v968_v23  ;;  %v857_v60 = vmul.f32 %v1509_v48, %v1980_v34  ;;  %v829_v14 = vadd.f32 1e-05, %v813_v10 }
 0x226   :  { %v784_v38 = vpop.xlane.xlu0 %783 }
 0x227   :  { %1176 = vst.msk [vmem:[%s2182_s4 + $0x4] sm:$0xf] %vm1174_vm1, %v1276_v32  ;;  %v1096_v57 = vmax.f32 %v1080_v29, 0.0  ;;  %v969_v35 = vmul.f32 %v1900_v37, %v857_v60  ;;  %1516 = vrsqrt.f32 %v829_v14  ;;  %v814_v25 = vmul.f32 0.03125, %v784_v38 }
 0x228   :  { %v1511_v22 = vpop.eup %1510 }
 0x229   :  { %v1277_v41 = vpack.c.bf16 %v1096_v57, %v1096_v57  ;;  %v1081_v2 = vadd.f32 %v1940_v63, %v969_v35  ;;  %v858_v3 = vmul.f32 %v1511_v22, %v1986_v45  ;;  %v830_v49 = vadd.f32 1e-05, %v814_v25 }
 0x22a   :  { %v787_v34 = vpop.xlane.xlu1 %786 }
 0x22b   :  { %1177 = vst.msk [vmem:[%s2182_s4 + $0x8] sm:$0xf] %vm1174_vm1, %v1277_v41  ;;  %v1097_v30 = vmax.f32 %v1081_v2, 0.0  ;;  %v970_v15 = vmul.f32 %v1906_v42, %v858_v3  ;;  %1518 = vrsqrt.f32 %v830_v49  ;;  %v815_v37 = vmul.f32 0.03125, %v787_v34 }
 0x22c   :  { %v1513_v12 = vpop.eup %1512 }
 0x22d   :  { %v1278_v19 = vpack.c.bf16 %v1097_v30, %v1097_v30  ;;  %v1082_v39 = vadd.f32 %v1950_v5, %v970_v15  ;;  %v859_v63 = vmul.f32 %v1513_v12, %v1992_v18  ;;  %v831_v16 = vadd.f32 1e-05, %v815_v37 }
 0x22e   :  { %v790_v45 = vpop.xlane.xlu0 %789 }
 0x22f   :  { %1178 = vst.msk [vmem:[%s2182_s4 + $0xc] sm:$0xf] %vm1174_vm1, %v1278_v19  ;;  %v1098_v24 = vmax.f32 %v1082_v39, 0.0  ;;  %v971_v44 = vmul.f32 %v1908_v43, %v859_v63  ;;  %1520 = vrsqrt.f32 %v831_v16  ;;  %v816_v42 = vmul.f32 0.03125, %v790_v45 }
 0x230   :  { %v1515_v21 = vpop.eup %1514 }
 0x231   :  { %v1279_v27 = vpack.c.bf16 %v1098_v24, %v1098_v24  ;;  %v1083_v0 = vadd.f32 %v1944_v1, %v971_v44  ;;  %v860_v5 = vmul.f32 %v1515_v21, %v1998_v26  ;;  %v832_v23 = vadd.f32 1e-05, %v816_v42 }
 0x232   :  { %v793_v18 = vpop.xlane.xlu1 %792 }
 0x233   :  { %1179 = vst.msk [vmem:[%s2182_s4 + $0x10] sm:$0xf] %vm1174_vm1, %v1279_v27  ;;  %v1099_v10 = vmax.f32 %v1083_v0, 0.0  ;;  %v972_v48 = vmul.f32 %v1915_v47, %v860_v5  ;;  %1522 = vrsqrt.f32 %v832_v23  ;;  %v817_v43 = vmul.f32 0.03125, %v793_v18 }
 0x234   :  { %v1517_v32 = vpop.eup %1516 }
 0x235   :  { %v1280_v29 = vpack.c.bf16 %v1099_v10, %v1099_v10  ;;  %v1084_v60 = vadd.f32 %v1954_v8, %v972_v48  ;;  %v861_v1 = vmul.f32 %v1517_v32, %v2004_v31  ;;  %v833_v14 = vadd.f32 1e-05, %v817_v43 }
 0x236   :  { %v796_v26 = vpop.xlane.xlu0 %795 }
 0x237   :  { %1180 = vst.msk [vmem:[%s2182_s4 + $0x14] sm:$0xf] %vm1174_vm1, %v1280_v29  ;;  %v1100_v38 = vmax.f32 %v1084_v60, 0.0  ;;  %v973_v57 = vmul.f32 %v1922_v51, %v861_v1  ;;  %1524 = vrsqrt.f32 %v833_v14  ;;  %v818_v47 = vmul.f32 0.03125, %v796_v26 }
 0x238   :  { %v1519_v35 = vpop.eup %1518 }
 0x239   :  { %v1281_v25 = vpack.c.bf16 %v1100_v38, %v1100_v38  ;;  %v1085_v22 = vadd.f32 %v1948_v4, %v973_v57  ;;  %v862_v8 = vmul.f32 %v1519_v35, %v2010_v36  ;;  %v834_v41 = vadd.f32 1e-05, %v818_v47 }
 0x23a   :  { %v799_v31 = vpop.xlane.xlu1 %798 }
 0x23b   :  { %1181 = vst.msk [vmem:[%s2182_s4 + $0x18] sm:$0xf] %vm1174_vm1, %v1281_v25  ;;  %v1101_v2 = vmax.f32 %v1085_v22, 0.0  ;;  %v974_v3 = vmul.f32 %v1926_v53, %v862_v8  ;;  %1526 = vrsqrt.f32 %v834_v41  ;;  %v819_v51 = vmul.f32 0.03125, %v799_v31 }
 0x23c   :  { %v1521_v49 = vpop.eup %1520 }
 0x23d   :  { %v1282_v34 = vpack.c.bf16 %v1101_v2, %v1101_v2  ;;  %v1086_v30 = vadd.f32 %v1958_v11, %v974_v3  ;;  %v863_v4 = vmul.f32 %v1521_v49, %v2016_v13  ;;  %v835_v15 = vadd.f32 1e-05, %v819_v51 }
 0x23e   :  { %v802_v36 = vpop.xlane.xlu0 %801 }
 0x23f   :  { %1182 = vst.msk [vmem:[%s2182_s4 + $0x1c] sm:$0xf] %vm1174_vm1, %v1282_v34  ;;  %v1102_v37 = vmax.f32 %v1086_v30, 0.0  ;;  %v975_v12 = vmul.f32 %v1920_v50, %v863_v4  ;;  %1528 = vrsqrt.f32 %v835_v15  ;;  %v820_v53 = vmul.f32 0.03125, %v802_v36 }
 0x240   :  { %v1523_v19 = vpop.eup %1522 }
 0x241   :  { %v1283_v39 = vpack.c.bf16 %v1102_v37, %v1102_v37  ;;  %v1087_v63 = vadd.f32 %v1952_v7, %v975_v12  ;;  %v864_v11 = vmul.f32 %v1523_v19, %v2022_v20  ;;  %v836_v16 = vadd.f32 1e-05, %v820_v53 }
 0x242   :  { %v805_v13 = vpop.xlane.xlu1 %804 }
 0x243   :  { %1183 = vst.msk [vmem:[%s2182_s4 + $0x20] sm:$0xf] %vm1174_vm1, %v1283_v39  ;;  %v1103_v45 = vmax.f32 %v1087_v63, 0.0  ;;  %v976_v24 = vmul.f32 %v1930_v56, %v864_v11  ;;  %1530 = vrsqrt.f32 %v836_v16  ;;  %v821_v50 = vmul.f32 0.03125, %v805_v13 }
 0x244   :  { %v1525_v44 = vpop.eup %1524 }
 0x245   :  { %v1284_v42 = vpack.c.bf16 %v1103_v45, %v1103_v45  ;;  %v1088_v21 = vadd.f32 %v1963_v17, %v976_v24  ;;  %v865_v7 = vmul.f32 %v1525_v44, %v2028_v28  ;;  %v837_v27 = vadd.f32 1e-05, %v821_v50 }
 0x246   :  { %v1071_v14 = vpop.permute.xlu1 %1070  ;;  %v1076_v57 = vpop.permute.xlu0 %1075 }
 0x247   :  { %1184 = vst.msk [vmem:[%s2182_s4 + $0x24] sm:$0xf] %vm1174_vm1, %v1284_v42  ;;  %v1104_v20 = vmax.f32 %v1088_v21, 0.0  ;;  %v977_v0 = vmul.f32 %v1924_v52, %v865_v7  ;;  %1532 = vrsqrt.f32 %v837_v27 }
 0x248   :  { %v1527_v5 = vpop.eup %1526 }
 0x249   :  { %v1285_v56 = vpack.c.bf16 %v1104_v20, %v1104_v20  ;;  %v1089_v23 = vadd.f32 %v1956_v9, %v977_v0  ;;  %v866_v18 = vmul.f32 %v1527_v5, %v2034_v46 }
 0x24b   :  { %1185 = vst.msk [vmem:[%s2182_s4 + $0x28] sm:$0xf] %vm1174_vm1, %v1285_v56  ;;  %v1105_v17 = vmax.f32 %v1089_v23, 0.0  ;;  %v978_v28 = vmul.f32 %v1934_v59, %v866_v18 }
 0x24c   :  { %v1529_v10 = vpop.eup %1528 }
 0x24d   :  { %v1286_v48 = vpack.c.bf16 %v1105_v17, %v1105_v17  ;;  %v1090_v43 = vadd.f32 %v2066_v33, %v978_v28  ;;  %v867_v52 = vmul.f32 %v1529_v10, %v2040_v54 }
 0x24f   :  { %1186 = vst.msk [vmem:[%s2182_s4 + $0x2c] sm:$0xf] %vm1174_vm1, %v1286_v48  ;;  %v1106_v9 = vmax.f32 %v1090_v43, 0.0  ;;  %v979_v46 = vmul.f32 %v1928_v55, %v867_v52 }
 0x250   :  { %v1531_v32 = vpop.eup %1530 }
 0x251   :  { %v1287_v29 = vpack.c.bf16 %v1106_v9, %v1106_v9  ;;  %v1091_v60 = vadd.f32 %v2064_v40, %v979_v46  ;;  %v868_v59 = vmul.f32 %v1531_v32, %v2046_v62 }
 0x253   :  { %1187 = vst.msk [vmem:[%s2182_s4 + $0x30] sm:$0xf] %vm1174_vm1, %v1287_v29  ;;  %v1107_v54 = vmax.f32 %v1091_v60, 0.0  ;;  %v980_v33 = vmul.f32 %v1938_v61, %v868_v59 }
 0x254   :  { %v1533_v1 = vpop.eup %1532 }
 0x255   :  { %v1288_v26 = vpack.c.bf16 %v1107_v54, %v1107_v54  ;;  %v1092_v38 = vadd.f32 %v1071_v14, %v980_v33  ;;  %v869_v55 = vmul.f32 %v1533_v1, %v2052_v6 }
 0x257   :  { %1188 = vst.msk [vmem:[%s2182_s4 + $0x34] sm:$0xf] %vm1174_vm1, %v1288_v26  ;;  %v1108_v62 = vmax.f32 %v1092_v38, 0.0  ;;  %v981_v40 = vmul.f32 %v1932_v58, %v869_v55 }
 0x259   :  { %v1289_v47 = vpack.c.bf16 %v1108_v62, %v1108_v62  ;;  %v1093_v35 = vadd.f32 %v1076_v57, %v981_v40 }
 0x25b   :  { %1189 = vst.msk [vmem:[%s2182_s4 + $0x38] sm:$0xf] %vm1174_vm1, %v1289_v47  ;;  %v1109_v61 = vmax.f32 %v1093_v35, 0.0 }
 0x25d   :  { %v1290_v25 = vpack.c.bf16 %v1109_v61, %v1109_v61 }
 0x25f   :  { %1190 = vst.msk [vmem:[%s2182_s4 + $0x3c] sm:$0xf] %vm1174_vm1, %v1290_v25 }

// kernel: generator_forward.6
= control target key start
LH: loop header
LB: loop body
LE: loop exit
PB: predicated region body
PF: predicated region fallthrough
CT: control target
= control target key end

     0   :  { %s3780_s0 = inlined_call_operand.vmem [shape: bf16[2048,128], index: 0, kind: input, shape index: {}]   ;;  %s3781_s1 = inlined_call_operand.vmem [shape: bf16[64,2048], index: 1, kind: input, shape index: {}]   ;;  %s3782_s2 = inlined_call_operand.vmem [shape: f32[64,1], index: 2, kind: input, shape index: {}]   ;;  %s3783_s3 = inlined_call_operand.vmem [shape: f32[64,1], index: 3, kind: input, shape index: {}]   ;;  %s3784_s4 = inlined_call_operand.vmem [shape: bf16[64,128], index: 4, kind: output, shape index: {}]  }
   0x1   :  { %v2753_v0 = vld [vmem:[%s3780_s0 + $0x78] sm:$0xff]   ;;  %v2757_v4 = vld [vmem:[%s3780_s0 + $0x70] sm:$0xff]   ;;  %v2761_v8 = vld [vmem:[%s3780_s0 + $0x68] sm:$0xff]  }
   0x2   :  { %v2754_v1 = vld [vmem:[%s3780_s0 + $0xf8] sm:$0xff]   ;;  %2430 = vmatprep.subr.bf16.mxu0 %v2753_v0  ;;  %v2758_v5 = vld [vmem:[%s3780_s0 + $0xf0] sm:$0xff]   ;;  %v2762_v9 = vld [vmem:[%s3780_s0 + $0xe8] sm:$0xff]  }
   0x3   :  { %v2755_v2 = vld [vmem:[%s3780_s0 + $0x38] sm:$0xff]   ;;  %2470 = vmatprep.subr.bf16.mxu1 %v2754_v1  ;;  %v2759_v6 = vld [vmem:[%s3780_s0 + $0x30] sm:$0xff]   ;;  %v2763_v10 = vld [vmem:[%s3780_s0 + $0x28] sm:$0xff]  }
   0x4   :  { %v2756_v3 = vld [vmem:[%s3780_s0 + $0xb8] sm:$0xff]   ;;  %2431 = vmatpush3.bf16.msra.mxu0 %v2755_v2  ;;  %v2760_v7 = vld [vmem:[%s3780_s0 + $0xb0] sm:$0xff]   ;;  %v2764_v11 = vld [vmem:[%s3780_s0 + $0xa8] sm:$0xff]  }
   0x5   :  { %2471 = vmatpush3.bf16.msra.mxu1 %v2756_v3  ;;  %2432 = vmatprep.subr.bf16.mxu0 %v2757_v4  ;;  %v2765_v12 = vld [vmem:[%s3780_s0 + $0x60] sm:$0xff]   ;;  %v2769_v16 = vld [vmem:[%s3780_s0 + $0x58] sm:$0xff]   ;;  %v2773_v20 = vld [vmem:[%s3780_s0 + $0x50] sm:$0xff]  }
   0x6   :  { %2472 = vmatprep.subr.bf16.mxu1 %v2758_v5  ;;  %v2766_v13 = vld [vmem:[%s3780_s0 + $0xe0] sm:$0xff]   ;;  %v2770_v17 = vld [vmem:[%s3780_s0 + $0xd8] sm:$0xff]   ;;  %v2774_v21 = vld [vmem:[%s3780_s0 + $0xd0] sm:$0xff]  }
   0x7   :  { %v2767_v14 = vld [vmem:[%s3780_s0 + $0x20] sm:$0xff]   ;;  %v2771_v18 = vld [vmem:[%s3780_s0 + $0x18] sm:$0xff]   ;;  %v2775_v22 = vld [vmem:[%s3780_s0 + $0x10] sm:$0xff]  }
   0x8   :  { %2433 = vmatpush3.bf16.msra.mxu0 %v2759_v6  ;;  %v2768_v15 = vld [vmem:[%s3780_s0 + $0xa0] sm:$0xff]   ;;  %v2772_v19 = vld [vmem:[%s3780_s0 + $0x98] sm:$0xff]   ;;  %v2776_v23 = vld [vmem:[%s3780_s0 + $0x90] sm:$0xff]  }
   0x9   :  { %2473 = vmatpush3.bf16.msra.mxu1 %v2760_v7  ;;  %2434 = vmatprep.subr.bf16.mxu0 %v2761_v8  ;;  %v2777_v24 = vld [vmem:[%s3780_s0 + $0x48] sm:$0xff]   ;;  %v2781_v28 = vld [vmem:[%s3780_s0 + $0x40] sm:$0xff]   ;;  %v2785_v40 = vld [vmem:[%s3780_s0 + $0x178] sm:$0xff]  }
   0xa   :  { %2474 = vmatprep.subr.bf16.mxu1 %v2762_v9  ;;  %v2778_v25 = vld [vmem:[%s3780_s0 + $0xc8] sm:$0xff]   ;;  %v2782_v29 = vld [vmem:[%s3780_s0 + $0xc0] sm:$0xff]   ;;  %v2786_v41 = vld [vmem:[%s3780_s0 + $0x1f8] sm:$0xff]  }
   0xb   :  { %v2779_v26 = vld [vmem:[%s3780_s0 + $0x8] sm:$0xff]   ;;  %v2783_v30 = vld [vmem:[%s3780_s0] sm:$0xff]   ;;  %v2787_v42 = vld [vmem:[%s3780_s0 + $0x138] sm:$0xff]  }
   0xc   :  { %2435 = vmatpush3.bf16.msra.mxu0 %v2763_v10  ;;  %v2780_v27 = vld [vmem:[%s3780_s0 + $0x88] sm:$0xff]   ;;  %v2784_v31 = vld [vmem:[%s3780_s0 + $0x80] sm:$0xff]   ;;  %v2788_v43 = vld [vmem:[%s3780_s0 + $0x1b8] sm:$0xff]  }
   0xd   :  { %2475 = vmatpush3.bf16.msra.mxu1 %v2764_v11  ;;  %2436 = vmatprep.subr.bf16.mxu0 %v2765_v12  ;;  %v18_v32 = vld [vmem:[%s3781_s1] sm:$0xff]  ;;  %v19_v34 = vld [vmem:[%s3781_s1 + $0x8] sm:$0xff]  ;;  %v2789_v44 = vld [vmem:[%s3780_s0 + $0x170] sm:$0xff]  }
   0xe   :  { %2476 = vmatprep.subr.bf16.mxu1 %v2766_v13  ;;  %v26_v33 = vld [vmem:[%s3781_s1 + $0x40] sm:$0xff]  ;;  %v27_v37 = vld [vmem:[%s3781_s1 + $0x48] sm:$0xff]  ;;  %v2790_v45 = vld [vmem:[%s3780_s0 + $0x1f0] sm:$0xff]  }
   0xf   :  { %v2199_v35 = vcombine.low %v18_v32, %v26_v33  ;;  %v2200_v36 = vcombine.high %v18_v32, %v26_v33  ;;  %v2201_v38 = vcombine.low %v19_v34, %v27_v37  ;;  %v2202_v39 = vcombine.high %v19_v34, %v27_v37  ;;  %v2791_v46 = vld [vmem:[%s3780_s0 + $0x130] sm:$0xff]   ;;  %v34_v48 = vld [vmem:[%s3781_s1 + $0x80] sm:$0xff]  ;;  %v35_v51 = vld [vmem:[%s3781_s1 + $0x88] sm:$0xff] }
  0x10   :  { %2437 = vmatpush3.bf16.msra.mxu0 %v2767_v14  ;;  %v2792_v47 = vld [vmem:[%s3780_s0 + $0x1b0] sm:$0xff]   ;;  %v42_v49 = vld [vmem:[%s3781_s1 + $0xc0] sm:$0xff]  ;;  %v43_v52 = vld [vmem:[%s3781_s1 + $0xc8] sm:$0xff] }
  0x11   :  { %2477 = vmatpush3.bf16.msra.mxu1 %v2768_v15  ;;  %2438 = vmatprep.subr.bf16.mxu0 %v2769_v16  ;;  %v2216_v50 = vcombine.high %v34_v48, %v42_v49  ;;  %v2215_v53 = vcombine.low %v34_v48, %v42_v49  ;;  %v2218_v54 = vcombine.high %v35_v51, %v43_v52  ;;  %v2793_v56 = vld [vmem:[%s3780_s0 + $0x168] sm:$0xff]   ;;  %v2797_v60 = vld [vmem:[%s3780_s0 + $0x160] sm:$0xff]   ;;  %v2801_v8 = vld [vmem:[%s3780_s0 + $0x158] sm:$0xff]  }
  0x12   :  { %2478 = vmatprep.subr.bf16.mxu1 %v2770_v17  ;;  %1458 = vmatprep.mubr.bf16.mxu0 %v2200_v36  ;;  %v2217_v55 = vcombine.low %v35_v51, %v43_v52  ;;  %v2794_v57 = vld [vmem:[%s3780_s0 + $0x1e8] sm:$0xff]   ;;  %v2798_v61 = vld [vmem:[%s3780_s0 + $0x1e0] sm:$0xff]   ;;  %v2802_v9 = vld [vmem:[%s3780_s0 + $0x1d8] sm:$0xff]  }
  0x13   :  { %1523 = vmatprep.mubr.bf16.mxu1 %v2202_v39  ;;  %v2795_v58 = vld [vmem:[%s3780_s0 + $0x128] sm:$0xff]   ;;  %v2799_v62 = vld [vmem:[%s3780_s0 + $0x120] sm:$0xff]   ;;  %v2803_v10 = vld [vmem:[%s3780_s0 + $0x118] sm:$0xff]  }
  0x14   :  { %2439 = vmatpush3.bf16.msra.mxu0 %v2771_v18  ;;  %v2796_v59 = vld [vmem:[%s3780_s0 + $0x1a8] sm:$0xff]   ;;  %v2800_v63 = vld [vmem:[%s3780_s0 + $0x1a0] sm:$0xff]   ;;  %v2804_v11 = vld [vmem:[%s3780_s0 + $0x198] sm:$0xff]  }
  0x15   :  { %2479 = vmatpush3.bf16.msra.mxu1 %v2772_v19  ;;  %2440 = vmatprep.subr.bf16.mxu0 %v2773_v20  ;;  %v50_v0 = vld [vmem:[%s3781_s1 + $0x100] sm:$0xff]  ;;  %v51_v2 = vld [vmem:[%s3781_s1 + $0x108] sm:$0xff]  ;;  %v2805_v12 = vld [vmem:[%s3780_s0 + $0x150] sm:$0xff]  }
  0x16   :  { %2480 = vmatprep.subr.bf16.mxu1 %v2774_v21  ;;  %v58_v1 = vld [vmem:[%s3781_s1 + $0x140] sm:$0xff]  ;;  %v59_v3 = vld [vmem:[%s3781_s1 + $0x148] sm:$0xff]  ;;  %v2806_v13 = vld [vmem:[%s3780_s0 + $0x1d0] sm:$0xff]  }
  0x17   :  { %v2232_v4 = vcombine.high %v50_v0, %v58_v1  ;;  %v2234_v5 = vcombine.high %v51_v2, %v59_v3  ;;  %v2231_v6 = vcombine.low %v50_v0, %v58_v1  ;;  %v2233_v7 = vcombine.low %v51_v2, %v59_v3  ;;  %v2807_v14 = vld [vmem:[%s3780_s0 + $0x110] sm:$0xff]   ;;  %v66_v16 = vld [vmem:[%s3781_s1 + $0x180] sm:$0xff]  ;;  %v67_v18 = vld [vmem:[%s3781_s1 + $0x188] sm:$0xff] }
  0x18   :  { %2441 = vmatpush3.bf16.msra.mxu0 %v2775_v22  ;;  %v2808_v15 = vld [vmem:[%s3780_s0 + $0x190] sm:$0xff]   ;;  %v74_v17 = vld [vmem:[%s3781_s1 + $0x1c0] sm:$0xff]  ;;  %v75_v20 = vld [vmem:[%s3781_s1 + $0x1c8] sm:$0xff] }
  0x19   :  { %2481 = vmatpush3.bf16.msra.mxu1 %v2776_v23  ;;  %2442 = vmatprep.subr.bf16.mxu0 %v2777_v24  ;;  %v2248_v19 = vcombine.high %v66_v16, %v74_v17  ;;  %v2247_v21 = vcombine.low %v66_v16, %v74_v17  ;;  %v2250_v22 = vcombine.high %v67_v18, %v75_v20  ;;  %v2809_v24 = vld [vmem:[%s3780_s0 + $0x148] sm:$0xff]   ;;  %v20_v32 = vld [vmem:[%s3781_s1 + $0x10] sm:$0xff]  ;;  %v21_v36 = vld [vmem:[%s3781_s1 + $0x18] sm:$0xff] }
  0x1a   :  { %2482 = vmatprep.subr.bf16.mxu1 %v2778_v25  ;;  %v2249_v23 = vcombine.low %v67_v18, %v75_v20  ;;  %v2810_v25 = vld [vmem:[%s3780_s0 + $0x1c8] sm:$0xff]   ;;  %v28_v33 = vld [vmem:[%s3781_s1 + $0x50] sm:$0xff]  ;;  %v29_v37 = vld [vmem:[%s3781_s1 + $0x58] sm:$0xff] }
  0x1b   :  { %v2203_v34 = vcombine.low %v20_v32, %v28_v33  ;;  %v2206_v39 = vcombine.high %v21_v36, %v29_v37  ;;  %v36_v48 = vld [vmem:[%s3781_s1 + $0x90] sm:$0xff]  ;;  %v45_v51 = vld [vmem:[%s3781_s1 + $0xd8] sm:$0xff] }
  0x1c   :  { %2443 = vmatpush3.bf16.msra.mxu0 %v2779_v26  ;;  %v2811_v26 = vld [vmem:[%s3780_s0 + $0x108] sm:$0xff]   ;;  %v44_v49 = vld [vmem:[%s3781_s1 + $0xd0] sm:$0xff]  ;;  %v53_v2 = vld [vmem:[%s3781_s1 + $0x118] sm:$0xff] }
  0x1d   :  { %2483 = vmatpush3.bf16.msra.mxu1 %v2780_v27  ;;  %2444 = vmatprep.subr.bf16.mxu0 %v2781_v28  ;;  %v2812_v27 = vld [vmem:[%s3780_s0 + $0x188] sm:$0xff]   ;;  %v2813_v28 = vld [vmem:[%s3780_s0 + $0x140] sm:$0xff]   ;;  %v2220_v52 = vcombine.high %v36_v48, %v44_v49  ;;  %v52_v0 = vld [vmem:[%s3781_s1 + $0x110] sm:$0xff] }
  0x1e   :  { %2484 = vmatprep.subr.bf16.mxu1 %v2782_v29  ;;  %v2814_v29 = vld [vmem:[%s3780_s0 + $0x1c0] sm:$0xff]   ;;  %v60_v1 = vld [vmem:[%s3781_s1 + $0x150] sm:$0xff]  ;;  %v77_v20 = vld [vmem:[%s3781_s1 + $0x1d8] sm:$0xff] }
  0x1f   :  { %v2236_v3 = vcombine.high %v52_v0, %v60_v1  ;;  %v68_v16 = vld [vmem:[%s3781_s1 + $0x190] sm:$0xff] }
  0x20   :  { %2445 = vmatpush3.bf16.msra.mxu0 %v2783_v30  ;;  %v2815_v30 = vld [vmem:[%s3780_s0 + $0x100] sm:$0xff]   ;;  %v76_v17 = vld [vmem:[%s3781_s1 + $0x1d0] sm:$0xff] }
  0x21   :  { %2485 = vmatpush3.bf16.msra.mxu1 %v2784_v31  ;;  %2510 = vmatprep.subr.bf16.mxu0 %v2785_v40  ;;  %v2816_v31 = vld [vmem:[%s3780_s0 + $0x180] sm:$0xff]   ;;  %v2817_v40 = vld [vmem:[%s3780_s0 + $0x278] sm:$0xff]   ;;  %v2252_v18 = vcombine.high %v68_v16, %v76_v17 }
  0x22   :  { %2550 = vmatprep.subr.bf16.mxu1 %v2786_v41  ;;  %v2818_v41 = vld [vmem:[%s3780_s0 + $0x2f8] sm:$0xff]  }
  0x23   :  { %1459 = vmatmul.mubr.bf16.vlgmr.msra.gmra.mxu0 %v2199_v35  ;;  %v2204_v35 = vcombine.high %v20_v32, %v28_v33  ;;  %v22_v32 = vld [vmem:[%s3781_s1 + $0x20] sm:$0xff] }
  0x24   :  { %1524 = vmatmul.mubr.bf16.vlgmr.msra.gmra.mxu1 %v2201_v38  ;;  %2511 = vmatpush3.bf16.msra.mxu0 %v2787_v42  ;;  %v2205_v38 = vcombine.low %v21_v36, %v29_v37  ;;  %v2819_v42 = vld [vmem:[%s3780_s0 + $0x238] sm:$0xff]   ;;  %v30_v33 = vld [vmem:[%s3781_s1 + $0x60] sm:$0xff] }
  0x25   :  { %2551 = vmatpush3.bf16.msra.mxu1 %v2788_v43  ;;  %2512 = vmatprep.subr.bf16.mxu0 %v2789_v44  ;;  %v2820_v43 = vld [vmem:[%s3780_s0 + $0x2b8] sm:$0xff]   ;;  %v2821_v44 = vld [vmem:[%s3780_s0 + $0x270] sm:$0xff]   ;;  %v2207_v36 = vcombine.low %v22_v32, %v30_v33  ;;  %v2208_v37 = vcombine.high %v22_v32, %v30_v33 }
  0x26   :  { %2552 = vmatprep.subr.bf16.mxu1 %v2790_v45  ;;  %1466 = vmatprep.mubr.bf16.mxu0 %v2216_v50  ;;  %v2822_v45 = vld [vmem:[%s3780_s0 + $0x2f0] sm:$0xff]   ;;  %v37_v50 = vld [vmem:[%s3781_s1 + $0x98] sm:$0xff] }
  0x27   :  { %1531 = vmatprep.mubr.bf16.mxu1 %v2218_v54  ;;  %v2219_v54 = vcombine.low %v36_v48, %v44_v49  ;;  %v38_v48 = vld [vmem:[%s3781_s1 + $0xa0] sm:$0xff]  ;;  %v24_v32 = vld [vmem:[%s3781_s1 + $0x30] sm:$0xff] }
  0x28   :  { %2513 = vmatpush3.bf16.msra.mxu0 %v2791_v46  ;;  %v2823_v46 = vld [vmem:[%s3780_s0 + $0x230] sm:$0xff]   ;;  %v46_v49 = vld [vmem:[%s3781_s1 + $0xe0] sm:$0xff] }
  0x29   :  { %2553 = vmatpush3.bf16.msra.mxu1 %v2792_v47  ;;  %2514 = vmatprep.subr.bf16.mxu0 %v2793_v56  ;;  %v2824_v47 = vld [vmem:[%s3780_s0 + $0x2b0] sm:$0xff]   ;;  %v2825_v56 = vld [vmem:[%s3780_s0 + $0x268] sm:$0xff]  }
  0x2a   :  { %2554 = vmatprep.subr.bf16.mxu1 %v2794_v57  ;;  %v2826_v57 = vld [vmem:[%s3780_s0 + $0x2e8] sm:$0xff]   ;;  %v32_v33 = vld [vmem:[%s3781_s1 + $0x70] sm:$0xff] }
  0x2b   :  { %1467 = vmatmul.mubr.bf16.gmra.mxu0 %v2215_v53  ;;  %v2222_v53 = vcombine.high %v37_v50, %v45_v51 }
  0x2c   :  { %1532 = vmatmul.mubr.bf16.gmra.mxu1 %v2217_v55  ;;  %2515 = vmatpush3.bf16.msra.mxu0 %v2795_v58  ;;  %v2221_v55 = vcombine.low %v37_v50, %v45_v51  ;;  %v2827_v58 = vld [vmem:[%s3780_s0 + $0x228] sm:$0xff]   ;;  %v2224_v51 = vcombine.high %v38_v48, %v46_v49 }
  0x2d   :  { %2555 = vmatpush3.bf16.msra.mxu1 %v2796_v59  ;;  %2516 = vmatprep.subr.bf16.mxu0 %v2797_v60  ;;  %v2828_v59 = vld [vmem:[%s3780_s0 + $0x2a8] sm:$0xff]   ;;  %v2829_v60 = vld [vmem:[%s3780_s0 + $0x260] sm:$0xff]  }
  0x2e   :  { %2556 = vmatprep.subr.bf16.mxu1 %v2798_v61  ;;  %1474 = vmatprep.mubr.bf16.mxu0 %v2232_v4  ;;  %v2830_v61 = vld [vmem:[%s3780_s0 + $0x2e0] sm:$0xff]   ;;  %v61_v4 = vld [vmem:[%s3781_s1 + $0x158] sm:$0xff]  ;;  %v39_v50 = vld [vmem:[%s3781_s1 + $0xa8] sm:$0xff] }
  0x2f   :  { %1539 = vmatprep.mubr.bf16.mxu1 %v2234_v5  ;;  %v2235_v5 = vcombine.low %v52_v0, %v60_v1  ;;  %v54_v0 = vld [vmem:[%s3781_s1 + $0x120] sm:$0xff] }
  0x30   :  { %2517 = vmatpush3.bf16.msra.mxu0 %v2799_v62  ;;  %v2831_v62 = vld [vmem:[%s3780_s0 + $0x220] sm:$0xff]  }
  0x31   :  { %2557 = vmatpush3.bf16.msra.mxu1 %v2800_v63  ;;  %2518 = vmatprep.subr.bf16.mxu0 %v2801_v8  ;;  %v2832_v63 = vld [vmem:[%s3780_s0 + $0x2a0] sm:$0xff]   ;;  %v2833_v8 = vld [vmem:[%s3780_s0 + $0x258] sm:$0xff]  }
  0x32   :  { %2558 = vmatprep.subr.bf16.mxu1 %v2802_v9  ;;  %v2834_v9 = vld [vmem:[%s3780_s0 + $0x2d8] sm:$0xff]   ;;  %v62_v1 = vld [vmem:[%s3781_s1 + $0x160] sm:$0xff] }
  0x33   :  { %1475 = vmatmul.mubr.bf16.gmra.mxu0 %v2231_v6  ;;  %v2238_v6 = vcombine.high %v53_v2, %v61_v4 }
  0x34   :  { %1540 = vmatmul.mubr.bf16.gmra.mxu1 %v2233_v7  ;;  %2519 = vmatpush3.bf16.msra.mxu0 %v2803_v10  ;;  %v2237_v7 = vcombine.low %v53_v2, %v61_v4  ;;  %v2835_v10 = vld [vmem:[%s3780_s0 + $0x218] sm:$0xff]   ;;  %v2240_v2 = vcombine.high %v54_v0, %v62_v1  ;;  %v63_v4 = vld [vmem:[%s3781_s1 + $0x168] sm:$0xff] }
  0x35   :  { %2559 = vmatpush3.bf16.msra.mxu1 %v2804_v11  ;;  %2520 = vmatprep.subr.bf16.mxu0 %v2805_v12  ;;  %v2836_v11 = vld [vmem:[%s3780_s0 + $0x298] sm:$0xff]   ;;  %v2837_v12 = vld [vmem:[%s3780_s0 + $0x250] sm:$0xff]  }
  0x36   :  { %2560 = vmatprep.subr.bf16.mxu1 %v2806_v13  ;;  %1482 = vmatprep.mubr.bf16.mxu0 %v2248_v19  ;;  %v2838_v13 = vld [vmem:[%s3780_s0 + $0x2d0] sm:$0xff]   ;;  %v69_v19 = vld [vmem:[%s3781_s1 + $0x198] sm:$0xff] }
  0x37   :  { %1547 = vmatprep.mubr.bf16.mxu1 %v2250_v22  ;;  %v2254_v22 = vcombine.high %v69_v19, %v77_v20 }
  0x38   :  { %2521 = vmatpush3.bf16.msra.mxu0 %v2807_v14  ;;  %v2839_v14 = vld [vmem:[%s3780_s0 + $0x210] sm:$0xff]  }
  0x39   :  { %2561 = vmatpush3.bf16.msra.mxu1 %v2808_v15  ;;  %2522 = vmatprep.subr.bf16.mxu0 %v2809_v24  ;;  %v2840_v15 = vld [vmem:[%s3780_s0 + $0x290] sm:$0xff]   ;;  %v2841_v24 = vld [vmem:[%s3780_s0 + $0x248] sm:$0xff]  }
  0x3a   :  { %2562 = vmatprep.subr.bf16.mxu1 %v2810_v25  ;;  %v2842_v25 = vld [vmem:[%s3780_s0 + $0x2c8] sm:$0xff]  }
  0x3b   :  { %1483 = vmatmul.mubr.bf16.gmra.mxu0 %v2247_v21  ;;  %v2251_v21 = vcombine.low %v68_v16, %v76_v17  ;;  %v70_v16 = vld [vmem:[%s3781_s1 + $0x1a0] sm:$0xff] }
  0x3c   :  { %1548 = vmatmul.mubr.bf16.gmra.mxu1 %v2249_v23  ;;  %2523 = vmatpush3.bf16.msra.mxu0 %v2811_v26  ;;  %v2253_v23 = vcombine.low %v69_v19, %v77_v20  ;;  %v2843_v26 = vld [vmem:[%s3780_s0 + $0x208] sm:$0xff]   ;;  %v78_v17 = vld [vmem:[%s3781_s1 + $0x1e0] sm:$0xff] }
  0x3d   :  { %2563 = vmatpush3.bf16.msra.mxu1 %v2812_v27  ;;  %2524 = vmatprep.subr.bf16.mxu0 %v2813_v28  ;;  %v2844_v27 = vld [vmem:[%s3780_s0 + $0x288] sm:$0xff]   ;;  %v2845_v28 = vld [vmem:[%s3780_s0 + $0x240] sm:$0xff]   ;;  %v2256_v20 = vcombine.high %v70_v16, %v78_v17 }
  0x3e   :  { %2564 = vmatprep.subr.bf16.mxu1 %v2814_v29  ;;  %1588 = vmatprep.mubr.bf16.mxu0 %v2204_v35  ;;  %v2846_v29 = vld [vmem:[%s3780_s0 + $0x2c0] sm:$0xff]   ;;  %v31_v35 = vld [vmem:[%s3781_s1 + $0x68] sm:$0xff] }
  0x3f   :  { %1653 = vmatprep.mubr.bf16.mxu1 %v2206_v39  ;;  %v79_v19 = vld [vmem:[%s3781_s1 + $0x1e8] sm:$0xff] }
  0x40   :  { %2525 = vmatpush3.bf16.msra.mxu0 %v2815_v30  ;;  %v2847_v30 = vld [vmem:[%s3780_s0 + $0x200] sm:$0xff]  }
  0x41   :  { %2565 = vmatpush3.bf16.msra.mxu1 %v2816_v31  ;;  %2590 = vmatprep.subr.bf16.mxu0 %v2817_v40  ;;  %v2848_v31 = vld [vmem:[%s3780_s0 + $0x280] sm:$0xff]   ;;  %v2849_v40 = vld [vmem:[%s3780_s0 + $0x378] sm:$0xff]  }
  0x42   :  { %2630 = vmatprep.subr.bf16.mxu1 %v2818_v41  ;;  %v2850_v41 = vld [vmem:[%s3780_s0 + $0x3f8] sm:$0xff]  }
  0x43   :  { %1589 = vmatmul.mubr.bf16.vlgmr.msra.gmra.mxu0 %v2203_v34  ;;  %v23_v34 = vld [vmem:[%s3781_s1 + $0x28] sm:$0xff] }
  0x44   :  { %1654 = vmatmul.mubr.bf16.vlgmr.msra.gmra.mxu1 %v2205_v38  ;;  %2591 = vmatpush3.bf16.msra.mxu0 %v2819_v42  ;;  %v2209_v38 = vcombine.low %v23_v34, %v31_v35  ;;  %v2210_v39 = vcombine.high %v23_v34, %v31_v35  ;;  %v2851_v42 = vld [vmem:[%s3780_s0 + $0x338] sm:$0xff]   ;;  %v2211_v35 = vcombine.low %v24_v32, %v32_v33 }
  0x45   :  { %2631 = vmatpush3.bf16.msra.mxu1 %v2820_v43  ;;  %2592 = vmatprep.subr.bf16.mxu0 %v2821_v44  ;;  %v2852_v43 = vld [vmem:[%s3780_s0 + $0x3b8] sm:$0xff]   ;;  %v2853_v44 = vld [vmem:[%s3780_s0 + $0x370] sm:$0xff]  }
  0x46   :  { %2632 = vmatprep.subr.bf16.mxu1 %v2822_v45  ;;  %1596 = vmatprep.mubr.bf16.mxu0 %v2220_v52  ;;  %v2854_v45 = vld [vmem:[%s3780_s0 + $0x3f0] sm:$0xff]   ;;  %v47_v52 = vld [vmem:[%s3781_s1 + $0xe8] sm:$0xff]  ;;  %v25_v34 = vld [vmem:[%s3781_s1 + $0x38] sm:$0xff] }
  0x47   :  { %1661 = vmatprep.mubr.bf16.mxu1 %v2222_v53  ;;  %v2223_v53 = vcombine.low %v38_v48, %v46_v49  ;;  %v57_v48 = vld [vmem:[%s3781_s1 + $0x138] sm:$0xff] }
  0x48   :  { %2593 = vmatpush3.bf16.msra.mxu0 %v2823_v46  ;;  %v2855_v46 = vld [vmem:[%s3780_s0 + $0x330] sm:$0xff]   ;;  %v65_v49 = vld [vmem:[%s3781_s1 + $0x178] sm:$0xff] }
  0x49   :  { %2633 = vmatpush3.bf16.msra.mxu1 %v2824_v47  ;;  %2594 = vmatprep.subr.bf16.mxu0 %v2825_v56  ;;  %v2856_v47 = vld [vmem:[%s3780_s0 + $0x3b0] sm:$0xff]   ;;  %v2857_v56 = vld [vmem:[%s3780_s0 + $0x368] sm:$0xff]  }
  0x4a   :  { %2634 = vmatprep.subr.bf16.mxu1 %v2826_v57  ;;  %v2858_v57 = vld [vmem:[%s3780_s0 + $0x3e8] sm:$0xff]  }
  0x4b   :  { %1597 = vmatmul.mubr.bf16.gmra.mxu0 %v2219_v54  ;;  %v2226_v54 = vcombine.high %v39_v50, %v47_v52 }
  0x4c   :  { %1662 = vmatmul.mubr.bf16.gmra.mxu1 %v2221_v55  ;;  %2595 = vmatpush3.bf16.msra.mxu0 %v2827_v58  ;;  %v2225_v55 = vcombine.low %v39_v50, %v47_v52  ;;  %v2859_v58 = vld [vmem:[%s3780_s0 + $0x328] sm:$0xff]  }
  0x4d   :  { %2635 = vmatpush3.bf16.msra.mxu1 %v2828_v59  ;;  %2596 = vmatprep.subr.bf16.mxu0 %v2829_v60  ;;  %v2860_v59 = vld [vmem:[%s3780_s0 + $0x3a8] sm:$0xff]   ;;  %v2861_v60 = vld [vmem:[%s3780_s0 + $0x360] sm:$0xff]  }
  0x4e   :  { %2636 = vmatprep.subr.bf16.mxu1 %v2830_v61  ;;  %1604 = vmatprep.mubr.bf16.mxu0 %v2236_v3  ;;  %v2862_v61 = vld [vmem:[%s3780_s0 + $0x3e0] sm:$0xff]   ;;  %v55_v3 = vld [vmem:[%s3781_s1 + $0x128] sm:$0xff] }
  0x4f   :  { %1669 = vmatprep.mubr.bf16.mxu1 %v2238_v6  ;;  %v2242_v6 = vcombine.high %v55_v3, %v63_v4 }
  0x50   :  { %2597 = vmatpush3.bf16.msra.mxu0 %v2831_v62  ;;  %v2863_v62 = vld [vmem:[%s3780_s0 + $0x320] sm:$0xff]  }
  0x51   :  { %2637 = vmatpush3.bf16.msra.mxu1 %v2832_v63  ;;  %2598 = vmatprep.subr.bf16.mxu0 %v2833_v8  ;;  %v2864_v63 = vld [vmem:[%s3780_s0 + $0x3a0] sm:$0xff]   ;;  %v2865_v8 = vld [vmem:[%s3780_s0 + $0x358] sm:$0xff]  }
  0x52   :  { %2638 = vmatprep.subr.bf16.mxu1 %v2834_v9  ;;  %v2866_v9 = vld [vmem:[%s3780_s0 + $0x3d8] sm:$0xff]  }
  0x53   :  { %1605 = vmatmul.mubr.bf16.gmra.mxu0 %v2235_v5  ;;  %v2239_v5 = vcombine.low %v54_v0, %v62_v1 }
  0x54   :  { %1670 = vmatmul.mubr.bf16.gmra.mxu1 %v2237_v7  ;;  %2599 = vmatpush3.bf16.msra.mxu0 %v2835_v10  ;;  %v2241_v7 = vcombine.low %v55_v3, %v63_v4  ;;  %v2867_v10 = vld [vmem:[%s3780_s0 + $0x318] sm:$0xff]  }
  0x55   :  { %2639 = vmatpush3.bf16.msra.mxu1 %v2836_v11  ;;  %2600 = vmatprep.subr.bf16.mxu0 %v2837_v12  ;;  %v2868_v11 = vld [vmem:[%s3780_s0 + $0x398] sm:$0xff]   ;;  %v2869_v12 = vld [vmem:[%s3780_s0 + $0x350] sm:$0xff]  }
  0x56   :  { %2640 = vmatprep.subr.bf16.mxu1 %v2838_v13  ;;  %1612 = vmatprep.mubr.bf16.mxu0 %v2252_v18  ;;  %v2870_v13 = vld [vmem:[%s3780_s0 + $0x3d0] sm:$0xff]   ;;  %v71_v18 = vld [vmem:[%s3781_s1 + $0x1a8] sm:$0xff] }
  0x57   :  { %1677 = vmatprep.mubr.bf16.mxu1 %v2254_v22  ;;  %v2255_v22 = vcombine.low %v70_v16, %v78_v17 }
  0x58   :  { %2601 = vmatpush3.bf16.msra.mxu0 %v2839_v14  ;;  %v2871_v14 = vld [vmem:[%s3780_s0 + $0x310] sm:$0xff]  }
  0x59   :  { %2641 = vmatpush3.bf16.msra.mxu1 %v2840_v15  ;;  %2602 = vmatprep.subr.bf16.mxu0 %v2841_v24  ;;  %v2872_v15 = vld [vmem:[%s3780_s0 + $0x390] sm:$0xff]   ;;  %v2873_v24 = vld [vmem:[%s3780_s0 + $0x348] sm:$0xff]  }
  0x5a   :  { %2642 = vmatprep.subr.bf16.mxu1 %v2842_v25  ;;  %v2874_v25 = vld [vmem:[%s3780_s0 + $0x3c8] sm:$0xff]  }
  0x5b   :  { %1613 = vmatmul.mubr.bf16.gmra.mxu0 %v2251_v21  ;;  %v2258_v21 = vcombine.high %v71_v18, %v79_v19 }
  0x5c   :  { %1678 = vmatmul.mubr.bf16.gmra.mxu1 %v2253_v23  ;;  %2603 = vmatpush3.bf16.msra.mxu0 %v2843_v26  ;;  %v2257_v23 = vcombine.low %v71_v18, %v79_v19  ;;  %v2875_v26 = vld [vmem:[%s3780_s0 + $0x308] sm:$0xff]  }
  0x5d   :  { %2643 = vmatpush3.bf16.msra.mxu1 %v2844_v27  ;;  %2604 = vmatprep.subr.bf16.mxu0 %v2845_v28  ;;  %v2876_v27 = vld [vmem:[%s3780_s0 + $0x388] sm:$0xff]   ;;  %v2877_v28 = vld [vmem:[%s3780_s0 + $0x340] sm:$0xff]  }
  0x5e   :  { %2644 = vmatprep.subr.bf16.mxu1 %v2846_v29  ;;  %1718 = vmatprep.mubr.bf16.mxu0 %v2208_v37  ;;  %v2878_v29 = vld [vmem:[%s3780_s0 + $0x3c0] sm:$0xff]   ;;  %v33_v37 = vld [vmem:[%s3781_s1 + $0x78] sm:$0xff] }
  0x5f   :  { %1783 = vmatprep.mubr.bf16.mxu1 %v2210_v39  ;;  %v48_v39 = vld [vmem:[%s3781_s1 + $0xf0] sm:$0xff] }
  0x60   :  { %2605 = vmatpush3.bf16.msra.mxu0 %v2847_v30  ;;  %v2879_v30 = vld [vmem:[%s3780_s0 + $0x300] sm:$0xff]  }
  0x61   :  { %2645 = vmatpush3.bf16.msra.mxu1 %v2848_v31  ;;  %2670 = vmatprep.subr.bf16.mxu0 %v2849_v40  ;;  %v2880_v31 = vld [vmem:[%s3780_s0 + $0x380] sm:$0xff]   ;;  %v2213_v40 = vcombine.low %v25_v34, %v33_v37 }
  0x62   :  { %2710 = vmatprep.subr.bf16.mxu1 %v2850_v41  ;;  %v2214_v41 = vcombine.high %v25_v34, %v33_v37 }
  0x63   :  { %1719 = vmatmul.mubr.bf16.vlgmr.msra.gmra.mxu0 %v2207_v36  ;;  %v2212_v36 = vcombine.high %v24_v32, %v32_v33 }
  0x64   :  { %1784 = vmatmul.mubr.bf16.vlgmr.msra.gmra.mxu1 %v2209_v38  ;;  %2671 = vmatpush3.bf16.msra.mxu0 %v2851_v42  ;;  %v40_v38 = vld [vmem:[%s3781_s1 + $0xb0] sm:$0xff] }
  0x65   :  { %2711 = vmatpush3.bf16.msra.mxu1 %v2852_v43  ;;  %2672 = vmatprep.subr.bf16.mxu0 %v2853_v44  ;;  %v2228_v42 = vcombine.high %v40_v38, %v48_v39  ;;  %v41_v43 = vld [vmem:[%s3781_s1 + $0xb8] sm:$0xff]  ;;  %v2227_v50 = vcombine.low %v40_v38, %v48_v39 }
  0x66   :  { %2712 = vmatprep.subr.bf16.mxu1 %v2854_v45  ;;  %1726 = vmatprep.mubr.bf16.mxu0 %v2224_v51  ;;  %v49_v44 = vld [vmem:[%s3781_s1 + $0xf8] sm:$0xff] }
  0x67   :  { %1791 = vmatprep.mubr.bf16.mxu1 %v2226_v54  ;;  %v2230_v45 = vcombine.high %v41_v43, %v49_v44  ;;  %v2229_v51 = vcombine.low %v41_v43, %v49_v44  ;;  %v72_v54 = vld [vmem:[%s3781_s1 + $0x1b0] sm:$0xff] }
  0x68   :  { %2673 = vmatpush3.bf16.msra.mxu0 %v2855_v46  ;;  %v56_v46 = vld [vmem:[%s3781_s1 + $0x130] sm:$0xff] }
  0x69   :  { %2713 = vmatpush3.bf16.msra.mxu1 %v2856_v47  ;;  %2674 = vmatprep.subr.bf16.mxu0 %v2857_v56  ;;  %v64_v47 = vld [vmem:[%s3781_s1 + $0x170] sm:$0xff]  ;;  %v73_v56 = vld [vmem:[%s3781_s1 + $0x1b8] sm:$0xff] }
  0x6a   :  { %2714 = vmatprep.subr.bf16.mxu1 %v2858_v57  ;;  %v2244_v52 = vcombine.high %v56_v46, %v64_v47  ;;  %v81_v57 = vld [vmem:[%s3781_s1 + $0x1f8] sm:$0xff] }
  0x6b   :  { %1727 = vmatmul.mubr.bf16.gmra.mxu0 %v2223_v53  ;;  %v2246_v53 = vcombine.high %v57_v48, %v65_v49 }
  0x6c   :  { %1792 = vmatmul.mubr.bf16.gmra.mxu1 %v2225_v55  ;;  %2675 = vmatpush3.bf16.msra.mxu0 %v2859_v58  ;;  %v80_v55 = vld [vmem:[%s3781_s1 + $0x1f0] sm:$0xff]  ;;  %v2243_v58 = vcombine.low %v56_v46, %v64_v47 }
  0x6d   :  { %2715 = vmatpush3.bf16.msra.mxu1 %v2860_v59  ;;  %2676 = vmatprep.subr.bf16.mxu0 %v2861_v60  ;;  %v2245_v59 = vcombine.low %v57_v48, %v65_v49  ;;  %v2260_v60 = vcombine.high %v72_v54, %v80_v55 }
  0x6e   :  { %2716 = vmatprep.subr.bf16.mxu1 %v2862_v61  ;;  %1734 = vmatprep.mubr.bf16.mxu0 %v2240_v2  ;;  %v2262_v61 = vcombine.high %v73_v56, %v81_v57 }
  0x6f   :  { %1799 = vmatprep.mubr.bf16.mxu1 %v2242_v6 }
  0x70   :  { %2677 = vmatpush3.bf16.msra.mxu0 %v2863_v62  ;;  %v2259_v62 = vcombine.low %v72_v54, %v80_v55 }
  0x71   :  { %2717 = vmatpush3.bf16.msra.mxu1 %v2864_v63  ;;  %2678 = vmatprep.subr.bf16.mxu0 %v2865_v8  ;;  %v2261_v63 = vcombine.low %v73_v56, %v81_v57 }
  0x72   :  { %2718 = vmatprep.subr.bf16.mxu1 %v2866_v9 }
  0x73   :  { %1735 = vmatmul.mubr.bf16.gmra.mxu0 %v2239_v5 }
  0x74   :  { %1800 = vmatmul.mubr.bf16.gmra.mxu1 %v2241_v7  ;;  %2679 = vmatpush3.bf16.msra.mxu0 %v2867_v10 }
  0x75   :  { %2719 = vmatpush3.bf16.msra.mxu1 %v2868_v11  ;;  %2680 = vmatprep.subr.bf16.mxu0 %v2869_v12 }
  0x76   :  { %2720 = vmatprep.subr.bf16.mxu1 %v2870_v13  ;;  %1742 = vmatprep.mubr.bf16.mxu0 %v2256_v20 }
  0x77   :  { %1807 = vmatprep.mubr.bf16.mxu1 %v2258_v21 }
  0x78   :  { %2681 = vmatpush3.bf16.msra.mxu0 %v2871_v14 }
  0x79   :  { %2721 = vmatpush3.bf16.msra.mxu1 %v2872_v15  ;;  %2682 = vmatprep.subr.bf16.mxu0 %v2873_v24 }
  0x7a   :  { %2722 = vmatprep.subr.bf16.mxu1 %v2874_v25 }
  0x7b   :  { %1743 = vmatmul.mubr.bf16.gmra.mxu0 %v2255_v22 }
  0x7c   :  { %1808 = vmatmul.mubr.bf16.gmra.mxu1 %v2257_v23  ;;  %2683 = vmatpush3.bf16.msra.mxu0 %v2875_v26 }
  0x7d   :  { %2723 = vmatpush3.bf16.msra.mxu1 %v2876_v27  ;;  %2684 = vmatprep.subr.bf16.mxu0 %v2877_v28  ;;  %v2897_v27 = vmov 0  }
  0x7e   :  { %2724 = vmatprep.subr.bf16.mxu1 %v2878_v29  ;;  %1848 = vmatprep.mubr.bf16.mxu0 %v2212_v36 }
  0x7f   :  { %1913 = vmatprep.mubr.bf16.mxu1 %v2214_v41  ;;  %2752 = vset.pattern.permute.xlu1 %v2897_v27 }
  0x80   :  { %2685 = vmatpush3.bf16.msra.mxu0 %v2879_v30  ;;  %2751 = vset.pattern.permute.xlu0 %v2897_v27 }
  0x81   :  { %2725 = vmatpush3.bf16.msra.mxu1 %v2880_v31 }
  0x83   :  { %1849 = vmatmul.mubr.bf16.vlgmr.msra.gmra.mxu0 %v2211_v35 }
  0x84   :  { %1914 = vmatmul.mubr.bf16.vlgmr.msra.gmra.mxu1 %v2213_v40  ;;  %1856 = vmatprep.mubr.bf16.mxu0 %v2228_v42 }
  0x85   :  { %1921 = vmatprep.mubr.bf16.mxu1 %v2230_v45 }
  0x8b   :  { %1857 = vmatmul.mubr.bf16.gmra.mxu0 %v2227_v50 }
  0x8c   :  { %1922 = vmatmul.mubr.bf16.gmra.mxu1 %v2229_v51  ;;  %1864 = vmatprep.mubr.bf16.mxu0 %v2244_v52 }
  0x8d   :  { %1929 = vmatprep.mubr.bf16.mxu1 %v2246_v53 }
  0x93   :  { %1865 = vmatmul.mubr.bf16.gmra.mxu0 %v2243_v58 }
  0x94   :  { %1930 = vmatmul.mubr.bf16.gmra.mxu1 %v2245_v59  ;;  %1872 = vmatprep.mubr.bf16.mxu0 %v2260_v60 }
  0x95   :  { %1937 = vmatprep.mubr.bf16.mxu1 %v2262_v61 }
  0x9b   :  { %1873 = vmatmul.mubr.bf16.gmra.mxu0 %v2259_v62 }
  0x9c   :  { %1938 = vmatmul.mubr.bf16.gmra.mxu1 %v2261_v63 }
  0xe3   :  { %v2446_v0 = vpop.f32.mrf.mxu0 }
  0xe4   :  { %v2486_v1 = vpop.f32.mrf.mxu1 }
  0xe5   :  { %v2447_v2 = vpop.f32.mrf.mxu0 }
  0xe6   :  { %v2448_v3 = vadd.f32 %v2447_v2, %v2446_v0  ;;  %v2487_v4 = vpop.f32.mrf.mxu1 }
  0xe7   :  { %v2488_v5 = vadd.f32 %v2487_v4, %v2486_v1  ;;  %v2449_v6 = vpop.f32.mrf.mxu0 }
  0xe8   :  { %v2489_v7 = vpop.f32.mrf.mxu1 }
  0xe9   :  { %v3499_v8 = vadd.f32 %v2488_v5, %v2448_v3  ;;  %v2450_v9 = vpop.f32.mrf.mxu0 }
  0xea   :  { %v2451_v10 = vadd.f32 %v2450_v9, %v2449_v6  ;;  %v2490_v11 = vpop.f32.mrf.mxu1 }
  0xeb   :  { %v2491_v12 = vadd.f32 %v2490_v11, %v2489_v7  ;;  %v2452_v13 = vpop.f32.mrf.mxu0 }
  0xec   :  { %v2492_v15 = vpop.f32.mrf.mxu1 }
  0xed   :  { %v3501_v14 = vadd.f32 %v2491_v12, %v2451_v10  ;;  %v2453_v16 = vpop.f32.mrf.mxu0 }
  0xee   :  { %v2454_v17 = vadd.f32 %v2453_v16, %v2452_v13  ;;  %v2493_v18 = vpop.f32.mrf.mxu1 }
  0xef   :  { %v2494_v19 = vadd.f32 %v2493_v18, %v2492_v15  ;;  %v2455_v20 = vpop.f32.mrf.mxu0 }
  0xf0   :  { %v2495_v21 = vpop.f32.mrf.mxu1 }
  0xf1   :  { %v3503_v22 = vadd.f32 %v2494_v19, %v2454_v17  ;;  %v2456_v23 = vpop.f32.mrf.mxu0 }
  0xf2   :  { %v2457_v24 = vadd.f32 %v2456_v23, %v2455_v20  ;;  %v2496_v25 = vpop.f32.mrf.mxu1 }
  0xf3   :  { %v2497_v26 = vadd.f32 %v2496_v25, %v2495_v21  ;;  %v2458_v29 = vpop.f32.mrf.mxu0 }
  0xf4   :  { %v2498_v30 = vpop.f32.mrf.mxu1 }
  0xf5   :  { %v3505_v28 = vadd.f32 %v2497_v26, %v2457_v24  ;;  %v2459_v31 = vpop.f32.mrf.mxu0 }
  0xf6   :  { %v2499_v32 = vpop.f32.mrf.mxu1  ;;  %v2460_v33 = vadd.f32 %v2459_v31, %v2458_v29 }
  0xf7   :  { %v2500_v34 = vadd.f32 %v2499_v32, %v2498_v30  ;;  %v2461_v35 = vpop.f32.mrf.mxu0 }
  0xf8   :  { %v2501_v36 = vpop.f32.mrf.mxu1 }
  0xf9   :  { %v3507_v37 = vadd.f32 %v2500_v34, %v2460_v33  ;;  %v2462_v38 = vpop.f32.mrf.mxu0 }
  0xfa   :  { %v2502_v39 = vpop.f32.mrf.mxu1  ;;  %v2463_v40 = vadd.f32 %v2462_v38, %v2461_v35 }
  0xfb   :  { %v2503_v41 = vadd.f32 %v2502_v39, %v2501_v36  ;;  %v2464_v43 = vpop.f32.mrf.mxu0 }
  0xfc   :  { %v2504_v44 = vpop.f32.mrf.mxu1 }
  0xfd   :  { %v3509_v42 = vadd.f32 %v2503_v41, %v2463_v40  ;;  %v2465_v45 = vpop.f32.mrf.mxu0 }
  0xfe   :  { %v2466_v46 = vadd.f32 %v2465_v45, %v2464_v43  ;;  %v2505_v47 = vpop.f32.mrf.mxu1 }
  0xff   :  { %v2506_v48 = vadd.f32 %v2505_v47, %v2504_v44  ;;  %v2467_v49 = vpop.f32.mrf.mxu0 }
 0x100   :  { %v2507_v50 = vpop.f32.mrf.mxu1 }
 0x101   :  { %v3511_v51 = vadd.f32 %v2506_v48, %v2466_v46  ;;  %v2468_v52 = vpop.f32.mrf.mxu0 }
 0x102   :  { %v2469_v53 = vadd.f32 %v2468_v52, %v2467_v49  ;;  %v2508_v54 = vpop.f32.mrf.mxu1 }
 0x103   :  { %3785 = vst [vmem:[#allocation2_spill] sm:$0xff] %v3511_v51  ;;  %v2509_v55 = vadd.f32 %v2508_v54, %v2507_v50  ;;  %v2526_v56 = vpop.f32.mrf.mxu0 }
 0x104   :  { %v3513_v58 = vpop.f32.mrf.mxu1 }
 0x105   :  { %v1553_v57 = vadd.f32 %v2509_v55, %v2469_v53  ;;  %v2527_v59 = vpop.f32.mrf.mxu0 }
 0x106   :  { %v3515_v60 = vpop.f32.mrf.mxu1 }
 0x107   :  { %v2529_v61 = vpop.f32.mrf.mxu0 }
 0x108   :  { %v3517_v62 = vpop.f32.mrf.mxu1 }
 0x109   :  { %v2530_v63 = vpop.f32.mrf.mxu0 }
 0x10a   :  { %v3519_v0 = vpop.f32.mrf.mxu1 }
 0x10b   :  { %v3521_v1 = vpop.f32.mrf.mxu0 }
 0x10c   :  { %v3523_v2 = vpop.f32.mrf.mxu1 }
 0x10d   :  { %v3525_v3 = vpop.f32.mrf.mxu0 }
 0x10e   :  { %v3527_v4 = vpop.f32.mrf.mxu1 }
 0x10f   :  { %v3529_v5 = vpop.f32.mrf.mxu0 }
 0x110   :  { %v3531_v6 = vpop.f32.mrf.mxu1 }
 0x111   :  { %v3533_v7 = vpop.f32.mrf.mxu0 }
 0x112   :  { %v3535_v9 = vpop.f32.mrf.mxu1 }
 0x113   :  { %v3537_v10 = vpop.f32.mrf.mxu0 }
 0x114   :  { %v3539_v11 = vpop.f32.mrf.mxu1 }
 0x115   :  { %v3541_v12 = vpop.f32.mrf.mxu0 }
 0x116   :  { %v3543_v13 = vpop.f32.mrf.mxu1 }
 0x117   :  { %v3545_v15 = vpop.f32.mrf.mxu0 }
 0x118   :  { %v3547_v16 = vpop.f32.mrf.mxu1 }
 0x119   :  { %v3549_v17 = vpop.f32.mrf.mxu0 }
 0x11a   :  { %v3551_v18 = vpop.f32.mrf.mxu1 }
 0x11b   :  { %v3553_v19 = vpop.f32.mrf.mxu0 }
 0x11c   :  { %v3555_v20 = vpop.f32.mrf.mxu1 }
 0x11d   :  { %3786 = vst [vmem:[#allocation3_spill] sm:$0xff] %v3555_v20  ;;  %v3557_v21 = vpop.f32.mrf.mxu0 }
 0x11e   :  { %v3559_v23 = vpop.f32.mrf.mxu1 }
 0x11f   :  { %3787 = vst [vmem:[#allocation4_spill] sm:$0xff] %v3559_v23  ;;  %v2547_v24 = vpop.f32.mrf.mxu0 }
 0x120   :  { %v2587_v25 = vpop.f32.mrf.mxu1 }
 0x121   :  { %v2548_v26 = vpop.f32.mrf.mxu0 }
 0x122   :  { %v2549_v27 = vadd.f32 %v2548_v26, %v2547_v24  ;;  %v2588_v29 = vpop.f32.mrf.mxu1 }
 0x123   :  { %v2589_v30 = vadd.f32 %v2588_v29, %v2587_v25  ;;  %v2606_v32 = vpop.f32.mrf.mxu0 }
 0x124   :  { %v1618_v31 = vadd.f32 %v2549_v27, %v1553_v57  ;;  %v2646_v33 = vpop.f32.mrf.mxu1  ;;  %v2528_v27 = vadd.f32 %v2527_v59, %v2526_v56  ;;  %v2534_v59 = vadd.f32 %v3525_v3, %v3521_v1 }
 0x125   :  { %v2607_v35 = vpop.f32.mrf.mxu0 }
 0x126   :  { %v1683_v34 = vadd.f32 %v2589_v30, %v1618_v31  ;;  %v2647_v36 = vpop.f32.mrf.mxu1  ;;  %v2531_v31 = vadd.f32 %v2530_v63, %v2529_v61  ;;  %v1591_v23 = vadd.f32 %v2528_v27, %v3499_v8  ;;  %v2571_v8 = vadd.f32 %v3519_v0, %v3517_v62 }
 0x127   :  { %v2609_v38 = vpop.f32.mrf.mxu0  ;;  %v2574_v62 = vadd.f32 %v3527_v4, %v3523_v2 }
 0x128   :  { %v2649_v39 = vpop.f32.mrf.mxu1 }
 0x129   :  { %v2610_v40 = vpop.f32.mrf.mxu0 }
 0x12a   :  { %v2650_v41 = vpop.f32.mrf.mxu1  ;;  %v2611_v63 = vadd.f32 %v2610_v40, %v2609_v38 }
 0x12b   :  { %v2612_v43 = vpop.f32.mrf.mxu0 }
 0x12c   :  { %v3561_v44 = vpop.f32.mrf.mxu1 }
 0x12d   :  { %v2613_v45 = vpop.f32.mrf.mxu0 }
 0x12e   :  { %v3563_v46 = vpop.f32.mrf.mxu1  ;;  %v2614_v38 = vadd.f32 %v2613_v45, %v2612_v43 }
 0x12f   :  { %v2615_v47 = vpop.f32.mrf.mxu0 }
 0x130   :  { %v3565_v48 = vpop.f32.mrf.mxu1 }
 0x131   :  { %v2616_v49 = vpop.f32.mrf.mxu0 }
 0x132   :  { %v3567_v50 = vpop.f32.mrf.mxu1 }
 0x133   :  { %v3569_v52 = vpop.f32.mrf.mxu0 }
 0x134   :  { %v3571_v53 = vpop.f32.mrf.mxu1 }
 0x135   :  { %3788 = vst [vmem:[#allocation5_spill] sm:$0xff] %v3571_v53  ;;  %v3573_v54 = vpop.f32.mrf.mxu0 }
 0x136   :  { %v3575_v55 = vpop.f32.mrf.mxu1 }
 0x137   :  { %3789 = vst [vmem:[#allocation6_spill] sm:$0xff] %v3575_v55  ;;  %v3577_v57 = vpop.f32.mrf.mxu0  ;;  %v2568_v55 = vadd.f32 %v3515_v60, %v3513_v58 }
 0x138   :  { %v3579_v24 = vpop.f32.mrf.mxu1 }
 0x139   :  { %3790 = vst [vmem:[#allocation7_spill] sm:$0xff] %v3579_v24  ;;  %v3581_v25 = vpop.f32.mrf.mxu0  ;;  %v2608_v24 = vadd.f32 %v2607_v35, %v2606_v32  ;;  %v1656_v56 = vadd.f32 %v2568_v55, %v1591_v23  ;;  %v1599_v32 = vadd.f32 %v2534_v59, %v3503_v22  ;;  %v2648_v23 = vadd.f32 %v2647_v36, %v2646_v33 }
 0x13a   :  { %3791 = vst [vmem:[#allocation8_spill] sm:$0xff] %v3581_v25  ;;  %v3583_v26 = vpop.f32.mrf.mxu1  ;;  %v2651_v22 = vadd.f32 %v2650_v41, %v2649_v39  ;;  %v2577_v36 = vadd.f32 %v3535_v9, %v3531_v6  ;;  %v2654_v41 = vadd.f32 %v3563_v46, %v3561_v44 }
 0x13b   :  { %3792 = vst [vmem:[#allocation9_spill] sm:$0xff] %v3583_v26  ;;  %v3585_v29 = vpop.f32.mrf.mxu0  ;;  %v1594_v26 = vadd.f32 %v2531_v31, %v3501_v14  ;;  %v2537_v14 = vadd.f32 %v3533_v7, %v3529_v5 }
 0x13c   :  { %3793 = vst [vmem:[#allocation10_spill] sm:$0xff] %v3585_v29  ;;  %v3587_v30 = vpop.f32.mrf.mxu1 }
 0x13d   :  { %3794 = vst [vmem:[#allocation11_spill] sm:$0xff] %v3587_v30  ;;  %v3590_v20 = vpop.f32.mrf.mxu0  ;;  %v1659_v29 = vadd.f32 %v2571_v8, %v1594_v26  ;;  %v1602_v5 = vadd.f32 %v2537_v14, %v3505_v28  ;;  %v2546_v8 = vadd.f32 %v3557_v21, %v3553_v19  ;;  %v3798_v21 = vld [vmem:[#allocation5_spill] sm:$0xff] }
 0x13e   :  { %3795 = vst [vmem:[#allocation12_spill] sm:$0xff] %v3590_v20  ;;  %v3592_v51 = vpop.f32.mrf.mxu1  ;;  %v1721_v20 = vadd.f32 %v2608_v24, %v1656_v56 }
 0x13f   :  { %3796 = vst [vmem:[#allocation13_spill] sm:$0xff] %v3592_v51  ;;  %v2627_v53 = vpop.f32.mrf.mxu0  ;;  %v1724_v1 = vadd.f32 %v2611_v63, %v1659_v29  ;;  %v1667_v39 = vadd.f32 %v2577_v36, %v1602_v5 }
 0x140   :  { %v2667_v25 = vpop.f32.mrf.mxu1  ;;  %v1786_v0 = vadd.f32 %v2648_v23, %v1721_v20  ;;  %v2617_v20 = vadd.f32 %v2616_v49, %v2615_v47  ;;  %v2580_v47 = vadd.f32 %v3543_v13, %v3539_v11  ;;  %v2620_v49 = vadd.f32 %v3573_v54, %v3569_v52 }
 0x141   :  { %v2628_v30 = vpop.f32.mrf.mxu0  ;;  %v1789_v26 = vadd.f32 %v2651_v22, %v1724_v1  ;;  %v2657_v11 = vadd.f32 %v3567_v50, %v3565_v48  ;;  %v2583_v54 = vadd.f32 %v3551_v18, %v3547_v16  ;;  %v3799_v48 = vld [vmem:[#allocation6_spill] sm:$0xff]  ;;  %v3801_v18 = vld [vmem:[#allocation3_spill] sm:$0xff] }
 0x142   :  { %v2668_v61 = vpop.f32.mrf.mxu1  ;;  %v2629_v27 = vadd.f32 %v2628_v30, %v2627_v53  ;;  %v1732_v56 = vadd.f32 %v2617_v20, %v1667_v39  ;;  %v2660_v50 = vadd.f32 %v3799_v48, %v3798_v21  ;;  %v2096_v21 = vld [vmem:[%s3783_s3 + $0x28] sm:$0xff]  ;;  %v2042_v48 = vld [vmem:[%s3782_s2 + $0x38] sm:$0xff] }
 0x143   :  { %v2669_v51 = vadd.f32 %v2668_v61, %v2667_v25  ;;  %v2686_v60 = vpop.f32.mrf.mxu0  ;;  %v1664_v25 = vadd.f32 %v2574_v62, %v1599_v32 }
 0x144   :  { %v1748_v58 = vadd.f32 %v2629_v27, %v1683_v34  ;;  %v2726_v35 = vpop.f32.mrf.mxu1  ;;  %v2540_v34 = vadd.f32 %v3541_v12, %v3537_v10  ;;  %v2543_v12 = vadd.f32 %v3549_v17, %v3545_v15 }
 0x145   :  { %v2687_v55 = vpop.f32.mrf.mxu0  ;;  %v1729_v4 = vadd.f32 %v2614_v38, %v1664_v25  ;;  %v3804_v25 = vld [vmem:[#allocation12_spill] sm:$0xff] }
 0x146   :  { %v3604_v3 = vadd.f32 %v2669_v51, %v1748_v58  ;;  %v2688_v40 = vadd.f32 %v2687_v55, %v2686_v60  ;;  %v2727_v53 = vpop.f32.mrf.mxu1  ;;  %v1607_v10 = vadd.f32 %v2540_v34, %v3507_v37  ;;  %v1610_v44 = vadd.f32 %v2543_v12, %v3509_v42  ;;  %v3797_v42 = vld [vmem:[#allocation8_spill] sm:$0xff]  ;;  %v3800_v55 = vld [vmem:[#allocation2_spill] sm:$0xff] }
 0x147   :  { %v2689_v24 = vpop.f32.mrf.mxu0  ;;  %v2728_v33 = vadd.f32 %v2727_v53, %v2726_v35  ;;  %v1794_v31 = vadd.f32 %v2654_v41, %v1729_v4  ;;  %v1797_v60 = vadd.f32 %v2657_v11, %v1732_v56  ;;  %v2623_v32 = vadd.f32 %v3797_v42, %v3577_v57  ;;  %v3806_v4 = vld [vmem:[#allocation9_spill] sm:$0xff]  ;;  %v2092_v42 = vld [vmem:[%s3783_s3 + $0x8] sm:$0xff] }
 0x148   :  { %v1851_v7 = vadd.f32 %v2688_v40, %v1786_v0  ;;  %v2729_v51 = vpop.f32.mrf.mxu1  ;;  %v1672_v61 = vadd.f32 %v2580_v47, %v1607_v10  ;;  %v1675_v1 = vadd.f32 %v2583_v54, %v1610_v44  ;;  %v1615_v62 = vadd.f32 %v2546_v8, %v3800_v55  ;;  %v3802_v40 = vld [vmem:[#allocation4_spill] sm:$0xff]  ;;  %v3807_v47 = vld [vmem:[#allocation11_spill] sm:$0xff] }
 0x149   :  { %v2690_v2 = vpop.f32.mrf.mxu0  ;;  %v2586_v53 = vadd.f32 %v3802_v40, %v3801_v18  ;;  %v2037_v54 = vld [vmem:[%s3782_s2 + $0x10] sm:$0xff] }
 0x14a   :  { %v2691_v43 = vadd.f32 %v2690_v2, %v2689_v24  ;;  %v2730_v45 = vpop.f32.mrf.mxu1  ;;  %v3613_v29 = vadd.f32 %v2728_v33, %v1851_v7  ;;  %v1737_v27 = vadd.f32 %v2620_v49, %v1672_v61  ;;  %v1740_v22 = vadd.f32 %v2623_v32, %v1675_v1  ;;  %v3803_v24 = vld [vmem:[#allocation10_spill] sm:$0xff]  ;;  %v3805_v2 = vld [vmem:[#allocation7_spill] sm:$0xff]  ;;  %v3808_v49 = vld [vmem:[#allocation13_spill] sm:$0xff] }
 0x14b   :  { %v2692_v28 = vpop.f32.mrf.mxu0  ;;  %v2731_v6 = vadd.f32 %v2730_v45, %v2729_v51  ;;  %v2626_v5 = vadd.f32 %v3804_v25, %v3803_v24  ;;  %v2663_v20 = vadd.f32 %v3806_v4, %v3805_v2  ;;  %v2040_v32 = vld [vmem:[%s3782_s2 + $0x28] sm:$0xff]  ;;  %v2093_v40 = vld [vmem:[%s3783_s3 + $0x10] sm:$0xff] }
 0x14c   :  { %v1854_v30 = vadd.f32 %v2691_v43, %v1789_v26  ;;  %v2732_v9 = vpop.f32.mrf.mxu1  ;;  %1946 = vadd.xlane.f32.xlu0 %v3613_v29  ;;  %v1802_v57 = vadd.f32 %v2660_v50, %v1737_v27  ;;  %v1680_v26 = vadd.f32 %v2586_v53, %v1615_v62  ;;  %v2038_v27 = vld [vmem:[%s3782_s2 + $0x18] sm:$0xff]  ;;  %v2091_v50 = vld [vmem:[%s3783_s3] sm:$0xff] }
 0x14d   :  { %v2693_v37 = vpop.f32.mrf.mxu0  ;;  %v2095_v53 = vld [vmem:[%s3783_s3 + $0x20] sm:$0xff] }
 0x14e   :  { %v2694_v15 = vadd.f32 %v2693_v37, %v2692_v28  ;;  %v2733_v17 = vpop.f32.mrf.mxu1  ;;  %v3625_v59 = vadd.f32 %v2731_v6, %v1854_v30  ;;  %v1805_v28 = vadd.f32 %v2663_v20, %v1740_v22  ;;  %v1745_v39 = vadd.f32 %v2626_v5, %v1680_v26 }
 0x14f   :  { %v2695_v46 = vpop.f32.mrf.mxu0  ;;  %v2734_v63 = vadd.f32 %v2733_v17, %v2732_v9  ;;  %v2666_v37 = vadd.f32 %v3808_v49, %v3807_v47  ;;  %v2098_v47 = vld [vmem:[%s3783_s3 + $0x38] sm:$0xff] }
 0x150   :  { %v1859_v13 = vadd.f32 %v2694_v15, %v1794_v31  ;;  %v2735_v52 = vpop.f32.mrf.mxu1  ;;  %1948 = vadd.xlane.f32.xlu0 %v3625_v59 }
 0x151   :  { %v2696_v58 = vpop.f32.mrf.mxu0  ;;  %v1810_v61 = vadd.f32 %v2666_v37, %v1745_v39 }
 0x152   :  { %v2697_v14 = vadd.f32 %v2696_v58, %v2695_v46  ;;  %v2736_v23 = vpop.f32.mrf.mxu1  ;;  %v3637_v19 = vadd.f32 %v2734_v63, %v1859_v13  ;;  %v2035_v58 = vld [vmem:[%s3782_s2] sm:$0xff] }
 0x153   :  { %v2698_v35 = vpop.f32.mrf.mxu0  ;;  %v2737_v38 = vadd.f32 %v2736_v23, %v2735_v52  ;;  %v2036_v52 = vld [vmem:[%s3782_s2 + $0x8] sm:$0xff]  ;;  %v2041_v23 = vld [vmem:[%s3782_s2 + $0x30] sm:$0xff] }
 0x154   :  { %v1862_v0 = vadd.f32 %v2697_v14, %v1797_v60  ;;  %v2738_v16 = vpop.f32.mrf.mxu1  ;;  %1950 = vadd.xlane.f32.xlu1 %v3637_v19  ;;  %v2039_v60 = vld [vmem:[%s3782_s2 + $0x20] sm:$0xff]  ;;  %v2094_v14 = vld [vmem:[%s3783_s3 + $0x18] sm:$0xff] }
 0x155   :  { %v2699_v34 = vpop.f32.mrf.mxu0 }
 0x156   :  { %v2700_v7 = vadd.f32 %v2699_v34, %v2698_v35  ;;  %v2739_v33 = vpop.f32.mrf.mxu1  ;;  %v3647_v51 = vadd.f32 %v2737_v38, %v1862_v0 }
 0x157   :  { %v2701_v36 = vpop.f32.mrf.mxu0  ;;  %v2740_v45 = vadd.f32 %v2739_v33, %v2738_v16 }
 0x158   :  { %v1867_v43 = vadd.f32 %v2700_v7, %v1802_v57  ;;  %v2741_v10 = vpop.f32.mrf.mxu1  ;;  %1952 = vadd.xlane.f32.xlu1 %v3647_v51 }
 0x159   :  { %v2702_v12 = vpop.f32.mrf.mxu0 }
 0x15a   :  { %v2703_v41 = vadd.f32 %v2702_v12, %v2701_v36  ;;  %v2742_v30 = vpop.f32.mrf.mxu1  ;;  %v3652_v6 = vadd.f32 %v2740_v45, %v1867_v43 }
 0x15b   :  { %v2704_v9 = vpop.f32.mrf.mxu0  ;;  %v2743_v56 = vadd.f32 %v2742_v30, %v2741_v10 }
 0x15c   :  { %v1870_v31 = vadd.f32 %v2703_v41, %v1805_v28  ;;  %1954 = vadd.xlane.f32.xlu0 %v3652_v6  ;;  %v2744_v15 = vpop.f32.mrf.mxu1 }
 0x15d   :  { %v2705_v17 = vpop.f32.mrf.mxu0 }
 0x15e   :  { %v2706_v44 = vadd.f32 %v2705_v17, %v2704_v9  ;;  %v2745_v46 = vpop.f32.mrf.mxu1  ;;  %v3657_v8 = vadd.f32 %v2743_v56, %v1870_v31 }
 0x15f   :  { %v2746_v11 = vadd.f32 %v2745_v46, %v2744_v15  ;;  %v2707_v35 = vpop.f32.mrf.mxu0 }
 0x160   :  { %v1875_v13 = vadd.f32 %v2706_v44, %v1810_v61  ;;  %1956 = vadd.xlane.f32.xlu1 %v3657_v8  ;;  %v2747_v55 = vpop.f32.mrf.mxu1 }
 0x161   :  { %v2708_v1 = vpop.f32.mrf.mxu0 }
 0x162   :  { %v3660_v63 = vadd.f32 %v2746_v11, %v1875_v13  ;;  %v2709_v62 = vadd.f32 %v2708_v1, %v2707_v35  ;;  %v2748_v0 = vpop.f32.mrf.mxu1 }
 0x163   :  { %v2749_v16 = vadd.f32 %v2748_v0, %v2747_v55 }
 0x164   :  { %1958 = vadd.xlane.f32.xlu0 %v3660_v63  ;;  %v1878_v38 = vadd.f32 %v2709_v62, %v3604_v3 }
 0x166   :  { %v1943_v18 = vadd.f32 %v2749_v16, %v1878_v38 }
 0x171   :  { %2050 = vperm.xlu1 %2752, %v2036_v52   ;;  %v2097_v52 = vld [vmem:[%s3783_s3 + $0x30] sm:$0xff] }
 0x175   :  { %2055 = vperm.xlu1 %2752, %v2037_v54  }
 0x179   :  { %2060 = vperm.xlu1 %2752, %v2038_v27  }
 0x17a   :  { %2045 = vperm.xlu0 %2751, %v2035_v58  }
 0x17d   :  { %2065 = vperm.xlu1 %2752, %v2039_v60  }
 0x17e   :  { %2106 = vperm.xlu0 %2751, %v2092_v42  }
 0x181   :  { %2070 = vperm.xlu1 %2752, %v2040_v32  }
 0x182   :  { %2116 = vperm.xlu0 %2751, %v2094_v14  }
 0x185   :  { %2075 = vperm.xlu1 %2752, %v2041_v23  }
 0x186   :  { %2126 = vperm.xlu0 %2751, %v2096_v21  }
 0x189   :  { %2080 = vperm.xlu1 %2752, %v2042_v48  }
 0x18d   :  { %2101 = vperm.xlu1 %2752, %v2091_v50  }
 0x1b1   :  { %1960 = vadd.xlane.f32.xlu1 %v1943_v18 }
 0x1c2   :  { %2111 = vperm.xlu1 %2752, %v2093_v40  }
 0x1c6   :  { %2121 = vperm.xlu1 %2752, %v2095_v53  }
 0x1d5   :  { %v1947_v57 = vpop.xlane.xlu0 %1946 }
 0x1d6   :  { %v1963_v34 = vmul.f32 0.0078125, %v1947_v57 }
 0x1d8   :  { %v3707_v22 = vsub.f32 %v3613_v29, %v1963_v34 }
 0x1d9   :  { %v1949_v24 = vpop.xlane.xlu0 %1948 }
 0x1da   :  { %v1979_v3 = vmul.f32 %v3707_v22, %v3707_v22  ;;  %v1964_v7 = vmul.f32 0.0078125, %v1949_v24 }
 0x1dc   :  { %1987 = vadd.xlane.f32.xlu0 %v1979_v3  ;;  %v3717_v2 = vsub.f32 %v3625_v59, %v1964_v7 }
 0x1dd   :  { %v1951_v25 = vpop.xlane.xlu1 %1950 }
 0x1de   :  { %v1965_v5 = vmul.f32 0.0078125, %v1951_v25 }
 0x1e0   :  { %v3712_v33 = vsub.f32 %v3637_v19, %v1965_v5  ;;  %v1980_v19 = vmul.f32 %v3717_v2, %v3717_v2 }
 0x1e1   :  { %v1953_v36 = vpop.xlane.xlu1 %1952 }
 0x1e2   :  { %v1981_v26 = vmul.f32 %v3712_v33, %v3712_v33  ;;  %v1966_v29 = vmul.f32 0.0078125, %v1953_v36 }
 0x1e4   :  { %1991 = vadd.xlane.f32.xlu0 %v1981_v26  ;;  %v3720_v43 = vsub.f32 %v3647_v51, %v1966_v29 }
 0x1e5   :  { %v1955_v4 = vpop.xlane.xlu0 %1954 }
 0x1e6   :  { %v1967_v20 = vmul.f32 0.0078125, %v1955_v4  ;;  %v1982_v51 = vmul.f32 %v3720_v43, %v3720_v43 }
 0x1e8   :  { %v3723_v45 = vsub.f32 %v3652_v6, %v1967_v20 }
 0x1e9   :  { %v1957_v10 = vpop.xlane.xlu1 %1956 }
 0x1ea   :  { %v1968_v12 = vmul.f32 0.0078125, %v1957_v10  ;;  %1989 = vadd.xlane.f32.xlu1 %v1980_v19  ;;  %v1983_v59 = vmul.f32 %v3723_v45, %v3723_v45 }
 0x1ec   :  { %v3730_v28 = vsub.f32 %v3657_v8, %v1968_v12  ;;  %1995 = vadd.xlane.f32.xlu0 %v1983_v59 }
 0x1ed   :  { %v1959_v39 = vpop.xlane.xlu0 %1958  ;;  %v2051_v49 = vpop.permute.xlu1 %2050 }
 0x1ee   :  { %v1969_v41 = vmul.f32 0.0078125, %v1959_v39  ;;  %1993 = vadd.xlane.f32.xlu1 %v1982_v51  ;;  %v1984_v6 = vmul.f32 %v3730_v28, %v3730_v28 }
 0x1f0   :  { %v3735_v30 = vsub.f32 %v3660_v63, %v1969_v41 }
 0x1f1   :  { %v2056_v37 = vpop.permute.xlu1 %2055 }
 0x1f2   :  { %1997 = vadd.xlane.f32.xlu1 %v1984_v6  ;;  %v1985_v9 = vmul.f32 %v3735_v30, %v3735_v30 }
 0x1f4   :  { %1999 = vadd.xlane.f32.xlu0 %v1985_v9 }
 0x1f5   :  { %v2061_v31 = vpop.permute.xlu1 %2060  ;;  %v2046_v63 = vpop.permute.xlu0 %2045 }
 0x1f9   :  { %v2066_v56 = vpop.permute.xlu1 %2065  ;;  %v2107_v54 = vpop.permute.xlu0 %2106 }
 0x1fd   :  { %v3744_v15 = vpop.permute.xlu1 %2070  ;;  %v2117_v27 = vpop.permute.xlu0 %2116 }
 0x201   :  { %v3746_v17 = vpop.permute.xlu1 %2075  ;;  %v2127_v58 = vpop.permute.xlu0 %2126 }
 0x205   :  { %v3748_v61 = vpop.permute.xlu1 %2080 }
 0x209   :  { %v2102_v44 = vpop.permute.xlu1 %2101 }
 0x20a   :  { %2136 = vperm.xlu0 %2751, %v2098_v47  }
 0x23a   :  { %v1961_v46 = vpop.xlane.xlu1 %1960 }
 0x23b   :  { %v1970_v8 = vmul.f32 0.0078125, %v1961_v46 }
 0x23d   :  { %v3750_v11 = vsub.f32 %v1943_v18, %v1970_v8 }
 0x23e   :  { %v2112_v32 = vpop.permute.xlu1 %2111 }
 0x23f   :  { %v1986_v13 = vmul.f32 %v3750_v11, %v3750_v11 }
 0x241   :  { %2001 = vadd.xlane.f32.xlu1 %v1986_v13 }
 0x242   :  { %v2122_v48 = vpop.permute.xlu1 %2121 }
 0x252   :  { %2131 = vperm.xlu1 %2752, %v2097_v52  }
 0x265   :  { %v1988_v60 = vpop.xlane.xlu0 %1987 }
 0x266   :  { %v2003_v42 = vmul.f32 0.0078125, %v1988_v60 }
 0x268   :  { %v2011_v14 = vadd.f32 1e-05, %v2003_v42 }
 0x26a   :  { %2881 = vrsqrt.f32 %v2011_v14 }
 0x26d   :  { %v1992_v23 = vpop.xlane.xlu0 %1991 }
 0x26e   :  { %v2005_v21 = vmul.f32 0.0078125, %v1992_v23 }
 0x270   :  { %v2013_v50 = vadd.f32 1e-05, %v2005_v21 }
 0x272   :  { %2883 = vrsqrt.f32 %v2013_v50 }
 0x273   :  { %v1990_v35 = vpop.xlane.xlu1 %1989 }
 0x274   :  { %v2004_v1 = vmul.f32 0.0078125, %v1990_v35 }
 0x275   :  { %v1996_v55 = vpop.xlane.xlu0 %1995 }
 0x276   :  { %v2012_v62 = vadd.f32 1e-05, %v2004_v1  ;;  %v2007_v0 = vmul.f32 0.0078125, %v1996_v55 }
 0x277   :  { %v1994_v38 = vpop.xlane.xlu1 %1993  ;;  %v2882_v57 = vpop.eup %2881 }
 0x278   :  { %2885 = vrsqrt.f32 %v2012_v62  ;;  %v2015_v16 = vadd.f32 1e-05, %v2007_v0  ;;  %v2006_v18 = vmul.f32 0.0078125, %v1994_v38  ;;  %v2027_v24 = vmul.f32 %v2882_v57, %v3707_v22 }
 0x27a   :  { %2887 = vrsqrt.f32 %v2015_v16  ;;  %v2014_v40 = vadd.f32 1e-05, %v2006_v18  ;;  %v2083_v5 = vmul.f32 %v2046_v63, %v2027_v24 }
 0x27b   :  { %v1998_v53 = vpop.xlane.xlu1 %1997 }
 0x27c   :  { %2889 = vrsqrt.f32 %v2014_v40  ;;  %v2008_v34 = vmul.f32 0.0078125, %v1998_v53  ;;  %v2139_v4 = vadd.f32 %v2102_v44, %v2083_v5 }
 0x27e   :  { %v2016_v3 = vadd.f32 1e-05, %v2008_v34  ;;  %v2147_v39 = vmax.f32 %v2139_v4, 0.0 }
 0x27f   :  { %v2884_v25 = vpop.eup %2883 }
 0x280   :  { %2891 = vrsqrt.f32 %v2016_v3  ;;  %v2029_v7 = vmul.f32 %v2884_v25, %v3712_v33 }
 0x282   :  { %v2085_v20 = vmul.f32 %v2056_v37, %v2029_v7 }
 0x284   :  { %v2141_v6 = vadd.f32 %v2112_v32, %v2085_v20 }
 0x285   :  { %v2886_v36 = vpop.eup %2885 }
 0x286   :  { %v2028_v26 = vmul.f32 %v2886_v36, %v3717_v2 }
 0x287   :  { %v2888_v29 = vpop.eup %2887 }
 0x288   :  { %v2084_v19 = vmul.f32 %v2051_v49, %v2028_v26  ;;  %v2031_v10 = vmul.f32 %v2888_v29, %v3723_v45  ;;  %v2149_v49 = vmax.f32 %v2141_v6, 0.0 }
 0x289   :  { %v2890_v12 = vpop.eup %2889 }
 0x28a   :  { %v2030_v59 = vmul.f32 %v2890_v12, %v3720_v43  ;;  %v2140_v51 = vadd.f32 %v2107_v54, %v2084_v19  ;;  %v2087_v22 = vmul.f32 %v2066_v56, %v2031_v10 }
 0x28c   :  { %v2086_v41 = vmul.f32 %v2061_v31, %v2030_v59  ;;  %v2148_v9 = vmax.f32 %v2140_v51, 0.0  ;;  %v2143_v37 = vadd.f32 %v2122_v48, %v2087_v22 }
 0x28d   :  { %v2892_v47 = vpop.eup %2891 }
 0x28e   :  { %v2032_v33 = vmul.f32 %v2892_v47, %v3730_v28  ;;  %v2142_v46 = vadd.f32 %v2117_v27, %v2086_v41  ;;  %v2410_v2 = vpack.c.bf16 %v2148_v9, %v2147_v39  ;;  %v2151_v56 = vmax.f32 %v2143_v37, 0.0 }
 0x290   :  { %v2088_v44 = vmul.f32 %v3744_v15, %v2032_v33  ;;  %v2150_v8 = vmax.f32 %v2142_v46, 0.0  ;;  %2411 = vst [vmem:[%s3784_s4] sm:$0xff] %v2410_v2   ;;  %v2000_v15 = vpop.xlane.xlu0 %1999 }
 0x291   :  { %v2009_v13 = vmul.f32 0.0078125, %v2000_v15 }
 0x292   :  { %v2144_v43 = vadd.f32 %v2127_v58, %v2088_v44  ;;  %v2415_v45 = vpack.c.bf16 %v2150_v8, %v2149_v49 }
 0x293   :  { %v2017_v63 = vadd.f32 1e-05, %v2009_v13 }
 0x294   :  { %v2152_v31 = vmax.f32 %v2144_v43, 0.0  ;;  %2427 = vst [vmem:[%s3784_s4 + $0x8] sm:$0xff] %v2415_v45   ;;  %v2137_v50 = vpop.permute.xlu0 %2136 }
 0x295   :  { %2893 = vrsqrt.f32 %v2017_v63 }
 0x296   :  { %v2420_v28 = vpack.c.bf16 %v2152_v31, %v2151_v56 }
 0x298   :  { %2428 = vst [vmem:[%s3784_s4 + $0x10] sm:$0xff] %v2420_v28  }
 0x2a2   :  { %v2894_v58 = vpop.eup %2893 }
 0x2a3   :  { %v2033_v60 = vmul.f32 %v2894_v58, %v3735_v30 }
 0x2a5   :  { %v2089_v23 = vmul.f32 %v3746_v17, %v2033_v60 }
 0x2ca   :  { %v2002_v52 = vpop.xlane.xlu1 %2001 }
 0x2cb   :  { %v2010_v54 = vmul.f32 0.0078125, %v2002_v52 }
 0x2cd   :  { %v2018_v27 = vadd.f32 1e-05, %v2010_v54 }
 0x2ce   :  { %v2132_v32 = vpop.permute.xlu1 %2131 }
 0x2cf   :  { %2895 = vrsqrt.f32 %v2018_v27  ;;  %v2145_v48 = vadd.f32 %v2132_v32, %v2089_v23 }
 0x2d1   :  { %v2153_v1 = vmax.f32 %v2145_v48, 0.0 }
 0x2dc   :  { %v2896_v42 = vpop.eup %2895 }
 0x2dd   :  { %v2034_v14 = vmul.f32 %v2896_v42, %v3750_v11 }
 0x2df   :  { %v2090_v21 = vmul.f32 %v3748_v61, %v2034_v14 }
 0x2e1   :  { %v2146_v35 = vadd.f32 %v2137_v50, %v2090_v21 }
 0x2e3   :  { %v2154_v55 = vmax.f32 %v2146_v35, 0.0 }
 0x2e5   :  { %v2425_v62 = vpack.c.bf16 %v2154_v55, %v2153_v1 }
 0x2e7   :  { %2429 = vst [vmem:[%s3784_s4 + $0x18] sm:$0xff] %v2425_v62  }

// kernel: generator_forward.7
= control target key start
LH: loop header
LB: loop body
LE: loop exit
PB: predicated region body
PF: predicated region fallthrough
CT: control target
= control target key end

     0   :  { %s4131_s0 = inlined_call_operand.vmem [shape: bf16[1024,512], index: 0, kind: input, shape index: {}]   ;;  %s4132_s1 = inlined_call_operand.vmem [shape: bf16[32,1024], index: 1, kind: input, shape index: {}]   ;;  %s4133_s2 = inlined_call_operand.vmem [shape: f32[32,1], index: 2, kind: input, shape index: {}]   ;;  %s4134_s3 = inlined_call_operand.vmem [shape: f32[32,1], index: 3, kind: input, shape index: {}]   ;;  %s4135_s4 = inlined_call_operand.vmem [shape: bf16[32,512], index: 4, kind: output, shape index: {}]  }
   0x1   :  { %v2625_v0 = vld [vmem:[%s4131_s0 + $0xe4] ss:$16 sps:$4 sm:$0xff]   ;;  %v2629_v2 = vld [vmem:[%s4131_s0 + $0xe0] ss:$16 sps:$4 sm:$0xff]   ;;  %v18_v50 = vld [vmem:[%s4132_s1 + $0x8] sm:$0xff] }
   0x2   :  { %v2627_v1 = vld [vmem:[%s4131_s0 + $0x2e4] ss:$16 sps:$4 sm:$0xff]   ;;  %1649 = vmatprep.subr.bf16.mxu0 %v2625_v0  ;;  %v2630_v3 = vld [vmem:[%s4131_s0 + $0x2e0] ss:$16 sps:$4 sm:$0xff]   ;;  %v22_v51 = vld [vmem:[%s4132_s1 + $0x28] sm:$0xff] }
   0x3   :  { %1702 = vmatprep.subr.bf16.mxu1 %v2627_v1  ;;  %v2631_v4 = vld [vmem:[%s4131_s0 + $0xc4] ss:$16 sps:$4 sm:$0xff]   ;;  %1650 = vmatpush1.bf16.msra.mxu0 %v2629_v2  ;;  %v2635_v6 = vld [vmem:[%s4131_s0 + $0xc0] ss:$16 sps:$4 sm:$0xff]   ;;  %v3207_v55 = vcombine.high %v18_v50, %v22_v51 }
   0x4   :  { %1703 = vmatpush1.bf16.msra.mxu1 %v2630_v3  ;;  %v2633_v5 = vld [vmem:[%s4131_s0 + $0x2c4] ss:$16 sps:$4 sm:$0xff]   ;;  %1651 = vmatprep.subr.bf16.mxu0 %v2631_v4  ;;  %v2636_v7 = vld [vmem:[%s4131_s0 + $0x2c0] ss:$16 sps:$4 sm:$0xff]  }
   0x5   :  { %1704 = vmatprep.subr.bf16.mxu1 %v2633_v5  ;;  %v2637_v8 = vld [vmem:[%s4131_s0 + $0xa4] ss:$16 sps:$4 sm:$0xff]   ;;  %v2641_v10 = vld [vmem:[%s4131_s0 + $0xa0] ss:$16 sps:$4 sm:$0xff]   ;;  %1734 = vmatprep.mubr.bf16.mxu1 %v3207_v55 }
   0x6   :  { %v2639_v9 = vld [vmem:[%s4131_s0 + $0x2a4] ss:$16 sps:$4 sm:$0xff]   ;;  %v2642_v11 = vld [vmem:[%s4131_s0 + $0x2a0] ss:$16 sps:$4 sm:$0xff]  }
   0x7   :  { %1652 = vmatpush1.bf16.msra.mxu0 %v2635_v6  ;;  %v2643_v12 = vld [vmem:[%s4131_s0 + $0x84] ss:$16 sps:$4 sm:$0xff]   ;;  %v2647_v14 = vld [vmem:[%s4131_s0 + $0x80] ss:$16 sps:$4 sm:$0xff]  }
   0x8   :  { %1705 = vmatpush1.bf16.msra.mxu1 %v2636_v7  ;;  %1653 = vmatprep.subr.bf16.mxu0 %v2637_v8  ;;  %v2645_v13 = vld [vmem:[%s4131_s0 + $0x284] ss:$16 sps:$4 sm:$0xff]   ;;  %v2648_v15 = vld [vmem:[%s4131_s0 + $0x280] ss:$16 sps:$4 sm:$0xff]  }
   0x9   :  { %1706 = vmatprep.subr.bf16.mxu1 %v2639_v9  ;;  %v2649_v16 = vld [vmem:[%s4131_s0 + $0x64] ss:$16 sps:$4 sm:$0xff]   ;;  %v2653_v18 = vld [vmem:[%s4131_s0 + $0x60] ss:$16 sps:$4 sm:$0xff]   ;;  %v3261_v9 = vcombine.low %v18_v50, %v22_v51  ;;  %v3395_v50 = vld [vmem:[%s4132_s1 + $0x38] sm:$0xff] }
   0xa   :  { %v2651_v17 = vld [vmem:[%s4131_s0 + $0x264] ss:$16 sps:$4 sm:$0xff]   ;;  %v2654_v19 = vld [vmem:[%s4131_s0 + $0x260] ss:$16 sps:$4 sm:$0xff]  }
   0xb   :  { %1654 = vmatpush1.bf16.msra.mxu0 %v2641_v10  ;;  %v2655_v20 = vld [vmem:[%s4131_s0 + $0x44] ss:$16 sps:$4 sm:$0xff]   ;;  %v2659_v22 = vld [vmem:[%s4131_s0 + $0x40] ss:$16 sps:$4 sm:$0xff]  }
   0xc   :  { %1707 = vmatpush1.bf16.msra.mxu1 %v2642_v11  ;;  %1655 = vmatprep.subr.bf16.mxu0 %v2643_v12  ;;  %v2657_v21 = vld [vmem:[%s4131_s0 + $0x244] ss:$16 sps:$4 sm:$0xff]   ;;  %v2660_v23 = vld [vmem:[%s4131_s0 + $0x240] ss:$16 sps:$4 sm:$0xff]  }
   0xd   :  { %1708 = vmatprep.subr.bf16.mxu1 %v2645_v13  ;;  %v2661_v24 = vld [vmem:[%s4131_s0 + $0x24] ss:$16 sps:$4 sm:$0xff]   ;;  %v2665_v26 = vld [vmem:[%s4131_s0 + $0x20] ss:$16 sps:$4 sm:$0xff]  }
   0xe   :  { %v2663_v25 = vld [vmem:[%s4131_s0 + $0x224] ss:$16 sps:$4 sm:$0xff]   ;;  %v2666_v27 = vld [vmem:[%s4131_s0 + $0x220] ss:$16 sps:$4 sm:$0xff]  }
   0xf   :  { %1656 = vmatpush1.bf16.msra.mxu0 %v2647_v14  ;;  %v2667_v28 = vld [vmem:[%s4131_s0 + $0x4] ss:$16 sps:$4 sm:$0xff]   ;;  %v2671_v30 = vld [vmem:[%s4131_s0] ss:$16 sps:$4 sm:$0xff]  }
  0x10   :  { %1709 = vmatpush1.bf16.msra.mxu1 %v2648_v15  ;;  %1657 = vmatprep.subr.bf16.mxu0 %v2649_v16  ;;  %v2669_v29 = vld [vmem:[%s4131_s0 + $0x204] ss:$16 sps:$4 sm:$0xff]   ;;  %v2672_v31 = vld [vmem:[%s4131_s0 + $0x200] ss:$16 sps:$4 sm:$0xff]  }
  0x11   :  { %1710 = vmatprep.subr.bf16.mxu1 %v2651_v17  ;;  %v2673_v32 = vld [vmem:[%s4131_s0 + $0x1e4] ss:$16 sps:$4 sm:$0xff]   ;;  %v2677_v34 = vld [vmem:[%s4131_s0 + $0x1e0] ss:$16 sps:$4 sm:$0xff]  }
  0x12   :  { %v2675_v33 = vld [vmem:[%s4131_s0 + $0x3e4] ss:$16 sps:$4 sm:$0xff]   ;;  %v2678_v35 = vld [vmem:[%s4131_s0 + $0x3e0] ss:$16 sps:$4 sm:$0xff]  }
  0x13   :  { %1658 = vmatpush1.bf16.msra.mxu0 %v2653_v18  ;;  %v2679_v36 = vld [vmem:[%s4131_s0 + $0x1c4] ss:$16 sps:$4 sm:$0xff]   ;;  %v2683_v38 = vld [vmem:[%s4131_s0 + $0x1c0] ss:$16 sps:$4 sm:$0xff]  }
  0x14   :  { %1711 = vmatpush1.bf16.msra.mxu1 %v2654_v19  ;;  %1659 = vmatprep.subr.bf16.mxu0 %v2655_v20  ;;  %v2681_v37 = vld [vmem:[%s4131_s0 + $0x3c4] ss:$16 sps:$4 sm:$0xff]   ;;  %v2684_v39 = vld [vmem:[%s4131_s0 + $0x3c0] ss:$16 sps:$4 sm:$0xff]  }
  0x15   :  { %1712 = vmatprep.subr.bf16.mxu1 %v2657_v21  ;;  %v2685_v40 = vld [vmem:[%s4131_s0 + $0x1a4] ss:$16 sps:$4 sm:$0xff]   ;;  %v2689_v42 = vld [vmem:[%s4131_s0 + $0x1a0] ss:$16 sps:$4 sm:$0xff]  }
  0x16   :  { %v2687_v41 = vld [vmem:[%s4131_s0 + $0x3a4] ss:$16 sps:$4 sm:$0xff]   ;;  %v2690_v43 = vld [vmem:[%s4131_s0 + $0x3a0] ss:$16 sps:$4 sm:$0xff]  }
  0x17   :  { %1660 = vmatpush1.bf16.msra.mxu0 %v2659_v22  ;;  %v2691_v44 = vld [vmem:[%s4131_s0 + $0x184] ss:$16 sps:$4 sm:$0xff]   ;;  %v2695_v46 = vld [vmem:[%s4131_s0 + $0x180] ss:$16 sps:$4 sm:$0xff]  }
  0x18   :  { %1713 = vmatpush1.bf16.msra.mxu1 %v2660_v23  ;;  %1661 = vmatprep.subr.bf16.mxu0 %v2661_v24  ;;  %v2693_v45 = vld [vmem:[%s4131_s0 + $0x384] ss:$16 sps:$4 sm:$0xff]   ;;  %v2696_v47 = vld [vmem:[%s4131_s0 + $0x380] ss:$16 sps:$4 sm:$0xff]  }
  0x19   :  { %1714 = vmatprep.subr.bf16.mxu1 %v2663_v25  ;;  %v17_v48 = vld [vmem:[%s4132_s1] sm:$0xff] }
  0x1a   :  { %v21_v49 = vld [vmem:[%s4132_s1 + $0x20] sm:$0xff] }
  0x1b   :  { %1662 = vmatpush1.bf16.msra.mxu0 %v2665_v26  ;;  %v2697_v52 = vld [vmem:[%s4131_s0 + $0x164] ss:$16 sps:$4 sm:$0xff]   ;;  %v3202_v53 = vcombine.high %v17_v48, %v21_v49  ;;  %v2701_v56 = vld [vmem:[%s4131_s0 + $0x160] ss:$16 sps:$4 sm:$0xff]   ;;  %v3259_v8 = vcombine.low %v17_v48, %v21_v49  ;;  %v3386_v48 = vld [vmem:[%s4132_s1 + $0x18] sm:$0xff] }
  0x1c   :  { %1715 = vmatpush1.bf16.msra.mxu1 %v2666_v27  ;;  %1663 = vmatprep.subr.bf16.mxu0 %v2667_v28  ;;  %v2699_v54 = vld [vmem:[%s4131_s0 + $0x364] ss:$16 sps:$4 sm:$0xff]   ;;  %v2702_v57 = vld [vmem:[%s4131_s0 + $0x360] ss:$16 sps:$4 sm:$0xff]   ;;  %v3399_v51 = vcombine.high %v3386_v48, %v3395_v50 }
  0x1d   :  { %1716 = vmatprep.subr.bf16.mxu1 %v2669_v29  ;;  %1681 = vmatprep.mubr.bf16.mxu0 %v3202_v53  ;;  %v2703_v58 = vld [vmem:[%s4131_s0 + $0x144] ss:$16 sps:$4 sm:$0xff]   ;;  %v2707_v60 = vld [vmem:[%s4131_s0 + $0x140] ss:$16 sps:$4 sm:$0xff]  }
  0x1e   :  { %v2705_v59 = vld [vmem:[%s4131_s0 + $0x344] ss:$16 sps:$4 sm:$0xff]   ;;  %v2708_v61 = vld [vmem:[%s4131_s0 + $0x340] ss:$16 sps:$4 sm:$0xff]  }
  0x1f   :  { %1664 = vmatpush1.bf16.msra.mxu0 %v2671_v30  ;;  %v2709_v62 = vld [vmem:[%s4131_s0 + $0x124] ss:$16 sps:$4 sm:$0xff]   ;;  %v2713_v0 = vld [vmem:[%s4131_s0 + $0x120] ss:$16 sps:$4 sm:$0xff]   ;;  %v26_v30 = vld [vmem:[%s4132_s1 + $0x48] sm:$0xff] }
  0x20   :  { %1717 = vmatpush1.bf16.msra.mxu1 %v2672_v31  ;;  %1665 = vmatprep.subr.bf16.mxu0 %v2673_v32  ;;  %v2711_v63 = vld [vmem:[%s4131_s0 + $0x324] ss:$16 sps:$4 sm:$0xff]   ;;  %v2714_v1 = vld [vmem:[%s4131_s0 + $0x320] ss:$16 sps:$4 sm:$0xff]   ;;  %v30_v31 = vld [vmem:[%s4132_s1 + $0x68] sm:$0xff] }
  0x21   :  { %1718 = vmatprep.subr.bf16.mxu1 %v2675_v33  ;;  %v2715_v2 = vld [vmem:[%s4131_s0 + $0x104] ss:$16 sps:$4 sm:$0xff]   ;;  %v2719_v4 = vld [vmem:[%s4131_s0 + $0x100] ss:$16 sps:$4 sm:$0xff]  }
  0x22   :  { %v2717_v3 = vld [vmem:[%s4131_s0 + $0x304] ss:$16 sps:$4 sm:$0xff]   ;;  %v2720_v5 = vld [vmem:[%s4131_s0 + $0x300] ss:$16 sps:$4 sm:$0xff]  }
  0x23   :  { %1666 = vmatpush2.bf16.msra.mxu0 %v2677_v34  ;;  %v2723_v6 = vld [vmem:[%s4131_s0 + $0x4e4] ss:$16 sps:$4 sm:$0xff]   ;;  %v2721_v10 = vld [vmem:[%s4131_s0 + $0x4e0] ss:$16 sps:$4 sm:$0xff]   ;;  %v3336_v34 = vcombine.high %v26_v30, %v30_v31 }
  0x24   :  { %1719 = vmatpush2.bf16.msra.mxu1 %v2678_v35  ;;  %1667 = vmatprep.subr.bf16.mxu0 %v2679_v36  ;;  %v2726_v7 = vld [vmem:[%s4131_s0 + $0x6e4] ss:$16 sps:$4 sm:$0xff]   ;;  %v2724_v11 = vld [vmem:[%s4131_s0 + $0x6e0] ss:$16 sps:$4 sm:$0xff]  }
  0x25   :  { %1720 = vmatprep.subr.bf16.mxu1 %v2681_v37  ;;  %v2729_v12 = vld [vmem:[%s4131_s0 + $0x4c4] ss:$16 sps:$4 sm:$0xff]   ;;  %v2727_v14 = vld [vmem:[%s4131_s0 + $0x4c0] ss:$16 sps:$4 sm:$0xff]   ;;  %v3343_v37 = vcombine.low %v26_v30, %v30_v31 }
  0x26   :  { %v2732_v13 = vld [vmem:[%s4131_s0 + $0x6c4] ss:$16 sps:$4 sm:$0xff]   ;;  %v2730_v15 = vld [vmem:[%s4131_s0 + $0x6c0] ss:$16 sps:$4 sm:$0xff]  }
  0x27   :  { %1668 = vmatpush2.bf16.msra.mxu0 %v2683_v38  ;;  %v2735_v16 = vld [vmem:[%s4131_s0 + $0x4a4] ss:$16 sps:$4 sm:$0xff]   ;;  %v2733_v18 = vld [vmem:[%s4131_s0 + $0x4a0] ss:$16 sps:$4 sm:$0xff]  }
  0x28   :  { %1721 = vmatpush2.bf16.msra.mxu1 %v2684_v39  ;;  %1669 = vmatprep.subr.bf16.mxu0 %v2685_v40  ;;  %v2738_v17 = vld [vmem:[%s4131_s0 + $0x6a4] ss:$16 sps:$4 sm:$0xff]   ;;  %v2736_v19 = vld [vmem:[%s4131_s0 + $0x6a0] ss:$16 sps:$4 sm:$0xff]  }
  0x29   :  { %1722 = vmatprep.subr.bf16.mxu1 %v2687_v41  ;;  %v2741_v20 = vld [vmem:[%s4131_s0 + $0x484] ss:$16 sps:$4 sm:$0xff]   ;;  %v2739_v22 = vld [vmem:[%s4131_s0 + $0x480] ss:$16 sps:$4 sm:$0xff]  }
  0x2a   :  { %v2744_v21 = vld [vmem:[%s4131_s0 + $0x684] ss:$16 sps:$4 sm:$0xff]   ;;  %v2742_v23 = vld [vmem:[%s4131_s0 + $0x680] ss:$16 sps:$4 sm:$0xff]  }
  0x2b   :  { %1670 = vmatpush2.bf16.msra.mxu0 %v2689_v42  ;;  %v2747_v24 = vld [vmem:[%s4131_s0 + $0x464] ss:$16 sps:$4 sm:$0xff]   ;;  %v2745_v26 = vld [vmem:[%s4131_s0 + $0x460] ss:$16 sps:$4 sm:$0xff]  }
  0x2c   :  { %1723 = vmatpush2.bf16.msra.mxu1 %v2690_v43  ;;  %1671 = vmatprep.subr.bf16.mxu0 %v2691_v44  ;;  %v2750_v25 = vld [vmem:[%s4131_s0 + $0x664] ss:$16 sps:$4 sm:$0xff]   ;;  %v2748_v27 = vld [vmem:[%s4131_s0 + $0x660] ss:$16 sps:$4 sm:$0xff]  }
  0x2d   :  { %1724 = vmatprep.subr.bf16.mxu1 %v2693_v45  ;;  %v25_v28 = vld [vmem:[%s4132_s1 + $0x40] sm:$0xff]  ;;  %v27_v30 = vld [vmem:[%s4132_s1 + $0x50] sm:$0xff] }
  0x2e   :  { %v29_v29 = vld [vmem:[%s4132_s1 + $0x60] sm:$0xff]  ;;  %v31_v31 = vld [vmem:[%s4132_s1 + $0x70] sm:$0xff] }
  0x2f   :  { %1672 = vmatpush2.bf16.msra.mxu0 %v2695_v46  ;;  %v2753_v32 = vld [vmem:[%s4131_s0 + $0x444] ss:$16 sps:$4 sm:$0xff]   ;;  %v3334_v33 = vcombine.high %v25_v28, %v29_v29  ;;  %v3338_v35 = vcombine.low %v25_v28, %v29_v29  ;;  %v2751_v38 = vld [vmem:[%s4131_s0 + $0x440] ss:$16 sps:$4 sm:$0xff]   ;;  %v2817_v28 = vld [vmem:[%s4131_s0 + $0xe8] ss:$16 sps:$4 sm:$0xff]  }
  0x30   :  { %1725 = vmatpush2.bf16.msra.mxu1 %v2696_v47  ;;  %1673 = vmatprep.subr.bf16.mxu0 %v2697_v52  ;;  %v2756_v36 = vld [vmem:[%s4131_s0 + $0x644] ss:$16 sps:$4 sm:$0xff]   ;;  %v2754_v39 = vld [vmem:[%s4131_s0 + $0x640] ss:$16 sps:$4 sm:$0xff]   ;;  %v2820_v29 = vld [vmem:[%s4131_s0 + $0x2e8] ss:$16 sps:$4 sm:$0xff]  }
  0x31   :  { %1726 = vmatprep.subr.bf16.mxu1 %v2699_v54  ;;  %v2759_v40 = vld [vmem:[%s4131_s0 + $0x424] ss:$16 sps:$4 sm:$0xff]   ;;  %v2757_v42 = vld [vmem:[%s4131_s0 + $0x420] ss:$16 sps:$4 sm:$0xff]  }
  0x32   :  { %v2762_v41 = vld [vmem:[%s4131_s0 + $0x624] ss:$16 sps:$4 sm:$0xff]   ;;  %v2760_v43 = vld [vmem:[%s4131_s0 + $0x620] ss:$16 sps:$4 sm:$0xff]  }
  0x33   :  { %1674 = vmatpush2.bf16.msra.mxu0 %v2701_v56  ;;  %v2765_v44 = vld [vmem:[%s4131_s0 + $0x404] ss:$16 sps:$4 sm:$0xff]   ;;  %v2763_v52 = vld [vmem:[%s4131_s0 + $0x400] ss:$16 sps:$4 sm:$0xff]  }
  0x34   :  { %1727 = vmatpush2.bf16.msra.mxu1 %v2702_v57  ;;  %1675 = vmatprep.subr.bf16.mxu0 %v2703_v58  ;;  %v2768_v45 = vld [vmem:[%s4131_s0 + $0x604] ss:$16 sps:$4 sm:$0xff]   ;;  %v2766_v54 = vld [vmem:[%s4131_s0 + $0x600] ss:$16 sps:$4 sm:$0xff]  }
  0x35   :  { %1728 = vmatprep.subr.bf16.mxu1 %v2705_v59  ;;  %v3376_v46 = vld [vmem:[%s4132_s1 + $0x10] sm:$0xff] }
  0x36   :  { %v3381_v47 = vld [vmem:[%s4132_s1 + $0x30] sm:$0xff] }
  0x37   :  { %1676 = vmatpush2.bf16.msra.mxu0 %v2707_v60  ;;  %v3390_v49 = vcombine.high %v3376_v46, %v3381_v47  ;;  %v2771_v56 = vld [vmem:[%s4131_s0 + $0x5e4] ss:$16 sps:$4 sm:$0xff]   ;;  %v2769_v58 = vld [vmem:[%s4131_s0 + $0x5e0] ss:$16 sps:$4 sm:$0xff]  }
  0x38   :  { %1729 = vmatpush2.bf16.msra.mxu1 %v2708_v61  ;;  %1677 = vmatprep.subr.bf16.mxu0 %v2709_v62  ;;  %v2774_v57 = vld [vmem:[%s4131_s0 + $0x7e4] ss:$16 sps:$4 sm:$0xff]   ;;  %v2772_v59 = vld [vmem:[%s4131_s0 + $0x7e0] ss:$16 sps:$4 sm:$0xff]  }
  0x39   :  { %1730 = vmatprep.subr.bf16.mxu1 %v2711_v63  ;;  %v2777_v60 = vld [vmem:[%s4131_s0 + $0x5c4] ss:$16 sps:$4 sm:$0xff]   ;;  %v2775_v62 = vld [vmem:[%s4131_s0 + $0x5c0] ss:$16 sps:$4 sm:$0xff]  }
  0x3a   :  { %v2780_v61 = vld [vmem:[%s4131_s0 + $0x7c4] ss:$16 sps:$4 sm:$0xff]   ;;  %v2778_v63 = vld [vmem:[%s4131_s0 + $0x7c0] ss:$16 sps:$4 sm:$0xff]  }
  0x3b   :  { %1678 = vmatpush2.bf16.msra.mxu0 %v2713_v0  ;;  %v2783_v0 = vld [vmem:[%s4131_s0 + $0x5a4] ss:$16 sps:$4 sm:$0xff]  }
  0x3c   :  { %1731 = vmatpush2.bf16.msra.mxu1 %v2714_v1  ;;  %1679 = vmatprep.subr.bf16.mxu0 %v2715_v2  ;;  %v2786_v1 = vld [vmem:[%s4131_s0 + $0x7a4] ss:$16 sps:$4 sm:$0xff]   ;;  %v2781_v2 = vld [vmem:[%s4131_s0 + $0x5a0] ss:$16 sps:$4 sm:$0xff]  }
  0x3d   :  { %1732 = vmatprep.subr.bf16.mxu1 %v2717_v3  ;;  %v2784_v3 = vld [vmem:[%s4131_s0 + $0x7a0] ss:$16 sps:$4 sm:$0xff]  }
  0x3f   :  { %1680 = vmatpush2.bf16.msra.mxu0 %v2719_v4  ;;  %v2789_v4 = vld [vmem:[%s4131_s0 + $0x584] ss:$16 sps:$4 sm:$0xff]  }
  0x40   :  { %1733 = vmatpush2.bf16.msra.mxu1 %v2720_v5  ;;  %1755 = vmatprep.subr.bf16.mxu0 %v2723_v6  ;;  %v2792_v5 = vld [vmem:[%s4131_s0 + $0x784] ss:$16 sps:$4 sm:$0xff]   ;;  %v2787_v6 = vld [vmem:[%s4131_s0 + $0x580] ss:$16 sps:$4 sm:$0xff]  }
  0x41   :  { %1808 = vmatprep.subr.bf16.mxu1 %v2726_v7  ;;  %v2790_v7 = vld [vmem:[%s4131_s0 + $0x780] ss:$16 sps:$4 sm:$0xff]  }
  0x42   :  { %1682 = vmatmul.mubr.bf16.vlgmr.msra.gmra.mxu0 %v3259_v8 }
  0x43   :  { %1735 = vmatmul.mubr.bf16.vlgmr.msra.gmra.mxu1 %v3261_v9  ;;  %1756 = vmatpush1.bf16.msra.mxu0 %v2721_v10  ;;  %v2795_v10 = vld [vmem:[%s4131_s0 + $0x564] ss:$16 sps:$4 sm:$0xff]  }
  0x44   :  { %1809 = vmatpush1.bf16.msra.mxu1 %v2724_v11  ;;  %1757 = vmatprep.subr.bf16.mxu0 %v2729_v12  ;;  %v2798_v11 = vld [vmem:[%s4131_s0 + $0x764] ss:$16 sps:$4 sm:$0xff]   ;;  %v2793_v12 = vld [vmem:[%s4131_s0 + $0x560] ss:$16 sps:$4 sm:$0xff]  }
  0x45   :  { %1810 = vmatprep.subr.bf16.mxu1 %v2732_v13  ;;  %1691 = vmatprep.mubr.bf16.mxu0 %v3334_v33  ;;  %v2796_v13 = vld [vmem:[%s4131_s0 + $0x760] ss:$16 sps:$4 sm:$0xff]  }
  0x46   :  { %1744 = vmatprep.mubr.bf16.mxu1 %v3336_v34 }
  0x47   :  { %1758 = vmatpush1.bf16.msra.mxu0 %v2727_v14  ;;  %v2801_v14 = vld [vmem:[%s4131_s0 + $0x544] ss:$16 sps:$4 sm:$0xff]  }
  0x48   :  { %1811 = vmatpush1.bf16.msra.mxu1 %v2730_v15  ;;  %1759 = vmatprep.subr.bf16.mxu0 %v2735_v16  ;;  %v2804_v15 = vld [vmem:[%s4131_s0 + $0x744] ss:$16 sps:$4 sm:$0xff]   ;;  %v2799_v16 = vld [vmem:[%s4131_s0 + $0x540] ss:$16 sps:$4 sm:$0xff]  }
  0x49   :  { %1812 = vmatprep.subr.bf16.mxu1 %v2738_v17  ;;  %v2802_v17 = vld [vmem:[%s4131_s0 + $0x740] ss:$16 sps:$4 sm:$0xff]  }
  0x4a   :  { %1692 = vmatmul.mubr.bf16.gmra.mxu0 %v3338_v35 }
  0x4b   :  { %1760 = vmatpush1.bf16.msra.mxu0 %v2733_v18  ;;  %1745 = vmatmul.mubr.bf16.gmra.mxu1 %v3343_v37  ;;  %v2807_v18 = vld [vmem:[%s4131_s0 + $0x524] ss:$16 sps:$4 sm:$0xff]  }
  0x4c   :  { %1813 = vmatpush1.bf16.msra.mxu1 %v2736_v19  ;;  %1761 = vmatprep.subr.bf16.mxu0 %v2741_v20  ;;  %v2810_v19 = vld [vmem:[%s4131_s0 + $0x724] ss:$16 sps:$4 sm:$0xff]   ;;  %v2805_v20 = vld [vmem:[%s4131_s0 + $0x520] ss:$16 sps:$4 sm:$0xff]  }
  0x4d   :  { %1814 = vmatprep.subr.bf16.mxu1 %v2744_v21  ;;  %1787 = vmatprep.mubr.bf16.mxu0 %v3390_v49  ;;  %v2808_v21 = vld [vmem:[%s4131_s0 + $0x720] ss:$16 sps:$4 sm:$0xff]  }
  0x4e   :  { %1840 = vmatprep.mubr.bf16.mxu1 %v3399_v51 }
  0x4f   :  { %1762 = vmatpush1.bf16.msra.mxu0 %v2739_v22  ;;  %v2813_v22 = vld [vmem:[%s4131_s0 + $0x504] ss:$16 sps:$4 sm:$0xff]  }
  0x50   :  { %1815 = vmatpush1.bf16.msra.mxu1 %v2742_v23  ;;  %1763 = vmatprep.subr.bf16.mxu0 %v2747_v24  ;;  %v2816_v23 = vld [vmem:[%s4131_s0 + $0x704] ss:$16 sps:$4 sm:$0xff]   ;;  %v2811_v24 = vld [vmem:[%s4131_s0 + $0x500] ss:$16 sps:$4 sm:$0xff]  }
  0x51   :  { %1816 = vmatprep.subr.bf16.mxu1 %v2750_v25  ;;  %v2814_v25 = vld [vmem:[%s4131_s0 + $0x700] ss:$16 sps:$4 sm:$0xff]  }
  0x53   :  { %1764 = vmatpush1.bf16.msra.mxu0 %v2745_v26  ;;  %v2819_v26 = vld [vmem:[%s4131_s0 + $0xec] ss:$16 sps:$4 sm:$0xff]  }
  0x54   :  { %1817 = vmatpush1.bf16.msra.mxu1 %v2748_v27  ;;  %1765 = vmatprep.subr.bf16.mxu0 %v2753_v32  ;;  %v2822_v27 = vld [vmem:[%s4131_s0 + $0x2ec] ss:$16 sps:$4 sm:$0xff]   ;;  %v3525_v32 = vcombine.low %v3376_v46, %v3381_v47 }
  0x55   :  { %1818 = vmatprep.subr.bf16.mxu1 %v2756_v36  ;;  %v3529_v36 = vcombine.low %v3386_v48, %v3395_v50  ;;  %v2831_v46 = vld [vmem:[%s4131_s0 + $0xac] ss:$16 sps:$4 sm:$0xff]   ;;  %v3563_v48 = vcombine.low %v27_v30, %v31_v31  ;;  %v2829_v50 = vld [vmem:[%s4131_s0 + $0xa8] ss:$16 sps:$4 sm:$0xff]  }
  0x56   :  { %v2834_v47 = vld [vmem:[%s4131_s0 + $0x2ac] ss:$16 sps:$4 sm:$0xff]  }
  0x57   :  { %1766 = vmatpush1.bf16.msra.mxu0 %v2751_v38  ;;  %v28_v38 = vld [vmem:[%s4132_s1 + $0x58] sm:$0xff] }
  0x58   :  { %1819 = vmatpush1.bf16.msra.mxu1 %v2754_v39  ;;  %1767 = vmatprep.subr.bf16.mxu0 %v2759_v40  ;;  %v32_v39 = vld [vmem:[%s4132_s1 + $0x78] sm:$0xff] }
  0x59   :  { %1820 = vmatprep.subr.bf16.mxu1 %v2762_v41  ;;  %v2825_v40 = vld [vmem:[%s4131_s0 + $0xcc] ss:$16 sps:$4 sm:$0xff]  }
  0x5a   :  { %v2828_v41 = vld [vmem:[%s4131_s0 + $0x2cc] ss:$16 sps:$4 sm:$0xff]  }
  0x5b   :  { %1768 = vmatpush1.bf16.msra.mxu0 %v2757_v42  ;;  %v3543_v42 = vcombine.high %v27_v30, %v31_v31  ;;  %v2889_v30 = vld [vmem:[%s4131_s0 + $0x168] ss:$16 sps:$4 sm:$0xff]  }
  0x5c   :  { %1821 = vmatpush1.bf16.msra.mxu1 %v2760_v43  ;;  %1769 = vmatprep.subr.bf16.mxu0 %v2765_v44  ;;  %v3545_v43 = vcombine.high %v28_v38, %v32_v39  ;;  %v2823_v44 = vld [vmem:[%s4131_s0 + $0xc8] ss:$16 sps:$4 sm:$0xff]  }
  0x5d   :  { %1822 = vmatprep.subr.bf16.mxu1 %v2768_v45  ;;  %v2826_v45 = vld [vmem:[%s4131_s0 + $0x2c8] ss:$16 sps:$4 sm:$0xff]  }
  0x5e   :  { %v2892_v31 = vld [vmem:[%s4131_s0 + $0x368] ss:$16 sps:$4 sm:$0xff]  }
  0x5f   :  { %1770 = vmatpush1.bf16.msra.mxu0 %v2763_v52  ;;  %v2832_v52 = vld [vmem:[%s4131_s0 + $0x2a8] ss:$16 sps:$4 sm:$0xff]  }
  0x60   :  { %1823 = vmatpush1.bf16.msra.mxu1 %v2766_v54  ;;  %1771 = vmatprep.subr.bf16.mxu0 %v2771_v56  ;;  %v3571_v54 = vcombine.low %v28_v38, %v32_v39  ;;  %v2837_v56 = vld [vmem:[%s4131_s0 + $0x8c] ss:$16 sps:$4 sm:$0xff]  }
  0x61   :  { %1824 = vmatprep.subr.bf16.mxu1 %v2774_v57  ;;  %v2840_v57 = vld [vmem:[%s4131_s0 + $0x28c] ss:$16 sps:$4 sm:$0xff]  }
  0x62   :  { %v2897_v38 = vld [vmem:[%s4131_s0 + $0x14c] ss:$16 sps:$4 sm:$0xff]  }
  0x63   :  { %1772 = vmatpush2.bf16.msra.mxu0 %v2769_v58  ;;  %v2835_v58 = vld [vmem:[%s4131_s0 + $0x88] ss:$16 sps:$4 sm:$0xff]   ;;  %v2900_v39 = vld [vmem:[%s4131_s0 + $0x34c] ss:$16 sps:$4 sm:$0xff]  }
  0x64   :  { %1825 = vmatpush2.bf16.msra.mxu1 %v2772_v59  ;;  %1773 = vmatprep.subr.bf16.mxu0 %v2777_v60  ;;  %v2838_v59 = vld [vmem:[%s4131_s0 + $0x288] ss:$16 sps:$4 sm:$0xff]   ;;  %v2843_v60 = vld [vmem:[%s4131_s0 + $0x6c] ss:$16 sps:$4 sm:$0xff]  }
  0x65   :  { %1826 = vmatprep.subr.bf16.mxu1 %v2780_v61  ;;  %v2846_v61 = vld [vmem:[%s4131_s0 + $0x26c] ss:$16 sps:$4 sm:$0xff]  }
  0x67   :  { %1774 = vmatpush2.bf16.msra.mxu0 %v2775_v62  ;;  %v2841_v62 = vld [vmem:[%s4131_s0 + $0x68] ss:$16 sps:$4 sm:$0xff]  }
  0x68   :  { %1827 = vmatpush2.bf16.msra.mxu1 %v2778_v63  ;;  %1775 = vmatprep.subr.bf16.mxu0 %v2783_v0  ;;  %v2844_v63 = vld [vmem:[%s4131_s0 + $0x268] ss:$16 sps:$4 sm:$0xff]   ;;  %v2849_v0 = vld [vmem:[%s4131_s0 + $0x4c] ss:$16 sps:$4 sm:$0xff]  }
  0x69   :  { %1828 = vmatprep.subr.bf16.mxu1 %v2786_v1  ;;  %v2850_v1 = vld [vmem:[%s4131_s0 + $0x248] ss:$16 sps:$4 sm:$0xff]  }
  0x6b   :  { %1776 = vmatpush2.bf16.msra.mxu0 %v2781_v2  ;;  %v2855_v2 = vld [vmem:[%s4131_s0 + $0x2c] ss:$16 sps:$4 sm:$0xff]  }
  0x6c   :  { %1829 = vmatpush2.bf16.msra.mxu1 %v2784_v3  ;;  %1777 = vmatprep.subr.bf16.mxu0 %v2789_v4  ;;  %v2858_v3 = vld [vmem:[%s4131_s0 + $0x22c] ss:$16 sps:$4 sm:$0xff]   ;;  %v2853_v4 = vld [vmem:[%s4131_s0 + $0x28] ss:$16 sps:$4 sm:$0xff]  }
  0x6d   :  { %1830 = vmatprep.subr.bf16.mxu1 %v2792_v5  ;;  %v2856_v5 = vld [vmem:[%s4131_s0 + $0x228] ss:$16 sps:$4 sm:$0xff]  }
  0x6f   :  { %1778 = vmatpush2.bf16.msra.mxu0 %v2787_v6  ;;  %v2861_v6 = vld [vmem:[%s4131_s0 + $0xc] ss:$16 sps:$4 sm:$0xff]  }
  0x70   :  { %1831 = vmatpush2.bf16.msra.mxu1 %v2790_v7  ;;  %1779 = vmatprep.subr.bf16.mxu0 %v2795_v10  ;;  %v2864_v7 = vld [vmem:[%s4131_s0 + $0x20c] ss:$16 sps:$4 sm:$0xff]   ;;  %v2859_v10 = vld [vmem:[%s4131_s0 + $0x8] ss:$16 sps:$4 sm:$0xff]  }
  0x71   :  { %1832 = vmatprep.subr.bf16.mxu1 %v2798_v11  ;;  %v2862_v11 = vld [vmem:[%s4131_s0 + $0x208] ss:$16 sps:$4 sm:$0xff]  }
  0x73   :  { %1780 = vmatpush2.bf16.msra.mxu0 %v2793_v12  ;;  %v2867_v12 = vld [vmem:[%s4131_s0 + $0x1ec] ss:$16 sps:$4 sm:$0xff]  }
  0x74   :  { %1833 = vmatpush2.bf16.msra.mxu1 %v2796_v13  ;;  %1781 = vmatprep.subr.bf16.mxu0 %v2801_v14  ;;  %v2870_v13 = vld [vmem:[%s4131_s0 + $0x3ec] ss:$16 sps:$4 sm:$0xff]   ;;  %v2865_v14 = vld [vmem:[%s4131_s0 + $0x1e8] ss:$16 sps:$4 sm:$0xff]  }
  0x75   :  { %1834 = vmatprep.subr.bf16.mxu1 %v2804_v15  ;;  %v2868_v15 = vld [vmem:[%s4131_s0 + $0x3e8] ss:$16 sps:$4 sm:$0xff]  }
  0x77   :  { %1782 = vmatpush2.bf16.msra.mxu0 %v2799_v16  ;;  %v2873_v16 = vld [vmem:[%s4131_s0 + $0x1cc] ss:$16 sps:$4 sm:$0xff]  }
  0x78   :  { %1835 = vmatpush2.bf16.msra.mxu1 %v2802_v17  ;;  %1783 = vmatprep.subr.bf16.mxu0 %v2807_v18  ;;  %v2876_v17 = vld [vmem:[%s4131_s0 + $0x3cc] ss:$16 sps:$4 sm:$0xff]   ;;  %v2871_v18 = vld [vmem:[%s4131_s0 + $0x1c8] ss:$16 sps:$4 sm:$0xff]  }
  0x79   :  { %1836 = vmatprep.subr.bf16.mxu1 %v2810_v19  ;;  %v2874_v19 = vld [vmem:[%s4131_s0 + $0x3c8] ss:$16 sps:$4 sm:$0xff]  }
  0x7b   :  { %1784 = vmatpush2.bf16.msra.mxu0 %v2805_v20  ;;  %v2879_v20 = vld [vmem:[%s4131_s0 + $0x1ac] ss:$16 sps:$4 sm:$0xff]  }
  0x7c   :  { %1837 = vmatpush2.bf16.msra.mxu1 %v2808_v21  ;;  %1785 = vmatprep.subr.bf16.mxu0 %v2813_v22  ;;  %v2882_v21 = vld [vmem:[%s4131_s0 + $0x3ac] ss:$16 sps:$4 sm:$0xff]   ;;  %v2877_v22 = vld [vmem:[%s4131_s0 + $0x1a8] ss:$16 sps:$4 sm:$0xff]  }
  0x7d   :  { %1838 = vmatprep.subr.bf16.mxu1 %v2816_v23  ;;  %v2880_v23 = vld [vmem:[%s4131_s0 + $0x3a8] ss:$16 sps:$4 sm:$0xff]  }
  0x7f   :  { %1786 = vmatpush2.bf16.msra.mxu0 %v2811_v24  ;;  %v2885_v24 = vld [vmem:[%s4131_s0 + $0x18c] ss:$16 sps:$4 sm:$0xff]  }
  0x80   :  { %1839 = vmatpush2.bf16.msra.mxu1 %v2814_v25  ;;  %1861 = vmatprep.subr.bf16.mxu0 %v2819_v26  ;;  %v2888_v25 = vld [vmem:[%s4131_s0 + $0x38c] ss:$16 sps:$4 sm:$0xff]   ;;  %v2883_v26 = vld [vmem:[%s4131_s0 + $0x188] ss:$16 sps:$4 sm:$0xff]  }
  0x81   :  { %1914 = vmatprep.subr.bf16.mxu1 %v2822_v27  ;;  %v2886_v27 = vld [vmem:[%s4131_s0 + $0x388] ss:$16 sps:$4 sm:$0xff]  }
  0x82   :  { %1788 = vmatmul.mubr.bf16.vlgmr.msra.gmra.mxu0 %v3525_v32 }
  0x83   :  { %1841 = vmatmul.mubr.bf16.vlgmr.msra.gmra.mxu1 %v3529_v36  ;;  %1862 = vmatpush1.bf16.msra.mxu0 %v2817_v28  ;;  %v2891_v28 = vld [vmem:[%s4131_s0 + $0x16c] ss:$16 sps:$4 sm:$0xff]  }
  0x84   :  { %1915 = vmatpush1.bf16.msra.mxu1 %v2820_v29  ;;  %1863 = vmatprep.subr.bf16.mxu0 %v2825_v40  ;;  %v2894_v29 = vld [vmem:[%s4131_s0 + $0x36c] ss:$16 sps:$4 sm:$0xff]   ;;  %v2895_v40 = vld [vmem:[%s4131_s0 + $0x148] ss:$16 sps:$4 sm:$0xff]  }
  0x85   :  { %1916 = vmatprep.subr.bf16.mxu1 %v2828_v41  ;;  %1797 = vmatprep.mubr.bf16.mxu0 %v3543_v42  ;;  %v2898_v41 = vld [vmem:[%s4131_s0 + $0x348] ss:$16 sps:$4 sm:$0xff]  }
  0x86   :  { %1850 = vmatprep.mubr.bf16.mxu1 %v3545_v43 }
  0x87   :  { %1864 = vmatpush1.bf16.msra.mxu0 %v2823_v44  ;;  %v2903_v44 = vld [vmem:[%s4131_s0 + $0x12c] ss:$16 sps:$4 sm:$0xff]  }
  0x88   :  { %1917 = vmatpush1.bf16.msra.mxu1 %v2826_v45  ;;  %1865 = vmatprep.subr.bf16.mxu0 %v2831_v46  ;;  %v2906_v45 = vld [vmem:[%s4131_s0 + $0x32c] ss:$16 sps:$4 sm:$0xff]   ;;  %v2901_v46 = vld [vmem:[%s4131_s0 + $0x128] ss:$16 sps:$4 sm:$0xff]  }
  0x89   :  { %1918 = vmatprep.subr.bf16.mxu1 %v2834_v47  ;;  %v2904_v47 = vld [vmem:[%s4131_s0 + $0x328] ss:$16 sps:$4 sm:$0xff]  }
  0x8a   :  { %1798 = vmatmul.mubr.bf16.gmra.mxu0 %v3563_v48 }
  0x8b   :  { %1851 = vmatmul.mubr.bf16.gmra.mxu1 %v3571_v54  ;;  %1866 = vmatpush1.bf16.msra.mxu0 %v2829_v50  ;;  %v2909_v50 = vld [vmem:[%s4131_s0 + $0x10c] ss:$16 sps:$4 sm:$0xff]  }
  0x8c   :  { %1919 = vmatpush1.bf16.msra.mxu1 %v2832_v52  ;;  %1867 = vmatprep.subr.bf16.mxu0 %v2837_v56  ;;  %v2912_v52 = vld [vmem:[%s4131_s0 + $0x30c] ss:$16 sps:$4 sm:$0xff]   ;;  %v2907_v56 = vld [vmem:[%s4131_s0 + $0x108] ss:$16 sps:$4 sm:$0xff]  }
  0x8d   :  { %1920 = vmatprep.subr.bf16.mxu1 %v2840_v57  ;;  %1893 = vmatprep.mubr.bf16.mxu0 %v3202_v53  ;;  %v2852_v53 = vld [vmem:[%s4131_s0 + $0x24c] ss:$16 sps:$4 sm:$0xff]   ;;  %v2910_v57 = vld [vmem:[%s4131_s0 + $0x308] ss:$16 sps:$4 sm:$0xff]  }
  0x8e   :  { %1946 = vmatprep.mubr.bf16.mxu1 %v3207_v55  ;;  %v2847_v55 = vld [vmem:[%s4131_s0 + $0x48] ss:$16 sps:$4 sm:$0xff]  }
  0x8f   :  { %1868 = vmatpush1.bf16.msra.mxu0 %v2835_v58  ;;  %v2915_v58 = vld [vmem:[%s4131_s0 + $0x4ec] ss:$16 sps:$4 sm:$0xff]  }
  0x90   :  { %1921 = vmatpush1.bf16.msra.mxu1 %v2838_v59  ;;  %1869 = vmatprep.subr.bf16.mxu0 %v2843_v60  ;;  %v2918_v59 = vld [vmem:[%s4131_s0 + $0x6ec] ss:$16 sps:$4 sm:$0xff]   ;;  %v2913_v60 = vld [vmem:[%s4131_s0 + $0x4e8] ss:$16 sps:$4 sm:$0xff]  }
  0x91   :  { %1922 = vmatprep.subr.bf16.mxu1 %v2846_v61  ;;  %v2916_v61 = vld [vmem:[%s4131_s0 + $0x6e8] ss:$16 sps:$4 sm:$0xff]  }
  0x93   :  { %1870 = vmatpush1.bf16.msra.mxu0 %v2841_v62  ;;  %v2921_v62 = vld [vmem:[%s4131_s0 + $0x4cc] ss:$16 sps:$4 sm:$0xff]  }
  0x94   :  { %1923 = vmatpush1.bf16.msra.mxu1 %v2844_v63  ;;  %1871 = vmatprep.subr.bf16.mxu0 %v2849_v0  ;;  %v2924_v63 = vld [vmem:[%s4131_s0 + $0x6cc] ss:$16 sps:$4 sm:$0xff]   ;;  %v2919_v0 = vld [vmem:[%s4131_s0 + $0x4c8] ss:$16 sps:$4 sm:$0xff]  }
  0x95   :  { %1924 = vmatprep.subr.bf16.mxu1 %v2852_v53  ;;  %v2922_v53 = vld [vmem:[%s4131_s0 + $0x6c8] ss:$16 sps:$4 sm:$0xff]  }
  0x97   :  { %1872 = vmatpush1.bf16.msra.mxu0 %v2847_v55  ;;  %v2927_v55 = vld [vmem:[%s4131_s0 + $0x4ac] ss:$16 sps:$4 sm:$0xff]  }
  0x98   :  { %1925 = vmatpush1.bf16.msra.mxu1 %v2850_v1  ;;  %1873 = vmatprep.subr.bf16.mxu0 %v2855_v2  ;;  %v2928_v1 = vld [vmem:[%s4131_s0 + $0x6a8] ss:$16 sps:$4 sm:$0xff]   ;;  %v2933_v2 = vld [vmem:[%s4131_s0 + $0x48c] ss:$16 sps:$4 sm:$0xff]  }
  0x99   :  { %1926 = vmatprep.subr.bf16.mxu1 %v2858_v3  ;;  %v2934_v3 = vld [vmem:[%s4131_s0 + $0x688] ss:$16 sps:$4 sm:$0xff]  }
  0x9b   :  { %1874 = vmatpush1.bf16.msra.mxu0 %v2853_v4  ;;  %v2939_v4 = vld [vmem:[%s4131_s0 + $0x46c] ss:$16 sps:$4 sm:$0xff]  }
  0x9c   :  { %1927 = vmatpush1.bf16.msra.mxu1 %v2856_v5  ;;  %1875 = vmatprep.subr.bf16.mxu0 %v2861_v6  ;;  %v2940_v5 = vld [vmem:[%s4131_s0 + $0x668] ss:$16 sps:$4 sm:$0xff]   ;;  %v2945_v6 = vld [vmem:[%s4131_s0 + $0x44c] ss:$16 sps:$4 sm:$0xff]  }
  0x9d   :  { %1928 = vmatprep.subr.bf16.mxu1 %v2864_v7  ;;  %v2946_v7 = vld [vmem:[%s4131_s0 + $0x648] ss:$16 sps:$4 sm:$0xff]  }
  0x9f   :  { %1876 = vmatpush1.bf16.msra.mxu0 %v2859_v10  ;;  %v2951_v10 = vld [vmem:[%s4131_s0 + $0x42c] ss:$16 sps:$4 sm:$0xff]  }
  0xa0   :  { %1929 = vmatpush1.bf16.msra.mxu1 %v2862_v11  ;;  %1877 = vmatprep.subr.bf16.mxu0 %v2867_v12  ;;  %v2954_v11 = vld [vmem:[%s4131_s0 + $0x62c] ss:$16 sps:$4 sm:$0xff]   ;;  %v2949_v12 = vld [vmem:[%s4131_s0 + $0x428] ss:$16 sps:$4 sm:$0xff]  }
  0xa1   :  { %1930 = vmatprep.subr.bf16.mxu1 %v2870_v13  ;;  %v2952_v13 = vld [vmem:[%s4131_s0 + $0x628] ss:$16 sps:$4 sm:$0xff]  }
  0xa3   :  { %1878 = vmatpush2.bf16.msra.mxu0 %v2865_v14  ;;  %v2957_v14 = vld [vmem:[%s4131_s0 + $0x40c] ss:$16 sps:$4 sm:$0xff]  }
  0xa4   :  { %1931 = vmatpush2.bf16.msra.mxu1 %v2868_v15  ;;  %1879 = vmatprep.subr.bf16.mxu0 %v2873_v16  ;;  %v2960_v15 = vld [vmem:[%s4131_s0 + $0x60c] ss:$16 sps:$4 sm:$0xff]   ;;  %v2955_v16 = vld [vmem:[%s4131_s0 + $0x408] ss:$16 sps:$4 sm:$0xff]  }
  0xa5   :  { %1932 = vmatprep.subr.bf16.mxu1 %v2876_v17  ;;  %v2958_v17 = vld [vmem:[%s4131_s0 + $0x608] ss:$16 sps:$4 sm:$0xff]  }
  0xa7   :  { %1880 = vmatpush2.bf16.msra.mxu0 %v2871_v18  ;;  %v2963_v18 = vld [vmem:[%s4131_s0 + $0x5ec] ss:$16 sps:$4 sm:$0xff]  }
  0xa8   :  { %1933 = vmatpush2.bf16.msra.mxu1 %v2874_v19  ;;  %1881 = vmatprep.subr.bf16.mxu0 %v2879_v20  ;;  %v2966_v19 = vld [vmem:[%s4131_s0 + $0x7ec] ss:$16 sps:$4 sm:$0xff]   ;;  %v2961_v20 = vld [vmem:[%s4131_s0 + $0x5e8] ss:$16 sps:$4 sm:$0xff]  }
  0xa9   :  { %1934 = vmatprep.subr.bf16.mxu1 %v2882_v21  ;;  %v2964_v21 = vld [vmem:[%s4131_s0 + $0x7e8] ss:$16 sps:$4 sm:$0xff]  }
  0xab   :  { %1882 = vmatpush2.bf16.msra.mxu0 %v2877_v22  ;;  %v2969_v22 = vld [vmem:[%s4131_s0 + $0x5cc] ss:$16 sps:$4 sm:$0xff]  }
  0xac   :  { %1935 = vmatpush2.bf16.msra.mxu1 %v2880_v23  ;;  %1883 = vmatprep.subr.bf16.mxu0 %v2885_v24  ;;  %v2972_v23 = vld [vmem:[%s4131_s0 + $0x7cc] ss:$16 sps:$4 sm:$0xff]   ;;  %v2967_v24 = vld [vmem:[%s4131_s0 + $0x5c8] ss:$16 sps:$4 sm:$0xff]  }
  0xad   :  { %1936 = vmatprep.subr.bf16.mxu1 %v2888_v25  ;;  %v2970_v25 = vld [vmem:[%s4131_s0 + $0x7c8] ss:$16 sps:$4 sm:$0xff]  }
  0xaf   :  { %1884 = vmatpush2.bf16.msra.mxu0 %v2883_v26  ;;  %v2975_v26 = vld [vmem:[%s4131_s0 + $0x5ac] ss:$16 sps:$4 sm:$0xff]  }
  0xb0   :  { %1937 = vmatpush2.bf16.msra.mxu1 %v2886_v27  ;;  %1885 = vmatprep.subr.bf16.mxu0 %v2891_v28  ;;  %v2978_v27 = vld [vmem:[%s4131_s0 + $0x7ac] ss:$16 sps:$4 sm:$0xff]   ;;  %v2973_v28 = vld [vmem:[%s4131_s0 + $0x5a8] ss:$16 sps:$4 sm:$0xff]  }
  0xb1   :  { %1938 = vmatprep.subr.bf16.mxu1 %v2894_v29  ;;  %v2976_v29 = vld [vmem:[%s4131_s0 + $0x7a8] ss:$16 sps:$4 sm:$0xff]  }
  0xb3   :  { %1886 = vmatpush2.bf16.msra.mxu0 %v2889_v30  ;;  %v2981_v30 = vld [vmem:[%s4131_s0 + $0x58c] ss:$16 sps:$4 sm:$0xff]  }
  0xb4   :  { %1939 = vmatpush2.bf16.msra.mxu1 %v2892_v31  ;;  %1887 = vmatprep.subr.bf16.mxu0 %v2897_v38  ;;  %v2984_v31 = vld [vmem:[%s4131_s0 + $0x78c] ss:$16 sps:$4 sm:$0xff]   ;;  %v2979_v38 = vld [vmem:[%s4131_s0 + $0x588] ss:$16 sps:$4 sm:$0xff]  }
  0xb5   :  { %1940 = vmatprep.subr.bf16.mxu1 %v2900_v39  ;;  %v2982_v39 = vld [vmem:[%s4131_s0 + $0x788] ss:$16 sps:$4 sm:$0xff]  }
  0xb7   :  { %1888 = vmatpush2.bf16.msra.mxu0 %v2895_v40  ;;  %v2987_v40 = vld [vmem:[%s4131_s0 + $0x56c] ss:$16 sps:$4 sm:$0xff]  }
  0xb8   :  { %1941 = vmatpush2.bf16.msra.mxu1 %v2898_v41  ;;  %1889 = vmatprep.subr.bf16.mxu0 %v2903_v44  ;;  %v2990_v41 = vld [vmem:[%s4131_s0 + $0x76c] ss:$16 sps:$4 sm:$0xff]   ;;  %v2985_v44 = vld [vmem:[%s4131_s0 + $0x568] ss:$16 sps:$4 sm:$0xff]  }
  0xb9   :  { %1942 = vmatprep.subr.bf16.mxu1 %v2906_v45  ;;  %v2988_v45 = vld [vmem:[%s4131_s0 + $0x768] ss:$16 sps:$4 sm:$0xff]  }
  0xbb   :  { %1890 = vmatpush2.bf16.msra.mxu0 %v2901_v46  ;;  %v2993_v46 = vld [vmem:[%s4131_s0 + $0x54c] ss:$16 sps:$4 sm:$0xff]  }
  0xbc   :  { %1943 = vmatpush2.bf16.msra.mxu1 %v2904_v47  ;;  %1891 = vmatprep.subr.bf16.mxu0 %v2909_v50  ;;  %v2996_v47 = vld [vmem:[%s4131_s0 + $0x74c] ss:$16 sps:$4 sm:$0xff]   ;;  %v2991_v50 = vld [vmem:[%s4131_s0 + $0x548] ss:$16 sps:$4 sm:$0xff]  }
  0xbd   :  { %1944 = vmatprep.subr.bf16.mxu1 %v2912_v52  ;;  %v2994_v52 = vld [vmem:[%s4131_s0 + $0x748] ss:$16 sps:$4 sm:$0xff]  }
  0xbf   :  { %1892 = vmatpush2.bf16.msra.mxu0 %v2907_v56  ;;  %v2999_v56 = vld [vmem:[%s4131_s0 + $0x52c] ss:$16 sps:$4 sm:$0xff]  }
  0xc0   :  { %1945 = vmatpush2.bf16.msra.mxu1 %v2910_v57  ;;  %1967 = vmatprep.subr.bf16.mxu0 %v2915_v58  ;;  %v3002_v57 = vld [vmem:[%s4131_s0 + $0x72c] ss:$16 sps:$4 sm:$0xff]   ;;  %v2997_v58 = vld [vmem:[%s4131_s0 + $0x528] ss:$16 sps:$4 sm:$0xff]  }
  0xc1   :  { %2020 = vmatprep.subr.bf16.mxu1 %v2918_v59  ;;  %v3000_v59 = vld [vmem:[%s4131_s0 + $0x728] ss:$16 sps:$4 sm:$0xff]  }
  0xc2   :  { %1894 = vmatmul.mubr.bf16.vlgmr.msra.gmra.mxu0 %v3259_v8  ;;  %v2930_v8 = vld [vmem:[%s4131_s0 + $0x6ac] ss:$16 sps:$4 sm:$0xff]  }
  0xc3   :  { %1947 = vmatmul.mubr.bf16.vlgmr.msra.gmra.mxu1 %v3261_v9  ;;  %1968 = vmatpush1.bf16.msra.mxu0 %v2913_v60  ;;  %v2925_v9 = vld [vmem:[%s4131_s0 + $0x4a8] ss:$16 sps:$4 sm:$0xff]   ;;  %v3005_v60 = vld [vmem:[%s4131_s0 + $0x50c] ss:$16 sps:$4 sm:$0xff]  }
  0xc4   :  { %2021 = vmatpush1.bf16.msra.mxu1 %v2916_v61  ;;  %1969 = vmatprep.subr.bf16.mxu0 %v2921_v62  ;;  %v3008_v61 = vld [vmem:[%s4131_s0 + $0x70c] ss:$16 sps:$4 sm:$0xff]   ;;  %v3003_v62 = vld [vmem:[%s4131_s0 + $0x508] ss:$16 sps:$4 sm:$0xff]  }
  0xc5   :  { %2022 = vmatprep.subr.bf16.mxu1 %v2924_v63  ;;  %1903 = vmatprep.mubr.bf16.mxu0 %v3334_v33  ;;  %v2936_v33 = vld [vmem:[%s4131_s0 + $0x68c] ss:$16 sps:$4 sm:$0xff]   ;;  %v3006_v63 = vld [vmem:[%s4131_s0 + $0x708] ss:$16 sps:$4 sm:$0xff]  }
  0xc6   :  { %1956 = vmatprep.mubr.bf16.mxu1 %v3336_v34  ;;  %v2931_v34 = vld [vmem:[%s4131_s0 + $0x488] ss:$16 sps:$4 sm:$0xff]  }
  0xc7   :  { %1970 = vmatpush1.bf16.msra.mxu0 %v2919_v0 }
  0xc8   :  { %2023 = vmatpush1.bf16.msra.mxu1 %v2922_v53  ;;  %1971 = vmatprep.subr.bf16.mxu0 %v2927_v55 }
  0xc9   :  { %2024 = vmatprep.subr.bf16.mxu1 %v2930_v8 }
  0xca   :  { %1904 = vmatmul.mubr.bf16.gmra.mxu0 %v3338_v35  ;;  %v2942_v35 = vld [vmem:[%s4131_s0 + $0x66c] ss:$16 sps:$4 sm:$0xff]  }
  0xcb   :  { %1957 = vmatmul.mubr.bf16.gmra.mxu1 %v3343_v37  ;;  %1972 = vmatpush1.bf16.msra.mxu0 %v2925_v9  ;;  %v2937_v37 = vld [vmem:[%s4131_s0 + $0x468] ss:$16 sps:$4 sm:$0xff]  }
  0xcc   :  { %2025 = vmatpush1.bf16.msra.mxu1 %v2928_v1  ;;  %1973 = vmatprep.subr.bf16.mxu0 %v2933_v2 }
  0xcd   :  { %2026 = vmatprep.subr.bf16.mxu1 %v2936_v33  ;;  %1999 = vmatprep.mubr.bf16.mxu0 %v3390_v49  ;;  %v2948_v49 = vld [vmem:[%s4131_s0 + $0x64c] ss:$16 sps:$4 sm:$0xff]  }
  0xce   :  { %2052 = vmatprep.mubr.bf16.mxu1 %v3399_v51  ;;  %v2943_v51 = vld [vmem:[%s4131_s0 + $0x448] ss:$16 sps:$4 sm:$0xff]  }
  0xcf   :  { %1974 = vmatpush1.bf16.msra.mxu0 %v2931_v34 }
  0xd0   :  { %2027 = vmatpush1.bf16.msra.mxu1 %v2934_v3  ;;  %1975 = vmatprep.subr.bf16.mxu0 %v2939_v4 }
  0xd1   :  { %2028 = vmatprep.subr.bf16.mxu1 %v2942_v35 }
  0xd3   :  { %1976 = vmatpush1.bf16.msra.mxu0 %v2937_v37 }
  0xd4   :  { %2029 = vmatpush1.bf16.msra.mxu1 %v2940_v5  ;;  %1977 = vmatprep.subr.bf16.mxu0 %v2945_v6 }
  0xd5   :  { %2030 = vmatprep.subr.bf16.mxu1 %v2948_v49 }
  0xd7   :  { %1978 = vmatpush1.bf16.msra.mxu0 %v2943_v51 }
  0xd8   :  { %2031 = vmatpush1.bf16.msra.mxu1 %v2946_v7  ;;  %1979 = vmatprep.subr.bf16.mxu0 %v2951_v10 }
  0xd9   :  { %2032 = vmatprep.subr.bf16.mxu1 %v2954_v11 }
  0xdb   :  { %1980 = vmatpush1.bf16.msra.mxu0 %v2949_v12 }
  0xdc   :  { %2033 = vmatpush1.bf16.msra.mxu1 %v2952_v13  ;;  %1981 = vmatprep.subr.bf16.mxu0 %v2957_v14 }
  0xdd   :  { %2034 = vmatprep.subr.bf16.mxu1 %v2960_v15 }
  0xdf   :  { %1982 = vmatpush1.bf16.msra.mxu0 %v2955_v16 }
  0xe0   :  { %2035 = vmatpush1.bf16.msra.mxu1 %v2958_v17  ;;  %1983 = vmatprep.subr.bf16.mxu0 %v2963_v18 }
  0xe1   :  { %2036 = vmatprep.subr.bf16.mxu1 %v2966_v19 }
  0xe3   :  { %1984 = vmatpush2.bf16.msra.mxu0 %v2961_v20 }
  0xe4   :  { %2037 = vmatpush2.bf16.msra.mxu1 %v2964_v21  ;;  %1985 = vmatprep.subr.bf16.mxu0 %v2969_v22 }
  0xe5   :  { %2038 = vmatprep.subr.bf16.mxu1 %v2972_v23 }
  0xe7   :  { %1986 = vmatpush2.bf16.msra.mxu0 %v2967_v24 }
  0xe8   :  { %2039 = vmatpush2.bf16.msra.mxu1 %v2970_v25  ;;  %1987 = vmatprep.subr.bf16.mxu0 %v2975_v26 }
  0xe9   :  { %2040 = vmatprep.subr.bf16.mxu1 %v2978_v27 }
  0xeb   :  { %1988 = vmatpush2.bf16.msra.mxu0 %v2973_v28 }
  0xec   :  { %2041 = vmatpush2.bf16.msra.mxu1 %v2976_v29  ;;  %1989 = vmatprep.subr.bf16.mxu0 %v2981_v30 }
  0xed   :  { %2042 = vmatprep.subr.bf16.mxu1 %v2984_v31 }
  0xef   :  { %1990 = vmatpush2.bf16.msra.mxu0 %v2979_v38 }
  0xf0   :  { %2043 = vmatpush2.bf16.msra.mxu1 %v2982_v39  ;;  %1991 = vmatprep.subr.bf16.mxu0 %v2987_v40 }
  0xf1   :  { %2044 = vmatprep.subr.bf16.mxu1 %v2990_v41 }
  0xf3   :  { %1992 = vmatpush2.bf16.msra.mxu0 %v2985_v44 }
  0xf4   :  { %2045 = vmatpush2.bf16.msra.mxu1 %v2988_v45  ;;  %1993 = vmatprep.subr.bf16.mxu0 %v2993_v46 }
  0xf5   :  { %2046 = vmatprep.subr.bf16.mxu1 %v2996_v47 }
  0xf7   :  { %1994 = vmatpush2.bf16.msra.mxu0 %v2991_v50 }
  0xf8   :  { %2047 = vmatpush2.bf16.msra.mxu1 %v2994_v52  ;;  %1995 = vmatprep.subr.bf16.mxu0 %v2999_v56 }
  0xf9   :  { %2048 = vmatprep.subr.bf16.mxu1 %v3002_v57 }
  0xfb   :  { %1996 = vmatpush2.bf16.msra.mxu0 %v2997_v58 }
  0xfc   :  { %2049 = vmatpush2.bf16.msra.mxu1 %v3000_v59  ;;  %1997 = vmatprep.subr.bf16.mxu0 %v3005_v60 }
  0xfd   :  { %2050 = vmatprep.subr.bf16.mxu1 %v3008_v61 }
  0xff   :  { %1998 = vmatpush2.bf16.msra.mxu0 %v3003_v62 }
 0x100   :  { %2051 = vmatpush2.bf16.msra.mxu1 %v3006_v63 }
 0x102   :  { %2000 = vmatmul.mubr.bf16.vlgmr.msra.gmra.mxu0 %v3525_v32  ;;  %v1683_v0 = vpop.f32.mrf.mxu0 }
 0x103   :  { %2053 = vmatmul.mubr.bf16.vlgmr.msra.gmra.mxu1 %v3529_v36  ;;  %2009 = vmatprep.mubr.bf16.mxu0 %v3543_v42  ;;  %v1736_v53 = vpop.f32.mrf.mxu1 }
 0x104   :  { %2062 = vmatprep.mubr.bf16.mxu1 %v3545_v43  ;;  %v1685_v55 = vpop.f32.mrf.mxu0  ;;  %v1737_v39 = vadd.f32 %v1736_v53, %v1683_v0 }
 0x105   :  { %v1738_v8 = vpop.f32.mrf.mxu1 }
 0x106   :  { %v1687_v9 = vpop.f32.mrf.mxu0  ;;  %v1739_v30 = vadd.f32 %v1738_v8, %v1685_v55 }
 0x107   :  { %v1740_v1 = vpop.f32.mrf.mxu1 }
 0x108   :  { %v1689_v2 = vpop.f32.mrf.mxu0  ;;  %v1741_v45 = vadd.f32 %v1740_v1, %v1687_v9 }
 0x109   :  { %v1742_v33 = vpop.f32.mrf.mxu1 }
 0x10a   :  { %2010 = vmatmul.mubr.bf16.gmra.mxu0 %v3563_v48  ;;  %v1693_v34 = vpop.f32.mrf.mxu0  ;;  %v1743_v41 = vadd.f32 %v1742_v33, %v1689_v2 }
 0x10b   :  { %2063 = vmatmul.mubr.bf16.gmra.mxu1 %v3571_v54  ;;  %v1746_v32 = vpop.f32.mrf.mxu1 }
 0x10c   :  { %v1695_v3 = vpop.f32.mrf.mxu0  ;;  %v1747_v55 = vadd.f32 %v1746_v32, %v1693_v34 }
 0x10d   :  { %v1748_v36 = vpop.f32.mrf.mxu1 }
 0x10e   :  { %v3939_v4 = vpop.f32.mrf.mxu0  ;;  %v1749_v57 = vadd.f32 %v1748_v36, %v1695_v3 }
 0x10f   :  { %v3941_v42 = vpop.f32.mrf.mxu1 }
 0x110   :  { %v1699_v43 = vpop.f32.mrf.mxu0 }
 0x111   :  { %v1752_v48 = vpop.f32.mrf.mxu1 }
 0x112   :  { %v1753_v36 = vadd.f32 %v1752_v48, %v1699_v43 }
 0x142   :  { %v1789_v35 = vpop.f32.mrf.mxu0 }
 0x143   :  { %v1842_v54 = vpop.f32.mrf.mxu1  ;;  %v1790_v44 = vadd.f32 %v1789_v35, %v1737_v39 }
 0x144   :  { %v1791_v37 = vpop.f32.mrf.mxu0 }
 0x145   :  { %v1844_v5 = vpop.f32.mrf.mxu1  ;;  %v1792_v40 = vadd.f32 %v1791_v37, %v1739_v30  ;;  %v3953_v61 = vadd.f32 %v1842_v54, %v1790_v44 }
 0x146   :  { %v1793_v6 = vpop.f32.mrf.mxu0 }
 0x147   :  { %v1846_v49 = vpop.f32.mrf.mxu1  ;;  %v3951_v52 = vadd.f32 %v1844_v5, %v1792_v40  ;;  %v1794_v58 = vadd.f32 %v1793_v6, %v1741_v45 }
 0x148   :  { %v1795_v51 = vpop.f32.mrf.mxu0 }
 0x149   :  { %v1848_v7 = vpop.f32.mrf.mxu1  ;;  %v1796_v46 = vadd.f32 %v1795_v51, %v1743_v41  ;;  %v2073_v1 = vadd.f32 %v3951_v52, %v3953_v61  ;;  %v3961_v35 = vadd.f32 %v1846_v49, %v1794_v58 }
 0x14a   :  { %v1799_v10 = vpop.f32.mrf.mxu0 }
 0x14b   :  { %v3943_v11 = vpop.f32.mrf.mxu1  ;;  %v3955_v0 = vadd.f32 %v1848_v7, %v1796_v46  ;;  %v1800_v54 = vadd.f32 %v1799_v10, %v1747_v55  ;;  %v1751_v7 = vadd.f32 %v3941_v42, %v3939_v4 }
 0x14c   :  { %v1801_v12 = vpop.f32.mrf.mxu0 }
 0x14d   :  { %v1854_v13 = vpop.f32.mrf.mxu1  ;;  %v1802_v53 = vadd.f32 %v1801_v12, %v1749_v57  ;;  %v2078_v12 = vadd.f32 %v3955_v0, %v3961_v35 }
 0x14e   :  { %v3945_v14 = vpop.f32.mrf.mxu0 }
 0x14f   :  { %v3947_v15 = vpop.f32.mrf.mxu1 }
 0x150   :  { %v1805_v16 = vpop.f32.mrf.mxu0 }
 0x151   :  { %v3949_v17 = vpop.f32.mrf.mxu1 }
 0x182   :  { %v1895_v18 = vpop.f32.mrf.mxu0 }
 0x183   :  { %v1948_v19 = vpop.f32.mrf.mxu1 }
 0x184   :  { %v1897_v20 = vpop.f32.mrf.mxu0  ;;  %v1949_v56 = vadd.f32 %v1948_v19, %v1895_v18  ;;  %v3968_v18 = vadd.f32 %v1854_v13, %v1802_v53  ;;  %v1806_v19 = vadd.f32 %v1805_v16, %v1753_v36 }
 0x185   :  { %v1950_v21 = vpop.f32.mrf.mxu1 }
 0x186   :  { %v1899_v22 = vpop.f32.mrf.mxu0  ;;  %v1951_v62 = vadd.f32 %v1950_v21, %v1897_v20  ;;  %v3974_v16 = vadd.f32 %v3949_v17, %v1806_v19 }
 0x187   :  { %v1952_v23 = vpop.f32.mrf.mxu1 }
 0x188   :  { %v1901_v24 = vpop.f32.mrf.mxu0  ;;  %v1953_v2 = vadd.f32 %v1952_v23, %v1899_v22  ;;  %v1853_v22 = vadd.f32 %v3943_v11, %v1800_v54  ;;  %v1804_v23 = vadd.f32 %v3945_v14, %v1751_v7 }
 0x189   :  { %v1954_v25 = vpop.f32.mrf.mxu1 }
 0x18a   :  { %v1905_v26 = vpop.f32.mrf.mxu0  ;;  %v1955_v6 = vadd.f32 %v1954_v25, %v1901_v24  ;;  %v2083_v13 = vadd.f32 %v3968_v18, %v1853_v22  ;;  %v3977_v14 = vadd.f32 %v3947_v15, %v1804_v23 }
 0x18b   :  { %v1958_v27 = vpop.f32.mrf.mxu1 }
 0x18c   :  { %v1907_v28 = vpop.f32.mrf.mxu0  ;;  %v1959_v49 = vadd.f32 %v1958_v27, %v1905_v26  ;;  %v2088_v17 = vadd.f32 %v3974_v16, %v3977_v14 }
 0x18d   :  { %v1960_v29 = vpop.f32.mrf.mxu1 }
 0x18e   :  { %v1909_v31 = vpop.f32.mrf.mxu0  ;;  %v1961_v30 = vadd.f32 %v1960_v29, %v1907_v28 }
 0x18f   :  { %v1962_v38 = vpop.f32.mrf.mxu1 }
 0x190   :  { %v1911_v47 = vpop.f32.mrf.mxu0  ;;  %v1963_v40 = vadd.f32 %v1962_v38, %v1909_v31 }
 0x191   :  { %v1964_v50 = vpop.f32.mrf.mxu1 }
 0x192   :  { %v1965_v29 = vadd.f32 %v1964_v50, %v1911_v47  ;;  %v3017_v50 = vmov 0  }
 0x193   :  { %2624 = vset.pattern.permute.xlu1 %v3017_v50  ;;  %2623 = vset.pattern.permute.xlu0 %v3017_v50 }
 0x1c2   :  { %v2001_v59 = vpop.f32.mrf.mxu0 }
 0x1c3   :  { %v2054_v60 = vpop.f32.mrf.mxu1  ;;  %v2002_v63 = vadd.f32 %v2001_v59, %v1949_v56 }
 0x1c4   :  { %v2003_v8 = vpop.f32.mrf.mxu0 }
 0x1c5   :  { %v2056_v9 = vpop.f32.mrf.mxu1  ;;  %v3959_v33 = vadd.f32 %v2054_v60, %v2002_v63  ;;  %v2004_v3 = vadd.f32 %v2003_v8, %v1951_v62 }
 0x1c6   :  { %v2005_v37 = vpop.f32.mrf.mxu0 }
 0x1c7   :  { %v2058_v5 = vpop.f32.mrf.mxu1  ;;  %v2057_v34 = vadd.f32 %v2056_v9, %v2004_v3  ;;  %v2006_v32 = vadd.f32 %v2005_v37, %v1953_v2  ;;  %v2074_v51 = vadd.f32 %v2073_v1, %v3959_v33 }
 0x1c8   :  { %v2007_v43 = vpop.f32.mrf.mxu0 }
 0x1c9   :  { %v2060_v48 = vpop.f32.mrf.mxu1  ;;  %v2059_v10 = vadd.f32 %v2058_v5, %v2006_v32  ;;  %v2008_v20 = vadd.f32 %v2007_v43, %v1955_v6  ;;  %v2075_v21 = vadd.f32 %v2074_v51, %v2057_v34 }
 0x1ca   :  { %v2011_v24 = vpop.f32.mrf.mxu0 }
 0x1cb   :  { %v2064_v25 = vpop.f32.mrf.mxu1  ;;  %v2079_v4 = vadd.f32 %v2078_v12, %v2059_v10  ;;  %v2061_v42 = vadd.f32 %v2060_v48, %v2008_v20  ;;  %v2012_v39 = vadd.f32 %v2011_v24, %v1959_v49  ;;  %2076 = vadd.xlane.f32.xlu0 %v2075_v21 }
 0x1cc   :  { %v2013_v26 = vpop.f32.mrf.mxu0 }
 0x1cd   :  { %v2066_v27 = vpop.f32.mrf.mxu1  ;;  %v2014_v41 = vadd.f32 %v2013_v26, %v1961_v30  ;;  %v2065_v44 = vadd.f32 %v2064_v25, %v2012_v39  ;;  %v2080_v11 = vadd.f32 %v2079_v4, %v2061_v42  ;;  %v2180_v26 = vld [vmem:[%s4133_s2 + $0x10] sm:$0xff] }
 0x1ce   :  { %v2015_v45 = vpop.f32.mrf.mxu0 }
 0x1cf   :  { %v2068_v28 = vpop.f32.mrf.mxu1  ;;  %v2016_v46 = vadd.f32 %v2015_v45, %v1963_v40  ;;  %v2067_v56 = vadd.f32 %v2066_v27, %v2014_v41  ;;  %2081 = vadd.xlane.f32.xlu0 %v2080_v11  ;;  %v2084_v57 = vadd.f32 %v2083_v13, %v2065_v44  ;;  %v2179_v13 = vld [vmem:[%s4133_s2 + $0x8] sm:$0xff]  ;;  %v2181_v27 = vld [vmem:[%s4133_s2 + $0x18] sm:$0xff]  ;;  %v2178_v40 = vld [vmem:[%s4133_s2] sm:$0xff] }
 0x1d0   :  { %v2017_v58 = vpop.f32.mrf.mxu0  ;;  %v2218_v41 = vld [vmem:[%s4134_s3] sm:$0xff]  ;;  %v2220_v11 = vld [vmem:[%s4134_s3 + $0x10] sm:$0xff] }
 0x1d1   :  { %v2070_v59 = vpop.f32.mrf.mxu1  ;;  %v2018_v60 = vadd.f32 %v2017_v58, %v1965_v29  ;;  %v3981_v31 = vadd.f32 %v2068_v28, %v2016_v46  ;;  %v2085_v38 = vadd.f32 %v2084_v57, %v2067_v56 }
 0x1d3   :  { %v2089_v62 = vadd.f32 %v2088_v17, %v3981_v31  ;;  %v3984_v15 = vadd.f32 %v2070_v59, %v2018_v60  ;;  %2086 = vadd.xlane.f32.xlu1 %v2085_v38 }
 0x1d5   :  { %v2090_v47 = vadd.f32 %v2089_v62, %v3984_v15  ;;  %v2221_v62 = vld [vmem:[%s4134_s3 + $0x18] sm:$0xff] }
 0x1d7   :  { %2091 = vadd.xlane.f32.xlu1 %v2090_v47 }
 0x254   :  { %v2077_v63 = vpop.xlane.xlu0 %2076 }
 0x255   :  { %v2094_v55 = vmul.f32 0.001953125, %v2077_v63 }
 0x257   :  { %v3988_v53 = vsub.f32 %v3953_v61, %v2094_v55  ;;  %v3991_v8 = vsub.f32 %v3951_v52, %v2094_v55  ;;  %v3994_v9 = vsub.f32 %v3959_v33, %v2094_v55  ;;  %v3996_v2 = vsub.f32 %v2057_v34, %v2094_v55 }
 0x258   :  { %v2082_v1 = vpop.xlane.xlu0 %2081 }
 0x259   :  { %v2095_v3 = vmul.f32 0.001953125, %v2082_v1  ;;  %v2114_v36 = vmul.f32 %v3988_v53, %v3988_v53  ;;  %v2115_v54 = vmul.f32 %v3991_v8, %v3991_v8  ;;  %v2116_v61 = vmul.f32 %v3994_v9, %v3994_v9 }
 0x25a   :  { %v2117_v34 = vmul.f32 %v3996_v2, %v3996_v2 }
 0x25b   :  { %v4005_v37 = vsub.f32 %v3961_v35, %v2095_v3  ;;  %v4008_v52 = vsub.f32 %v3955_v0, %v2095_v3  ;;  %v2130_v33 = vadd.f32 %v2115_v54, %v2114_v36  ;;  %v4010_v5 = vsub.f32 %v2059_v10, %v2095_v3 }
 0x25c   :  { %v2087_v6 = vpop.xlane.xlu1 %2086  ;;  %v4014_v32 = vsub.f32 %v2061_v42, %v2095_v3 }
 0x25d   :  { %v2096_v51 = vmul.f32 0.001953125, %v2087_v6  ;;  %v2131_v7 = vadd.f32 %v2130_v33, %v2116_v61  ;;  %v2118_v12 = vmul.f32 %v4005_v37, %v4005_v37  ;;  %v2119_v35 = vmul.f32 %v4008_v52, %v4008_v52 }
 0x25e   :  { %v2120_v0 = vmul.f32 %v4010_v5, %v4010_v5  ;;  %v2121_v10 = vmul.f32 %v4014_v32, %v4014_v32 }
 0x25f   :  { %v4022_v19 = vsub.f32 %v1853_v22, %v2096_v51  ;;  %v4025_v43 = vsub.f32 %v3968_v18, %v2096_v51  ;;  %v2132_v48 = vadd.f32 %v2131_v7, %v2117_v34  ;;  %v2135_v49 = vadd.f32 %v2119_v35, %v2118_v12 }
 0x260   :  { %v4029_v20 = vsub.f32 %v2065_v44, %v2096_v51  ;;  %v4031_v23 = vsub.f32 %v2067_v56, %v2096_v51  ;;  %v2219_v44 = vld [vmem:[%s4134_s3 + $0x8] sm:$0xff]  ;;  %v2092_v45 = vpop.xlane.xlu1 %2091 }
 0x261   :  { %2133 = vadd.xlane.f32.xlu0 %v2132_v48  ;;  %v2136_v21 = vadd.f32 %v2135_v49, %v2120_v0  ;;  %v2122_v24 = vmul.f32 %v4022_v19, %v4022_v19  ;;  %v2123_v22 = vmul.f32 %v4025_v43, %v4025_v43  ;;  %v2097_v28 = vmul.f32 0.001953125, %v2092_v45 }
 0x262   :  { %v2124_v18 = vmul.f32 %v4029_v20, %v4029_v20  ;;  %v2125_v4 = vmul.f32 %v4031_v23, %v4031_v23 }
 0x263   :  { %v2137_v25 = vadd.f32 %v2136_v21, %v2121_v10  ;;  %v2140_v30 = vadd.f32 %v2123_v22, %v2122_v24  ;;  %v4063_v29 = vsub.f32 %v3977_v14, %v2097_v28  ;;  %v4066_v46 = vsub.f32 %v3974_v16, %v2097_v28 }
 0x264   :  { %v4073_v58 = vsub.f32 %v3981_v31, %v2097_v28  ;;  %v4076_v17 = vsub.f32 %v3984_v15, %v2097_v28 }
 0x265   :  { %2138 = vadd.xlane.f32.xlu1 %v2137_v25  ;;  %v2141_v42 = vadd.f32 %v2140_v30, %v2124_v18  ;;  %v2126_v56 = vmul.f32 %v4063_v29, %v4063_v29  ;;  %v2127_v57 = vmul.f32 %v4066_v46, %v4066_v46 }
 0x266   :  { %v2128_v14 = vmul.f32 %v4073_v58, %v4073_v58  ;;  %v2129_v16 = vmul.f32 %v4076_v17, %v4076_v17 }
 0x267   :  { %v2142_v39 = vadd.f32 %v2141_v42, %v2125_v4  ;;  %v2145_v59 = vadd.f32 %v2127_v57, %v2126_v56 }
 0x269   :  { %2143 = vadd.xlane.f32.xlu0 %v2142_v39  ;;  %v2146_v60 = vadd.f32 %v2145_v59, %v2128_v14 }
 0x26b   :  { %v2147_v38 = vadd.f32 %v2146_v60, %v2129_v16 }
 0x276   :  { %2189 = vperm.xlu1 %2624, %v2179_v13  }
 0x27a   :  { %2194 = vperm.xlu1 %2624, %v2180_v26  }
 0x27e   :  { %2199 = vperm.xlu1 %2624, %v2181_v27  }
 0x27f   :  { %2184 = vperm.xlu0 %2623, %v2178_v40  }
 0x282   :  { %2224 = vperm.xlu1 %2624, %v2218_v41  }
 0x286   :  { %2229 = vperm.xlu1 %2624, %v2219_v44  }
 0x28a   :  { %2234 = vperm.xlu1 %2624, %v2220_v11  }
 0x2ae   :  { %2148 = vadd.xlane.f32.xlu1 %v2147_v38 }
 0x2bf   :  { %2239 = vperm.xlu1 %2624, %v2221_v62  }
 0x2ea   :  { %v2134_v31 = vpop.xlane.xlu0 %2133 }
 0x2eb   :  { %v2150_v47 = vmul.f32 0.001953125, %v2134_v31 }
 0x2ed   :  { %v2154_v50 = vadd.f32 1e-05, %v2150_v47 }
 0x2ee   :  { %v2139_v63 = vpop.xlane.xlu1 %2138 }
 0x2ef   :  { %3009 = vrsqrt.f32 %v2154_v50  ;;  %v2151_v15 = vmul.f32 0.001953125, %v2139_v63 }
 0x2f1   :  { %v2155_v55 = vadd.f32 1e-05, %v2151_v15 }
 0x2f2   :  { %v2144_v1 = vpop.xlane.xlu0 %2143  ;;  %v2190_v3 = vpop.permute.xlu1 %2189 }
 0x2f3   :  { %3011 = vrsqrt.f32 %v2155_v55  ;;  %v2152_v36 = vmul.f32 0.001953125, %v2144_v1 }
 0x2f5   :  { %v2156_v54 = vadd.f32 1e-05, %v2152_v36 }
 0x2f6   :  { %v2195_v61 = vpop.permute.xlu1 %2194 }
 0x2f7   :  { %3013 = vrsqrt.f32 %v2156_v54 }
 0x2fa   :  { %v4085_v33 = vpop.permute.xlu1 %2199  ;;  %v2185_v34 = vpop.permute.xlu0 %2184 }
 0x2fc   :  { %v3010_v6 = vpop.eup %3009 }
 0x2fd   :  { %v2162_v51 = vmul.f32 %v3010_v6, %v3988_v53  ;;  %v2163_v7 = vmul.f32 %v3010_v6, %v3991_v8  ;;  %v2164_v12 = vmul.f32 %v3010_v6, %v3994_v9  ;;  %v2165_v35 = vmul.f32 %v3010_v6, %v3996_v2 }
 0x2fe   :  { %v2225_v0 = vpop.permute.xlu1 %2224 }
 0x2ff   :  { %v2202_v48 = vmul.f32 %v2185_v34, %v2162_v51  ;;  %v2203_v49 = vmul.f32 %v2185_v34, %v2163_v7  ;;  %v2204_v10 = vmul.f32 %v2185_v34, %v2164_v12  ;;  %v2205_v21 = vmul.f32 %v2185_v34, %v2165_v35 }
 0x300   :  { %v3012_v24 = vpop.eup %3011 }
 0x301   :  { %v2166_v22 = vmul.f32 %v3012_v24, %v4005_v37  ;;  %v2167_v25 = vmul.f32 %v3012_v24, %v4008_v52  ;;  %v2168_v18 = vmul.f32 %v3012_v24, %v4010_v5  ;;  %v2169_v53 = vmul.f32 %v3012_v24, %v4014_v32 }
 0x302   :  { %v2242_v30 = vadd.f32 %v2225_v0, %v2202_v48  ;;  %v2243_v8 = vadd.f32 %v2225_v0, %v2203_v49  ;;  %v2244_v4 = vadd.f32 %v2225_v0, %v2204_v10  ;;  %v2245_v9 = vadd.f32 %v2225_v0, %v2205_v21  ;;  %v2230_v42 = vpop.permute.xlu1 %2229 }
 0x303   :  { %v2206_v2 = vmul.f32 %v2190_v3, %v2166_v22  ;;  %v2207_v39 = vmul.f32 %v2190_v3, %v2167_v25  ;;  %v2208_v13 = vmul.f32 %v2190_v3, %v2168_v18  ;;  %v2209_v26 = vmul.f32 %v2190_v3, %v2169_v53 }
 0x304   :  { %v3014_v27 = vpop.eup %3013  ;;  %v2258_v40 = vmax.f32 %v2242_v30, 0.0  ;;  %v2259_v41 = vmax.f32 %v2243_v8, 0.0  ;;  %v2260_v44 = vmax.f32 %v2244_v4, 0.0  ;;  %v2261_v37 = vmax.f32 %v2245_v9, 0.0 }
 0x305   :  { %v2170_v52 = vmul.f32 %v3014_v27, %v4022_v19  ;;  %v2171_v5 = vmul.f32 %v3014_v27, %v4025_v43  ;;  %v2172_v32 = vmul.f32 %v3014_v27, %v4029_v20  ;;  %v2173_v11 = vmul.f32 %v3014_v27, %v4031_v23 }
 0x306   :  { %v2614_v45 = vpack.c.bf16 %v2259_v41, %v2258_v40  ;;  %v2615_v28 = vpack.c.bf16 %v2261_v37, %v2260_v44  ;;  %v2246_v56 = vadd.f32 %v2230_v42, %v2206_v2  ;;  %v2247_v57 = vadd.f32 %v2230_v42, %v2207_v39  ;;  %v2235_v38 = vpop.permute.xlu1 %2234 }
 0x307   :  { %v2210_v59 = vmul.f32 %v2195_v61, %v2170_v52  ;;  %v2211_v14 = vmul.f32 %v2195_v61, %v2171_v5  ;;  %v2212_v60 = vmul.f32 %v2195_v61, %v2172_v32  ;;  %v2213_v16 = vmul.f32 %v2195_v61, %v2173_v11 }
 0x308   :  { %2322 = vst [vmem:[%s4135_s4] sm:$0xff] %v2614_v45  ;;  %2323 = vst [vmem:[%s4135_s4 + $0x8] sm:$0xff] %v2615_v28  ;;  %v2248_v19 = vadd.f32 %v2230_v42, %v2208_v13  ;;  %v2249_v43 = vadd.f32 %v2230_v42, %v2209_v26  ;;  %v2262_v20 = vmax.f32 %v2246_v56, 0.0  ;;  %v2263_v23 = vmax.f32 %v2247_v57, 0.0 }
 0x309   :  { %v2250_v62 = vadd.f32 %v2235_v38, %v2210_v59  ;;  %v2251_v31 = vadd.f32 %v2235_v38, %v2211_v14  ;;  %v2252_v47 = vadd.f32 %v2235_v38, %v2212_v60  ;;  %v2253_v50 = vadd.f32 %v2235_v38, %v2213_v16 }
 0x30a   :  { %v2264_v63 = vmax.f32 %v2248_v19, 0.0  ;;  %v2265_v15 = vmax.f32 %v2249_v43, 0.0  ;;  %v2616_v55 = vpack.c.bf16 %v2263_v23, %v2262_v20 }
 0x30b   :  { %v2266_v1 = vmax.f32 %v2250_v62, 0.0  ;;  %v2267_v3 = vmax.f32 %v2251_v31, 0.0  ;;  %v2268_v36 = vmax.f32 %v2252_v47, 0.0  ;;  %v2269_v54 = vmax.f32 %v2253_v50, 0.0 }
 0x30c   :  { %v2617_v61 = vpack.c.bf16 %v2265_v15, %v2264_v63  ;;  %2324 = vst [vmem:[%s4135_s4 + $0x10] sm:$0xff] %v2616_v55 }
 0x30d   :  { %v2618_v6 = vpack.c.bf16 %v2267_v3, %v2266_v1  ;;  %v2619_v34 = vpack.c.bf16 %v2269_v54, %v2268_v36 }
 0x30e   :  { %2325 = vst [vmem:[%s4135_s4 + $0x18] sm:$0xff] %v2617_v61 }
 0x30f   :  { %2326 = vst [vmem:[%s4135_s4 + $0x20] sm:$0xff] %v2618_v6  ;;  %2327 = vst [vmem:[%s4135_s4 + $0x28] sm:$0xff] %v2619_v34 }
 0x337   :  { %v2149_v51 = vpop.xlane.xlu1 %2148 }
 0x338   :  { %v2153_v7 = vmul.f32 0.001953125, %v2149_v51 }
 0x33a   :  { %v2157_v12 = vadd.f32 1e-05, %v2153_v7 }
 0x33b   :  { %v2240_v18 = vpop.permute.xlu1 %2239 }
 0x33c   :  { %3015 = vrsqrt.f32 %v2157_v12 }
 0x349   :  { %v3016_v35 = vpop.eup %3015 }
 0x34a   :  { %v2174_v0 = vmul.f32 %v3016_v35, %v4063_v29  ;;  %v2175_v48 = vmul.f32 %v3016_v35, %v4066_v46  ;;  %v2176_v49 = vmul.f32 %v3016_v35, %v4073_v58  ;;  %v2177_v10 = vmul.f32 %v3016_v35, %v4076_v17 }
 0x34c   :  { %v2214_v21 = vmul.f32 %v4085_v33, %v2174_v0  ;;  %v2215_v24 = vmul.f32 %v4085_v33, %v2175_v48  ;;  %v2216_v22 = vmul.f32 %v4085_v33, %v2176_v49  ;;  %v2217_v25 = vmul.f32 %v4085_v33, %v2177_v10 }
 0x34e   :  { %v2254_v53 = vadd.f32 %v2240_v18, %v2214_v21  ;;  %v2255_v30 = vadd.f32 %v2240_v18, %v2215_v24  ;;  %v2256_v8 = vadd.f32 %v2240_v18, %v2216_v22  ;;  %v2257_v4 = vadd.f32 %v2240_v18, %v2217_v25 }
 0x350   :  { %v2270_v29 = vmax.f32 %v2254_v53, 0.0  ;;  %v2271_v9 = vmax.f32 %v2255_v30, 0.0  ;;  %v2272_v46 = vmax.f32 %v2256_v8, 0.0  ;;  %v2273_v42 = vmax.f32 %v2257_v4, 0.0 }
 0x352   :  { %v2620_v58 = vpack.c.bf16 %v2271_v9, %v2270_v29  ;;  %v2621_v2 = vpack.c.bf16 %v2273_v42, %v2272_v46 }
 0x354   :  { %2328 = vst [vmem:[%s4135_s4 + $0x30] sm:$0xff] %v2620_v58  ;;  %2329 = vst [vmem:[%s4135_s4 + $0x38] sm:$0xff] %v2621_v2 }

// kernel: generator_forward.8
= control target key start
LH: loop header
LB: loop body
LE: loop exit
PB: predicated region body
PF: predicated region fallthrough
CT: control target
= control target key end

     0   :  { %s6896_s0 = inlined_call_operand.vmem [shape: bf16[512,2048], index: 0, kind: input, shape index: {}]   ;;  %s6897_s1 = inlined_call_operand.vmem [shape: bf16[16,512], index: 1, kind: input, shape index: {}]   ;;  %s6898_s2 = inlined_call_operand.vmem [shape: f32[16,1], index: 2, kind: input, shape index: {}]   ;;  %s6899_s3 = inlined_call_operand.vmem [shape: f32[16,1], index: 3, kind: input, shape index: {}]   ;;  %s6900_s4 = inlined_call_operand.vmem [shape: bf16[16,2048], index: 4, kind: output, shape index: {}]  }
   0x1   :  { %v133_v0 = vld [vmem:[%s6896_s0 + $0x380] sm:$0xff]  ;;  %v4909_v59 = vld [vmem:[%s6897_s1 + $0xc] ss:$16 sps:$4 sm:$0xff]  }
   0x2   :  { %v141_v1 = vld [vmem:[%s6896_s0 + $0x3c0] sm:$0xff]  ;;  %3188 = vmatprep.mubr.bf16.mxu1 %v4909_v59 }
   0x3   :  { %v389_v2 = vld [vmem:[%s6896_s0 + $0xb80] sm:$0xff]  ;;  %v4327_v3 = vcombine.high %v133_v0, %v141_v1  ;;  %v4326_v5 = vcombine.low %v133_v0, %v141_v1 }
   0x4   :  { %v397_v4 = vld [vmem:[%s6896_s0 + $0xbc0] sm:$0xff] }
   0x5   :  { %v117_v6 = vld [vmem:[%s6896_s0 + $0x300] sm:$0xff]  ;;  %v4583_v8 = vcombine.high %v389_v2, %v397_v4  ;;  %v4582_v9 = vcombine.low %v389_v2, %v397_v4  ;;  %3113 = vmatprep.subr.bf16.mxu0 %v4327_v3 }
   0x6   :  { %v125_v7 = vld [vmem:[%s6896_s0 + $0x340] sm:$0xff]  ;;  %3114 = vmatpush1.bf16.msra.mxu0 %v4326_v5 }
   0x7   :  { %v4311_v10 = vcombine.high %v117_v6, %v125_v7  ;;  %v373_v11 = vld [vmem:[%s6896_s0 + $0xb00] sm:$0xff]  ;;  %3156 = vmatprep.subr.bf16.mxu1 %v4583_v8  ;;  %v4310_v18 = vcombine.low %v117_v6, %v125_v7 }
   0x8   :  { %v381_v12 = vld [vmem:[%s6896_s0 + $0xb40] sm:$0xff]  ;;  %3157 = vmatpush1.bf16.msra.mxu1 %v4582_v9 }
   0x9   :  { %v101_v13 = vld [vmem:[%s6896_s0 + $0x280] sm:$0xff]  ;;  %v4567_v14 = vcombine.high %v373_v11, %v381_v12  ;;  %3115 = vmatprep.subr.bf16.mxu0 %v4311_v10  ;;  %v4566_v19 = vcombine.low %v373_v11, %v381_v12 }
   0xa   :  { %v109_v15 = vld [vmem:[%s6896_s0 + $0x2c0] sm:$0xff]  ;;  %3116 = vmatpush1.bf16.msra.mxu0 %v4310_v18 }
   0xb   :  { %v357_v16 = vld [vmem:[%s6896_s0 + $0xa80] sm:$0xff]  ;;  %v4295_v20 = vcombine.high %v101_v13, %v109_v15  ;;  %3158 = vmatprep.subr.bf16.mxu1 %v4567_v14  ;;  %v4294_v26 = vcombine.low %v101_v13, %v109_v15 }
   0xc   :  { %v365_v17 = vld [vmem:[%s6896_s0 + $0xac0] sm:$0xff]  ;;  %3159 = vmatpush1.bf16.msra.mxu1 %v4566_v19 }
   0xd   :  { %v4551_v21 = vcombine.high %v357_v16, %v365_v17  ;;  %v85_v22 = vld [vmem:[%s6896_s0 + $0x200] sm:$0xff]  ;;  %3117 = vmatprep.subr.bf16.mxu0 %v4295_v20  ;;  %v4550_v27 = vcombine.low %v357_v16, %v365_v17 }
   0xe   :  { %v93_v23 = vld [vmem:[%s6896_s0 + $0x240] sm:$0xff]  ;;  %3118 = vmatpush1.bf16.msra.mxu0 %v4294_v26 }
   0xf   :  { %v341_v24 = vld [vmem:[%s6896_s0 + $0xa00] sm:$0xff]  ;;  %v4279_v28 = vcombine.high %v85_v22, %v93_v23  ;;  %3160 = vmatprep.subr.bf16.mxu1 %v4551_v21  ;;  %v4278_v34 = vcombine.low %v85_v22, %v93_v23 }
  0x10   :  { %v349_v25 = vld [vmem:[%s6896_s0 + $0xa40] sm:$0xff]  ;;  %3161 = vmatpush1.bf16.msra.mxu1 %v4550_v27 }
  0x11   :  { %v4535_v29 = vcombine.high %v341_v24, %v349_v25  ;;  %v69_v30 = vld [vmem:[%s6896_s0 + $0x180] sm:$0xff]  ;;  %3119 = vmatprep.subr.bf16.mxu0 %v4279_v28  ;;  %v4534_v35 = vcombine.low %v341_v24, %v349_v25 }
  0x12   :  { %v77_v31 = vld [vmem:[%s6896_s0 + $0x1c0] sm:$0xff]  ;;  %3120 = vmatpush1.bf16.msra.mxu0 %v4278_v34 }
  0x13   :  { %v325_v32 = vld [vmem:[%s6896_s0 + $0x980] sm:$0xff]  ;;  %v4263_v36 = vcombine.high %v69_v30, %v77_v31  ;;  %3162 = vmatprep.subr.bf16.mxu1 %v4535_v29  ;;  %v4262_v42 = vcombine.low %v69_v30, %v77_v31 }
  0x14   :  { %v333_v33 = vld [vmem:[%s6896_s0 + $0x9c0] sm:$0xff]  ;;  %3163 = vmatpush1.bf16.msra.mxu1 %v4534_v35 }
  0x15   :  { %v4519_v37 = vcombine.high %v325_v32, %v333_v33  ;;  %v53_v38 = vld [vmem:[%s6896_s0 + $0x100] sm:$0xff]  ;;  %3121 = vmatprep.subr.bf16.mxu0 %v4263_v36  ;;  %v4518_v43 = vcombine.low %v325_v32, %v333_v33 }
  0x16   :  { %v61_v39 = vld [vmem:[%s6896_s0 + $0x140] sm:$0xff]  ;;  %3122 = vmatpush1.bf16.msra.mxu0 %v4262_v42 }
  0x17   :  { %v309_v40 = vld [vmem:[%s6896_s0 + $0x900] sm:$0xff]  ;;  %v4247_v44 = vcombine.high %v53_v38, %v61_v39  ;;  %3164 = vmatprep.subr.bf16.mxu1 %v4519_v37  ;;  %v4246_v50 = vcombine.low %v53_v38, %v61_v39 }
  0x18   :  { %v317_v41 = vld [vmem:[%s6896_s0 + $0x940] sm:$0xff]  ;;  %3165 = vmatpush1.bf16.msra.mxu1 %v4518_v43 }
  0x19   :  { %v4503_v45 = vcombine.high %v309_v40, %v317_v41  ;;  %v37_v46 = vld [vmem:[%s6896_s0 + $0x80] sm:$0xff]  ;;  %3123 = vmatprep.subr.bf16.mxu0 %v4247_v44  ;;  %v4502_v52 = vcombine.low %v309_v40, %v317_v41 }
  0x1a   :  { %v45_v47 = vld [vmem:[%s6896_s0 + $0xc0] sm:$0xff]  ;;  %3124 = vmatpush1.bf16.msra.mxu0 %v4246_v50 }
  0x1b   :  { %v293_v48 = vld [vmem:[%s6896_s0 + $0x880] sm:$0xff]  ;;  %v4231_v53 = vcombine.high %v37_v46, %v45_v47  ;;  %3166 = vmatprep.subr.bf16.mxu1 %v4503_v45  ;;  %v4230_v60 = vcombine.low %v37_v46, %v45_v47 }
  0x1c   :  { %v301_v49 = vld [vmem:[%s6896_s0 + $0x8c0] sm:$0xff]  ;;  %3167 = vmatpush1.bf16.msra.mxu1 %v4502_v52 }
  0x1d   :  { %v21_v51 = vld [vmem:[%s6896_s0] sm:$0xff]  ;;  %v4487_v55 = vcombine.high %v293_v48, %v301_v49  ;;  %3125 = vmatprep.subr.bf16.mxu0 %v4231_v53  ;;  %v4486_v61 = vcombine.low %v293_v48, %v301_v49 }
  0x1e   :  { %v29_v54 = vld [vmem:[%s6896_s0 + $0x40] sm:$0xff]  ;;  %3126 = vmatpush1.bf16.msra.mxu0 %v4230_v60 }
  0x1f   :  { %v4898_v56 = vld [vmem:[%s6897_s1 + $0x4] ss:$16 sps:$4 sm:$0xff]   ;;  %v4215_v62 = vcombine.high %v21_v51, %v29_v54  ;;  %3168 = vmatprep.subr.bf16.mxu1 %v4487_v55  ;;  %v4214_v4 = vcombine.low %v21_v51, %v29_v54 }
  0x20   :  { %v277_v57 = vld [vmem:[%s6896_s0 + $0x800] sm:$0xff]  ;;  %3145 = vmatprep.mubr.bf16.mxu0 %v4898_v56  ;;  %3169 = vmatpush1.bf16.msra.mxu1 %v4486_v61 }
  0x21   :  { %v285_v58 = vld [vmem:[%s6896_s0 + $0x840] sm:$0xff]  ;;  %3127 = vmatprep.subr.bf16.mxu0 %v4215_v62 }
  0x22   :  { %v4471_v63 = vcombine.high %v277_v57, %v285_v58  ;;  %v261_v0 = vld [vmem:[%s6896_s0 + $0x780] sm:$0xff]  ;;  %v4470_v5 = vcombine.low %v277_v57, %v285_v58  ;;  %3128 = vmatpush1.bf16.msra.mxu0 %v4214_v4  ;;  %v390_v4 = vld [vmem:[%s6896_s0 + $0xb88] sm:$0xff] }
  0x23   :  { %v269_v1 = vld [vmem:[%s6896_s0 + $0x7c0] sm:$0xff] }
  0x24   :  { %v517_v2 = vld [vmem:[%s6896_s0 + $0xf80] sm:$0xff]  ;;  %v4455_v6 = vcombine.high %v261_v0, %v269_v1  ;;  %3170 = vmatprep.subr.bf16.mxu1 %v4471_v63  ;;  %v4454_v12 = vcombine.low %v261_v0, %v269_v1 }
  0x25   :  { %v525_v3 = vld [vmem:[%s6896_s0 + $0xfc0] sm:$0xff]  ;;  %3171 = vmatpush1.bf16.msra.mxu1 %v4470_v5  ;;  %v398_v5 = vld [vmem:[%s6896_s0 + $0xbc8] sm:$0xff] }
  0x26   :  { %v4711_v7 = vcombine.high %v517_v2, %v525_v3  ;;  %v245_v8 = vld [vmem:[%s6896_s0 + $0x700] sm:$0xff]  ;;  %3129 = vmatprep.subr.bf16.mxu0 %v4455_v6  ;;  %v4710_v13 = vcombine.low %v517_v2, %v525_v3  ;;  %v134_v2 = vld [vmem:[%s6896_s0 + $0x388] sm:$0xff] }
  0x27   :  { %v253_v9 = vld [vmem:[%s6896_s0 + $0x740] sm:$0xff]  ;;  %3130 = vmatpush2.bf16.msra.mxu0 %v4454_v12  ;;  %v142_v3 = vld [vmem:[%s6896_s0 + $0x3c8] sm:$0xff] }
  0x28   :  { %v501_v10 = vld [vmem:[%s6896_s0 + $0xf00] sm:$0xff]  ;;  %v4439_v14 = vcombine.high %v245_v8, %v253_v9  ;;  %3172 = vmatprep.subr.bf16.mxu1 %v4711_v7  ;;  %v4438_v20 = vcombine.low %v245_v8, %v253_v9  ;;  %v4329_v8 = vcombine.high %v134_v2, %v142_v3  ;;  %v4585_v9 = vcombine.high %v390_v4, %v398_v5 }
  0x29   :  { %v509_v11 = vld [vmem:[%s6896_s0 + $0xf40] sm:$0xff]  ;;  %3173 = vmatpush2.bf16.msra.mxu1 %v4710_v13  ;;  %v374_v13 = vld [vmem:[%s6896_s0 + $0xb08] sm:$0xff] }
  0x2a   :  { %v4695_v15 = vcombine.high %v501_v10, %v509_v11  ;;  %v229_v16 = vld [vmem:[%s6896_s0 + $0x680] sm:$0xff]  ;;  %3131 = vmatprep.subr.bf16.mxu0 %v4439_v14  ;;  %v4694_v21 = vcombine.low %v501_v10, %v509_v11  ;;  %v118_v10 = vld [vmem:[%s6896_s0 + $0x308] sm:$0xff] }
  0x2b   :  { %v237_v17 = vld [vmem:[%s6896_s0 + $0x6c0] sm:$0xff]  ;;  %3132 = vmatpush2.bf16.msra.mxu0 %v4438_v20  ;;  %v126_v11 = vld [vmem:[%s6896_s0 + $0x348] sm:$0xff] }
  0x2c   :  { %v485_v18 = vld [vmem:[%s6896_s0 + $0xe80] sm:$0xff]  ;;  %v4423_v22 = vcombine.high %v229_v16, %v237_v17  ;;  %3174 = vmatprep.subr.bf16.mxu1 %v4695_v15  ;;  %v4422_v28 = vcombine.low %v229_v16, %v237_v17  ;;  %v382_v14 = vld [vmem:[%s6896_s0 + $0xb48] sm:$0xff]  ;;  %v4328_v16 = vcombine.low %v134_v2, %v142_v3  ;;  %v4584_v17 = vcombine.low %v390_v4, %v398_v5 }
  0x2d   :  { %v493_v19 = vld [vmem:[%s6896_s0 + $0xec0] sm:$0xff]  ;;  %3175 = vmatpush2.bf16.msra.mxu1 %v4694_v21  ;;  %v5041_v15 = vld [vmem:[%s6897_s1 + $0x8] ss:$16 sps:$4 sm:$0xff]  }
  0x2e   :  { %v4679_v23 = vcombine.high %v485_v18, %v493_v19  ;;  %v213_v24 = vld [vmem:[%s6896_s0 + $0x600] sm:$0xff]  ;;  %3133 = vmatprep.subr.bf16.mxu0 %v4423_v22  ;;  %v4678_v29 = vcombine.low %v485_v18, %v493_v19  ;;  %v4313_v18 = vcombine.high %v118_v10, %v126_v11  ;;  %v4569_v19 = vcombine.high %v374_v13, %v382_v14  ;;  %v102_v20 = vld [vmem:[%s6896_s0 + $0x288] sm:$0xff] }
  0x2f   :  { %v221_v25 = vld [vmem:[%s6896_s0 + $0x640] sm:$0xff]  ;;  %3134 = vmatpush2.bf16.msra.mxu0 %v4422_v28  ;;  %v110_v21 = vld [vmem:[%s6896_s0 + $0x2c8] sm:$0xff] }
  0x30   :  { %v469_v26 = vld [vmem:[%s6896_s0 + $0xe00] sm:$0xff]  ;;  %v4407_v30 = vcombine.high %v213_v24, %v221_v25  ;;  %3176 = vmatprep.subr.bf16.mxu1 %v4679_v23  ;;  %v4406_v36 = vcombine.low %v213_v24, %v221_v25  ;;  %v358_v22 = vld [vmem:[%s6896_s0 + $0xa88] sm:$0xff]  ;;  %v4312_v24 = vcombine.low %v118_v10, %v126_v11  ;;  %v4568_v25 = vcombine.low %v374_v13, %v382_v14 }
  0x31   :  { %v477_v27 = vld [vmem:[%s6896_s0 + $0xe40] sm:$0xff]  ;;  %3177 = vmatpush2.bf16.msra.mxu1 %v4678_v29  ;;  %v366_v23 = vld [vmem:[%s6896_s0 + $0xac8] sm:$0xff] }
  0x32   :  { %v4663_v31 = vcombine.high %v469_v26, %v477_v27  ;;  %v197_v32 = vld [vmem:[%s6896_s0 + $0x580] sm:$0xff]  ;;  %3135 = vmatprep.subr.bf16.mxu0 %v4407_v30  ;;  %v4662_v37 = vcombine.low %v469_v26, %v477_v27  ;;  %v4297_v26 = vcombine.high %v102_v20, %v110_v21  ;;  %v4553_v27 = vcombine.high %v358_v22, %v366_v23  ;;  %v86_v28 = vld [vmem:[%s6896_s0 + $0x208] sm:$0xff] }
  0x33   :  { %v205_v33 = vld [vmem:[%s6896_s0 + $0x5c0] sm:$0xff]  ;;  %3136 = vmatpush2.bf16.msra.mxu0 %v4406_v36  ;;  %v94_v29 = vld [vmem:[%s6896_s0 + $0x248] sm:$0xff] }
  0x34   :  { %v453_v34 = vld [vmem:[%s6896_s0 + $0xd80] sm:$0xff]  ;;  %v4391_v38 = vcombine.high %v197_v32, %v205_v33  ;;  %3178 = vmatprep.subr.bf16.mxu1 %v4663_v31  ;;  %v4390_v44 = vcombine.low %v197_v32, %v205_v33  ;;  %v342_v30 = vld [vmem:[%s6896_s0 + $0xa08] sm:$0xff]  ;;  %v4296_v32 = vcombine.low %v102_v20, %v110_v21  ;;  %v4552_v33 = vcombine.low %v358_v22, %v366_v23 }
  0x35   :  { %v461_v35 = vld [vmem:[%s6896_s0 + $0xdc0] sm:$0xff]  ;;  %3179 = vmatpush2.bf16.msra.mxu1 %v4662_v37  ;;  %v350_v31 = vld [vmem:[%s6896_s0 + $0xa48] sm:$0xff] }
  0x36   :  { %v4647_v39 = vcombine.high %v453_v34, %v461_v35  ;;  %v181_v40 = vld [vmem:[%s6896_s0 + $0x500] sm:$0xff]  ;;  %3137 = vmatprep.subr.bf16.mxu0 %v4391_v38  ;;  %v4646_v45 = vcombine.low %v453_v34, %v461_v35  ;;  %v4281_v34 = vcombine.high %v86_v28, %v94_v29  ;;  %v4537_v35 = vcombine.high %v342_v30, %v350_v31  ;;  %v70_v36 = vld [vmem:[%s6896_s0 + $0x188] sm:$0xff] }
  0x37   :  { %v189_v41 = vld [vmem:[%s6896_s0 + $0x540] sm:$0xff]  ;;  %3138 = vmatpush2.bf16.msra.mxu0 %v4390_v44  ;;  %v78_v37 = vld [vmem:[%s6896_s0 + $0x1c8] sm:$0xff] }
  0x38   :  { %v437_v42 = vld [vmem:[%s6896_s0 + $0xd00] sm:$0xff]  ;;  %v4375_v46 = vcombine.high %v181_v40, %v189_v41  ;;  %3180 = vmatprep.subr.bf16.mxu1 %v4647_v39  ;;  %v4374_v52 = vcombine.low %v181_v40, %v189_v41  ;;  %v326_v38 = vld [vmem:[%s6896_s0 + $0x988] sm:$0xff]  ;;  %v4280_v40 = vcombine.low %v86_v28, %v94_v29  ;;  %v4536_v41 = vcombine.low %v342_v30, %v350_v31 }
  0x39   :  { %v445_v43 = vld [vmem:[%s6896_s0 + $0xd40] sm:$0xff]  ;;  %3181 = vmatpush2.bf16.msra.mxu1 %v4646_v45  ;;  %v334_v39 = vld [vmem:[%s6896_s0 + $0x9c8] sm:$0xff] }
  0x3a   :  { %v4631_v47 = vcombine.high %v437_v42, %v445_v43  ;;  %v165_v48 = vld [vmem:[%s6896_s0 + $0x480] sm:$0xff]  ;;  %3139 = vmatprep.subr.bf16.mxu0 %v4375_v46  ;;  %v4630_v53 = vcombine.low %v437_v42, %v445_v43  ;;  %v4265_v42 = vcombine.high %v70_v36, %v78_v37  ;;  %v4521_v43 = vcombine.high %v326_v38, %v334_v39  ;;  %v54_v44 = vld [vmem:[%s6896_s0 + $0x108] sm:$0xff] }
  0x3b   :  { %v173_v49 = vld [vmem:[%s6896_s0 + $0x4c0] sm:$0xff]  ;;  %3140 = vmatpush2.bf16.msra.mxu0 %v4374_v52  ;;  %v62_v45 = vld [vmem:[%s6896_s0 + $0x148] sm:$0xff] }
  0x3c   :  { %v421_v50 = vld [vmem:[%s6896_s0 + $0xc80] sm:$0xff]  ;;  %v4359_v54 = vcombine.high %v165_v48, %v173_v49  ;;  %3182 = vmatprep.subr.bf16.mxu1 %v4631_v47  ;;  %v4358_v62 = vcombine.low %v165_v48, %v173_v49  ;;  %v310_v46 = vld [vmem:[%s6896_s0 + $0x908] sm:$0xff]  ;;  %v4264_v48 = vcombine.low %v70_v36, %v78_v37  ;;  %v4520_v49 = vcombine.low %v326_v38, %v334_v39 }
  0x3d   :  { %v429_v51 = vld [vmem:[%s6896_s0 + $0xcc0] sm:$0xff]  ;;  %3183 = vmatpush2.bf16.msra.mxu1 %v4630_v53  ;;  %v318_v47 = vld [vmem:[%s6896_s0 + $0x948] sm:$0xff] }
  0x3e   :  { %v4615_v55 = vcombine.high %v421_v50, %v429_v51  ;;  %v149_v57 = vld [vmem:[%s6896_s0 + $0x400] sm:$0xff]  ;;  %3141 = vmatprep.subr.bf16.mxu0 %v4359_v54  ;;  %v4614_v63 = vcombine.low %v421_v50, %v429_v51  ;;  %v4249_v50 = vcombine.high %v54_v44, %v62_v45  ;;  %v4505_v51 = vcombine.high %v310_v46, %v318_v47  ;;  %v38_v52 = vld [vmem:[%s6896_s0 + $0x88] sm:$0xff] }
  0x3f   :  { %v157_v58 = vld [vmem:[%s6896_s0 + $0x440] sm:$0xff]  ;;  %3142 = vmatpush2.bf16.msra.mxu0 %v4358_v62  ;;  %v46_v53 = vld [vmem:[%s6896_s0 + $0xc8] sm:$0xff] }
  0x40   :  { %v405_v60 = vld [vmem:[%s6896_s0 + $0xc00] sm:$0xff]  ;;  %v4343_v0 = vcombine.high %v149_v57, %v157_v58  ;;  %3184 = vmatprep.subr.bf16.mxu1 %v4615_v55  ;;  %v4342_v6 = vcombine.low %v149_v57, %v157_v58  ;;  %v294_v54 = vld [vmem:[%s6896_s0 + $0x888] sm:$0xff]  ;;  %v4248_v57 = vcombine.low %v54_v44, %v62_v45  ;;  %v4504_v58 = vcombine.low %v310_v46, %v318_v47 }
  0x41   :  { %v413_v61 = vld [vmem:[%s6896_s0 + $0xc40] sm:$0xff]  ;;  %3185 = vmatpush2.bf16.msra.mxu1 %v4614_v63  ;;  %v302_v55 = vld [vmem:[%s6896_s0 + $0x8c8] sm:$0xff]  ;;  %v4232_v2 = vcombine.low %v38_v52, %v46_v53 }
  0x42   :  { %v4599_v1 = vcombine.high %v405_v60, %v413_v61  ;;  %3143 = vmatprep.subr.bf16.mxu0 %v4343_v0  ;;  %v4598_v7 = vcombine.low %v405_v60, %v413_v61  ;;  %v5030_v12 = vld [vmem:[%s6897_s1] ss:$16 sps:$4 sm:$0xff]   ;;  %v4233_v60 = vcombine.high %v38_v52, %v46_v53  ;;  %v4489_v61 = vcombine.high %v294_v54, %v302_v55  ;;  %v22_v62 = vld [vmem:[%s6896_s0 + $0x8] sm:$0xff] }
  0x43   :  { %3144 = vmatpush2.bf16.msra.mxu0 %v4342_v6  ;;  %v30_v63 = vld [vmem:[%s6896_s0 + $0x48] sm:$0xff]  ;;  %v4488_v3 = vcombine.low %v294_v54, %v302_v55 }
  0x44   :  { %3186 = vmatprep.subr.bf16.mxu1 %v4599_v1  ;;  %3199 = vmatprep.subr.bf16.mxu0 %v4329_v8  ;;  %v278_v0 = vld [vmem:[%s6896_s0 + $0x808] sm:$0xff]  ;;  %v4217_v4 = vcombine.high %v22_v62, %v30_v63  ;;  %v4216_v10 = vcombine.low %v22_v62, %v30_v63 }
  0x45   :  { %3187 = vmatpush2.bf16.msra.mxu1 %v4598_v7  ;;  %v286_v1 = vld [vmem:[%s6896_s0 + $0x848] sm:$0xff] }
  0x46   :  { %3242 = vmatprep.subr.bf16.mxu1 %v4585_v9  ;;  %3146 = vmatmul.mubr.bf16.vlgmr.msra.gmra.mxu0 %v5030_v12  ;;  %v4473_v5 = vcombine.high %v278_v0, %v286_v1  ;;  %v262_v6 = vld [vmem:[%s6896_s0 + $0x788] sm:$0xff]  ;;  %v4472_v11 = vcombine.low %v278_v0, %v286_v1 }
  0x47   :  { %3200 = vmatpush1.bf16.msra.mxu0 %v4328_v16  ;;  %3231 = vmatprep.mubr.bf16.mxu0 %v4898_v56  ;;  %v270_v7 = vld [vmem:[%s6896_s0 + $0x7c8] sm:$0xff] }
  0x48   :  { %3189 = vmatmul.mubr.bf16.vlgmr.msra.gmra.mxu1 %v5041_v15  ;;  %3201 = vmatprep.subr.bf16.mxu0 %v4313_v18  ;;  %v518_v8 = vld [vmem:[%s6896_s0 + $0xf88] sm:$0xff]  ;;  %v4457_v13 = vcombine.high %v262_v6, %v270_v7  ;;  %v4456_v20 = vcombine.low %v262_v6, %v270_v7 }
  0x49   :  { %3243 = vmatpush1.bf16.msra.mxu1 %v4584_v17  ;;  %3274 = vmatprep.mubr.bf16.mxu1 %v4909_v59  ;;  %v526_v9 = vld [vmem:[%s6896_s0 + $0xfc8] sm:$0xff] }
  0x4a   :  { %3244 = vmatprep.subr.bf16.mxu1 %v4569_v19  ;;  %v4713_v14 = vcombine.high %v518_v8, %v526_v9  ;;  %v246_v16 = vld [vmem:[%s6896_s0 + $0x708] sm:$0xff]  ;;  %v4712_v21 = vcombine.low %v518_v8, %v526_v9 }
  0x4b   :  { %3202 = vmatpush1.bf16.msra.mxu0 %v4312_v24  ;;  %v254_v17 = vld [vmem:[%s6896_s0 + $0x748] sm:$0xff] }
  0x4c   :  { %3203 = vmatprep.subr.bf16.mxu0 %v4297_v26  ;;  %v502_v18 = vld [vmem:[%s6896_s0 + $0xf08] sm:$0xff]  ;;  %v4441_v22 = vcombine.high %v246_v16, %v254_v17  ;;  %v4440_v28 = vcombine.low %v246_v16, %v254_v17 }
  0x4d   :  { %3245 = vmatpush1.bf16.msra.mxu1 %v4568_v25  ;;  %v510_v19 = vld [vmem:[%s6896_s0 + $0xf48] sm:$0xff] }
  0x4e   :  { %3246 = vmatprep.subr.bf16.mxu1 %v4553_v27  ;;  %v4697_v23 = vcombine.high %v502_v18, %v510_v19  ;;  %v230_v24 = vld [vmem:[%s6896_s0 + $0x688] sm:$0xff]  ;;  %v4696_v29 = vcombine.low %v502_v18, %v510_v19 }
  0x4f   :  { %3204 = vmatpush1.bf16.msra.mxu0 %v4296_v32  ;;  %v238_v25 = vld [vmem:[%s6896_s0 + $0x6c8] sm:$0xff] }
  0x50   :  { %3205 = vmatprep.subr.bf16.mxu0 %v4281_v34  ;;  %v486_v26 = vld [vmem:[%s6896_s0 + $0xe88] sm:$0xff]  ;;  %v4425_v30 = vcombine.high %v230_v24, %v238_v25  ;;  %v4424_v36 = vcombine.low %v230_v24, %v238_v25 }
  0x51   :  { %3247 = vmatpush1.bf16.msra.mxu1 %v4552_v33  ;;  %v494_v27 = vld [vmem:[%s6896_s0 + $0xec8] sm:$0xff] }
  0x52   :  { %3248 = vmatprep.subr.bf16.mxu1 %v4537_v35  ;;  %v4681_v31 = vcombine.high %v486_v26, %v494_v27  ;;  %v214_v32 = vld [vmem:[%s6896_s0 + $0x608] sm:$0xff]  ;;  %v4680_v37 = vcombine.low %v486_v26, %v494_v27 }
  0x53   :  { %3206 = vmatpush1.bf16.msra.mxu0 %v4280_v40  ;;  %v222_v33 = vld [vmem:[%s6896_s0 + $0x648] sm:$0xff] }
  0x54   :  { %3207 = vmatprep.subr.bf16.mxu0 %v4265_v42  ;;  %v470_v34 = vld [vmem:[%s6896_s0 + $0xe08] sm:$0xff]  ;;  %v4409_v38 = vcombine.high %v214_v32, %v222_v33  ;;  %v4408_v44 = vcombine.low %v214_v32, %v222_v33 }
  0x55   :  { %3249 = vmatpush1.bf16.msra.mxu1 %v4536_v41  ;;  %v478_v35 = vld [vmem:[%s6896_s0 + $0xe48] sm:$0xff] }
  0x56   :  { %3250 = vmatprep.subr.bf16.mxu1 %v4521_v43  ;;  %v4665_v39 = vcombine.high %v470_v34, %v478_v35  ;;  %v198_v40 = vld [vmem:[%s6896_s0 + $0x588] sm:$0xff]  ;;  %v4664_v45 = vcombine.low %v470_v34, %v478_v35 }
  0x57   :  { %3208 = vmatpush1.bf16.msra.mxu0 %v4264_v48  ;;  %v206_v41 = vld [vmem:[%s6896_s0 + $0x5c8] sm:$0xff] }
  0x58   :  { %3209 = vmatprep.subr.bf16.mxu0 %v4249_v50  ;;  %v454_v42 = vld [vmem:[%s6896_s0 + $0xd88] sm:$0xff]  ;;  %v4393_v46 = vcombine.high %v198_v40, %v206_v41  ;;  %v4392_v52 = vcombine.low %v198_v40, %v206_v41 }
  0x59   :  { %3251 = vmatpush1.bf16.msra.mxu1 %v4520_v49  ;;  %v462_v43 = vld [vmem:[%s6896_s0 + $0xdc8] sm:$0xff] }
  0x5a   :  { %3252 = vmatprep.subr.bf16.mxu1 %v4505_v51  ;;  %v4649_v47 = vcombine.high %v454_v42, %v462_v43  ;;  %v182_v48 = vld [vmem:[%s6896_s0 + $0x508] sm:$0xff]  ;;  %v4648_v53 = vcombine.low %v454_v42, %v462_v43 }
  0x5b   :  { %3210 = vmatpush1.bf16.msra.mxu0 %v4248_v57  ;;  %v190_v49 = vld [vmem:[%s6896_s0 + $0x548] sm:$0xff] }
  0x5c   :  { %3211 = vmatprep.subr.bf16.mxu0 %v4233_v60  ;;  %v438_v50 = vld [vmem:[%s6896_s0 + $0xd08] sm:$0xff]  ;;  %v4377_v54 = vcombine.high %v182_v48, %v190_v49  ;;  %v4376_v62 = vcombine.low %v182_v48, %v190_v49 }
  0x5d   :  { %3253 = vmatpush1.bf16.msra.mxu1 %v4504_v58  ;;  %v446_v51 = vld [vmem:[%s6896_s0 + $0xd48] sm:$0xff] }
  0x5e   :  { %3254 = vmatprep.subr.bf16.mxu1 %v4489_v61  ;;  %v4633_v55 = vcombine.high %v438_v50, %v446_v51  ;;  %v166_v57 = vld [vmem:[%s6896_s0 + $0x488] sm:$0xff]  ;;  %v4632_v63 = vcombine.low %v438_v50, %v446_v51  ;;  %v55_v50 = vld [vmem:[%s6896_s0 + $0x110] sm:$0xff] }
  0x5f   :  { %3212 = vmatpush1.bf16.msra.mxu0 %v4232_v2  ;;  %v174_v58 = vld [vmem:[%s6896_s0 + $0x4c8] sm:$0xff]  ;;  %v63_v51 = vld [vmem:[%s6896_s0 + $0x150] sm:$0xff] }
  0x60   :  { %3213 = vmatprep.subr.bf16.mxu0 %v4217_v4  ;;  %v422_v60 = vld [vmem:[%s6896_s0 + $0xc88] sm:$0xff]  ;;  %v4361_v0 = vcombine.high %v166_v57, %v174_v58  ;;  %v4360_v6 = vcombine.low %v166_v57, %v174_v58  ;;  %v4251_v57 = vcombine.high %v55_v50, %v63_v51 }
  0x61   :  { %3255 = vmatpush1.bf16.msra.mxu1 %v4488_v3  ;;  %v430_v61 = vld [vmem:[%s6896_s0 + $0xcc8] sm:$0xff] }
  0x62   :  { %3256 = vmatprep.subr.bf16.mxu1 %v4473_v5  ;;  %v4617_v1 = vcombine.high %v422_v60, %v430_v61  ;;  %v150_v2 = vld [vmem:[%s6896_s0 + $0x408] sm:$0xff]  ;;  %v4616_v7 = vcombine.low %v422_v60, %v430_v61  ;;  %v39_v60 = vld [vmem:[%s6896_s0 + $0x90] sm:$0xff] }
  0x63   :  { %3214 = vmatpush1.bf16.msra.mxu0 %v4216_v10  ;;  %v158_v3 = vld [vmem:[%s6896_s0 + $0x448] sm:$0xff]  ;;  %v135_v10 = vld [vmem:[%s6896_s0 + $0x390] sm:$0xff] }
  0x64   :  { %3215 = vmatprep.subr.bf16.mxu0 %v4457_v13  ;;  %v406_v4 = vld [vmem:[%s6896_s0 + $0xc08] sm:$0xff]  ;;  %v4345_v8 = vcombine.high %v150_v2, %v158_v3  ;;  %v391_v13 = vld [vmem:[%s6896_s0 + $0xb90] sm:$0xff]  ;;  %v4344_v16 = vcombine.low %v150_v2, %v158_v3 }
  0x65   :  { %3257 = vmatpush1.bf16.msra.mxu1 %v4472_v11  ;;  %v414_v5 = vld [vmem:[%s6896_s0 + $0xc48] sm:$0xff]  ;;  %v143_v11 = vld [vmem:[%s6896_s0 + $0x3d0] sm:$0xff] }
  0x66   :  { %3258 = vmatprep.subr.bf16.mxu1 %v4713_v14  ;;  %v4601_v9 = vcombine.high %v406_v4, %v414_v5  ;;  %v399_v14 = vld [vmem:[%s6896_s0 + $0xbd0] sm:$0xff]  ;;  %v4600_v17 = vcombine.low %v406_v4, %v414_v5  ;;  %v4331_v18 = vcombine.high %v135_v10, %v143_v11  ;;  %v4330_v24 = vcombine.low %v135_v10, %v143_v11 }
  0x67   :  { %3216 = vmatpush2.bf16.msra.mxu0 %v4456_v20  ;;  %v4587_v19 = vcombine.high %v391_v13, %v399_v14  ;;  %v119_v20 = vld [vmem:[%s6896_s0 + $0x310] sm:$0xff]  ;;  %v4586_v25 = vcombine.low %v391_v13, %v399_v14 }
  0x68   :  { %3217 = vmatprep.subr.bf16.mxu0 %v4441_v22  ;;  %v375_v22 = vld [vmem:[%s6896_s0 + $0xb10] sm:$0xff] }
  0x69   :  { %3259 = vmatpush2.bf16.msra.mxu1 %v4712_v21  ;;  %v127_v21 = vld [vmem:[%s6896_s0 + $0x350] sm:$0xff] }
  0x6a   :  { %3260 = vmatprep.subr.bf16.mxu1 %v4697_v23  ;;  %v383_v23 = vld [vmem:[%s6896_s0 + $0xb50] sm:$0xff]  ;;  %v4315_v26 = vcombine.high %v119_v20, %v127_v21  ;;  %v4314_v32 = vcombine.low %v119_v20, %v127_v21 }
  0x6b   :  { %3218 = vmatpush2.bf16.msra.mxu0 %v4440_v28  ;;  %v4571_v27 = vcombine.high %v375_v22, %v383_v23  ;;  %v103_v28 = vld [vmem:[%s6896_s0 + $0x290] sm:$0xff]  ;;  %v4570_v33 = vcombine.low %v375_v22, %v383_v23 }
  0x6c   :  { %3219 = vmatprep.subr.bf16.mxu0 %v4425_v30  ;;  %v359_v30 = vld [vmem:[%s6896_s0 + $0xa90] sm:$0xff] }
  0x6d   :  { %3261 = vmatpush2.bf16.msra.mxu1 %v4696_v29  ;;  %v111_v29 = vld [vmem:[%s6896_s0 + $0x2d0] sm:$0xff] }
  0x6e   :  { %3262 = vmatprep.subr.bf16.mxu1 %v4681_v31  ;;  %v367_v31 = vld [vmem:[%s6896_s0 + $0xad0] sm:$0xff]  ;;  %v4299_v34 = vcombine.high %v103_v28, %v111_v29  ;;  %v4298_v40 = vcombine.low %v103_v28, %v111_v29 }
  0x6f   :  { %3220 = vmatpush2.bf16.msra.mxu0 %v4424_v36  ;;  %v4555_v35 = vcombine.high %v359_v30, %v367_v31  ;;  %v87_v36 = vld [vmem:[%s6896_s0 + $0x210] sm:$0xff]  ;;  %v4554_v41 = vcombine.low %v359_v30, %v367_v31 }
  0x70   :  { %3221 = vmatprep.subr.bf16.mxu0 %v4409_v38  ;;  %v343_v38 = vld [vmem:[%s6896_s0 + $0xa10] sm:$0xff] }
  0x71   :  { %3263 = vmatpush2.bf16.msra.mxu1 %v4680_v37  ;;  %v95_v37 = vld [vmem:[%s6896_s0 + $0x250] sm:$0xff] }
  0x72   :  { %3264 = vmatprep.subr.bf16.mxu1 %v4665_v39  ;;  %v351_v39 = vld [vmem:[%s6896_s0 + $0xa50] sm:$0xff]  ;;  %v4283_v42 = vcombine.high %v87_v36, %v95_v37 }
  0x73   :  { %3222 = vmatpush2.bf16.msra.mxu0 %v4408_v44  ;;  %v4539_v43 = vcombine.high %v343_v38, %v351_v39  ;;  %v79_v44 = vld [vmem:[%s6896_s0 + $0x1d0] sm:$0xff] }
  0x74   :  { %3223 = vmatprep.subr.bf16.mxu0 %v4393_v46  ;;  %v4282_v46 = vcombine.low %v87_v36, %v95_v37  ;;  %v47_v61 = vld [vmem:[%s6896_s0 + $0xd0] sm:$0xff] }
  0x75   :  { %3265 = vmatpush2.bf16.msra.mxu1 %v4664_v45  ;;  %v335_v45 = vld [vmem:[%s6896_s0 + $0x9d0] sm:$0xff]  ;;  %v4235_v2 = vcombine.high %v39_v60, %v47_v61 }
  0x76   :  { %3266 = vmatprep.subr.bf16.mxu1 %v4649_v47  ;;  %v4538_v47 = vcombine.low %v343_v38, %v351_v39  ;;  %v23_v4 = vld [vmem:[%s6896_s0 + $0x10] sm:$0xff] }
  0x77   :  { %3224 = vmatpush2.bf16.msra.mxu0 %v4392_v52  ;;  %v311_v52 = vld [vmem:[%s6896_s0 + $0x910] sm:$0xff] }
  0x78   :  { %3225 = vmatprep.subr.bf16.mxu0 %v4377_v54  ;;  %v31_v5 = vld [vmem:[%s6896_s0 + $0x50] sm:$0xff] }
  0x79   :  { %3267 = vmatpush2.bf16.msra.mxu1 %v4648_v53  ;;  %v319_v53 = vld [vmem:[%s6896_s0 + $0x950] sm:$0xff]  ;;  %v4219_v10 = vcombine.high %v23_v4, %v31_v5 }
  0x7a   :  { %3268 = vmatprep.subr.bf16.mxu1 %v4633_v55  ;;  %v4507_v58 = vcombine.high %v311_v52, %v319_v53  ;;  %v263_v13 = vld [vmem:[%s6896_s0 + $0x790] sm:$0xff] }
  0x7b   :  { %3226 = vmatpush2.bf16.msra.mxu0 %v4376_v62  ;;  %v295_v62 = vld [vmem:[%s6896_s0 + $0x890] sm:$0xff] }
  0x7c   :  { %3227 = vmatprep.subr.bf16.mxu0 %v4361_v0  ;;  %v4250_v0 = vcombine.low %v55_v50, %v63_v51  ;;  %v271_v14 = vld [vmem:[%s6896_s0 + $0x7d0] sm:$0xff] }
  0x7d   :  { %3269 = vmatpush2.bf16.msra.mxu1 %v4632_v63  ;;  %v303_v63 = vld [vmem:[%s6896_s0 + $0x8d0] sm:$0xff]  ;;  %v4459_v20 = vcombine.high %v263_v13, %v271_v14 }
  0x7e   :  { %3270 = vmatprep.subr.bf16.mxu1 %v4617_v1  ;;  %v4506_v1 = vcombine.low %v311_v52, %v319_v53  ;;  %v4491_v3 = vcombine.high %v295_v62, %v303_v63  ;;  %v247_v22 = vld [vmem:[%s6896_s0 + $0x710] sm:$0xff] }
  0x7f   :  { %3228 = vmatpush2.bf16.msra.mxu0 %v4360_v6  ;;  %v279_v6 = vld [vmem:[%s6896_s0 + $0x810] sm:$0xff] }
  0x80   :  { %3229 = vmatprep.subr.bf16.mxu0 %v4345_v8  ;;  %v4234_v8 = vcombine.low %v39_v60, %v47_v61  ;;  %v255_v23 = vld [vmem:[%s6896_s0 + $0x750] sm:$0xff] }
  0x81   :  { %3271 = vmatpush2.bf16.msra.mxu1 %v4616_v7  ;;  %v287_v7 = vld [vmem:[%s6896_s0 + $0x850] sm:$0xff]  ;;  %v4443_v28 = vcombine.high %v247_v22, %v255_v23 }
  0x82   :  { %3272 = vmatprep.subr.bf16.mxu1 %v4601_v9  ;;  %v4490_v9 = vcombine.low %v295_v62, %v303_v63  ;;  %v4475_v11 = vcombine.high %v279_v6, %v287_v7  ;;  %v231_v30 = vld [vmem:[%s6896_s0 + $0x690] sm:$0xff] }
  0x83   :  { %3230 = vmatpush2.bf16.msra.mxu0 %v4344_v16  ;;  %v519_v16 = vld [vmem:[%s6896_s0 + $0xf90] sm:$0xff] }
  0x84   :  { %3285 = vmatprep.subr.bf16.mxu0 %v4331_v18  ;;  %v4218_v18 = vcombine.low %v23_v4, %v31_v5  ;;  %v239_v31 = vld [vmem:[%s6896_s0 + $0x6d0] sm:$0xff] }
  0x85   :  { %3273 = vmatpush2.bf16.msra.mxu1 %v4600_v17  ;;  %v527_v17 = vld [vmem:[%s6896_s0 + $0xfd0] sm:$0xff]  ;;  %v4427_v36 = vcombine.high %v231_v30, %v239_v31 }
  0x86   :  { %3328 = vmatprep.subr.bf16.mxu1 %v4587_v19  ;;  %3232 = vmatmul.mubr.bf16.vlgmr.msra.gmra.mxu0 %v5030_v12  ;;  %v4474_v19 = vcombine.low %v279_v6, %v287_v7  ;;  %v4715_v21 = vcombine.high %v519_v16, %v527_v17  ;;  %v215_v38 = vld [vmem:[%s6896_s0 + $0x610] sm:$0xff] }
  0x87   :  { %3286 = vmatpush1.bf16.msra.mxu0 %v4330_v24  ;;  %3317 = vmatprep.mubr.bf16.mxu0 %v4898_v56  ;;  %v71_v56 = vld [vmem:[%s6896_s0 + $0x190] sm:$0xff] }
  0x88   :  { %3275 = vmatmul.mubr.bf16.vlgmr.msra.gmra.mxu1 %v5041_v15  ;;  %3287 = vmatprep.subr.bf16.mxu0 %v4315_v26  ;;  %v4267_v48 = vcombine.high %v71_v56, %v79_v44  ;;  %v4266_v54 = vcombine.low %v71_v56, %v79_v44  ;;  %v503_v24 = vld [vmem:[%s6896_s0 + $0xf10] sm:$0xff]  ;;  %v4458_v26 = vcombine.low %v263_v13, %v271_v14 }
  0x89   :  { %3329 = vmatpush1.bf16.msra.mxu1 %v4586_v25  ;;  %3360 = vmatprep.mubr.bf16.mxu1 %v4909_v59  ;;  %v327_v59 = vld [vmem:[%s6896_s0 + $0x990] sm:$0xff] }
  0x8a   :  { %3330 = vmatprep.subr.bf16.mxu1 %v4571_v27  ;;  %v4523_v49 = vcombine.high %v327_v59, %v335_v45  ;;  %v4522_v55 = vcombine.low %v327_v59, %v335_v45  ;;  %v511_v25 = vld [vmem:[%s6896_s0 + $0xf50] sm:$0xff]  ;;  %v4714_v27 = vcombine.low %v519_v16, %v527_v17  ;;  %v136_v16 = vld [vmem:[%s6896_s0 + $0x398] sm:$0xff] }
  0x8b   :  { %3288 = vmatpush1.bf16.msra.mxu0 %v4314_v32  ;;  %v4699_v29 = vcombine.high %v503_v24, %v511_v25  ;;  %v487_v32 = vld [vmem:[%s6896_s0 + $0xe90] sm:$0xff]  ;;  %v144_v17 = vld [vmem:[%s6896_s0 + $0x3d8] sm:$0xff] }
  0x8c   :  { %3289 = vmatprep.subr.bf16.mxu0 %v4299_v34  ;;  %v4442_v34 = vcombine.low %v247_v22, %v255_v23  ;;  %v223_v39 = vld [vmem:[%s6896_s0 + $0x650] sm:$0xff]  ;;  %v4333_v22 = vcombine.high %v136_v16, %v144_v17 }
  0x8d   :  { %3331 = vmatpush1.bf16.msra.mxu1 %v4570_v33  ;;  %v495_v33 = vld [vmem:[%s6896_s0 + $0xed0] sm:$0xff]  ;;  %v4411_v56 = vcombine.high %v215_v38, %v223_v39 }
  0x8e   :  { %3332 = vmatprep.subr.bf16.mxu1 %v4555_v35  ;;  %v4698_v35 = vcombine.low %v503_v24, %v511_v25  ;;  %v4683_v37 = vcombine.high %v487_v32, %v495_v33  ;;  %v199_v59 = vld [vmem:[%s6896_s0 + $0x590] sm:$0xff]  ;;  %v120_v24 = vld [vmem:[%s6896_s0 + $0x318] sm:$0xff] }
  0x8f   :  { %3290 = vmatpush1.bf16.msra.mxu0 %v4298_v40  ;;  %v471_v40 = vld [vmem:[%s6896_s0 + $0xe10] sm:$0xff]  ;;  %v128_v25 = vld [vmem:[%s6896_s0 + $0x358] sm:$0xff] }
  0x90   :  { %3291 = vmatprep.subr.bf16.mxu0 %v4283_v42  ;;  %v4426_v42 = vcombine.low %v231_v30, %v239_v31  ;;  %v207_v45 = vld [vmem:[%s6896_s0 + $0x5d0] sm:$0xff]  ;;  %v4317_v30 = vcombine.high %v120_v24, %v128_v25 }
  0x91   :  { %3333 = vmatpush1.bf16.msra.mxu1 %v4554_v41  ;;  %v479_v41 = vld [vmem:[%s6896_s0 + $0xe50] sm:$0xff]  ;;  %v4395_v50 = vcombine.high %v199_v59, %v207_v45 }
  0x92   :  { %3334 = vmatprep.subr.bf16.mxu1 %v4539_v43  ;;  %v4682_v43 = vcombine.low %v487_v32, %v495_v33  ;;  %v4667_v44 = vcombine.high %v471_v40, %v479_v41  ;;  %v183_v52 = vld [vmem:[%s6896_s0 + $0x510] sm:$0xff]  ;;  %v104_v32 = vld [vmem:[%s6896_s0 + $0x298] sm:$0xff] }
  0x93   :  { %3292 = vmatpush1.bf16.msra.mxu0 %v4282_v46  ;;  %v455_v46 = vld [vmem:[%s6896_s0 + $0xd90] sm:$0xff]  ;;  %v112_v33 = vld [vmem:[%s6896_s0 + $0x2d8] sm:$0xff] }
  0x94   :  { %3293 = vmatprep.subr.bf16.mxu0 %v4267_v48  ;;  %v4410_v48 = vcombine.low %v215_v38, %v223_v39  ;;  %v191_v53 = vld [vmem:[%s6896_s0 + $0x550] sm:$0xff]  ;;  %v4301_v38 = vcombine.high %v104_v32, %v112_v33 }
  0x95   :  { %3335 = vmatpush1.bf16.msra.mxu1 %v4538_v47  ;;  %v463_v47 = vld [vmem:[%s6896_s0 + $0xdd0] sm:$0xff]  ;;  %v4379_v60 = vcombine.high %v183_v52, %v191_v53 }
  0x96   :  { %3336 = vmatprep.subr.bf16.mxu1 %v4523_v49  ;;  %v4666_v49 = vcombine.low %v471_v40, %v479_v41  ;;  %v4651_v51 = vcombine.high %v455_v46, %v463_v47  ;;  %v167_v62 = vld [vmem:[%s6896_s0 + $0x490] sm:$0xff]  ;;  %v96_v40 = vld [vmem:[%s6896_s0 + $0x258] sm:$0xff] }
  0x97   :  { %3294 = vmatpush1.bf16.msra.mxu0 %v4266_v54  ;;  %v439_v54 = vld [vmem:[%s6896_s0 + $0xd10] sm:$0xff]  ;;  %v344_v41 = vld [vmem:[%s6896_s0 + $0xa18] sm:$0xff] }
  0x98   :  { %3295 = vmatprep.subr.bf16.mxu0 %v4251_v57  ;;  %v4394_v57 = vcombine.low %v199_v59, %v207_v45  ;;  %v175_v63 = vld [vmem:[%s6896_s0 + $0x4d0] sm:$0xff] }
  0x99   :  { %3337 = vmatpush1.bf16.msra.mxu1 %v4522_v55  ;;  %v447_v55 = vld [vmem:[%s6896_s0 + $0xd50] sm:$0xff]  ;;  %v4363_v4 = vcombine.high %v167_v62, %v175_v63 }
  0x9a   :  { %3338 = vmatprep.subr.bf16.mxu1 %v4507_v58  ;;  %v4650_v58 = vcombine.low %v455_v46, %v463_v47  ;;  %v4635_v61 = vcombine.high %v439_v54, %v447_v55  ;;  %v151_v6 = vld [vmem:[%s6896_s0 + $0x410] sm:$0xff]  ;;  %v72_v46 = vld [vmem:[%s6896_s0 + $0x198] sm:$0xff] }
  0x9b   :  { %3296 = vmatpush1.bf16.msra.mxu0 %v4250_v0  ;;  %v423_v0 = vld [vmem:[%s6896_s0 + $0xc90] sm:$0xff]  ;;  %v80_v47 = vld [vmem:[%s6896_s0 + $0x1d8] sm:$0xff] }
  0x9c   :  { %3297 = vmatprep.subr.bf16.mxu0 %v4235_v2  ;;  %v4378_v2 = vcombine.low %v183_v52, %v191_v53  ;;  %v159_v7 = vld [vmem:[%s6896_s0 + $0x450] sm:$0xff]  ;;  %v4269_v52 = vcombine.high %v72_v46, %v80_v47 }
  0x9d   :  { %3339 = vmatpush1.bf16.msra.mxu1 %v4506_v1  ;;  %v431_v1 = vld [vmem:[%s6896_s0 + $0xcd0] sm:$0xff]  ;;  %v4347_v13 = vcombine.high %v151_v6, %v159_v7 }
  0x9e   :  { %3340 = vmatprep.subr.bf16.mxu1 %v4491_v3  ;;  %v4634_v3 = vcombine.low %v439_v54, %v447_v55  ;;  %v4619_v5 = vcombine.high %v423_v0, %v431_v1  ;;  %v56_v54 = vld [vmem:[%s6896_s0 + $0x118] sm:$0xff] }
  0x9f   :  { %3298 = vmatpush1.bf16.msra.mxu0 %v4234_v8  ;;  %v407_v8 = vld [vmem:[%s6896_s0 + $0xc10] sm:$0xff]  ;;  %v64_v55 = vld [vmem:[%s6896_s0 + $0x158] sm:$0xff] }
  0xa0   :  { %3299 = vmatprep.subr.bf16.mxu0 %v4219_v10  ;;  %v4362_v10 = vcombine.low %v167_v62, %v175_v63  ;;  %v4253_v62 = vcombine.high %v56_v54, %v64_v55 }
  0xa1   :  { %3341 = vmatpush1.bf16.msra.mxu1 %v4490_v9  ;;  %v415_v9 = vld [vmem:[%s6896_s0 + $0xc50] sm:$0xff] }
  0xa2   :  { %3342 = vmatprep.subr.bf16.mxu1 %v4475_v11  ;;  %v4618_v11 = vcombine.low %v423_v0, %v431_v1  ;;  %v4603_v14 = vcombine.high %v407_v8, %v415_v9  ;;  %v40_v0 = vld [vmem:[%s6896_s0 + $0x98] sm:$0xff] }
  0xa3   :  { %3300 = vmatpush1.bf16.msra.mxu0 %v4218_v18  ;;  %v392_v18 = vld [vmem:[%s6896_s0 + $0xb98] sm:$0xff] }
  0xa4   :  { %3301 = vmatprep.subr.bf16.mxu0 %v4459_v20  ;;  %v4346_v20 = vcombine.low %v151_v6, %v159_v7  ;;  %v48_v1 = vld [vmem:[%s6896_s0 + $0xd8] sm:$0xff] }
  0xa5   :  { %3343 = vmatpush1.bf16.msra.mxu1 %v4474_v19  ;;  %v400_v19 = vld [vmem:[%s6896_s0 + $0xbd8] sm:$0xff]  ;;  %v4237_v6 = vcombine.high %v40_v0, %v48_v1 }
  0xa6   :  { %3344 = vmatprep.subr.bf16.mxu1 %v4715_v21  ;;  %v4602_v21 = vcombine.low %v407_v8, %v415_v9  ;;  %v4589_v23 = vcombine.high %v392_v18, %v400_v19  ;;  %v24_v8 = vld [vmem:[%s6896_s0 + $0x18] sm:$0xff] }
  0xa7   :  { %3302 = vmatpush2.bf16.msra.mxu0 %v4458_v26  ;;  %v376_v26 = vld [vmem:[%s6896_s0 + $0xb18] sm:$0xff] }
  0xa8   :  { %3303 = vmatprep.subr.bf16.mxu0 %v4443_v28  ;;  %v4332_v28 = vcombine.low %v136_v16, %v144_v17  ;;  %v32_v9 = vld [vmem:[%s6896_s0 + $0x58] sm:$0xff] }
  0xa9   :  { %3345 = vmatpush2.bf16.msra.mxu1 %v4714_v27  ;;  %v384_v27 = vld [vmem:[%s6896_s0 + $0xb58] sm:$0xff]  ;;  %v4221_v16 = vcombine.high %v24_v8, %v32_v9 }
  0xaa   :  { %3346 = vmatprep.subr.bf16.mxu1 %v4699_v29  ;;  %v4588_v29 = vcombine.low %v392_v18, %v400_v19  ;;  %v4573_v31 = vcombine.high %v376_v26, %v384_v27  ;;  %v264_v18 = vld [vmem:[%s6896_s0 + $0x798] sm:$0xff] }
  0xab   :  { %3304 = vmatpush2.bf16.msra.mxu0 %v4442_v34  ;;  %v360_v34 = vld [vmem:[%s6896_s0 + $0xa98] sm:$0xff] }
  0xac   :  { %3305 = vmatprep.subr.bf16.mxu0 %v4427_v36  ;;  %v4316_v36 = vcombine.low %v120_v24, %v128_v25  ;;  %v272_v19 = vld [vmem:[%s6896_s0 + $0x7d8] sm:$0xff] }
  0xad   :  { %3347 = vmatpush2.bf16.msra.mxu1 %v4698_v35  ;;  %v368_v35 = vld [vmem:[%s6896_s0 + $0xad8] sm:$0xff]  ;;  %v4461_v24 = vcombine.high %v264_v18, %v272_v19 }
  0xae   :  { %3348 = vmatprep.subr.bf16.mxu1 %v4683_v37  ;;  %v4572_v37 = vcombine.low %v376_v26, %v384_v27  ;;  %v4557_v39 = vcombine.high %v360_v34, %v368_v35  ;;  %v248_v26 = vld [vmem:[%s6896_s0 + $0x718] sm:$0xff] }
  0xaf   :  { %3306 = vmatpush2.bf16.msra.mxu0 %v4426_v42  ;;  %v352_v42 = vld [vmem:[%s6896_s0 + $0xa58] sm:$0xff] }
  0xb0   :  { %3307 = vmatprep.subr.bf16.mxu0 %v4411_v56  ;;  %v4300_v56 = vcombine.low %v104_v32, %v112_v33  ;;  %v4541_v45 = vcombine.high %v344_v41, %v352_v42  ;;  %v256_v27 = vld [vmem:[%s6896_s0 + $0x758] sm:$0xff] }
  0xb1   :  { %3349 = vmatpush2.bf16.msra.mxu1 %v4682_v43  ;;  %v5470_v43 = vld [vmem:[%s6897_s1 + $0xc] ss:$16 sps:$4 sm:$0xff]   ;;  %v4445_v32 = vcombine.high %v248_v26, %v256_v27 }
  0xb2   :  { %3350 = vmatprep.subr.bf16.mxu1 %v4667_v44  ;;  %v4556_v44 = vcombine.low %v360_v34, %v368_v35  ;;  %v232_v34 = vld [vmem:[%s6896_s0 + $0x698] sm:$0xff] }
  0xb3   :  { %3308 = vmatpush2.bf16.msra.mxu0 %v4410_v48  ;;  %v328_v48 = vld [vmem:[%s6896_s0 + $0x998] sm:$0xff] }
  0xb4   :  { %3309 = vmatprep.subr.bf16.mxu0 %v4395_v50  ;;  %v240_v35 = vld [vmem:[%s6896_s0 + $0x6d8] sm:$0xff] }
  0xb5   :  { %3351 = vmatpush2.bf16.msra.mxu1 %v4666_v49  ;;  %v336_v49 = vld [vmem:[%s6896_s0 + $0x9d8] sm:$0xff] }
  0xb6   :  { %3352 = vmatprep.subr.bf16.mxu1 %v4651_v51  ;;  %v4540_v51 = vcombine.low %v344_v41, %v352_v42  ;;  %v4525_v53 = vcombine.high %v328_v48, %v336_v49  ;;  %v216_v41 = vld [vmem:[%s6896_s0 + $0x618] sm:$0xff] }
  0xb7   :  { %3310 = vmatpush2.bf16.msra.mxu0 %v4394_v57  ;;  %v312_v57 = vld [vmem:[%s6896_s0 + $0x918] sm:$0xff] }
  0xb8   :  { %3311 = vmatprep.subr.bf16.mxu0 %v4379_v60  ;;  %v4268_v60 = vcombine.low %v72_v46, %v80_v47  ;;  %v224_v42 = vld [vmem:[%s6896_s0 + $0x658] sm:$0xff] }
  0xb9   :  { %3353 = vmatpush2.bf16.msra.mxu1 %v4650_v58  ;;  %v320_v58 = vld [vmem:[%s6896_s0 + $0x958] sm:$0xff]  ;;  %v4413_v46 = vcombine.high %v216_v41, %v224_v42 }
  0xba   :  { %3354 = vmatprep.subr.bf16.mxu1 %v4635_v61  ;;  %v4524_v61 = vcombine.low %v328_v48, %v336_v49  ;;  %v4509_v63 = vcombine.high %v312_v57, %v320_v58  ;;  %v200_v48 = vld [vmem:[%s6896_s0 + $0x598] sm:$0xff] }
  0xbb   :  { %3312 = vmatpush2.bf16.msra.mxu0 %v4378_v2  ;;  %v296_v2 = vld [vmem:[%s6896_s0 + $0x898] sm:$0xff] }
  0xbc   :  { %3313 = vmatprep.subr.bf16.mxu0 %v4363_v4  ;;  %v4252_v4 = vcombine.low %v56_v54, %v64_v55  ;;  %v208_v49 = vld [vmem:[%s6896_s0 + $0x5d8] sm:$0xff] }
  0xbd   :  { %3355 = vmatpush2.bf16.msra.mxu1 %v4634_v3  ;;  %v304_v3 = vld [vmem:[%s6896_s0 + $0x8d8] sm:$0xff]  ;;  %v4397_v54 = vcombine.high %v200_v48, %v208_v49 }
  0xbe   :  { %3356 = vmatprep.subr.bf16.mxu1 %v4619_v5  ;;  %v4508_v5 = vcombine.low %v312_v57, %v320_v58  ;;  %v4493_v7 = vcombine.high %v296_v2, %v304_v3  ;;  %v184_v57 = vld [vmem:[%s6896_s0 + $0x518] sm:$0xff] }
  0xbf   :  { %3314 = vmatpush2.bf16.msra.mxu0 %v4362_v10  ;;  %v280_v10 = vld [vmem:[%s6896_s0 + $0x818] sm:$0xff] }
  0xc0   :  { %3315 = vmatprep.subr.bf16.mxu0 %v4347_v13  ;;  %v4236_v13 = vcombine.low %v40_v0, %v48_v1  ;;  %v192_v58 = vld [vmem:[%s6896_s0 + $0x558] sm:$0xff] }
  0xc1   :  { %3357 = vmatpush2.bf16.msra.mxu1 %v4618_v11  ;;  %v288_v11 = vld [vmem:[%s6896_s0 + $0x858] sm:$0xff]  ;;  %v4381_v0 = vcombine.high %v184_v57, %v192_v58 }
  0xc2   :  { %3358 = vmatprep.subr.bf16.mxu1 %v4603_v14  ;;  %v4492_v14 = vcombine.low %v296_v2, %v304_v3  ;;  %v4477_v17 = vcombine.high %v280_v10, %v288_v11  ;;  %v168_v2 = vld [vmem:[%s6896_s0 + $0x498] sm:$0xff] }
  0xc3   :  { %3316 = vmatpush2.bf16.msra.mxu0 %v4346_v20  ;;  %v520_v20 = vld [vmem:[%s6896_s0 + $0xf98] sm:$0xff] }
  0xc4   :  { %3371 = vmatprep.subr.bf16.mxu0 %v4333_v22  ;;  %v4220_v22 = vcombine.low %v24_v8, %v32_v9  ;;  %v176_v3 = vld [vmem:[%s6896_s0 + $0x4d8] sm:$0xff] }
  0xc5   :  { %3359 = vmatpush2.bf16.msra.mxu1 %v4602_v21  ;;  %v528_v21 = vld [vmem:[%s6896_s0 + $0xfd8] sm:$0xff]  ;;  %v4365_v8 = vcombine.high %v168_v2, %v176_v3 }
  0xc6   :  { %3414 = vmatprep.subr.bf16.mxu1 %v4589_v23  ;;  %3318 = vmatmul.mubr.bf16.vlgmr.msra.gmra.mxu0 %v5030_v12  ;;  %v88_v12 = vld [vmem:[%s6896_s0 + $0x218] sm:$0xff]  ;;  %v4476_v23 = vcombine.low %v280_v10, %v288_v11  ;;  %v4717_v25 = vcombine.high %v520_v20, %v528_v21 }
  0xc7   :  { %3372 = vmatpush1.bf16.msra.mxu0 %v4332_v28  ;;  %v4285_v59 = vcombine.high %v88_v12, %v96_v40  ;;  %v4284_v50 = vcombine.low %v88_v12, %v96_v40  ;;  %v504_v28 = vld [vmem:[%s6896_s0 + $0xf18] sm:$0xff]  ;;  %v4429_v12 = vcombine.high %v232_v34, %v240_v35 }
  0xc8   :  { %3361 = vmatmul.mubr.bf16.vlgmr.msra.gmra.mxu1 %v5041_v15  ;;  %3373 = vmatprep.subr.bf16.mxu0 %v4317_v30  ;;  %v5458_v15 = vld [vmem:[%s6897_s1 + $0x4] ss:$16 sps:$4 sm:$0xff]   ;;  %v4460_v30 = vcombine.low %v264_v18, %v272_v19  ;;  %v152_v10 = vld [vmem:[%s6896_s0 + $0x418] sm:$0xff] }
  0xc9   :  { %3415 = vmatpush1.bf16.msra.mxu1 %v4588_v29  ;;  %3403 = vmatprep.mubr.bf16.mxu0 %v5458_v15  ;;  %v512_v29 = vld [vmem:[%s6896_s0 + $0xf58] sm:$0xff] }
  0xca   :  { %3416 = vmatprep.subr.bf16.mxu1 %v4573_v31  ;;  %3446 = vmatprep.mubr.bf16.mxu1 %v5470_v43  ;;  %v4716_v31 = vcombine.low %v520_v20, %v528_v21  ;;  %v4701_v33 = vcombine.high %v504_v28, %v512_v29  ;;  %v160_v11 = vld [vmem:[%s6896_s0 + $0x458] sm:$0xff]  ;;  %v137_v20 = vld [vmem:[%s6896_s0 + $0x3a0] sm:$0xff] }
  0xcb   :  { %3374 = vmatpush1.bf16.msra.mxu0 %v4316_v36  ;;  %v488_v36 = vld [vmem:[%s6896_s0 + $0xe98] sm:$0xff]  ;;  %v4349_v18 = vcombine.high %v152_v10, %v160_v11  ;;  %v145_v21 = vld [vmem:[%s6896_s0 + $0x3e0] sm:$0xff] }
  0xcc   :  { %3375 = vmatprep.subr.bf16.mxu0 %v4301_v38  ;;  %v4444_v38 = vcombine.low %v248_v26, %v256_v27  ;;  %v4335_v26 = vcombine.high %v137_v20, %v145_v21 }
  0xcd   :  { %3417 = vmatpush1.bf16.msra.mxu1 %v4572_v37  ;;  %v496_v37 = vld [vmem:[%s6896_s0 + $0xed8] sm:$0xff] }
  0xce   :  { %3418 = vmatprep.subr.bf16.mxu1 %v4557_v39  ;;  %v4700_v39 = vcombine.low %v504_v28, %v512_v29  ;;  %v4685_v40 = vcombine.high %v488_v36, %v496_v37  ;;  %v121_v28 = vld [vmem:[%s6896_s0 + $0x320] sm:$0xff] }
  0xcf   :  { %3376 = vmatpush1.bf16.msra.mxu0 %v4300_v56  ;;  %v472_v56 = vld [vmem:[%s6896_s0 + $0xe18] sm:$0xff]  ;;  %v129_v29 = vld [vmem:[%s6896_s0 + $0x360] sm:$0xff] }
  0xd0   :  { %3377 = vmatprep.subr.bf16.mxu0 %v4285_v59  ;;  %v4428_v59 = vcombine.low %v232_v34, %v240_v35  ;;  %v4319_v34 = vcombine.high %v121_v28, %v129_v29 }
  0xd1   :  { %3419 = vmatpush1.bf16.msra.mxu1 %v4556_v44  ;;  %v480_v44 = vld [vmem:[%s6896_s0 + $0xe58] sm:$0xff] }
  0xd2   :  { %3420 = vmatprep.subr.bf16.mxu1 %v4541_v45  ;;  %v4684_v45 = vcombine.low %v488_v36, %v496_v37  ;;  %v4669_v47 = vcombine.high %v472_v56, %v480_v44  ;;  %v105_v36 = vld [vmem:[%s6896_s0 + $0x2a0] sm:$0xff] }
  0xd3   :  { %3378 = vmatpush1.bf16.msra.mxu0 %v4284_v50  ;;  %v456_v50 = vld [vmem:[%s6896_s0 + $0xd98] sm:$0xff]  ;;  %v113_v37 = vld [vmem:[%s6896_s0 + $0x2e0] sm:$0xff] }
  0xd4   :  { %3379 = vmatprep.subr.bf16.mxu0 %v4269_v52  ;;  %v4412_v52 = vcombine.low %v216_v41, %v224_v42  ;;  %v4318_v41 = vcombine.low %v121_v28, %v129_v29 }
  0xd5   :  { %3421 = vmatpush1.bf16.msra.mxu1 %v4540_v51  ;;  %v464_v51 = vld [vmem:[%s6896_s0 + $0xdd8] sm:$0xff] }
  0xd6   :  { %3422 = vmatprep.subr.bf16.mxu1 %v4525_v53  ;;  %v4668_v53 = vcombine.low %v472_v56, %v480_v44  ;;  %v4653_v55 = vcombine.high %v456_v50, %v464_v51  ;;  %v4303_v56 = vcombine.high %v105_v36, %v113_v37 }
  0xd7   :  { %3380 = vmatpush1.bf16.msra.mxu0 %v4268_v60  ;;  %v440_v60 = vld [vmem:[%s6896_s0 + $0xd18] sm:$0xff] }
  0xd8   :  { %3381 = vmatprep.subr.bf16.mxu0 %v4253_v62  ;;  %v4396_v62 = vcombine.low %v200_v48, %v208_v49  ;;  %v4302_v48 = vcombine.low %v105_v36, %v113_v37 }
  0xd9   :  { %3423 = vmatpush1.bf16.msra.mxu1 %v4524_v61  ;;  %v448_v61 = vld [vmem:[%s6896_s0 + $0xd58] sm:$0xff] }
  0xda   :  { %3424 = vmatprep.subr.bf16.mxu1 %v4509_v63  ;;  %v4652_v63 = vcombine.low %v456_v50, %v464_v51  ;;  %v4637_v1 = vcombine.high %v440_v60, %v448_v61 }
  0xdb   :  { %3382 = vmatpush1.bf16.msra.mxu0 %v4252_v4  ;;  %v424_v4 = vld [vmem:[%s6896_s0 + $0xc98] sm:$0xff] }
  0xdc   :  { %3383 = vmatprep.subr.bf16.mxu0 %v4237_v6  ;;  %v4380_v6 = vcombine.low %v184_v57, %v192_v58 }
  0xdd   :  { %3425 = vmatpush1.bf16.msra.mxu1 %v4508_v5  ;;  %v432_v5 = vld [vmem:[%s6896_s0 + $0xcd8] sm:$0xff] }
  0xde   :  { %3426 = vmatprep.subr.bf16.mxu1 %v4493_v7  ;;  %v4636_v7 = vcombine.low %v440_v60, %v448_v61  ;;  %v4621_v9 = vcombine.high %v424_v4, %v432_v5 }
  0xdf   :  { %3384 = vmatpush1.bf16.msra.mxu0 %v4236_v13  ;;  %v408_v13 = vld [vmem:[%s6896_s0 + $0xc18] sm:$0xff] }
  0xe0   :  { %3385 = vmatprep.subr.bf16.mxu0 %v4221_v16  ;;  %v4364_v16 = vcombine.low %v168_v2, %v176_v3 }
  0xe1   :  { %3427 = vmatpush1.bf16.msra.mxu1 %v4492_v14  ;;  %v416_v14 = vld [vmem:[%s6896_s0 + $0xc58] sm:$0xff] }
  0xe2   :  { %3428 = vmatprep.subr.bf16.mxu1 %v4477_v17  ;;  %v4620_v17 = vcombine.low %v424_v4, %v432_v5  ;;  %v4605_v19 = vcombine.high %v408_v13, %v416_v14 }
  0xe3   :  { %3386 = vmatpush1.bf16.msra.mxu0 %v4220_v22  ;;  %v393_v22 = vld [vmem:[%s6896_s0 + $0xba0] sm:$0xff] }
  0xe4   :  { %3387 = vmatprep.subr.bf16.mxu0 %v4461_v24  ;;  %v4348_v24 = vcombine.low %v152_v10, %v160_v11 }
  0xe5   :  { %3429 = vmatpush1.bf16.msra.mxu1 %v4476_v23  ;;  %v401_v23 = vld [vmem:[%s6896_s0 + $0xbe0] sm:$0xff] }
  0xe6   :  { %3430 = vmatprep.subr.bf16.mxu1 %v4717_v25  ;;  %v4604_v25 = vcombine.low %v408_v13, %v416_v14  ;;  %v4591_v27 = vcombine.high %v393_v22, %v401_v23 }
  0xe7   :  { %3388 = vmatpush2.bf16.msra.mxu0 %v4460_v30  ;;  %v377_v30 = vld [vmem:[%s6896_s0 + $0xb20] sm:$0xff] }
  0xe8   :  { %3389 = vmatprep.subr.bf16.mxu0 %v4445_v32  ;;  %v4334_v32 = vcombine.low %v137_v20, %v145_v21 }
  0xe9   :  { %3431 = vmatpush2.bf16.msra.mxu1 %v4716_v31  ;;  %v385_v31 = vld [vmem:[%s6896_s0 + $0xb60] sm:$0xff] }
  0xea   :  { %3432 = vmatprep.subr.bf16.mxu1 %v4701_v33  ;;  %v4590_v33 = vcombine.low %v393_v22, %v401_v23  ;;  %v4575_v35 = vcombine.high %v377_v30, %v385_v31  ;;  %v4574_v42 = vcombine.low %v377_v30, %v385_v31 }
  0xeb   :  { %3390 = vmatpush2.bf16.msra.mxu0 %v4444_v38  ;;  %v5650_v38 = vld [vmem:[%s6897_s1] ss:$16 sps:$4 sm:$0xff]  }
  0xec   :  { %3391 = vmatprep.subr.bf16.mxu0 %v4429_v12  ;;  %v369_v12 = vld [vmem:[%s6896_s0 + $0xae0] sm:$0xff] }
  0xed   :  { %3433 = vmatpush2.bf16.msra.mxu1 %v4700_v39  ;;  %v361_v39 = vld [vmem:[%s6896_s0 + $0xaa0] sm:$0xff] }
  0xee   :  { %3434 = vmatprep.subr.bf16.mxu1 %v4685_v40  ;;  %v5662_v40 = vld [vmem:[%s6897_s1 + $0x8] ss:$16 sps:$4 sm:$0xff]   ;;  %v4559_v44 = vcombine.high %v361_v39, %v369_v12  ;;  %v4558_v49 = vcombine.low %v361_v39, %v369_v12 }
  0xef   :  { %3392 = vmatpush2.bf16.msra.mxu0 %v4428_v59  ;;  %v89_v59 = vld [vmem:[%s6896_s0 + $0x220] sm:$0xff] }
  0xf0   :  { %3393 = vmatprep.subr.bf16.mxu0 %v4413_v46  ;;  %v345_v46 = vld [vmem:[%s6896_s0 + $0xa20] sm:$0xff] }
  0xf1   :  { %3435 = vmatpush2.bf16.msra.mxu1 %v4684_v45  ;;  %v97_v45 = vld [vmem:[%s6896_s0 + $0x260] sm:$0xff] }
  0xf2   :  { %3436 = vmatprep.subr.bf16.mxu1 %v4669_v47  ;;  %v353_v47 = vld [vmem:[%s6896_s0 + $0xa60] sm:$0xff]  ;;  %v4287_v50 = vcombine.high %v89_v59, %v97_v45  ;;  %v4286_v57 = vcombine.low %v89_v59, %v97_v45 }
  0xf3   :  { %3394 = vmatpush2.bf16.msra.mxu0 %v4412_v52  ;;  %v4543_v51 = vcombine.high %v345_v46, %v353_v47  ;;  %v73_v52 = vld [vmem:[%s6896_s0 + $0x1a0] sm:$0xff]  ;;  %v4542_v58 = vcombine.low %v345_v46, %v353_v47 }
  0xf4   :  { %3395 = vmatprep.subr.bf16.mxu0 %v4397_v54  ;;  %v329_v54 = vld [vmem:[%s6896_s0 + $0x9a0] sm:$0xff] }
  0xf5   :  { %3437 = vmatpush2.bf16.msra.mxu1 %v4668_v53  ;;  %v81_v53 = vld [vmem:[%s6896_s0 + $0x1e0] sm:$0xff] }
  0xf6   :  { %3438 = vmatprep.subr.bf16.mxu1 %v4653_v55  ;;  %v337_v55 = vld [vmem:[%s6896_s0 + $0x9e0] sm:$0xff]  ;;  %v4271_v60 = vcombine.high %v73_v52, %v81_v53  ;;  %v4270_v2 = vcombine.low %v73_v52, %v81_v53 }
  0xf7   :  { %3396 = vmatpush2.bf16.msra.mxu0 %v4396_v62  ;;  %v4527_v61 = vcombine.high %v329_v54, %v337_v55  ;;  %v57_v62 = vld [vmem:[%s6896_s0 + $0x120] sm:$0xff]  ;;  %v4526_v3 = vcombine.low %v329_v54, %v337_v55 }
  0xf8   :  { %3397 = vmatprep.subr.bf16.mxu0 %v4381_v0  ;;  %v313_v0 = vld [vmem:[%s6896_s0 + $0x920] sm:$0xff] }
  0xf9   :  { %3439 = vmatpush2.bf16.msra.mxu1 %v4652_v63  ;;  %v65_v63 = vld [vmem:[%s6896_s0 + $0x160] sm:$0xff] }
  0xfa   :  { %3440 = vmatprep.subr.bf16.mxu1 %v4637_v1  ;;  %v321_v1 = vld [vmem:[%s6896_s0 + $0x960] sm:$0xff]  ;;  %v4255_v4 = vcombine.high %v57_v62, %v65_v63  ;;  %v4254_v10 = vcombine.low %v57_v62, %v65_v63 }
  0xfb   :  { %3398 = vmatpush2.bf16.msra.mxu0 %v4380_v6  ;;  %v4511_v5 = vcombine.high %v313_v0, %v321_v1  ;;  %v41_v6 = vld [vmem:[%s6896_s0 + $0xa0] sm:$0xff]  ;;  %v4510_v11 = vcombine.low %v313_v0, %v321_v1 }
  0xfc   :  { %3399 = vmatprep.subr.bf16.mxu0 %v4365_v8  ;;  %v297_v8 = vld [vmem:[%s6896_s0 + $0x8a0] sm:$0xff] }
  0xfd   :  { %3441 = vmatpush2.bf16.msra.mxu1 %v4636_v7  ;;  %v49_v7 = vld [vmem:[%s6896_s0 + $0xe0] sm:$0xff] }
  0xfe   :  { %3442 = vmatprep.subr.bf16.mxu1 %v4621_v9  ;;  %v305_v9 = vld [vmem:[%s6896_s0 + $0x8e0] sm:$0xff]  ;;  %v4239_v13 = vcombine.high %v41_v6, %v49_v7  ;;  %v4238_v20 = vcombine.low %v41_v6, %v49_v7 }
  0xff   :  { %3400 = vmatpush2.bf16.msra.mxu0 %v4364_v16  ;;  %v4495_v14 = vcombine.high %v297_v8, %v305_v9  ;;  %v25_v16 = vld [vmem:[%s6896_s0 + $0x20] sm:$0xff]  ;;  %v4494_v21 = vcombine.low %v297_v8, %v305_v9 }
 0x100   :  { %3401 = vmatprep.subr.bf16.mxu0 %v4349_v18  ;;  %v281_v18 = vld [vmem:[%s6896_s0 + $0x820] sm:$0xff] }
 0x101   :  { %3443 = vmatpush2.bf16.msra.mxu1 %v4620_v17  ;;  %v33_v17 = vld [vmem:[%s6896_s0 + $0x60] sm:$0xff] }
 0x102   :  { %3444 = vmatprep.subr.bf16.mxu1 %v4605_v19  ;;  %v289_v19 = vld [vmem:[%s6896_s0 + $0x860] sm:$0xff]  ;;  %v4223_v22 = vcombine.high %v25_v16, %v33_v17  ;;  %v4222_v28 = vcombine.low %v25_v16, %v33_v17 }
 0x103   :  { %3402 = vmatpush2.bf16.msra.mxu0 %v4348_v24  ;;  %v4479_v23 = vcombine.high %v281_v18, %v289_v19  ;;  %v265_v24 = vld [vmem:[%s6896_s0 + $0x7a0] sm:$0xff]  ;;  %v4478_v29 = vcombine.low %v281_v18, %v289_v19 }
 0x104   :  { %3457 = vmatprep.subr.bf16.mxu0 %v4335_v26  ;;  %v521_v26 = vld [vmem:[%s6896_s0 + $0xfa0] sm:$0xff] }
 0x105   :  { %3445 = vmatpush2.bf16.msra.mxu1 %v4604_v25  ;;  %v273_v25 = vld [vmem:[%s6896_s0 + $0x7e0] sm:$0xff] }
 0x106   :  { %3500 = vmatprep.subr.bf16.mxu1 %v4591_v27  ;;  %3404 = vmatmul.mubr.bf16.vlgmr.msra.gmra.mxu0 %v5650_v38  ;;  %v529_v27 = vld [vmem:[%s6896_s0 + $0xfe0] sm:$0xff]  ;;  %v4463_v30 = vcombine.high %v265_v24, %v273_v25  ;;  %v4462_v36 = vcombine.low %v265_v24, %v273_v25 }
 0x107   :  { %3458 = vmatpush1.bf16.msra.mxu0 %v4334_v32  ;;  %3489 = vmatprep.mubr.bf16.mxu0 %v5458_v15  ;;  %v4719_v31 = vcombine.high %v521_v26, %v529_v27  ;;  %v249_v32 = vld [vmem:[%s6896_s0 + $0x720] sm:$0xff]  ;;  %v4718_v37 = vcombine.low %v521_v26, %v529_v27 }
 0x108   :  { %3447 = vmatmul.mubr.bf16.vlgmr.msra.gmra.mxu1 %v5662_v40  ;;  %3459 = vmatprep.subr.bf16.mxu0 %v4319_v34  ;;  %v505_v34 = vld [vmem:[%s6896_s0 + $0xf20] sm:$0xff] }
 0x109   :  { %3501 = vmatpush1.bf16.msra.mxu1 %v4590_v33  ;;  %3532 = vmatprep.mubr.bf16.mxu1 %v5470_v43  ;;  %v257_v33 = vld [vmem:[%s6896_s0 + $0x760] sm:$0xff] }
 0x10a   :  { %3502 = vmatprep.subr.bf16.mxu1 %v4575_v35  ;;  %v513_v35 = vld [vmem:[%s6896_s0 + $0xf60] sm:$0xff]  ;;  %v4447_v39 = vcombine.high %v249_v32, %v257_v33  ;;  %v4446_v59 = vcombine.low %v249_v32, %v257_v33 }
 0x10b   :  { %3460 = vmatpush1.bf16.msra.mxu0 %v4318_v41  ;;  %v4703_v12 = vcombine.high %v505_v34, %v513_v35  ;;  %v233_v41 = vld [vmem:[%s6896_s0 + $0x6a0] sm:$0xff]  ;;  %v4702_v45 = vcombine.low %v505_v34, %v513_v35 }
 0x10c   :  { %3461 = vmatprep.subr.bf16.mxu0 %v4303_v56  ;;  %v489_v56 = vld [vmem:[%s6896_s0 + $0xea0] sm:$0xff] }
 0x10d   :  { %3503 = vmatpush1.bf16.msra.mxu1 %v4574_v42  ;;  %v241_v42 = vld [vmem:[%s6896_s0 + $0x6e0] sm:$0xff] }
 0x10e   :  { %3504 = vmatprep.subr.bf16.mxu1 %v4559_v44  ;;  %v497_v44 = vld [vmem:[%s6896_s0 + $0xee0] sm:$0xff]  ;;  %v4431_v46 = vcombine.high %v233_v41, %v241_v42  ;;  %v4430_v52 = vcombine.low %v233_v41, %v241_v42 }
 0x10f   :  { %3462 = vmatpush1.bf16.msra.mxu0 %v4302_v48  ;;  %v4687_v47 = vcombine.high %v489_v56, %v497_v44  ;;  %v217_v48 = vld [vmem:[%s6896_s0 + $0x620] sm:$0xff]  ;;  %v4686_v53 = vcombine.low %v489_v56, %v497_v44 }
 0x110   :  { %3463 = vmatprep.subr.bf16.mxu0 %v4287_v50  ;;  %v473_v50 = vld [vmem:[%s6896_s0 + $0xe20] sm:$0xff] }
 0x111   :  { %3505 = vmatpush1.bf16.msra.mxu1 %v4558_v49  ;;  %v225_v49 = vld [vmem:[%s6896_s0 + $0x660] sm:$0xff] }
 0x112   :  { %3506 = vmatprep.subr.bf16.mxu1 %v4543_v51  ;;  %v481_v51 = vld [vmem:[%s6896_s0 + $0xe60] sm:$0xff]  ;;  %v4415_v54 = vcombine.high %v217_v48, %v225_v49  ;;  %v4414_v62 = vcombine.low %v217_v48, %v225_v49 }
 0x113   :  { %3464 = vmatpush1.bf16.msra.mxu0 %v4286_v57  ;;  %v4671_v55 = vcombine.high %v473_v50, %v481_v51  ;;  %v201_v57 = vld [vmem:[%s6896_s0 + $0x5a0] sm:$0xff]  ;;  %v4670_v63 = vcombine.low %v473_v50, %v481_v51 }
 0x114   :  { %3465 = vmatprep.subr.bf16.mxu0 %v4271_v60  ;;  %v457_v60 = vld [vmem:[%s6896_s0 + $0xda0] sm:$0xff] }
 0x115   :  { %3507 = vmatpush1.bf16.msra.mxu1 %v4542_v58  ;;  %v209_v58 = vld [vmem:[%s6896_s0 + $0x5e0] sm:$0xff] }
 0x116   :  { %3508 = vmatprep.subr.bf16.mxu1 %v4527_v61  ;;  %v465_v61 = vld [vmem:[%s6896_s0 + $0xde0] sm:$0xff]  ;;  %v4399_v0 = vcombine.high %v201_v57, %v209_v58  ;;  %v4398_v6 = vcombine.low %v201_v57, %v209_v58 }
 0x117   :  { %3466 = vmatpush1.bf16.msra.mxu0 %v4270_v2  ;;  %v4655_v1 = vcombine.high %v457_v60, %v465_v61  ;;  %v185_v2 = vld [vmem:[%s6896_s0 + $0x520] sm:$0xff]  ;;  %v4654_v7 = vcombine.low %v457_v60, %v465_v61 }
 0x118   :  { %3467 = vmatprep.subr.bf16.mxu0 %v4255_v4  ;;  %v441_v4 = vld [vmem:[%s6896_s0 + $0xd20] sm:$0xff] }
 0x119   :  { %3509 = vmatpush1.bf16.msra.mxu1 %v4526_v3  ;;  %v193_v3 = vld [vmem:[%s6896_s0 + $0x560] sm:$0xff] }
 0x11a   :  { %3510 = vmatprep.subr.bf16.mxu1 %v4511_v5  ;;  %v449_v5 = vld [vmem:[%s6896_s0 + $0xd60] sm:$0xff]  ;;  %v4383_v8 = vcombine.high %v185_v2, %v193_v3  ;;  %v4382_v16 = vcombine.low %v185_v2, %v193_v3 }
 0x11b   :  { %3468 = vmatpush1.bf16.msra.mxu0 %v4254_v10  ;;  %v4639_v9 = vcombine.high %v441_v4, %v449_v5  ;;  %v169_v10 = vld [vmem:[%s6896_s0 + $0x4a0] sm:$0xff]  ;;  %v4638_v17 = vcombine.low %v441_v4, %v449_v5  ;;  %v58_v4 = vld [vmem:[%s6896_s0 + $0x128] sm:$0xff] }
 0x11c   :  { %3469 = vmatprep.subr.bf16.mxu0 %v4239_v13  ;;  %v425_v13 = vld [vmem:[%s6896_s0 + $0xca0] sm:$0xff]  ;;  %v66_v5 = vld [vmem:[%s6896_s0 + $0x168] sm:$0xff] }
 0x11d   :  { %3511 = vmatpush1.bf16.msra.mxu1 %v4510_v11  ;;  %v177_v11 = vld [vmem:[%s6896_s0 + $0x4e0] sm:$0xff] }
 0x11e   :  { %3512 = vmatprep.subr.bf16.mxu1 %v4495_v14  ;;  %v433_v14 = vld [vmem:[%s6896_s0 + $0xce0] sm:$0xff]  ;;  %v4367_v18 = vcombine.high %v169_v10, %v177_v11  ;;  %v4366_v24 = vcombine.low %v169_v10, %v177_v11  ;;  %v4257_v10 = vcombine.high %v58_v4, %v66_v5 }
 0x11f   :  { %3470 = vmatpush1.bf16.msra.mxu0 %v4238_v20  ;;  %v4623_v19 = vcombine.high %v425_v13, %v433_v14  ;;  %v153_v20 = vld [vmem:[%s6896_s0 + $0x420] sm:$0xff]  ;;  %v4622_v25 = vcombine.low %v425_v13, %v433_v14  ;;  %v42_v13 = vld [vmem:[%s6896_s0 + $0xa8] sm:$0xff] }
 0x120   :  { %3471 = vmatprep.subr.bf16.mxu0 %v4223_v22  ;;  %v409_v22 = vld [vmem:[%s6896_s0 + $0xc20] sm:$0xff]  ;;  %v50_v14 = vld [vmem:[%s6896_s0 + $0xe8] sm:$0xff] }
 0x121   :  { %3513 = vmatpush1.bf16.msra.mxu1 %v4494_v21  ;;  %v161_v21 = vld [vmem:[%s6896_s0 + $0x460] sm:$0xff] }
 0x122   :  { %3514 = vmatprep.subr.bf16.mxu1 %v4479_v23  ;;  %v417_v23 = vld [vmem:[%s6896_s0 + $0xc60] sm:$0xff]  ;;  %v4351_v26 = vcombine.high %v153_v20, %v161_v21  ;;  %v4350_v32 = vcombine.low %v153_v20, %v161_v21  ;;  %v4241_v20 = vcombine.high %v42_v13, %v50_v14 }
 0x123   :  { %3472 = vmatpush1.bf16.msra.mxu0 %v4222_v28  ;;  %v4607_v27 = vcombine.high %v409_v22, %v417_v23  ;;  %v138_v28 = vld [vmem:[%s6896_s0 + $0x3a8] sm:$0xff]  ;;  %v4606_v33 = vcombine.low %v409_v22, %v417_v23 }
 0x124   :  { %3473 = vmatprep.subr.bf16.mxu0 %v4463_v30  ;;  %v394_v30 = vld [vmem:[%s6896_s0 + $0xba8] sm:$0xff] }
 0x125   :  { %3515 = vmatpush1.bf16.msra.mxu1 %v4478_v29  ;;  %v146_v29 = vld [vmem:[%s6896_s0 + $0x3e8] sm:$0xff] }
 0x126   :  { %3516 = vmatprep.subr.bf16.mxu1 %v4719_v31  ;;  %v402_v31 = vld [vmem:[%s6896_s0 + $0xbe8] sm:$0xff]  ;;  %v4337_v34 = vcombine.high %v138_v28, %v146_v29  ;;  %v4336_v41 = vcombine.low %v138_v28, %v146_v29 }
 0x127   :  { %3474 = vmatpush2.bf16.msra.mxu0 %v4462_v36  ;;  %v4593_v35 = vcombine.high %v394_v30, %v402_v31  ;;  %v122_v36 = vld [vmem:[%s6896_s0 + $0x328] sm:$0xff]  ;;  %v4592_v42 = vcombine.low %v394_v30, %v402_v31 }
 0x128   :  { %3475 = vmatprep.subr.bf16.mxu0 %v4447_v39  ;;  %v378_v39 = vld [vmem:[%s6896_s0 + $0xb28] sm:$0xff] }
 0x129   :  { %3517 = vmatpush2.bf16.msra.mxu1 %v4718_v37  ;;  %v130_v37 = vld [vmem:[%s6896_s0 + $0x368] sm:$0xff] }
 0x12a   :  { %3518 = vmatprep.subr.bf16.mxu1 %v4703_v12  ;;  %v386_v12 = vld [vmem:[%s6896_s0 + $0xb68] sm:$0xff]  ;;  %v4321_v56 = vcombine.high %v122_v36, %v130_v37  ;;  %v4320_v48 = vcombine.low %v122_v36, %v130_v37 }
 0x12b   :  { %3476 = vmatpush2.bf16.msra.mxu0 %v4446_v59  ;;  %v4577_v44 = vcombine.high %v378_v39, %v386_v12  ;;  %v106_v59 = vld [vmem:[%s6896_s0 + $0x2a8] sm:$0xff]  ;;  %v4576_v49 = vcombine.low %v378_v39, %v386_v12 }
 0x12c   :  { %3477 = vmatprep.subr.bf16.mxu0 %v4431_v46  ;;  %v362_v46 = vld [vmem:[%s6896_s0 + $0xaa8] sm:$0xff] }
 0x12d   :  { %3519 = vmatpush2.bf16.msra.mxu1 %v4702_v45  ;;  %v114_v45 = vld [vmem:[%s6896_s0 + $0x2e8] sm:$0xff] }
 0x12e   :  { %3520 = vmatprep.subr.bf16.mxu1 %v4687_v47  ;;  %v370_v47 = vld [vmem:[%s6896_s0 + $0xae8] sm:$0xff]  ;;  %v4305_v50 = vcombine.high %v106_v59, %v114_v45  ;;  %v4304_v57 = vcombine.low %v106_v59, %v114_v45 }
 0x12f   :  { %3478 = vmatpush2.bf16.msra.mxu0 %v4430_v52  ;;  %v4561_v51 = vcombine.high %v362_v46, %v370_v47  ;;  %v90_v52 = vld [vmem:[%s6896_s0 + $0x228] sm:$0xff]  ;;  %v4560_v58 = vcombine.low %v362_v46, %v370_v47 }
 0x130   :  { %3479 = vmatprep.subr.bf16.mxu0 %v4415_v54  ;;  %v346_v54 = vld [vmem:[%s6896_s0 + $0xa28] sm:$0xff] }
 0x131   :  { %3521 = vmatpush2.bf16.msra.mxu1 %v4686_v53  ;;  %v98_v53 = vld [vmem:[%s6896_s0 + $0x268] sm:$0xff] }
 0x132   :  { %3522 = vmatprep.subr.bf16.mxu1 %v4671_v55  ;;  %v354_v55 = vld [vmem:[%s6896_s0 + $0xa68] sm:$0xff]  ;;  %v4289_v60 = vcombine.high %v90_v52, %v98_v53 }
 0x133   :  { %3480 = vmatpush2.bf16.msra.mxu0 %v4414_v62  ;;  %v4545_v61 = vcombine.high %v346_v54, %v354_v55  ;;  %v82_v62 = vld [vmem:[%s6896_s0 + $0x1e8] sm:$0xff] }
 0x134   :  { %3481 = vmatprep.subr.bf16.mxu0 %v4399_v0  ;;  %v4288_v0 = vcombine.low %v90_v52, %v98_v53  ;;  %v26_v22 = vld [vmem:[%s6896_s0 + $0x28] sm:$0xff] }
 0x135   :  { %3523 = vmatpush2.bf16.msra.mxu1 %v4670_v63  ;;  %v338_v63 = vld [vmem:[%s6896_s0 + $0x9e8] sm:$0xff] }
 0x136   :  { %3524 = vmatprep.subr.bf16.mxu1 %v4655_v1  ;;  %v4544_v1 = vcombine.low %v346_v54, %v354_v55  ;;  %v34_v23 = vld [vmem:[%s6896_s0 + $0x68] sm:$0xff] }
 0x137   :  { %3482 = vmatpush2.bf16.msra.mxu0 %v4398_v6  ;;  %v314_v6 = vld [vmem:[%s6896_s0 + $0x928] sm:$0xff]  ;;  %v4225_v28 = vcombine.high %v26_v22, %v34_v23 }
 0x138   :  { %3483 = vmatprep.subr.bf16.mxu0 %v4383_v8  ;;  %v266_v30 = vld [vmem:[%s6896_s0 + $0x7a8] sm:$0xff] }
 0x139   :  { %3525 = vmatpush2.bf16.msra.mxu1 %v4654_v7  ;;  %v322_v7 = vld [vmem:[%s6896_s0 + $0x968] sm:$0xff] }
 0x13a   :  { %3526 = vmatprep.subr.bf16.mxu1 %v4639_v9  ;;  %v4513_v11 = vcombine.high %v314_v6, %v322_v7  ;;  %v274_v31 = vld [vmem:[%s6896_s0 + $0x7e8] sm:$0xff] }
 0x13b   :  { %3484 = vmatpush2.bf16.msra.mxu0 %v4382_v16  ;;  %v298_v16 = vld [vmem:[%s6896_s0 + $0x8a8] sm:$0xff]  ;;  %v4465_v36 = vcombine.high %v266_v30, %v274_v31 }
 0x13c   :  { %3485 = vmatprep.subr.bf16.mxu0 %v4367_v18  ;;  %v4256_v18 = vcombine.low %v58_v4, %v66_v5  ;;  %v250_v39 = vld [vmem:[%s6896_s0 + $0x728] sm:$0xff] }
 0x13d   :  { %3527 = vmatpush2.bf16.msra.mxu1 %v4638_v17  ;;  %v306_v17 = vld [vmem:[%s6896_s0 + $0x8e8] sm:$0xff] }
 0x13e   :  { %3528 = vmatprep.subr.bf16.mxu1 %v4623_v19  ;;  %v4512_v19 = vcombine.low %v314_v6, %v322_v7  ;;  %v4497_v21 = vcombine.high %v298_v16, %v306_v17  ;;  %v258_v12 = vld [vmem:[%s6896_s0 + $0x768] sm:$0xff] }
 0x13f   :  { %3486 = vmatpush2.bf16.msra.mxu0 %v4366_v24  ;;  %v282_v24 = vld [vmem:[%s6896_s0 + $0x828] sm:$0xff]  ;;  %v4449_v59 = vcombine.high %v250_v39, %v258_v12 }
 0x140   :  { %3487 = vmatprep.subr.bf16.mxu0 %v4351_v26  ;;  %v4240_v26 = vcombine.low %v42_v13, %v50_v14  ;;  %v234_v46 = vld [vmem:[%s6896_s0 + $0x6a8] sm:$0xff] }
 0x141   :  { %3529 = vmatpush2.bf16.msra.mxu1 %v4622_v25  ;;  %v290_v25 = vld [vmem:[%s6896_s0 + $0x868] sm:$0xff] }
 0x142   :  { %3530 = vmatprep.subr.bf16.mxu1 %v4607_v27  ;;  %v4496_v27 = vcombine.low %v298_v16, %v306_v17  ;;  %v4481_v29 = vcombine.high %v282_v24, %v290_v25  ;;  %v242_v47 = vld [vmem:[%s6896_s0 + $0x6e8] sm:$0xff] }
 0x143   :  { %3488 = vmatpush2.bf16.msra.mxu0 %v4350_v32  ;;  %v522_v32 = vld [vmem:[%s6896_s0 + $0xfa8] sm:$0xff]  ;;  %v4433_v52 = vcombine.high %v234_v46, %v242_v47 }
 0x144   :  { %3543 = vmatprep.subr.bf16.mxu0 %v4337_v34  ;;  %v4224_v34 = vcombine.low %v26_v22, %v34_v23  ;;  %v218_v54 = vld [vmem:[%s6896_s0 + $0x628] sm:$0xff] }
 0x145   :  { %3531 = vmatpush2.bf16.msra.mxu1 %v4606_v33  ;;  %v530_v33 = vld [vmem:[%s6896_s0 + $0xfe8] sm:$0xff] }
 0x146   :  { %3586 = vmatprep.subr.bf16.mxu1 %v4593_v35  ;;  %3490 = vmatmul.mubr.bf16.vlgmr.msra.gmra.mxu0 %v5650_v38  ;;  %v4480_v35 = vcombine.low %v282_v24, %v290_v25  ;;  %v4721_v37 = vcombine.high %v522_v32, %v530_v33  ;;  %v226_v55 = vld [vmem:[%s6896_s0 + $0x668] sm:$0xff] }
 0x147   :  { %3544 = vmatpush1.bf16.msra.mxu0 %v4336_v41  ;;  %3575 = vmatprep.mubr.bf16.mxu0 %v5458_v15  ;;  %v74_v15 = vld [vmem:[%s6896_s0 + $0x1a8] sm:$0xff] }
 0x148   :  { %3533 = vmatmul.mubr.bf16.vlgmr.msra.gmra.mxu1 %v5662_v40  ;;  %3545 = vmatprep.subr.bf16.mxu0 %v4321_v56  ;;  %v4273_v2 = vcombine.high %v74_v15, %v82_v62  ;;  %v4272_v8 = vcombine.low %v74_v15, %v82_v62  ;;  %v506_v41 = vld [vmem:[%s6896_s0 + $0xf28] sm:$0xff]  ;;  %v4464_v56 = vcombine.low %v266_v30, %v274_v31 }
 0x149   :  { %3587 = vmatpush1.bf16.msra.mxu1 %v4592_v42  ;;  %3618 = vmatprep.mubr.bf16.mxu1 %v5470_v43  ;;  %v330_v43 = vld [vmem:[%s6896_s0 + $0x9a8] sm:$0xff]  ;;  %v4417_v15 = vcombine.high %v218_v54, %v226_v55 }
 0x14a   :  { %3588 = vmatprep.subr.bf16.mxu1 %v4577_v44  ;;  %v4529_v3 = vcombine.high %v330_v43, %v338_v63  ;;  %v4528_v9 = vcombine.low %v330_v43, %v338_v63  ;;  %v514_v42 = vld [vmem:[%s6896_s0 + $0xf68] sm:$0xff]  ;;  %v4720_v44 = vcombine.low %v522_v32, %v530_v33  ;;  %v139_v32 = vld [vmem:[%s6896_s0 + $0x3b0] sm:$0xff] }
 0x14b   :  { %3546 = vmatpush1.bf16.msra.mxu0 %v4320_v48  ;;  %v4705_v45 = vcombine.high %v506_v41, %v514_v42  ;;  %v490_v48 = vld [vmem:[%s6896_s0 + $0xea8] sm:$0xff]  ;;  %v147_v33 = vld [vmem:[%s6896_s0 + $0x3f0] sm:$0xff] }
 0x14c   :  { %3547 = vmatprep.subr.bf16.mxu0 %v4305_v50  ;;  %v4448_v50 = vcombine.low %v250_v39, %v258_v12  ;;  %v202_v43 = vld [vmem:[%s6896_s0 + $0x5a8] sm:$0xff]  ;;  %v4339_v39 = vcombine.high %v139_v32, %v147_v33 }
 0x14d   :  { %3589 = vmatpush1.bf16.msra.mxu1 %v4576_v49  ;;  %v498_v49 = vld [vmem:[%s6896_s0 + $0xee8] sm:$0xff] }
 0x14e   :  { %3590 = vmatprep.subr.bf16.mxu1 %v4561_v51  ;;  %v4704_v51 = vcombine.low %v506_v41, %v514_v42  ;;  %v4689_v53 = vcombine.high %v490_v48, %v498_v49  ;;  %v210_v63 = vld [vmem:[%s6896_s0 + $0x5e8] sm:$0xff]  ;;  %v123_v41 = vld [vmem:[%s6896_s0 + $0x330] sm:$0xff] }
 0x14f   :  { %3548 = vmatpush1.bf16.msra.mxu0 %v4304_v57  ;;  %v474_v57 = vld [vmem:[%s6896_s0 + $0xe28] sm:$0xff]  ;;  %v4401_v4 = vcombine.high %v202_v43, %v210_v63  ;;  %v131_v42 = vld [vmem:[%s6896_s0 + $0x370] sm:$0xff] }
 0x150   :  { %3549 = vmatprep.subr.bf16.mxu0 %v4289_v60  ;;  %v4432_v60 = vcombine.low %v234_v46, %v242_v47  ;;  %v186_v6 = vld [vmem:[%s6896_s0 + $0x528] sm:$0xff]  ;;  %v4323_v46 = vcombine.high %v123_v41, %v131_v42 }
 0x151   :  { %3591 = vmatpush1.bf16.msra.mxu1 %v4560_v58  ;;  %v482_v58 = vld [vmem:[%s6896_s0 + $0xe68] sm:$0xff] }
 0x152   :  { %3592 = vmatprep.subr.bf16.mxu1 %v4545_v61  ;;  %v4688_v61 = vcombine.low %v490_v48, %v498_v49  ;;  %v4673_v62 = vcombine.high %v474_v57, %v482_v58  ;;  %v194_v7 = vld [vmem:[%s6896_s0 + $0x568] sm:$0xff]  ;;  %v107_v48 = vld [vmem:[%s6896_s0 + $0x2b0] sm:$0xff] }
 0x153   :  { %3550 = vmatpush1.bf16.msra.mxu0 %v4288_v0  ;;  %v458_v0 = vld [vmem:[%s6896_s0 + $0xda8] sm:$0xff]  ;;  %v4385_v13 = vcombine.high %v186_v6, %v194_v7  ;;  %v115_v49 = vld [vmem:[%s6896_s0 + $0x2f0] sm:$0xff] }
 0x154   :  { %3551 = vmatprep.subr.bf16.mxu0 %v4273_v2  ;;  %v4416_v2 = vcombine.low %v218_v54, %v226_v55  ;;  %v170_v16 = vld [vmem:[%s6896_s0 + $0x4a8] sm:$0xff]  ;;  %v4307_v54 = vcombine.high %v107_v48, %v115_v49 }
 0x155   :  { %3593 = vmatpush1.bf16.msra.mxu1 %v4544_v1  ;;  %v466_v1 = vld [vmem:[%s6896_s0 + $0xde8] sm:$0xff] }
 0x156   :  { %3594 = vmatprep.subr.bf16.mxu1 %v4529_v3  ;;  %v4672_v3 = vcombine.low %v474_v57, %v482_v58  ;;  %v4657_v5 = vcombine.high %v458_v0, %v466_v1  ;;  %v178_v17 = vld [vmem:[%s6896_s0 + $0x4e8] sm:$0xff]  ;;  %v99_v57 = vld [vmem:[%s6896_s0 + $0x270] sm:$0xff] }
 0x157   :  { %3552 = vmatpush1.bf16.msra.mxu0 %v4272_v8  ;;  %v442_v8 = vld [vmem:[%s6896_s0 + $0xd28] sm:$0xff]  ;;  %v4369_v22 = vcombine.high %v170_v16, %v178_v17  ;;  %v347_v58 = vld [vmem:[%s6896_s0 + $0xa30] sm:$0xff] }
 0x158   :  { %3553 = vmatprep.subr.bf16.mxu0 %v4257_v10  ;;  %v4400_v10 = vcombine.low %v202_v43, %v210_v63  ;;  %v154_v24 = vld [vmem:[%s6896_s0 + $0x428] sm:$0xff] }
 0x159   :  { %3595 = vmatpush1.bf16.msra.mxu1 %v4528_v9  ;;  %v450_v9 = vld [vmem:[%s6896_s0 + $0xd68] sm:$0xff] }
 0x15a   :  { %3596 = vmatprep.subr.bf16.mxu1 %v4513_v11  ;;  %v4656_v11 = vcombine.low %v458_v0, %v466_v1  ;;  %v4641_v14 = vcombine.high %v442_v8, %v450_v9  ;;  %v162_v25 = vld [vmem:[%s6896_s0 + $0x468] sm:$0xff]  ;;  %v75_v0 = vld [vmem:[%s6896_s0 + $0x1b0] sm:$0xff] }
 0x15b   :  { %3554 = vmatpush1.bf16.msra.mxu0 %v4256_v18  ;;  %v426_v18 = vld [vmem:[%s6896_s0 + $0xca8] sm:$0xff]  ;;  %v4353_v30 = vcombine.high %v154_v24, %v162_v25  ;;  %v83_v1 = vld [vmem:[%s6896_s0 + $0x1f0] sm:$0xff] }
 0x15c   :  { %3555 = vmatprep.subr.bf16.mxu0 %v4241_v20  ;;  %v4384_v20 = vcombine.low %v186_v6, %v194_v7  ;;  %v4275_v6 = vcombine.high %v75_v0, %v83_v1 }
 0x15d   :  { %3597 = vmatpush1.bf16.msra.mxu1 %v4512_v19  ;;  %v434_v19 = vld [vmem:[%s6896_s0 + $0xce8] sm:$0xff] }
 0x15e   :  { %3598 = vmatprep.subr.bf16.mxu1 %v4497_v21  ;;  %v4640_v21 = vcombine.low %v442_v8, %v450_v9  ;;  %v4625_v23 = vcombine.high %v426_v18, %v434_v19  ;;  %v59_v8 = vld [vmem:[%s6896_s0 + $0x130] sm:$0xff] }
 0x15f   :  { %3556 = vmatpush1.bf16.msra.mxu0 %v4240_v26  ;;  %v410_v26 = vld [vmem:[%s6896_s0 + $0xc28] sm:$0xff]  ;;  %v67_v9 = vld [vmem:[%s6896_s0 + $0x170] sm:$0xff] }
 0x160   :  { %3557 = vmatprep.subr.bf16.mxu0 %v4225_v28  ;;  %v4368_v28 = vcombine.low %v170_v16, %v178_v17  ;;  %v4259_v16 = vcombine.high %v59_v8, %v67_v9 }
 0x161   :  { %3599 = vmatpush1.bf16.msra.mxu1 %v4496_v27  ;;  %v418_v27 = vld [vmem:[%s6896_s0 + $0xc68] sm:$0xff] }
 0x162   :  { %3600 = vmatprep.subr.bf16.mxu1 %v4481_v29  ;;  %v4624_v29 = vcombine.low %v426_v18, %v434_v19  ;;  %v4609_v31 = vcombine.high %v410_v26, %v418_v27  ;;  %v43_v18 = vld [vmem:[%s6896_s0 + $0xb0] sm:$0xff] }
 0x163   :  { %3558 = vmatpush1.bf16.msra.mxu0 %v4224_v34  ;;  %v395_v34 = vld [vmem:[%s6896_s0 + $0xbb0] sm:$0xff] }
 0x164   :  { %3559 = vmatprep.subr.bf16.mxu0 %v4465_v36  ;;  %v4352_v36 = vcombine.low %v154_v24, %v162_v25  ;;  %v51_v19 = vld [vmem:[%s6896_s0 + $0xf0] sm:$0xff] }
 0x165   :  { %3601 = vmatpush1.bf16.msra.mxu1 %v4480_v35  ;;  %v403_v35 = vld [vmem:[%s6896_s0 + $0xbf0] sm:$0xff]  ;;  %v4243_v24 = vcombine.high %v43_v18, %v51_v19 }
 0x166   :  { %3602 = vmatprep.subr.bf16.mxu1 %v4721_v37  ;;  %v4608_v37 = vcombine.low %v410_v26, %v418_v27  ;;  %v4595_v12 = vcombine.high %v395_v34, %v403_v35  ;;  %v27_v26 = vld [vmem:[%s6896_s0 + $0x30] sm:$0xff] }
 0x167   :  { %3560 = vmatpush2.bf16.msra.mxu0 %v4464_v56  ;;  %v379_v56 = vld [vmem:[%s6896_s0 + $0xb30] sm:$0xff] }
 0x168   :  { %3561 = vmatprep.subr.bf16.mxu0 %v4449_v59  ;;  %v4338_v59 = vcombine.low %v139_v32, %v147_v33  ;;  %v35_v27 = vld [vmem:[%s6896_s0 + $0x70] sm:$0xff] }
 0x169   :  { %3603 = vmatpush2.bf16.msra.mxu1 %v4720_v44  ;;  %v387_v44 = vld [vmem:[%s6896_s0 + $0xb70] sm:$0xff]  ;;  %v4227_v32 = vcombine.high %v27_v26, %v35_v27 }
 0x16a   :  { %3604 = vmatprep.subr.bf16.mxu1 %v4705_v45  ;;  %v4594_v45 = vcombine.low %v395_v34, %v403_v35  ;;  %v4579_v47 = vcombine.high %v379_v56, %v387_v44  ;;  %v267_v34 = vld [vmem:[%s6896_s0 + $0x7b0] sm:$0xff] }
 0x16b   :  { %3562 = vmatpush2.bf16.msra.mxu0 %v4448_v50  ;;  %v363_v50 = vld [vmem:[%s6896_s0 + $0xab0] sm:$0xff] }
 0x16c   :  { %3563 = vmatprep.subr.bf16.mxu0 %v4433_v52  ;;  %v4322_v52 = vcombine.low %v123_v41, %v131_v42  ;;  %v275_v35 = vld [vmem:[%s6896_s0 + $0x7f0] sm:$0xff] }
 0x16d   :  { %3605 = vmatpush2.bf16.msra.mxu1 %v4704_v51  ;;  %v371_v51 = vld [vmem:[%s6896_s0 + $0xaf0] sm:$0xff]  ;;  %v4467_v41 = vcombine.high %v267_v34, %v275_v35 }
 0x16e   :  { %3606 = vmatprep.subr.bf16.mxu1 %v4689_v53  ;;  %v4578_v53 = vcombine.low %v379_v56, %v387_v44  ;;  %v4563_v55 = vcombine.high %v363_v50, %v371_v51  ;;  %v251_v56 = vld [vmem:[%s6896_s0 + $0x730] sm:$0xff] }
 0x16f   :  { %3564 = vmatpush2.bf16.msra.mxu0 %v4432_v60  ;;  %v355_v60 = vld [vmem:[%s6896_s0 + $0xa70] sm:$0xff] }
 0x170   :  { %3565 = vmatprep.subr.bf16.mxu0 %v4417_v15  ;;  %v4306_v15 = vcombine.low %v107_v48, %v115_v49  ;;  %v4547_v63 = vcombine.high %v347_v58, %v355_v60  ;;  %v259_v44 = vld [vmem:[%s6896_s0 + $0x770] sm:$0xff] }
 0x171   :  { %3607 = vmatpush2.bf16.msra.mxu1 %v4688_v61  ;;  %v6078_v61 = vld [vmem:[%s6897_s1 + $0xc] ss:$16 sps:$4 sm:$0xff]   ;;  %v4451_v48 = vcombine.high %v251_v56, %v259_v44 }
 0x172   :  { %3608 = vmatprep.subr.bf16.mxu1 %v4673_v62  ;;  %v4562_v62 = vcombine.low %v363_v50, %v371_v51  ;;  %v235_v50 = vld [vmem:[%s6896_s0 + $0x6b0] sm:$0xff] }
 0x173   :  { %3566 = vmatpush2.bf16.msra.mxu0 %v4416_v2  ;;  %v331_v2 = vld [vmem:[%s6896_s0 + $0x9b0] sm:$0xff] }
 0x174   :  { %3567 = vmatprep.subr.bf16.mxu0 %v4401_v4  ;;  %v243_v51 = vld [vmem:[%s6896_s0 + $0x6f0] sm:$0xff] }
 0x175   :  { %3609 = vmatpush2.bf16.msra.mxu1 %v4672_v3  ;;  %v339_v3 = vld [vmem:[%s6896_s0 + $0x9f0] sm:$0xff] }
 0x176   :  { %3610 = vmatprep.subr.bf16.mxu1 %v4657_v5  ;;  %v4546_v5 = vcombine.low %v347_v58, %v355_v60  ;;  %v4531_v7 = vcombine.high %v331_v2, %v339_v3  ;;  %v219_v58 = vld [vmem:[%s6896_s0 + $0x630] sm:$0xff] }
 0x177   :  { %3568 = vmatpush2.bf16.msra.mxu0 %v4400_v10  ;;  %v315_v10 = vld [vmem:[%s6896_s0 + $0x930] sm:$0xff] }
 0x178   :  { %3569 = vmatprep.subr.bf16.mxu0 %v4385_v13  ;;  %v4274_v13 = vcombine.low %v75_v0, %v83_v1  ;;  %v227_v60 = vld [vmem:[%s6896_s0 + $0x670] sm:$0xff] }
 0x179   :  { %3611 = vmatpush2.bf16.msra.mxu1 %v4656_v11  ;;  %v323_v11 = vld [vmem:[%s6896_s0 + $0x970] sm:$0xff]  ;;  %v4419_v0 = vcombine.high %v219_v58, %v227_v60 }
 0x17a   :  { %3612 = vmatprep.subr.bf16.mxu1 %v4641_v14  ;;  %v4530_v14 = vcombine.low %v331_v2, %v339_v3  ;;  %v4515_v17 = vcombine.high %v315_v10, %v323_v11  ;;  %v203_v2 = vld [vmem:[%s6896_s0 + $0x5b0] sm:$0xff] }
 0x17b   :  { %3570 = vmatpush2.bf16.msra.mxu0 %v4384_v20  ;;  %v299_v20 = vld [vmem:[%s6896_s0 + $0x8b0] sm:$0xff] }
 0x17c   :  { %3571 = vmatprep.subr.bf16.mxu0 %v4369_v22  ;;  %v4258_v22 = vcombine.low %v59_v8, %v67_v9  ;;  %v211_v3 = vld [vmem:[%s6896_s0 + $0x5f0] sm:$0xff] }
 0x17d   :  { %3613 = vmatpush2.bf16.msra.mxu1 %v4640_v21  ;;  %v307_v21 = vld [vmem:[%s6896_s0 + $0x8f0] sm:$0xff]  ;;  %v4403_v8 = vcombine.high %v203_v2, %v211_v3 }
 0x17e   :  { %3614 = vmatprep.subr.bf16.mxu1 %v4625_v23  ;;  %v4514_v23 = vcombine.low %v315_v10, %v323_v11  ;;  %v4499_v25 = vcombine.high %v299_v20, %v307_v21  ;;  %v187_v10 = vld [vmem:[%s6896_s0 + $0x530] sm:$0xff] }
 0x17f   :  { %3572 = vmatpush2.bf16.msra.mxu0 %v4368_v28  ;;  %v283_v28 = vld [vmem:[%s6896_s0 + $0x830] sm:$0xff] }
 0x180   :  { %3573 = vmatprep.subr.bf16.mxu0 %v4353_v30  ;;  %v4242_v30 = vcombine.low %v43_v18, %v51_v19  ;;  %v195_v11 = vld [vmem:[%s6896_s0 + $0x570] sm:$0xff] }
 0x181   :  { %3615 = vmatpush2.bf16.msra.mxu1 %v4624_v29  ;;  %v291_v29 = vld [vmem:[%s6896_s0 + $0x870] sm:$0xff]  ;;  %v4387_v18 = vcombine.high %v187_v10, %v195_v11 }
 0x182   :  { %3616 = vmatprep.subr.bf16.mxu1 %v4609_v31  ;;  %v4498_v31 = vcombine.low %v299_v20, %v307_v21  ;;  %v4483_v33 = vcombine.high %v283_v28, %v291_v29  ;;  %v171_v20 = vld [vmem:[%s6896_s0 + $0x4b0] sm:$0xff] }
 0x183   :  { %3574 = vmatpush2.bf16.msra.mxu0 %v4352_v36  ;;  %v523_v36 = vld [vmem:[%s6896_s0 + $0xfb0] sm:$0xff] }
 0x184   :  { %3629 = vmatprep.subr.bf16.mxu0 %v4339_v39  ;;  %v4226_v39 = vcombine.low %v27_v26, %v35_v27  ;;  %v179_v21 = vld [vmem:[%s6896_s0 + $0x4f0] sm:$0xff] }
 0x185   :  { %3617 = vmatpush2.bf16.msra.mxu1 %v4608_v37  ;;  %v531_v37 = vld [vmem:[%s6896_s0 + $0xff0] sm:$0xff]  ;;  %v4371_v26 = vcombine.high %v171_v20, %v179_v21 }
 0x186   :  { %3672 = vmatprep.subr.bf16.mxu1 %v4595_v12  ;;  %3576 = vmatmul.mubr.bf16.vlgmr.msra.gmra.mxu0 %v5650_v38  ;;  %v91_v38 = vld [vmem:[%s6896_s0 + $0x230] sm:$0xff]  ;;  %v4482_v12 = vcombine.low %v283_v28, %v291_v29  ;;  %v4723_v42 = vcombine.high %v523_v36, %v531_v37 }
 0x187   :  { %3630 = vmatpush1.bf16.msra.mxu0 %v4338_v59  ;;  %v4291_v43 = vcombine.high %v91_v38, %v99_v57  ;;  %v4290_v4 = vcombine.low %v91_v38, %v99_v57  ;;  %v507_v59 = vld [vmem:[%s6896_s0 + $0xf30] sm:$0xff]  ;;  %v4435_v38 = vcombine.high %v235_v50, %v243_v51 }
 0x188   :  { %3619 = vmatmul.mubr.bf16.vlgmr.msra.gmra.mxu1 %v5662_v40  ;;  %3631 = vmatprep.subr.bf16.mxu0 %v4323_v46  ;;  %v6066_v40 = vld [vmem:[%s6897_s1 + $0x4] ss:$16 sps:$4 sm:$0xff]   ;;  %v4466_v46 = vcombine.low %v267_v34, %v275_v35 }
 0x189   :  { %3673 = vmatpush1.bf16.msra.mxu1 %v4594_v45  ;;  %3661 = vmatprep.mubr.bf16.mxu0 %v6066_v40  ;;  %v515_v45 = vld [vmem:[%s6896_s0 + $0xf70] sm:$0xff] }
 0x18a   :  { %3674 = vmatprep.subr.bf16.mxu1 %v4579_v47  ;;  %3704 = vmatprep.mubr.bf16.mxu1 %v6078_v61  ;;  %v4722_v47 = vcombine.low %v523_v36, %v531_v37  ;;  %v4707_v49 = vcombine.high %v507_v59, %v515_v45  ;;  %v155_v28 = vld [vmem:[%s6896_s0 + $0x430] sm:$0xff]  ;;  %v140_v36 = vld [vmem:[%s6896_s0 + $0x3b8] sm:$0xff] }
 0x18b   :  { %3632 = vmatpush1.bf16.msra.mxu0 %v4322_v52  ;;  %v491_v52 = vld [vmem:[%s6896_s0 + $0xeb0] sm:$0xff]  ;;  %v148_v37 = vld [vmem:[%s6896_s0 + $0x3f8] sm:$0xff] }
 0x18c   :  { %3633 = vmatprep.subr.bf16.mxu0 %v4307_v54  ;;  %v4450_v54 = vcombine.low %v251_v56, %v259_v44  ;;  %v163_v29 = vld [vmem:[%s6896_s0 + $0x470] sm:$0xff]  ;;  %v4341_v56 = vcombine.high %v140_v36, %v148_v37 }
 0x18d   :  { %3675 = vmatpush1.bf16.msra.mxu1 %v4578_v53  ;;  %v499_v53 = vld [vmem:[%s6896_s0 + $0xef0] sm:$0xff]  ;;  %v4355_v34 = vcombine.high %v155_v28, %v163_v29 }
 0x18e   :  { %3676 = vmatprep.subr.bf16.mxu1 %v4563_v55  ;;  %v4706_v55 = vcombine.low %v507_v59, %v515_v45  ;;  %v4691_v57 = vcombine.high %v491_v52, %v499_v53  ;;  %v124_v59 = vld [vmem:[%s6896_s0 + $0x338] sm:$0xff] }
 0x18f   :  { %3634 = vmatpush1.bf16.msra.mxu0 %v4306_v15  ;;  %v475_v15 = vld [vmem:[%s6896_s0 + $0xe30] sm:$0xff]  ;;  %v132_v45 = vld [vmem:[%s6896_s0 + $0x378] sm:$0xff] }
 0x190   :  { %3635 = vmatprep.subr.bf16.mxu0 %v4291_v43  ;;  %v4434_v43 = vcombine.low %v235_v50, %v243_v51  ;;  %v4325_v50 = vcombine.high %v124_v59, %v132_v45 }
 0x191   :  { %3677 = vmatpush1.bf16.msra.mxu1 %v4562_v62  ;;  %v483_v62 = vld [vmem:[%s6896_s0 + $0xe70] sm:$0xff] }
 0x192   :  { %3678 = vmatprep.subr.bf16.mxu1 %v4547_v63  ;;  %v4690_v63 = vcombine.low %v491_v52, %v499_v53  ;;  %v4675_v1 = vcombine.high %v475_v15, %v483_v62  ;;  %v108_v52 = vld [vmem:[%s6896_s0 + $0x2b8] sm:$0xff] }
 0x193   :  { %3636 = vmatpush1.bf16.msra.mxu0 %v4290_v4  ;;  %v459_v4 = vld [vmem:[%s6896_s0 + $0xdb0] sm:$0xff]  ;;  %v116_v53 = vld [vmem:[%s6896_s0 + $0x2f8] sm:$0xff] }
 0x194   :  { %3637 = vmatprep.subr.bf16.mxu0 %v4275_v6  ;;  %v4418_v6 = vcombine.low %v219_v58, %v227_v60  ;;  %v4324_v58 = vcombine.low %v124_v59, %v132_v45 }
 0x195   :  { %3679 = vmatpush1.bf16.msra.mxu1 %v4546_v5  ;;  %v467_v5 = vld [vmem:[%s6896_s0 + $0xdf0] sm:$0xff] }
 0x196   :  { %3680 = vmatprep.subr.bf16.mxu1 %v4531_v7  ;;  %v4674_v7 = vcombine.low %v475_v15, %v483_v62  ;;  %v4659_v9 = vcombine.high %v459_v4, %v467_v5  ;;  %v4309_v15 = vcombine.high %v108_v52, %v116_v53 }
 0x197   :  { %3638 = vmatpush1.bf16.msra.mxu0 %v4274_v13  ;;  %v443_v13 = vld [vmem:[%s6896_s0 + $0xd30] sm:$0xff] }
 0x198   :  { %3639 = vmatprep.subr.bf16.mxu0 %v4259_v16  ;;  %v4402_v16 = vcombine.low %v203_v2, %v211_v3  ;;  %v4308_v2 = vcombine.low %v108_v52, %v116_v53 }
 0x199   :  { %3681 = vmatpush1.bf16.msra.mxu1 %v4530_v14  ;;  %v451_v14 = vld [vmem:[%s6896_s0 + $0xd70] sm:$0xff] }
 0x19a   :  { %3682 = vmatprep.subr.bf16.mxu1 %v4515_v17  ;;  %v4658_v17 = vcombine.low %v459_v4, %v467_v5  ;;  %v4643_v19 = vcombine.high %v443_v13, %v451_v14 }
 0x19b   :  { %3640 = vmatpush1.bf16.msra.mxu0 %v4258_v22  ;;  %v427_v22 = vld [vmem:[%s6896_s0 + $0xcb0] sm:$0xff] }
 0x19c   :  { %3641 = vmatprep.subr.bf16.mxu0 %v4243_v24  ;;  %v4386_v24 = vcombine.low %v187_v10, %v195_v11 }
 0x19d   :  { %3683 = vmatpush1.bf16.msra.mxu1 %v4514_v23  ;;  %v435_v23 = vld [vmem:[%s6896_s0 + $0xcf0] sm:$0xff] }
 0x19e   :  { %3684 = vmatprep.subr.bf16.mxu1 %v4499_v25  ;;  %v4642_v25 = vcombine.low %v443_v13, %v451_v14  ;;  %v4627_v27 = vcombine.high %v427_v22, %v435_v23  ;;  %v60_v13 = vld [vmem:[%s6896_s0 + $0x138] sm:$0xff] }
 0x19f   :  { %3642 = vmatpush1.bf16.msra.mxu0 %v4242_v30  ;;  %v411_v30 = vld [vmem:[%s6896_s0 + $0xc30] sm:$0xff]  ;;  %v68_v14 = vld [vmem:[%s6896_s0 + $0x178] sm:$0xff] }
 0x1a0   :  { %3643 = vmatprep.subr.bf16.mxu0 %v4227_v32  ;;  %v4370_v32 = vcombine.low %v171_v20, %v179_v21  ;;  %v4261_v20 = vcombine.high %v60_v13, %v68_v14 }
 0x1a1   :  { %3685 = vmatpush1.bf16.msra.mxu1 %v4498_v31  ;;  %v419_v31 = vld [vmem:[%s6896_s0 + $0xc70] sm:$0xff] }
 0x1a2   :  { %3686 = vmatprep.subr.bf16.mxu1 %v4483_v33  ;;  %v4626_v33 = vcombine.low %v427_v22, %v435_v23  ;;  %v4611_v35 = vcombine.high %v411_v30, %v419_v31  ;;  %v44_v22 = vld [vmem:[%s6896_s0 + $0xb8] sm:$0xff] }
 0x1a3   :  { %3644 = vmatpush1.bf16.msra.mxu0 %v4226_v39  ;;  %v396_v39 = vld [vmem:[%s6896_s0 + $0xbb8] sm:$0xff] }
 0x1a4   :  { %3645 = vmatprep.subr.bf16.mxu0 %v4467_v41  ;;  %v4354_v41 = vcombine.low %v155_v28, %v163_v29  ;;  %v52_v23 = vld [vmem:[%s6896_s0 + $0xf8] sm:$0xff] }
 0x1a5   :  { %3687 = vmatpush1.bf16.msra.mxu1 %v4482_v12  ;;  %v404_v12 = vld [vmem:[%s6896_s0 + $0xbf8] sm:$0xff]  ;;  %v4245_v28 = vcombine.high %v44_v22, %v52_v23 }
 0x1a6   :  { %3688 = vmatprep.subr.bf16.mxu1 %v4723_v42  ;;  %v4610_v42 = vcombine.low %v411_v30, %v419_v31  ;;  %v4597_v44 = vcombine.high %v396_v39, %v404_v12  ;;  %v28_v30 = vld [vmem:[%s6896_s0 + $0x38] sm:$0xff] }
 0x1a7   :  { %3646 = vmatpush2.bf16.msra.mxu0 %v4466_v46  ;;  %v380_v46 = vld [vmem:[%s6896_s0 + $0xb38] sm:$0xff] }
 0x1a8   :  { %3647 = vmatprep.subr.bf16.mxu0 %v4451_v48  ;;  %v4340_v48 = vcombine.low %v140_v36, %v148_v37  ;;  %v36_v31 = vld [vmem:[%s6896_s0 + $0x78] sm:$0xff] }
 0x1a9   :  { %3689 = vmatpush2.bf16.msra.mxu1 %v4722_v47  ;;  %v388_v47 = vld [vmem:[%s6896_s0 + $0xb78] sm:$0xff]  ;;  %v4229_v36 = vcombine.high %v28_v30, %v36_v31 }
 0x1aa   :  { %3690 = vmatprep.subr.bf16.mxu1 %v4707_v49  ;;  %v4596_v49 = vcombine.low %v396_v39, %v404_v12  ;;  %v4581_v51 = vcombine.high %v380_v46, %v388_v47  ;;  %v4580_v60 = vcombine.low %v380_v46, %v388_v47  ;;  %v268_v39 = vld [vmem:[%s6896_s0 + $0x7b8] sm:$0xff] }
 0x1ab   :  { %3648 = vmatpush2.bf16.msra.mxu0 %v4450_v54  ;;  %v6258_v54 = vld [vmem:[%s6897_s1] ss:$16 sps:$4 sm:$0xff]   ;;  %v276_v12 = vld [vmem:[%s6896_s0 + $0x7f8] sm:$0xff] }
 0x1ac   :  { %3649 = vmatprep.subr.bf16.mxu0 %v4435_v38  ;;  %v372_v38 = vld [vmem:[%s6896_s0 + $0xaf8] sm:$0xff]  ;;  %v4469_v59 = vcombine.high %v268_v39, %v276_v12 }
 0x1ad   :  { %3691 = vmatpush2.bf16.msra.mxu1 %v4706_v55  ;;  %v364_v55 = vld [vmem:[%s6896_s0 + $0xab8] sm:$0xff] }
 0x1ae   :  { %3692 = vmatprep.subr.bf16.mxu1 %v4691_v57  ;;  %v6270_v57 = vld [vmem:[%s6897_s1 + $0x8] ss:$16 sps:$4 sm:$0xff]   ;;  %v4565_v62 = vcombine.high %v364_v55, %v372_v38  ;;  %v4564_v3 = vcombine.low %v364_v55, %v372_v38 }
 0x1af   :  { %3650 = vmatpush2.bf16.msra.mxu0 %v4434_v43  ;;  %v92_v43 = vld [vmem:[%s6896_s0 + $0x238] sm:$0xff] }
 0x1b0   :  { %3651 = vmatprep.subr.bf16.mxu0 %v4419_v0  ;;  %v348_v0 = vld [vmem:[%s6896_s0 + $0xa38] sm:$0xff] }
 0x1b1   :  { %3693 = vmatpush2.bf16.msra.mxu1 %v4690_v63  ;;  %v100_v63 = vld [vmem:[%s6896_s0 + $0x278] sm:$0xff] }
 0x1b2   :  { %3694 = vmatprep.subr.bf16.mxu1 %v4675_v1  ;;  %v356_v1 = vld [vmem:[%s6896_s0 + $0xa78] sm:$0xff]  ;;  %v4293_v4 = vcombine.high %v92_v43, %v100_v63 }
 0x1b3   :  { %3652 = vmatpush2.bf16.msra.mxu0 %v4418_v6  ;;  %v4549_v5 = vcombine.high %v348_v0, %v356_v1  ;;  %v84_v6 = vld [vmem:[%s6896_s0 + $0x1f8] sm:$0xff] }
 0x1b4   :  { %3653 = vmatprep.subr.bf16.mxu0 %v4403_v8  ;;  %v4292_v8 = vcombine.low %v92_v43, %v100_v63  ;;  %v252_v46 = vld [vmem:[%s6896_s0 + $0x738] sm:$0xff] }
 0x1b5   :  { %3695 = vmatpush2.bf16.msra.mxu1 %v4674_v7  ;;  %v340_v7 = vld [vmem:[%s6896_s0 + $0x9f8] sm:$0xff] }
 0x1b6   :  { %3696 = vmatprep.subr.bf16.mxu1 %v4659_v9  ;;  %v4548_v9 = vcombine.low %v348_v0, %v356_v1  ;;  %v260_v47 = vld [vmem:[%s6896_s0 + $0x778] sm:$0xff] }
 0x1b7   :  { %3654 = vmatpush2.bf16.msra.mxu0 %v4402_v16  ;;  %v316_v16 = vld [vmem:[%s6896_s0 + $0x938] sm:$0xff]  ;;  %v4453_v52 = vcombine.high %v252_v46, %v260_v47 }
 0x1b8   :  { %3655 = vmatprep.subr.bf16.mxu0 %v4387_v18  ;;  %v236_v55 = vld [vmem:[%s6896_s0 + $0x6b8] sm:$0xff] }
 0x1b9   :  { %3697 = vmatpush2.bf16.msra.mxu1 %v4658_v17  ;;  %v324_v17 = vld [vmem:[%s6896_s0 + $0x978] sm:$0xff] }
 0x1ba   :  { %3698 = vmatprep.subr.bf16.mxu1 %v4643_v19  ;;  %v4517_v21 = vcombine.high %v316_v16, %v324_v17  ;;  %v244_v38 = vld [vmem:[%s6896_s0 + $0x6f8] sm:$0xff] }
 0x1bb   :  { %3656 = vmatpush2.bf16.msra.mxu0 %v4386_v24  ;;  %v300_v24 = vld [vmem:[%s6896_s0 + $0x8b8] sm:$0xff]  ;;  %v4437_v43 = vcombine.high %v236_v55, %v244_v38 }
 0x1bc   :  { %3657 = vmatprep.subr.bf16.mxu0 %v4371_v26  ;;  %v4260_v26 = vcombine.low %v60_v13, %v68_v14  ;;  %v220_v0 = vld [vmem:[%s6896_s0 + $0x638] sm:$0xff] }
 0x1bd   :  { %3699 = vmatpush2.bf16.msra.mxu1 %v4642_v25  ;;  %v308_v25 = vld [vmem:[%s6896_s0 + $0x8f8] sm:$0xff] }
 0x1be   :  { %3700 = vmatprep.subr.bf16.mxu1 %v4627_v27  ;;  %v4516_v27 = vcombine.low %v316_v16, %v324_v17  ;;  %v4501_v29 = vcombine.high %v300_v24, %v308_v25  ;;  %v228_v1 = vld [vmem:[%s6896_s0 + $0x678] sm:$0xff] }
 0x1bf   :  { %3658 = vmatpush2.bf16.msra.mxu0 %v4370_v32  ;;  %v284_v32 = vld [vmem:[%s6896_s0 + $0x838] sm:$0xff] }
 0x1c0   :  { %3659 = vmatprep.subr.bf16.mxu0 %v4355_v34  ;;  %v4244_v34 = vcombine.low %v44_v22, %v52_v23  ;;  %v188_v16 = vld [vmem:[%s6896_s0 + $0x538] sm:$0xff] }
 0x1c1   :  { %3701 = vmatpush2.bf16.msra.mxu1 %v4626_v33  ;;  %v292_v33 = vld [vmem:[%s6896_s0 + $0x878] sm:$0xff] }
 0x1c2   :  { %3702 = vmatprep.subr.bf16.mxu1 %v4611_v35  ;;  %v4500_v35 = vcombine.low %v300_v24, %v308_v25  ;;  %v4485_v37 = vcombine.high %v284_v32, %v292_v33  ;;  %v196_v17 = vld [vmem:[%s6896_s0 + $0x578] sm:$0xff] }
 0x1c3   :  { %3660 = vmatpush2.bf16.msra.mxu0 %v4354_v41  ;;  %v524_v41 = vld [vmem:[%s6896_s0 + $0xfb8] sm:$0xff]  ;;  %v4389_v22 = vcombine.high %v188_v16, %v196_v17 }
 0x1c4   :  { %3715 = vmatprep.subr.bf16.mxu0 %v4341_v56  ;;  %v4228_v56 = vcombine.low %v28_v30, %v36_v31  ;;  %v172_v24 = vld [vmem:[%s6896_s0 + $0x4b8] sm:$0xff] }
 0x1c5   :  { %3703 = vmatpush2.bf16.msra.mxu1 %v4610_v42  ;;  %v532_v42 = vld [vmem:[%s6896_s0 + $0xff8] sm:$0xff] }
 0x1c6   :  { %3758 = vmatprep.subr.bf16.mxu1 %v4597_v44  ;;  %3662 = vmatmul.mubr.bf16.vlgmr.msra.gmra.mxu0 %v6258_v54  ;;  %v4484_v44 = vcombine.low %v284_v32, %v292_v33  ;;  %v4725_v45 = vcombine.high %v524_v41, %v532_v42  ;;  %v180_v25 = vld [vmem:[%s6896_s0 + $0x4f8] sm:$0xff] }
 0x1c7   :  { %3716 = vmatpush1.bf16.msra.mxu0 %v4340_v48  ;;  %3747 = vmatprep.mubr.bf16.mxu0 %v6066_v40  ;;  %v76_v40 = vld [vmem:[%s6896_s0 + $0x1b8] sm:$0xff]  ;;  %v4373_v30 = vcombine.high %v172_v24, %v180_v25 }
 0x1c8   :  { %3705 = vmatmul.mubr.bf16.vlgmr.msra.gmra.mxu1 %v6270_v57  ;;  %3717 = vmatprep.subr.bf16.mxu0 %v4325_v50  ;;  %v4277_v10 = vcombine.high %v76_v40, %v84_v6  ;;  %v4276_v18 = vcombine.low %v76_v40, %v84_v6  ;;  %v508_v48 = vld [vmem:[%s6896_s0 + $0xf38] sm:$0xff]  ;;  %v4468_v50 = vcombine.low %v268_v39, %v276_v12 }
 0x1c9   :  { %3759 = vmatpush1.bf16.msra.mxu1 %v4596_v49  ;;  %3790 = vmatprep.mubr.bf16.mxu1 %v6078_v61  ;;  %v332_v61 = vld [vmem:[%s6896_s0 + $0x9b8] sm:$0xff]  ;;  %v4421_v40 = vcombine.high %v220_v0, %v228_v1 }
 0x1ca   :  { %3760 = vmatprep.subr.bf16.mxu1 %v4581_v51  ;;  %v4533_v11 = vcombine.high %v332_v61, %v340_v7  ;;  %v4532_v19 = vcombine.low %v332_v61, %v340_v7  ;;  %v516_v49 = vld [vmem:[%s6896_s0 + $0xf78] sm:$0xff]  ;;  %v4724_v51 = vcombine.low %v524_v41, %v532_v42 }
 0x1cb   :  { %3718 = vmatpush1.bf16.msra.mxu0 %v4324_v58  ;;  %v4709_v53 = vcombine.high %v508_v48, %v516_v49  ;;  %v492_v58 = vld [vmem:[%s6896_s0 + $0xeb8] sm:$0xff] }
 0x1cc   :  { %3719 = vmatprep.subr.bf16.mxu0 %v4309_v15  ;;  %v4452_v15 = vcombine.low %v252_v46, %v260_v47  ;;  %v204_v61 = vld [vmem:[%s6896_s0 + $0x5b8] sm:$0xff]  ;;  %v3190_v46 = vpop.f32.mrf.mxu1 }
 0x1cd   :  { %3761 = vmatpush1.bf16.msra.mxu1 %v4580_v60  ;;  %v500_v60 = vld [vmem:[%s6896_s0 + $0xef8] sm:$0xff] }
 0x1ce   :  { %3762 = vmatprep.subr.bf16.mxu1 %v4565_v62  ;;  %v4708_v62 = vcombine.low %v508_v48, %v516_v49  ;;  %v4693_v63 = vcombine.high %v492_v58, %v500_v60  ;;  %v212_v7 = vld [vmem:[%s6896_s0 + $0x5f8] sm:$0xff]  ;;  %v3192_v48 = vpop.f32.mrf.mxu1 }
 0x1cf   :  { %3720 = vmatpush1.bf16.msra.mxu0 %v4308_v2  ;;  %v476_v2 = vld [vmem:[%s6896_s0 + $0xe38] sm:$0xff]  ;;  %v4405_v13 = vcombine.high %v204_v61, %v212_v7 }
 0x1d0   :  { %3721 = vmatprep.subr.bf16.mxu0 %v4293_v4  ;;  %v4436_v4 = vcombine.low %v236_v55, %v244_v38  ;;  %v156_v32 = vld [vmem:[%s6896_s0 + $0x438] sm:$0xff]  ;;  %v3194_v49 = vpop.f32.mrf.mxu1 }
 0x1d1   :  { %3763 = vmatpush1.bf16.msra.mxu1 %v4564_v3  ;;  %v484_v3 = vld [vmem:[%s6896_s0 + $0xe78] sm:$0xff] }
 0x1d2   :  { %3764 = vmatprep.subr.bf16.mxu1 %v4549_v5  ;;  %v4692_v5 = vcombine.low %v492_v58, %v500_v60  ;;  %v4677_v6 = vcombine.high %v476_v2, %v484_v3  ;;  %v164_v33 = vld [vmem:[%s6896_s0 + $0x478] sm:$0xff] }
 0x1d3   :  { %3722 = vmatpush1.bf16.msra.mxu0 %v4292_v8  ;;  %v460_v8 = vld [vmem:[%s6896_s0 + $0xdb8] sm:$0xff]  ;;  %v4357_v39 = vcombine.high %v156_v32, %v164_v33  ;;  %v4356_v41 = vcombine.low %v156_v32, %v164_v33 }
 0x1d4   :  { %3723 = vmatprep.subr.bf16.mxu0 %v4277_v10  ;;  %v4420_v10 = vcombine.low %v220_v0, %v228_v1 }
 0x1d5   :  { %3765 = vmatpush1.bf16.msra.mxu1 %v4548_v9  ;;  %v468_v9 = vld [vmem:[%s6896_s0 + $0xdf8] sm:$0xff] }
 0x1d6   :  { %3766 = vmatprep.subr.bf16.mxu1 %v4533_v11  ;;  %v4676_v11 = vcombine.low %v476_v2, %v484_v3  ;;  %v4661_v14 = vcombine.high %v460_v8, %v468_v9 }
 0x1d7   :  { %3724 = vmatpush1.bf16.msra.mxu0 %v4276_v18  ;;  %v444_v18 = vld [vmem:[%s6896_s0 + $0xd38] sm:$0xff] }
 0x1d8   :  { %3725 = vmatprep.subr.bf16.mxu0 %v4261_v20  ;;  %v4404_v20 = vcombine.low %v204_v61, %v212_v7 }
 0x1d9   :  { %3767 = vmatpush1.bf16.msra.mxu1 %v4532_v19  ;;  %v452_v19 = vld [vmem:[%s6896_s0 + $0xd78] sm:$0xff] }
 0x1da   :  { %3768 = vmatprep.subr.bf16.mxu1 %v4517_v21  ;;  %v4660_v21 = vcombine.low %v460_v8, %v468_v9  ;;  %v4645_v23 = vcombine.high %v444_v18, %v452_v19 }
 0x1db   :  { %3726 = vmatpush1.bf16.msra.mxu0 %v4260_v26  ;;  %v428_v26 = vld [vmem:[%s6896_s0 + $0xcb8] sm:$0xff] }
 0x1dc   :  { %3727 = vmatprep.subr.bf16.mxu0 %v4245_v28  ;;  %v4388_v28 = vcombine.low %v188_v16, %v196_v17 }
 0x1dd   :  { %3769 = vmatpush1.bf16.msra.mxu1 %v4516_v27  ;;  %v436_v27 = vld [vmem:[%s6896_s0 + $0xcf8] sm:$0xff] }
 0x1de   :  { %3770 = vmatprep.subr.bf16.mxu1 %v4501_v29  ;;  %v4644_v29 = vcombine.low %v444_v18, %v452_v19  ;;  %v4629_v31 = vcombine.high %v428_v26, %v436_v27 }
 0x1df   :  { %3728 = vmatpush1.bf16.msra.mxu0 %v4244_v34  ;;  %v412_v34 = vld [vmem:[%s6896_s0 + $0xc38] sm:$0xff] }
 0x1e0   :  { %3729 = vmatprep.subr.bf16.mxu0 %v4229_v36  ;;  %v4372_v36 = vcombine.low %v172_v24, %v180_v25 }
 0x1e1   :  { %3771 = vmatpush1.bf16.msra.mxu1 %v4500_v35  ;;  %v420_v35 = vld [vmem:[%s6896_s0 + $0xc78] sm:$0xff] }
 0x1e2   :  { %3772 = vmatprep.subr.bf16.mxu1 %v4485_v37  ;;  %v4628_v37 = vcombine.low %v428_v26, %v436_v27  ;;  %v4613_v12 = vcombine.high %v412_v34, %v420_v35  ;;  %v4612_v42 = vcombine.low %v412_v34, %v420_v35 }
 0x1e3   :  { %3730 = vmatpush1.bf16.msra.mxu0 %v4228_v56  ;;  %v4779_v56 = vmov 0  }
 0x1e4   :  { %3731 = vmatprep.subr.bf16.mxu0 %v4469_v59  ;;  %4760 = vset.pattern.permute.xlu1 %v4779_v56  ;;  %v4018_v59 = vld [vmem:[%s6899_s3] sm:$0xff] }
 0x1e5   :  { %3773 = vmatpush1.bf16.msra.mxu1 %v4484_v44  ;;  %v3975_v44 = vld [vmem:[%s6898_s2 + $0x8] sm:$0xff]  ;;  %4759 = vset.pattern.permute.xlu0 %v4779_v56 }
 0x1e6   :  { %3774 = vmatprep.subr.bf16.mxu1 %v4725_v45  ;;  %3983 = vperm.xlu1 %4760, %v3975_v44   ;;  %v3147_v45 = vpop.f32.mrf.mxu0 }
 0x1e7   :  { %3732 = vmatpush2.bf16.msra.mxu0 %v4468_v50  ;;  %v3196_v50 = vpop.f32.mrf.mxu1 }
 0x1e8   :  { %3733 = vmatprep.subr.bf16.mxu0 %v4453_v52  ;;  %v3149_v47 = vpop.f32.mrf.mxu0 }
 0x1e9   :  { %3775 = vmatpush2.bf16.msra.mxu1 %v4724_v51  ;;  %v3276_v52 = vpop.f32.mrf.mxu1  ;;  %v6441_v16 = vadd.f32 %v3192_v48, %v3149_v47 }
 0x1ea   :  { %3776 = vmatprep.subr.bf16.mxu1 %v4709_v53  ;;  %4022 = vperm.xlu1 %4760, %v4018_v59  }
 0x1eb   :  { %3734 = vmatpush2.bf16.msra.mxu0 %v4452_v15  ;;  %v3278_v55 = vpop.f32.mrf.mxu1 }
 0x1ec   :  { %3735 = vmatprep.subr.bf16.mxu0 %v4437_v43 }
 0x1ed   :  { %3777 = vmatpush2.bf16.msra.mxu1 %v4708_v62  ;;  %v3280_v58 = vpop.f32.mrf.mxu1 }
 0x1ee   :  { %3778 = vmatprep.subr.bf16.mxu1 %v4693_v63 }
 0x1ef   :  { %3736 = vmatpush2.bf16.msra.mxu0 %v4436_v4  ;;  %v3282_v15 = vpop.f32.mrf.mxu1 }
 0x1f0   :  { %3737 = vmatprep.subr.bf16.mxu0 %v4421_v40 }
 0x1f1   :  { %3779 = vmatpush2.bf16.msra.mxu1 %v4692_v5  ;;  %v3362_v43 = vpop.f32.mrf.mxu1 }
 0x1f2   :  { %3780 = vmatprep.subr.bf16.mxu1 %v4677_v6 }
 0x1f3   :  { %3738 = vmatpush2.bf16.msra.mxu0 %v4420_v10  ;;  %v3364_v0 = vpop.f32.mrf.mxu1 }
 0x1f4   :  { %3739 = vmatprep.subr.bf16.mxu0 %v4405_v13 }
 0x1f5   :  { %3781 = vmatpush2.bf16.msra.mxu1 %v4676_v11  ;;  %v3366_v2 = vpop.f32.mrf.mxu1 }
 0x1f6   :  { %3782 = vmatprep.subr.bf16.mxu1 %v4661_v14  ;;  %v6439_v14 = vadd.f32 %v3190_v46, %v3147_v45 }
 0x1f7   :  { %3740 = vmatpush2.bf16.msra.mxu0 %v4404_v20  ;;  %v3368_v4 = vpop.f32.mrf.mxu1 }
 0x1f8   :  { %3741 = vmatprep.subr.bf16.mxu0 %v4389_v22  ;;  %v3801_v20 = vadd.f32 %v6441_v16, %v6439_v14 }
 0x1f9   :  { %3783 = vmatpush2.bf16.msra.mxu1 %v4660_v21  ;;  %v3448_v40 = vpop.f32.mrf.mxu1 }
 0x1fa   :  { %3784 = vmatprep.subr.bf16.mxu1 %v4645_v23 }
 0x1fb   :  { %3742 = vmatpush2.bf16.msra.mxu0 %v4388_v28  ;;  %v3450_v61 = vpop.f32.mrf.mxu1 }
 0x1fc   :  { %3743 = vmatprep.subr.bf16.mxu0 %v4373_v30 }
 0x1fd   :  { %3785 = vmatpush2.bf16.msra.mxu1 %v4644_v29  ;;  %v3452_v8 = vpop.f32.mrf.mxu1 }
 0x1fe   :  { %3786 = vmatprep.subr.bf16.mxu1 %v4629_v31 }
 0x1ff   :  { %3744 = vmatpush2.bf16.msra.mxu0 %v4372_v36  ;;  %v3454_v10 = vpop.f32.mrf.mxu1 }
 0x200   :  { %3745 = vmatprep.subr.bf16.mxu0 %v4357_v39 }
 0x201   :  { %3787 = vmatpush2.bf16.msra.mxu1 %v4628_v37 }
 0x202   :  { %3788 = vmatprep.subr.bf16.mxu1 %v4613_v12 }
 0x203   :  { %3746 = vmatpush2.bf16.msra.mxu0 %v4356_v41 }
 0x205   :  { %3789 = vmatpush2.bf16.msra.mxu1 %v4612_v42 }
 0x206   :  { %3748 = vmatmul.mubr.bf16.vlgmr.msra.gmra.mxu0 %v6258_v54  ;;  %v3151_v54 = vpop.f32.mrf.mxu0 }
 0x207   :  { %v6449_v24 = vadd.f32 %v3194_v49, %v3151_v54 }
 0x208   :  { %3791 = vmatmul.mubr.bf16.vlgmr.msra.gmra.mxu1 %v6270_v57  ;;  %v3153_v57 = vpop.f32.mrf.mxu0  ;;  %v3534_v13 = vpop.f32.mrf.mxu1 }
 0x209   :  { %v6447_v21 = vadd.f32 %v3196_v50, %v3153_v57 }
 0x20a   :  { %v3233_v51 = vpop.f32.mrf.mxu0  ;;  %v3536_v18 = vpop.f32.mrf.mxu1 }
 0x20b   :  { %v6443_v19 = vadd.f32 %v3276_v52, %v3233_v51  ;;  %v3818_v28 = vadd.f32 %v6447_v21, %v6449_v24 }
 0x20c   :  { %v3235_v53 = vpop.f32.mrf.mxu0  ;;  %v3538_v23 = vpop.f32.mrf.mxu1 }
 0x20d   :  { %v3802_v25 = vadd.f32 %v3801_v20, %v6443_v19  ;;  %v6452_v26 = vadd.f32 %v3278_v55, %v3235_v53 }
 0x20e   :  { %v3237_v38 = vpop.f32.mrf.mxu0  ;;  %v3540_v31 = vpop.f32.mrf.mxu1 }
 0x20f   :  { %v6454_v27 = vadd.f32 %v3280_v58, %v3237_v38  ;;  %v3803_v32 = vadd.f32 %v3802_v25, %v6452_v26 }
 0x210   :  { %v3239_v60 = vpop.f32.mrf.mxu0 }
 0x211   :  { %v3819_v33 = vadd.f32 %v3818_v28, %v6454_v27  ;;  %v6462_v34 = vadd.f32 %v3282_v15, %v3239_v60 }
 0x212   :  { %v3319_v62 = vpop.f32.mrf.mxu0 }
 0x213   :  { %v6458_v29 = vadd.f32 %v3362_v43, %v3319_v62  ;;  %v3820_v41 = vadd.f32 %v3819_v33, %v6462_v34 }
 0x214   :  { %v3321_v63 = vpop.f32.mrf.mxu0 }
 0x215   :  { %v3804_v37 = vadd.f32 %v3803_v32, %v6458_v29  ;;  %v6465_v39 = vadd.f32 %v3364_v0, %v3321_v63 }
 0x216   :  { %v3323_v1 = vpop.f32.mrf.mxu0 }
 0x217   :  { %v6467_v12 = vadd.f32 %v3366_v2, %v3323_v1  ;;  %v3805_v59 = vadd.f32 %v3804_v37, %v6465_v39 }
 0x218   :  { %v3325_v3 = vpop.f32.mrf.mxu0 }
 0x219   :  { %v3821_v45 = vadd.f32 %v3820_v41, %v6467_v12  ;;  %v6474_v46 = vadd.f32 %v3368_v4, %v3325_v3 }
 0x21a   :  { %v3405_v5 = vpop.f32.mrf.mxu0 }
 0x21b   :  { %v6470_v42 = vadd.f32 %v3448_v40, %v3405_v5  ;;  %v3822_v50 = vadd.f32 %v3821_v45, %v6474_v46 }
 0x21c   :  { %v3407_v6 = vpop.f32.mrf.mxu0 }
 0x21d   :  { %v3806_v47 = vadd.f32 %v3805_v59, %v6470_v42  ;;  %v6477_v48 = vadd.f32 %v3450_v61, %v3407_v6 }
 0x21e   :  { %v3409_v7 = vpop.f32.mrf.mxu0 }
 0x21f   :  { %v6479_v54 = vadd.f32 %v3452_v8, %v3409_v7  ;;  %v3807_v52 = vadd.f32 %v3806_v47, %v6477_v48 }
 0x220   :  { %v3411_v9 = vpop.f32.mrf.mxu0 }
 0x221   :  { %v3823_v53 = vadd.f32 %v3822_v50, %v6479_v54  ;;  %v6486_v55 = vadd.f32 %v3454_v10, %v3411_v9 }
 0x222   :  { %v3491_v11 = vpop.f32.mrf.mxu0 }
 0x223   :  { %v6482_v51 = vadd.f32 %v3534_v13, %v3491_v11  ;;  %v3824_v0 = vadd.f32 %v3823_v53, %v6486_v55 }
 0x224   :  { %v3493_v17 = vpop.f32.mrf.mxu0 }
 0x225   :  { %v3808_v60 = vadd.f32 %v3807_v52, %v6482_v51  ;;  %v6489_v15 = vadd.f32 %v3536_v18, %v3493_v17 }
 0x226   :  { %v3495_v22 = vpop.f32.mrf.mxu0 }
 0x227   :  { %v6491_v62 = vadd.f32 %v3538_v23, %v3495_v22  ;;  %v3809_v2 = vadd.f32 %v3808_v60, %v6489_v15 }
 0x228   :  { %v3497_v30 = vpop.f32.mrf.mxu0 }
 0x229   :  { %v3825_v3 = vadd.f32 %v3824_v0, %v6491_v62  ;;  %v6498_v4 = vadd.f32 %v3540_v31, %v3497_v30 }
 0x22b   :  { %v3826_v8 = vadd.f32 %v3825_v3, %v6498_v4 }
 0x246   :  { %v3577_v35 = vpop.f32.mrf.mxu0 }
 0x248   :  { %v3620_v36 = vpop.f32.mrf.mxu1  ;;  %v3579_v56 = vpop.f32.mrf.mxu0 }
 0x249   :  { %v6494_v1 = vadd.f32 %v3620_v36, %v3577_v35 }
 0x24a   :  { %v3622_v44 = vpop.f32.mrf.mxu1  ;;  %v3581_v49 = vpop.f32.mrf.mxu0 }
 0x24b   :  { %v3810_v6 = vadd.f32 %v3809_v2, %v6494_v1  ;;  %v6501_v61 = vadd.f32 %v3622_v44, %v3579_v56 }
 0x24c   :  { %v3624_v57 = vpop.f32.mrf.mxu1  ;;  %v3583_v38 = vpop.f32.mrf.mxu0 }
 0x24d   :  { %v6503_v7 = vadd.f32 %v3624_v57, %v3581_v49  ;;  %v3811_v13 = vadd.f32 %v3810_v6, %v6501_v61 }
 0x24e   :  { %v3626_v58 = vpop.f32.mrf.mxu1 }
 0x24f   :  { %v3827_v17 = vadd.f32 %v3826_v8, %v6503_v7  ;;  %v6510_v18 = vadd.f32 %v3626_v58, %v3583_v38 }
 0x251   :  { %v3828_v30 = vadd.f32 %v3827_v17, %v6510_v18 }
 0x286   :  { %v3663_v43 = vpop.f32.mrf.mxu0 }
 0x288   :  { %v3706_v63 = vpop.f32.mrf.mxu1  ;;  %v3665_v5 = vpop.f32.mrf.mxu0 }
 0x289   :  { %v6506_v9 = vadd.f32 %v3706_v63, %v3663_v43  ;;  %v3974_v43 = vld [vmem:[%s6898_s2] sm:$0xff] }
 0x28a   :  { %v3708_v40 = vpop.f32.mrf.mxu1  ;;  %v3667_v10 = vpop.f32.mrf.mxu0 }
 0x28b   :  { %v3812_v20 = vadd.f32 %v3811_v13, %v6506_v9  ;;  %v6513_v22 = vadd.f32 %v3708_v40, %v3665_v5 }
 0x28c   :  { %v3710_v11 = vpop.f32.mrf.mxu1  ;;  %v3669_v25 = vpop.f32.mrf.mxu0 }
 0x28d   :  { %v6515_v23 = vadd.f32 %v3710_v11, %v3667_v10  ;;  %v3813_v33 = vadd.f32 %v3812_v20, %v6513_v22 }
 0x28e   :  { %v3712_v28 = vpop.f32.mrf.mxu1 }
 0x28f   :  { %v3829_v35 = vadd.f32 %v3828_v30, %v6515_v23  ;;  %v6520_v36 = vadd.f32 %v3712_v28, %v3669_v25 }
 0x291   :  { %v3830_v49 = vadd.f32 %v3829_v35, %v6520_v36 }
 0x2c6   :  { %v3749_v31 = vpop.f32.mrf.mxu0 }
 0x2c8   :  { %v3792_v32 = vpop.f32.mrf.mxu1  ;;  %v3751_v41 = vpop.f32.mrf.mxu0 }
 0x2c9   :  { %v6522_v37 = vadd.f32 %v3792_v32, %v3749_v31 }
 0x2ca   :  { %v3794_v56 = vpop.f32.mrf.mxu1  ;;  %v3753_v59 = vpop.f32.mrf.mxu0 }
 0x2cb   :  { %v6524_v44 = vadd.f32 %v3794_v56, %v3751_v41  ;;  %v3814_v45 = vadd.f32 %v3813_v33, %v6522_v37 }
 0x2cc   :  { %v3796_v47 = vpop.f32.mrf.mxu1  ;;  %v3755_v50 = vpop.f32.mrf.mxu0 }
 0x2cd   :  { %v6528_v57 = vadd.f32 %v3796_v47, %v3753_v59  ;;  %v3815_v52 = vadd.f32 %v3814_v45, %v6524_v44 }
 0x2ce   :  { %v3798_v53 = vpop.f32.mrf.mxu1 }
 0x2cf   :  { %v3831_v38 = vadd.f32 %v3830_v49, %v6528_v57  ;;  %v6532_v58 = vadd.f32 %v3798_v53, %v3755_v50  ;;  %3816 = vadd.xlane.f32.xlu0 %v3815_v52 }
 0x2d1   :  { %v3832_v60 = vadd.f32 %v3831_v38, %v6532_v58 }
 0x2d3   :  { %3833 = vadd.xlane.f32.xlu0 %v3832_v60 }
 0x2e9   :  { %3978 = vperm.xlu0 %4759, %v3974_v43  }
 0x358   :  { %v3817_v63 = vpop.xlane.xlu0 %3816 }
 0x359   :  { %v6538_v0 = vmul.f32 0.00048828125, %v3817_v63 }
 0x35b   :  { %v6542_v2 = vsub.f32 %v6439_v14, %v6538_v0  ;;  %v6546_v3 = vsub.f32 %v6441_v16, %v6538_v0  ;;  %v6550_v40 = vsub.f32 %v6443_v19, %v6538_v0  ;;  %v6560_v14 = vsub.f32 %v6452_v26, %v6538_v0 }
 0x35c   :  { %v3834_v5 = vpop.xlane.xlu0 %3833  ;;  %v6564_v16 = vsub.f32 %v6458_v29, %v6538_v0  ;;  %v6578_v26 = vsub.f32 %v6465_v39, %v6538_v0  ;;  %v6584_v25 = vsub.f32 %v6470_v42, %v6538_v0  ;;  %v6598_v31 = vsub.f32 %v6477_v48, %v6538_v0 }
 0x35d   :  { %v3870_v6 = vmul.f32 %v6542_v2, %v6542_v2  ;;  %v3871_v8 = vmul.f32 %v6546_v3, %v6546_v3  ;;  %v6556_v10 = vmul.f32 0.00048828125, %v3834_v5  ;;  %v3872_v19 = vmul.f32 %v6550_v40, %v6550_v40 }
 0x35e   :  { %v3873_v29 = vmul.f32 %v6560_v14, %v6560_v14  ;;  %v3875_v42 = vmul.f32 %v6578_v26, %v6578_v26  ;;  %v3876_v35 = vmul.f32 %v6584_v25, %v6584_v25  ;;  %v6632_v50 = vsub.f32 %v6494_v1, %v6538_v0 }
 0x35f   :  { %v3902_v11 = vadd.f32 %v3871_v8, %v3870_v6  ;;  %v6570_v13 = vsub.f32 %v6449_v24, %v6556_v10  ;;  %v6574_v17 = vsub.f32 %v6447_v21, %v6556_v10  ;;  %v3874_v24 = vmul.f32 %v6564_v16, %v6564_v16 }
 0x360   :  { %v6590_v21 = vsub.f32 %v6454_v27, %v6556_v10  ;;  %v6604_v33 = vsub.f32 %v6462_v34, %v6556_v10  ;;  %v6608_v27 = vsub.f32 %v6482_v51, %v6538_v0  ;;  %v6614_v48 = vsub.f32 %v6467_v12, %v6556_v10 }
 0x361   :  { %v3903_v20 = vadd.f32 %v3902_v11, %v3872_v19  ;;  %v3886_v39 = vmul.f32 %v6570_v13, %v6570_v13  ;;  %v3887_v30 = vmul.f32 %v6574_v17, %v6574_v17  ;;  %v6620_v34 = vsub.f32 %v6489_v15, %v6538_v0 }
 0x362   :  { %v3888_v56 = vmul.f32 %v6590_v21, %v6590_v21  ;;  %v3877_v51 = vmul.f32 %v6598_v31, %v6598_v31  ;;  %v6626_v47 = vsub.f32 %v6474_v46, %v6556_v10  ;;  %v3889_v12 = vmul.f32 %v6604_v33, %v6604_v33 }
 0x363   :  { %v3904_v28 = vadd.f32 %v3903_v20, %v3873_v29  ;;  %v3919_v59 = vadd.f32 %v3887_v30, %v3886_v39  ;;  %v3878_v15 = vmul.f32 %v6608_v27, %v6608_v27  ;;  %v6638_v53 = vsub.f32 %v6479_v54, %v6556_v10 }
 0x364   :  { %v3890_v46 = vmul.f32 %v6614_v48, %v6614_v48  ;;  %v6644_v60 = vsub.f32 %v6501_v61, %v6538_v0  ;;  %v3879_v1 = vmul.f32 %v6620_v34, %v6620_v34  ;;  %v6650_v63 = vsub.f32 %v6486_v55, %v6556_v10 }
 0x365   :  { %v3905_v32 = vadd.f32 %v3904_v28, %v3874_v24  ;;  %v3920_v49 = vadd.f32 %v3919_v59, %v3888_v56  ;;  %v3891_v54 = vmul.f32 %v6626_v47, %v6626_v47  ;;  %v6656_v6 = vsub.f32 %v6506_v9, %v6538_v0 }
 0x366   :  { %v3880_v61 = vmul.f32 %v6632_v50, %v6632_v50  ;;  %v6662_v19 = vsub.f32 %v6491_v62, %v6556_v10  ;;  %v3892_v55 = vmul.f32 %v6638_v53, %v6638_v53  ;;  %v6668_v29 = vsub.f32 %v6513_v22, %v6538_v0 }
 0x367   :  { %v3906_v41 = vadd.f32 %v3905_v32, %v3875_v42  ;;  %v3921_v38 = vadd.f32 %v3920_v49, %v3889_v12  ;;  %v3881_v9 = vmul.f32 %v6644_v60, %v6644_v60  ;;  %v6674_v24 = vsub.f32 %v6498_v4, %v6556_v10 }
 0x368   :  { %v3893_v62 = vmul.f32 %v6650_v63, %v6650_v63  ;;  %v6680_v39 = vsub.f32 %v6522_v37, %v6538_v0  ;;  %v3882_v22 = vmul.f32 %v6656_v6, %v6656_v6  ;;  %v6686_v42 = vsub.f32 %v6503_v7, %v6556_v10 }
 0x369   :  { %v3907_v45 = vadd.f32 %v3906_v41, %v3876_v35  ;;  %v3922_v5 = vadd.f32 %v3921_v38, %v3890_v46  ;;  %v3894_v4 = vmul.f32 %v6662_v19, %v6662_v19  ;;  %v3853_v35 = vsub.f32 %v6524_v44, %v6538_v0 }
 0x36a   :  { %v3883_v41 = vmul.f32 %v6668_v29, %v6668_v29  ;;  %v6696_v56 = vsub.f32 %v6510_v18, %v6556_v10  ;;  %v3895_v59 = vmul.f32 %v6674_v24, %v6674_v24  ;;  %v6704_v12 = vsub.f32 %v6515_v23, %v6556_v10 }
 0x36b   :  { %v3908_v52 = vadd.f32 %v3907_v45, %v3877_v51  ;;  %v3923_v11 = vadd.f32 %v3922_v5, %v3891_v54  ;;  %v3884_v51 = vmul.f32 %v6680_v39, %v6680_v39  ;;  %v3896_v44 = vmul.f32 %v6686_v42, %v6686_v42 }
 0x36c   :  { %v3885_v49 = vmul.f32 %v3853_v35, %v3853_v35  ;;  %v6710_v18 = vsub.f32 %v6520_v36, %v6556_v10  ;;  %v3898_v23 = vmul.f32 %v6704_v12, %v6704_v12  ;;  %v6722_v54 = vsub.f32 %v6532_v58, %v6556_v10  ;;  %v6733_v58 = vpop.permute.xlu1 %3983 }
 0x36d   :  { %v3909_v43 = vadd.f32 %v3908_v52, %v3878_v15  ;;  %v3924_v28 = vadd.f32 %v3923_v11, %v3892_v55  ;;  %v3897_v52 = vmul.f32 %v6696_v56, %v6696_v56 }
 0x36e   :  { %v3899_v36 = vmul.f32 %v6710_v18, %v6710_v18 }
 0x36f   :  { %v3910_v8 = vadd.f32 %v3909_v43, %v3879_v1  ;;  %v3925_v32 = vadd.f32 %v3924_v28, %v3893_v62  ;;  %v6716_v1 = vsub.f32 %v6528_v57, %v6556_v10  ;;  %v3901_v57 = vmul.f32 %v6722_v54, %v6722_v54 }
 0x370   :  { %v6735_v10 = vpop.permute.xlu1 %4022 }
 0x371   :  { %v3911_v20 = vadd.f32 %v3910_v8, %v3880_v61  ;;  %v3926_v7 = vadd.f32 %v3925_v32, %v3894_v4  ;;  %v3900_v61 = vmul.f32 %v6716_v1, %v6716_v1 }
 0x373   :  { %v3912_v30 = vadd.f32 %v3911_v20, %v3881_v9  ;;  %v3927_v0 = vadd.f32 %v3926_v7, %v3895_v59  ;;  %v4019_v9 = vld [vmem:[%s6899_s3 + $0x8] sm:$0xff] }
 0x375   :  { %v3913_v37 = vadd.f32 %v3912_v30, %v3882_v22  ;;  %v3928_v46 = vadd.f32 %v3927_v0, %v3896_v44 }
 0x377   :  { %v3914_v45 = vadd.f32 %v3913_v37, %v3883_v41  ;;  %v3929_v43 = vadd.f32 %v3928_v46, %v3897_v52 }
 0x379   :  { %v3915_v15 = vadd.f32 %v3914_v45, %v3884_v51  ;;  %v3930_v5 = vadd.f32 %v3929_v43, %v3898_v23 }
 0x37b   :  { %v3916_v38 = vadd.f32 %v3915_v15, %v3885_v49  ;;  %v3931_v8 = vadd.f32 %v3930_v5, %v3899_v36  ;;  %v3979_v49 = vpop.permute.xlu0 %3978 }
 0x37d   :  { %3917 = vadd.xlane.f32.xlu1 %v3916_v38  ;;  %v3932_v55 = vadd.f32 %v3931_v8, %v3900_v61 }
 0x37f   :  { %v3933_v11 = vadd.f32 %v3932_v55, %v3901_v57 }
 0x381   :  { %3934 = vadd.xlane.f32.xlu1 %v3933_v11 }
 0x392   :  { %4027 = vperm.xlu1 %4760, %v4019_v9  }
 0x406   :  { %v3918_v20 = vpop.xlane.xlu1 %3917 }
 0x407   :  { %v3936_v62 = vmul.f32 0.00048828125, %v3918_v20 }
 0x409   :  { %v3938_v28 = vadd.f32 1e-05, %v3936_v62 }
 0x40a   :  { %v3935_v22 = vpop.xlane.xlu1 %3934 }
 0x40b   :  { %4767 = vrsqrt.f32 %v3938_v28  ;;  %v3937_v30 = vmul.f32 0.00048828125, %v3935_v22 }
 0x40d   :  { %v3939_v4 = vadd.f32 1e-05, %v3937_v30 }
 0x40f   :  { %4769 = vrsqrt.f32 %v3939_v4 }
 0x418   :  { %v4768_v32 = vpop.eup %4767 }
 0x419   :  { %v3942_v41 = vmul.f32 %v4768_v32, %v6542_v2  ;;  %v3943_v37 = vmul.f32 %v4768_v32, %v6546_v3  ;;  %v3944_v59 = vmul.f32 %v4768_v32, %v6550_v40  ;;  %v3945_v7 = vmul.f32 %v4768_v32, %v6560_v14 }
 0x41a   :  { %v3946_v51 = vmul.f32 %v4768_v32, %v6564_v16  ;;  %v3947_v45 = vmul.f32 %v4768_v32, %v6578_v26  ;;  %v3948_v44 = vmul.f32 %v4768_v32, %v6584_v25  ;;  %v3949_v0 = vmul.f32 %v4768_v32, %v6598_v31 }
 0x41b   :  { %v3950_v15 = vmul.f32 %v4768_v32, %v6608_v27  ;;  %v3951_v52 = vmul.f32 %v4768_v32, %v6620_v34  ;;  %v3952_v2 = vmul.f32 %v4768_v32, %v6632_v50  ;;  %v3953_v3 = vmul.f32 %v4768_v32, %v6644_v60 }
 0x41c   :  { %v3954_v40 = vmul.f32 %v4768_v32, %v6656_v6  ;;  %v3955_v14 = vmul.f32 %v4768_v32, %v6668_v29  ;;  %v3956_v16 = vmul.f32 %v4768_v32, %v6680_v39  ;;  %v3957_v26 = vmul.f32 %v4768_v32, %v3853_v35  ;;  %v4770_v61 = vpop.eup %4769 }
 0x41d   :  { %v3986_v46 = vmul.f32 %v3979_v49, %v3942_v41  ;;  %v3987_v25 = vmul.f32 %v3979_v49, %v3943_v37  ;;  %v3988_v38 = vmul.f32 %v3979_v49, %v3944_v59  ;;  %v3989_v31 = vmul.f32 %v3979_v49, %v3945_v7 }
 0x41e   :  { %v6752_v23 = vmul.f32 %v3979_v49, %v3946_v51  ;;  %v6754_v27 = vmul.f32 %v3979_v49, %v3947_v45  ;;  %v6756_v34 = vmul.f32 %v3979_v49, %v3948_v44  ;;  %v6758_v50 = vmul.f32 %v3979_v49, %v3949_v0 }
 0x41f   :  { %v6760_v60 = vmul.f32 %v3979_v49, %v3950_v15  ;;  %v6762_v6 = vmul.f32 %v3979_v49, %v3951_v52  ;;  %v6764_v29 = vmul.f32 %v3979_v49, %v3952_v2  ;;  %v6766_v39 = vmul.f32 %v3979_v49, %v3953_v3 }
 0x420   :  { %v6768_v35 = vmul.f32 %v3979_v49, %v3954_v40  ;;  %v6770_v43 = vmul.f32 %v3979_v49, %v3955_v14  ;;  %v6772_v36 = vmul.f32 %v3979_v49, %v3956_v16  ;;  %v6774_v5 = vmul.f32 %v3979_v49, %v3957_v26  ;;  %v4028_v49 = vpop.permute.xlu1 %4027 }
 0x421   :  { %v6777_v8 = vadd.f32 %v6735_v10, %v3986_v46  ;;  %v6780_v57 = vadd.f32 %v6735_v10, %v3987_v25  ;;  %v6783_v55 = vadd.f32 %v6735_v10, %v3988_v38  ;;  %v6786_v11 = vadd.f32 %v6735_v10, %v3989_v31 }
 0x422   :  { %v3958_v9 = vmul.f32 %v4770_v61, %v6570_v13  ;;  %v3959_v20 = vmul.f32 %v4770_v61, %v6574_v17  ;;  %v3960_v62 = vmul.f32 %v4770_v61, %v6590_v21  ;;  %v3961_v28 = vmul.f32 %v4770_v61, %v6604_v33 }
 0x423   :  { %v3962_v22 = vmul.f32 %v4770_v61, %v6614_v48  ;;  %v3963_v30 = vmul.f32 %v4770_v61, %v6626_v47  ;;  %v3964_v4 = vmul.f32 %v4770_v61, %v6638_v53  ;;  %v3965_v32 = vmul.f32 %v4770_v61, %v6650_v63 }
 0x424   :  { %v3966_v41 = vmul.f32 %v4770_v61, %v6662_v19  ;;  %v3967_v37 = vmul.f32 %v4770_v61, %v6674_v24  ;;  %v3968_v13 = vmul.f32 %v4770_v61, %v6686_v42  ;;  %v3969_v17 = vmul.f32 %v4770_v61, %v6696_v56 }
 0x425   :  { %v3970_v21 = vmul.f32 %v4770_v61, %v6704_v12  ;;  %v3971_v33 = vmul.f32 %v4770_v61, %v6710_v18  ;;  %v3972_v48 = vmul.f32 %v4770_v61, %v6716_v1  ;;  %v3973_v47 = vmul.f32 %v4770_v61, %v6722_v54 }
 0x426   :  { %v4002_v53 = vmul.f32 %v6733_v58, %v3958_v9  ;;  %v4003_v63 = vmul.f32 %v6733_v58, %v3959_v20  ;;  %v4004_v19 = vmul.f32 %v6733_v58, %v3960_v62  ;;  %v4005_v24 = vmul.f32 %v6733_v58, %v3961_v28 }
 0x427   :  { %v4006_v42 = vmul.f32 %v6733_v58, %v3962_v22  ;;  %v4007_v56 = vmul.f32 %v6733_v58, %v3963_v30  ;;  %v4008_v12 = vmul.f32 %v6733_v58, %v3964_v4  ;;  %v4009_v18 = vmul.f32 %v6733_v58, %v3965_v32 }
 0x428   :  { %v4010_v1 = vmul.f32 %v6733_v58, %v3966_v41  ;;  %v4011_v54 = vmul.f32 %v6733_v58, %v3967_v37  ;;  %v4012_v59 = vmul.f32 %v6733_v58, %v3968_v13  ;;  %v4013_v7 = vmul.f32 %v6733_v58, %v3969_v17 }
 0x429   :  { %v4014_v51 = vmul.f32 %v6733_v58, %v3970_v21  ;;  %v4015_v45 = vmul.f32 %v6733_v58, %v3971_v33  ;;  %v4016_v44 = vmul.f32 %v6733_v58, %v3972_v48  ;;  %v4017_v0 = vmul.f32 %v6733_v58, %v3973_v47 }
 0x42a   :  { %v4046_v15 = vadd.f32 %v4028_v49, %v4002_v53  ;;  %v4047_v52 = vadd.f32 %v4028_v49, %v4003_v63  ;;  %v4048_v2 = vadd.f32 %v4028_v49, %v4004_v19  ;;  %v4049_v3 = vadd.f32 %v4028_v49, %v4005_v24 }
 0x42b   :  { %v4050_v40 = vadd.f32 %v4028_v49, %v4006_v42  ;;  %v4051_v14 = vadd.f32 %v4028_v49, %v4007_v56  ;;  %v4052_v16 = vadd.f32 %v4028_v49, %v4008_v12  ;;  %v4053_v26 = vadd.f32 %v4028_v49, %v4009_v18 }
 0x42c   :  { %v4054_v46 = vadd.f32 %v4028_v49, %v4010_v1  ;;  %v4055_v25 = vadd.f32 %v4028_v49, %v4011_v54  ;;  %v4056_v38 = vadd.f32 %v4028_v49, %v4012_v59  ;;  %v4057_v31 = vadd.f32 %v4028_v49, %v4013_v7 }
 0x42d   :  { %v4058_v61 = vadd.f32 %v4028_v49, %v4014_v51  ;;  %v4059_v9 = vadd.f32 %v4028_v49, %v4015_v45  ;;  %v4060_v20 = vadd.f32 %v4028_v49, %v4016_v44  ;;  %v4061_v62 = vadd.f32 %v4028_v49, %v4017_v0 }
 0x42e   :  { %v4078_v28 = vmax.f32 %v4046_v15, 0.0  ;;  %v4079_v22 = vmax.f32 %v4047_v52, 0.0  ;;  %v4080_v58 = vmax.f32 %v4048_v2, 0.0  ;;  %v4081_v30 = vmax.f32 %v4049_v3, 0.0 }
 0x42f   :  { %v4082_v4 = vmax.f32 %v4050_v40, 0.0  ;;  %v4083_v32 = vmax.f32 %v4051_v14, 0.0  ;;  %v4084_v41 = vmax.f32 %v4052_v16, 0.0  ;;  %v4085_v37 = vmax.f32 %v4053_v26, 0.0 }
 0x430   :  { %v4086_v13 = vmax.f32 %v4054_v46, 0.0  ;;  %v4087_v17 = vmax.f32 %v4055_v25, 0.0  ;;  %v4088_v21 = vmax.f32 %v4056_v38, 0.0  ;;  %v4089_v33 = vmax.f32 %v4057_v31, 0.0 }
 0x431   :  { %v4090_v48 = vmax.f32 %v4058_v61, 0.0  ;;  %v4091_v47 = vmax.f32 %v4059_v9, 0.0  ;;  %v4092_v53 = vmax.f32 %v4060_v20, 0.0  ;;  %v4093_v63 = vmax.f32 %v4061_v62, 0.0 }
 0x432   :  { %v4750_v19 = vpack.c.bf16 %v4079_v22, %v4078_v28  ;;  %v4751_v24 = vpack.c.bf16 %v4081_v30, %v4080_v58  ;;  %v4752_v42 = vpack.c.bf16 %v4083_v32, %v4082_v4  ;;  %v4753_v56 = vpack.c.bf16 %v4085_v37, %v4084_v41 }
 0x433   :  { %v4754_v12 = vpack.c.bf16 %v4087_v17, %v4086_v13  ;;  %v4755_v18 = vpack.c.bf16 %v4089_v33, %v4088_v21  ;;  %v4756_v1 = vpack.c.bf16 %v4091_v47, %v4090_v48  ;;  %v4757_v54 = vpack.c.bf16 %v4093_v63, %v4092_v53 }
 0x434   :  { %4198 = vst [vmem:[%s6900_s4 + $0x40] sm:$0xff] %v4750_v19  ;;  %4199 = vst [vmem:[%s6900_s4 + $0x48] sm:$0xff] %v4751_v24  ;;  %v4034_v59 = vadd.f32 %v6735_v10, %v6752_v23  ;;  %v4035_v7 = vadd.f32 %v6735_v10, %v6754_v27  ;;  %v4036_v51 = vadd.f32 %v6735_v10, %v6756_v34  ;;  %v4063_v15 = vmax.f32 %v6780_v57, 0.0 }
 0x435   :  { %4200 = vst [vmem:[%s6900_s4 + $0x50] sm:$0xff] %v4752_v42  ;;  %4201 = vst [vmem:[%s6900_s4 + $0x58] sm:$0xff] %v4753_v56  ;;  %v4037_v45 = vadd.f32 %v6735_v10, %v6758_v50  ;;  %v4038_v23 = vadd.f32 %v6735_v10, %v6760_v60  ;;  %v4039_v27 = vadd.f32 %v6735_v10, %v6762_v6  ;;  %v4062_v6 = vmax.f32 %v6777_v8, 0.0 }
 0x436   :  { %4202 = vst [vmem:[%s6900_s4 + $0x60] sm:$0xff] %v4754_v12  ;;  %4203 = vst [vmem:[%s6900_s4 + $0x68] sm:$0xff] %v4755_v18  ;;  %v4040_v34 = vadd.f32 %v6735_v10, %v6764_v29  ;;  %v4041_v50 = vadd.f32 %v6735_v10, %v6766_v39  ;;  %v4042_v44 = vadd.f32 %v6735_v10, %v6768_v35  ;;  %v4064_v29 = vmax.f32 %v6783_v55, 0.0 }
 0x437   :  { %4204 = vst [vmem:[%s6900_s4 + $0x70] sm:$0xff] %v4756_v1  ;;  %4205 = vst [vmem:[%s6900_s4 + $0x78] sm:$0xff] %v4757_v54  ;;  %v4043_v0 = vadd.f32 %v6735_v10, %v6770_v43  ;;  %v4044_v49 = vadd.f32 %v6735_v10, %v6772_v36  ;;  %v4045_v60 = vadd.f32 %v6735_v10, %v6774_v5  ;;  %v4065_v39 = vmax.f32 %v6786_v11, 0.0 }
 0x438   :  { %v4066_v52 = vmax.f32 %v4034_v59, 0.0  ;;  %v4067_v2 = vmax.f32 %v4035_v7, 0.0  ;;  %v4068_v35 = vmax.f32 %v4036_v51, 0.0  ;;  %v4069_v3 = vmax.f32 %v4037_v45, 0.0 }
 0x439   :  { %v4070_v40 = vmax.f32 %v4038_v23, 0.0  ;;  %v4071_v43 = vmax.f32 %v4039_v27, 0.0  ;;  %v4072_v14 = vmax.f32 %v4040_v34, 0.0  ;;  %v4073_v16 = vmax.f32 %v4041_v50, 0.0 }
 0x43a   :  { %v4074_v36 = vmax.f32 %v4042_v44, 0.0  ;;  %v4075_v26 = vmax.f32 %v4043_v0, 0.0  ;;  %v4076_v46 = vmax.f32 %v4044_v49, 0.0  ;;  %v4077_v10 = vmax.f32 %v4045_v60, 0.0 }
 0x43b   :  { %v4742_v5 = vpack.c.bf16 %v4063_v15, %v4062_v6  ;;  %v4743_v8 = vpack.c.bf16 %v4065_v39, %v4064_v29  ;;  %v4744_v25 = vpack.c.bf16 %v4067_v2, %v4066_v52  ;;  %v4745_v57 = vpack.c.bf16 %v4069_v3, %v4068_v35 }
 0x43c   :  { %v4746_v38 = vpack.c.bf16 %v4071_v43, %v4070_v40  ;;  %v4747_v55 = vpack.c.bf16 %v4073_v16, %v4072_v14  ;;  %v4748_v31 = vpack.c.bf16 %v4075_v26, %v4074_v36  ;;  %v4749_v11 = vpack.c.bf16 %v4077_v10, %v4076_v46 }
 0x43d   :  { %4190 = vst [vmem:[%s6900_s4] sm:$0xff] %v4742_v5  ;;  %4191 = vst [vmem:[%s6900_s4 + $0x8] sm:$0xff] %v4743_v8 }
 0x43e   :  { %4192 = vst [vmem:[%s6900_s4 + $0x10] sm:$0xff] %v4744_v25  ;;  %4193 = vst [vmem:[%s6900_s4 + $0x18] sm:$0xff] %v4745_v57 }
 0x43f   :  { %4194 = vst [vmem:[%s6900_s4 + $0x20] sm:$0xff] %v4746_v38  ;;  %4195 = vst [vmem:[%s6900_s4 + $0x28] sm:$0xff] %v4747_v55 }
 0x440   :  { %4196 = vst [vmem:[%s6900_s4 + $0x30] sm:$0xff] %v4748_v31  ;;  %4197 = vst [vmem:[%s6900_s4 + $0x38] sm:$0xff] %v4749_v11 }

// kernel: generator_forward.9
= control target key start
LH: loop header
LB: loop body
LE: loop exit
PB: predicated region body
PF: predicated region fallthrough
CT: control target
= control target key end

     0   :  { %s3037_s9 = smov 0   ;;  %s3039_s10 = smov 0   ;;  %s3903_s0 = inlined_call_operand.vmem [shape: bf16[256,8192], index: 0, kind: input, shape index: {}]   ;;  %s3904_s1 = inlined_call_operand.vmem [shape: bf16[3,256], index: 1, kind: input, shape index: {}]   ;;  %s3905_s2 = inlined_call_operand.vmem [shape: f32[3,8192], index: 2, kind: output, shape index: {}]  }
   0x1   :  { %s3041_s11 = smov 0  }
   0x2 LB: > { %s2670_s12 = sadd.s32 4294967295, %s3020_s11   ;;  %s3054_s13 = sadd.s32 1, %s3020_s11   ;;  %s3020_s11 = sphi %s3041_s11, %s3908_s11   ;;  %s3016_s10 = sphi %s3039_s10, %s3907_s10   ;;  %s3012_s9 = sphi %s3037_s9, %s3906_s9  }
   0x3   : > { %s16_s14 = ssub.s32 %s3020_s11, %s3054_s13  ;;  %s19_s15 = sadd.s32 1, %s3016_s10 }
   0x4   : > { %p17_p0 = scmp.eq.s32.totalorder %s16_s14, 0  ;;  %p26_p1 = scmp.ne.s32.totalorder %s3016_s10, %s3012_s9 }
   0x5   : > { %p27_p2 = scmp.eq.s32.totalorder %s3020_s11, 0  ;;  %p2673_p4 = scmp.ge.s32.totalorder %s3020_s11, 4 }
   0x6   : > { %s3063_s16 = scalar_select %p17_p0, %s3016_s10, %s19_s15  }
   0x7   : > { %p28_p3 = por %p27_p2, %p26_p1  ;;  %102 = sbr.rel (%p2673_p4) target bundleno = 144 (0x90), region = 20 }
   0xc   : > { %105 = sbr.rel (!%p28_p3) target bundleno = 144 (0x90), region = 24  ;;  %s107_s17 = sand.u32 (%p28_p3), 1, %s3016_s10  }
   0xd   : > { %s2940_s18 = sshll.u32 (%p28_p3), %s3020_s11, 6  ;;  %s2674_s19 = sshll.u32 (%p28_p3), %s107_s17, 11 }
   0xe   : > { %s3071_s22 = scalar_lea.vmem (%p28_p3), %s3903_s0, %s2940_s18  ;;  %s3076_s23 = scalar_lea.vmem (%p28_p3), [#allocation2], %s2674_s19 }
   0xf   : > { %v125_v0 = vld [vmem:[%s3071_s22] sm:$0xff] (%p28_p3)  ;;  %v127_v1 = vld [vmem:[%s3071_s22 + $0x8] sm:$0xff] (%p28_p3)  ;;  %v129_v2 = vld [vmem:[%s3071_s22 + $0x10] sm:$0xff] (%p28_p3) }
  0x10   : > { %126 = vst [vmem:[%s3076_s23] sm:$0xff] (%p28_p3), %v125_v0  ;;  %128 = vst [vmem:[%s3076_s23 + $0x8] sm:$0xff] (%p28_p3), %v127_v1  ;;  %v131_v3 = vld [vmem:[%s3071_s22 + $0x18] sm:$0xff] (%p28_p3)  ;;  %v133_v4 = vld [vmem:[%s3071_s22 + $0x20] sm:$0xff] (%p28_p3) }
  0x11   : > { %130 = vst [vmem:[%s3076_s23 + $0x10] sm:$0xff] %v129_v2  ;;  %v135_v5 = vld [vmem:[%s3071_s22 + $0x28] sm:$0xff]  ;;  %132 = vst [vmem:[%s3076_s23 + $0x18] sm:$0xff] %v131_v3  ;;  %v137_v6 = vld [vmem:[%s3071_s22 + $0x30] sm:$0xff] }
  0x12   : > { %134 = vst [vmem:[%s3076_s23 + $0x20] sm:$0xff] %v133_v4  ;;  %136 = vst [vmem:[%s3076_s23 + $0x28] sm:$0xff] %v135_v5  ;;  %v139_v7 = vld [vmem:[%s3071_s22 + $0x38] sm:$0xff]  ;;  %v141_v8 = vld [vmem:[%s3071_s22 + $0x100] sm:$0xff] }
  0x13   : > { %138 = vst [vmem:[%s3076_s23 + $0x30] sm:$0xff] %v137_v6  ;;  %140 = vst [vmem:[%s3076_s23 + $0x38] sm:$0xff] %v139_v7  ;;  %v143_v9 = vld [vmem:[%s3071_s22 + $0x108] sm:$0xff]  ;;  %v145_v10 = vld [vmem:[%s3071_s22 + $0x110] sm:$0xff] }
  0x14   : > { %142 = vst [vmem:[%s3076_s23 + $0x40] sm:$0xff] %v141_v8  ;;  %v147_v11 = vld [vmem:[%s3071_s22 + $0x118] sm:$0xff]  ;;  %144 = vst [vmem:[%s3076_s23 + $0x48] sm:$0xff] %v143_v9  ;;  %v149_v12 = vld [vmem:[%s3071_s22 + $0x120] sm:$0xff] }
  0x15   : > { %146 = vst [vmem:[%s3076_s23 + $0x50] sm:$0xff] %v145_v10  ;;  %148 = vst [vmem:[%s3076_s23 + $0x58] sm:$0xff] %v147_v11  ;;  %v151_v13 = vld [vmem:[%s3071_s22 + $0x128] sm:$0xff]  ;;  %v153_v14 = vld [vmem:[%s3071_s22 + $0x130] sm:$0xff] }
  0x16   : > { %150 = vst [vmem:[%s3076_s23 + $0x60] sm:$0xff] %v149_v12  ;;  %152 = vst [vmem:[%s3076_s23 + $0x68] sm:$0xff] %v151_v13  ;;  %v155_v15 = vld [vmem:[%s3071_s22 + $0x138] sm:$0xff]  ;;  %v157_v16 = vld [vmem:[%s3071_s22 + $0x200] sm:$0xff] }
  0x17   : > { %154 = vst [vmem:[%s3076_s23 + $0x70] sm:$0xff] %v153_v14  ;;  %v159_v17 = vld [vmem:[%s3071_s22 + $0x208] sm:$0xff]  ;;  %156 = vst [vmem:[%s3076_s23 + $0x78] sm:$0xff] %v155_v15  ;;  %v161_v18 = vld [vmem:[%s3071_s22 + $0x210] sm:$0xff] }
  0x18   : > { %158 = vst [vmem:[%s3076_s23 + $0x80] sm:$0xff] %v157_v16  ;;  %160 = vst [vmem:[%s3076_s23 + $0x88] sm:$0xff] %v159_v17  ;;  %v163_v19 = vld [vmem:[%s3071_s22 + $0x218] sm:$0xff]  ;;  %v165_v20 = vld [vmem:[%s3071_s22 + $0x220] sm:$0xff] }
  0x19   : > { %162 = vst [vmem:[%s3076_s23 + $0x90] sm:$0xff] %v161_v18  ;;  %164 = vst [vmem:[%s3076_s23 + $0x98] sm:$0xff] %v163_v19  ;;  %v167_v21 = vld [vmem:[%s3071_s22 + $0x228] sm:$0xff]  ;;  %v169_v22 = vld [vmem:[%s3071_s22 + $0x230] sm:$0xff] }
  0x1a   : > { %166 = vst [vmem:[%s3076_s23 + $0xa0] sm:$0xff] %v165_v20  ;;  %v171_v23 = vld [vmem:[%s3071_s22 + $0x238] sm:$0xff]  ;;  %168 = vst [vmem:[%s3076_s23 + $0xa8] sm:$0xff] %v167_v21  ;;  %v173_v24 = vld [vmem:[%s3071_s22 + $0x300] sm:$0xff] }
  0x1b   : > { %170 = vst [vmem:[%s3076_s23 + $0xb0] sm:$0xff] %v169_v22  ;;  %172 = vst [vmem:[%s3076_s23 + $0xb8] sm:$0xff] %v171_v23  ;;  %v175_v25 = vld [vmem:[%s3071_s22 + $0x308] sm:$0xff]  ;;  %v177_v26 = vld [vmem:[%s3071_s22 + $0x310] sm:$0xff] }
  0x1c   : > { %174 = vst [vmem:[%s3076_s23 + $0xc0] sm:$0xff] %v173_v24  ;;  %176 = vst [vmem:[%s3076_s23 + $0xc8] sm:$0xff] %v175_v25  ;;  %v179_v27 = vld [vmem:[%s3071_s22 + $0x318] sm:$0xff]  ;;  %v181_v28 = vld [vmem:[%s3071_s22 + $0x320] sm:$0xff] }
  0x1d   : > { %178 = vst [vmem:[%s3076_s23 + $0xd0] sm:$0xff] %v177_v26  ;;  %v183_v29 = vld [vmem:[%s3071_s22 + $0x328] sm:$0xff]  ;;  %180 = vst [vmem:[%s3076_s23 + $0xd8] sm:$0xff] %v179_v27  ;;  %v185_v30 = vld [vmem:[%s3071_s22 + $0x330] sm:$0xff] }
  0x1e   : > { %182 = vst [vmem:[%s3076_s23 + $0xe0] sm:$0xff] %v181_v28  ;;  %184 = vst [vmem:[%s3076_s23 + $0xe8] sm:$0xff] %v183_v29  ;;  %v187_v31 = vld [vmem:[%s3071_s22 + $0x338] sm:$0xff]  ;;  %v189_v32 = vld [vmem:[%s3071_s22 + $0x400] sm:$0xff] }
  0x1f   : > { %186 = vst [vmem:[%s3076_s23 + $0xf0] sm:$0xff] %v185_v30  ;;  %188 = vst [vmem:[%s3076_s23 + $0xf8] sm:$0xff] %v187_v31  ;;  %v191_v33 = vld [vmem:[%s3071_s22 + $0x408] sm:$0xff]  ;;  %v193_v34 = vld [vmem:[%s3071_s22 + $0x410] sm:$0xff] }
  0x20   : > { %190 = vst [vmem:[%s3076_s23 + $0x100] sm:$0xff] %v189_v32  ;;  %v195_v35 = vld [vmem:[%s3071_s22 + $0x418] sm:$0xff]  ;;  %192 = vst [vmem:[%s3076_s23 + $0x108] sm:$0xff] %v191_v33  ;;  %v197_v36 = vld [vmem:[%s3071_s22 + $0x420] sm:$0xff] }
  0x21   : > { %194 = vst [vmem:[%s3076_s23 + $0x110] sm:$0xff] %v193_v34  ;;  %196 = vst [vmem:[%s3076_s23 + $0x118] sm:$0xff] %v195_v35  ;;  %v199_v37 = vld [vmem:[%s3071_s22 + $0x428] sm:$0xff]  ;;  %v201_v38 = vld [vmem:[%s3071_s22 + $0x430] sm:$0xff] }
  0x22   : > { %198 = vst [vmem:[%s3076_s23 + $0x120] sm:$0xff] %v197_v36  ;;  %200 = vst [vmem:[%s3076_s23 + $0x128] sm:$0xff] %v199_v37  ;;  %v203_v39 = vld [vmem:[%s3071_s22 + $0x438] sm:$0xff]  ;;  %v205_v40 = vld [vmem:[%s3071_s22 + $0x500] sm:$0xff] }
  0x23   : > { %202 = vst [vmem:[%s3076_s23 + $0x130] sm:$0xff] %v201_v38  ;;  %v207_v41 = vld [vmem:[%s3071_s22 + $0x508] sm:$0xff]  ;;  %204 = vst [vmem:[%s3076_s23 + $0x138] sm:$0xff] %v203_v39  ;;  %v209_v42 = vld [vmem:[%s3071_s22 + $0x510] sm:$0xff] }
  0x24   : > { %206 = vst [vmem:[%s3076_s23 + $0x140] sm:$0xff] %v205_v40  ;;  %208 = vst [vmem:[%s3076_s23 + $0x148] sm:$0xff] %v207_v41  ;;  %v211_v43 = vld [vmem:[%s3071_s22 + $0x518] sm:$0xff]  ;;  %v213_v44 = vld [vmem:[%s3071_s22 + $0x520] sm:$0xff] }
  0x25   : > { %210 = vst [vmem:[%s3076_s23 + $0x150] sm:$0xff] %v209_v42  ;;  %212 = vst [vmem:[%s3076_s23 + $0x158] sm:$0xff] %v211_v43  ;;  %v215_v45 = vld [vmem:[%s3071_s22 + $0x528] sm:$0xff]  ;;  %v217_v46 = vld [vmem:[%s3071_s22 + $0x530] sm:$0xff] }
  0x26   : > { %214 = vst [vmem:[%s3076_s23 + $0x160] sm:$0xff] %v213_v44  ;;  %v219_v47 = vld [vmem:[%s3071_s22 + $0x538] sm:$0xff]  ;;  %216 = vst [vmem:[%s3076_s23 + $0x168] sm:$0xff] %v215_v45  ;;  %v221_v48 = vld [vmem:[%s3071_s22 + $0x600] sm:$0xff] }
  0x27   : > { %218 = vst [vmem:[%s3076_s23 + $0x170] sm:$0xff] %v217_v46  ;;  %220 = vst [vmem:[%s3076_s23 + $0x178] sm:$0xff] %v219_v47  ;;  %v223_v49 = vld [vmem:[%s3071_s22 + $0x608] sm:$0xff]  ;;  %v225_v50 = vld [vmem:[%s3071_s22 + $0x610] sm:$0xff] }
  0x28   : > { %222 = vst [vmem:[%s3076_s23 + $0x180] sm:$0xff] %v221_v48  ;;  %224 = vst [vmem:[%s3076_s23 + $0x188] sm:$0xff] %v223_v49  ;;  %v227_v51 = vld [vmem:[%s3071_s22 + $0x618] sm:$0xff]  ;;  %v229_v52 = vld [vmem:[%s3071_s22 + $0x620] sm:$0xff] }
  0x29   : > { %226 = vst [vmem:[%s3076_s23 + $0x190] sm:$0xff] %v225_v50  ;;  %v231_v53 = vld [vmem:[%s3071_s22 + $0x628] sm:$0xff]  ;;  %228 = vst [vmem:[%s3076_s23 + $0x198] sm:$0xff] %v227_v51  ;;  %v233_v54 = vld [vmem:[%s3071_s22 + $0x630] sm:$0xff] }
  0x2a   : > { %230 = vst [vmem:[%s3076_s23 + $0x1a0] sm:$0xff] %v229_v52  ;;  %232 = vst [vmem:[%s3076_s23 + $0x1a8] sm:$0xff] %v231_v53  ;;  %v235_v55 = vld [vmem:[%s3071_s22 + $0x638] sm:$0xff]  ;;  %v237_v56 = vld [vmem:[%s3071_s22 + $0x700] sm:$0xff] }
  0x2b   : > { %234 = vst [vmem:[%s3076_s23 + $0x1b0] sm:$0xff] %v233_v54  ;;  %236 = vst [vmem:[%s3076_s23 + $0x1b8] sm:$0xff] %v235_v55  ;;  %v239_v57 = vld [vmem:[%s3071_s22 + $0x708] sm:$0xff]  ;;  %v241_v58 = vld [vmem:[%s3071_s22 + $0x710] sm:$0xff] }
  0x2c   : > { %238 = vst [vmem:[%s3076_s23 + $0x1c0] sm:$0xff] %v237_v56  ;;  %v243_v59 = vld [vmem:[%s3071_s22 + $0x718] sm:$0xff]  ;;  %240 = vst [vmem:[%s3076_s23 + $0x1c8] sm:$0xff] %v239_v57  ;;  %v245_v60 = vld [vmem:[%s3071_s22 + $0x720] sm:$0xff] }
  0x2d   : > { %242 = vst [vmem:[%s3076_s23 + $0x1d0] sm:$0xff] %v241_v58  ;;  %244 = vst [vmem:[%s3076_s23 + $0x1d8] sm:$0xff] %v243_v59  ;;  %v247_v61 = vld [vmem:[%s3071_s22 + $0x728] sm:$0xff]  ;;  %v249_v62 = vld [vmem:[%s3071_s22 + $0x730] sm:$0xff] }
  0x2e   : > { %246 = vst [vmem:[%s3076_s23 + $0x1e0] sm:$0xff] %v245_v60  ;;  %248 = vst [vmem:[%s3076_s23 + $0x1e8] sm:$0xff] %v247_v61  ;;  %v251_v63 = vld [vmem:[%s3071_s22 + $0x738] sm:$0xff]  ;;  %v253_v0 = vld [vmem:[%s3071_s22 + $0x800] sm:$0xff] }
  0x2f   : > { %250 = vst [vmem:[%s3076_s23 + $0x1f0] sm:$0xff] %v249_v62  ;;  %v255_v1 = vld [vmem:[%s3071_s22 + $0x808] sm:$0xff]  ;;  %252 = vst [vmem:[%s3076_s23 + $0x1f8] sm:$0xff] %v251_v63  ;;  %v257_v2 = vld [vmem:[%s3071_s22 + $0x810] sm:$0xff] }
  0x30   : > { %254 = vst [vmem:[%s3076_s23 + $0x200] sm:$0xff] %v253_v0  ;;  %256 = vst [vmem:[%s3076_s23 + $0x208] sm:$0xff] %v255_v1  ;;  %v259_v3 = vld [vmem:[%s3071_s22 + $0x818] sm:$0xff]  ;;  %v261_v4 = vld [vmem:[%s3071_s22 + $0x820] sm:$0xff] }
  0x31   : > { %258 = vst [vmem:[%s3076_s23 + $0x210] sm:$0xff] %v257_v2  ;;  %260 = vst [vmem:[%s3076_s23 + $0x218] sm:$0xff] %v259_v3  ;;  %v263_v5 = vld [vmem:[%s3071_s22 + $0x828] sm:$0xff]  ;;  %v265_v6 = vld [vmem:[%s3071_s22 + $0x830] sm:$0xff] }
  0x32   : > { %262 = vst [vmem:[%s3076_s23 + $0x220] sm:$0xff] %v261_v4  ;;  %v267_v7 = vld [vmem:[%s3071_s22 + $0x838] sm:$0xff]  ;;  %264 = vst [vmem:[%s3076_s23 + $0x228] sm:$0xff] %v263_v5  ;;  %v269_v8 = vld [vmem:[%s3071_s22 + $0x900] sm:$0xff] }
  0x33   : > { %266 = vst [vmem:[%s3076_s23 + $0x230] sm:$0xff] %v265_v6  ;;  %268 = vst [vmem:[%s3076_s23 + $0x238] sm:$0xff] %v267_v7  ;;  %v271_v9 = vld [vmem:[%s3071_s22 + $0x908] sm:$0xff]  ;;  %v273_v10 = vld [vmem:[%s3071_s22 + $0x910] sm:$0xff] }
  0x34   : > { %270 = vst [vmem:[%s3076_s23 + $0x240] sm:$0xff] %v269_v8  ;;  %272 = vst [vmem:[%s3076_s23 + $0x248] sm:$0xff] %v271_v9  ;;  %v275_v11 = vld [vmem:[%s3071_s22 + $0x918] sm:$0xff]  ;;  %v277_v12 = vld [vmem:[%s3071_s22 + $0x920] sm:$0xff] }
  0x35   : > { %274 = vst [vmem:[%s3076_s23 + $0x250] sm:$0xff] %v273_v10  ;;  %v279_v13 = vld [vmem:[%s3071_s22 + $0x928] sm:$0xff]  ;;  %276 = vst [vmem:[%s3076_s23 + $0x258] sm:$0xff] %v275_v11  ;;  %v281_v14 = vld [vmem:[%s3071_s22 + $0x930] sm:$0xff] }
  0x36   : > { %278 = vst [vmem:[%s3076_s23 + $0x260] sm:$0xff] %v277_v12  ;;  %280 = vst [vmem:[%s3076_s23 + $0x268] sm:$0xff] %v279_v13  ;;  %v283_v15 = vld [vmem:[%s3071_s22 + $0x938] sm:$0xff]  ;;  %v285_v16 = vld [vmem:[%s3071_s22 + $0xa00] sm:$0xff] }
  0x37   : > { %282 = vst [vmem:[%s3076_s23 + $0x270] sm:$0xff] %v281_v14  ;;  %284 = vst [vmem:[%s3076_s23 + $0x278] sm:$0xff] %v283_v15  ;;  %v287_v17 = vld [vmem:[%s3071_s22 + $0xa08] sm:$0xff]  ;;  %v289_v18 = vld [vmem:[%s3071_s22 + $0xa10] sm:$0xff] }
  0x38   : > { %286 = vst [vmem:[%s3076_s23 + $0x280] sm:$0xff] %v285_v16  ;;  %v291_v19 = vld [vmem:[%s3071_s22 + $0xa18] sm:$0xff]  ;;  %288 = vst [vmem:[%s3076_s23 + $0x288] sm:$0xff] %v287_v17  ;;  %v293_v20 = vld [vmem:[%s3071_s22 + $0xa20] sm:$0xff] }
  0x39   : > { %290 = vst [vmem:[%s3076_s23 + $0x290] sm:$0xff] %v289_v18  ;;  %292 = vst [vmem:[%s3076_s23 + $0x298] sm:$0xff] %v291_v19  ;;  %v295_v21 = vld [vmem:[%s3071_s22 + $0xa28] sm:$0xff]  ;;  %v297_v22 = vld [vmem:[%s3071_s22 + $0xa30] sm:$0xff] }
  0x3a   : > { %294 = vst [vmem:[%s3076_s23 + $0x2a0] sm:$0xff] %v293_v20  ;;  %296 = vst [vmem:[%s3076_s23 + $0x2a8] sm:$0xff] %v295_v21  ;;  %v299_v23 = vld [vmem:[%s3071_s22 + $0xa38] sm:$0xff]  ;;  %v301_v24 = vld [vmem:[%s3071_s22 + $0xb00] sm:$0xff] }
  0x3b   : > { %298 = vst [vmem:[%s3076_s23 + $0x2b0] sm:$0xff] %v297_v22  ;;  %v303_v25 = vld [vmem:[%s3071_s22 + $0xb08] sm:$0xff]  ;;  %300 = vst [vmem:[%s3076_s23 + $0x2b8] sm:$0xff] %v299_v23  ;;  %v305_v26 = vld [vmem:[%s3071_s22 + $0xb10] sm:$0xff] }
  0x3c   : > { %302 = vst [vmem:[%s3076_s23 + $0x2c0] sm:$0xff] %v301_v24  ;;  %304 = vst [vmem:[%s3076_s23 + $0x2c8] sm:$0xff] %v303_v25  ;;  %v307_v27 = vld [vmem:[%s3071_s22 + $0xb18] sm:$0xff]  ;;  %v309_v28 = vld [vmem:[%s3071_s22 + $0xb20] sm:$0xff] }
  0x3d   : > { %306 = vst [vmem:[%s3076_s23 + $0x2d0] sm:$0xff] %v305_v26  ;;  %308 = vst [vmem:[%s3076_s23 + $0x2d8] sm:$0xff] %v307_v27  ;;  %v311_v29 = vld [vmem:[%s3071_s22 + $0xb28] sm:$0xff]  ;;  %v313_v30 = vld [vmem:[%s3071_s22 + $0xb30] sm:$0xff] }
  0x3e   : > { %310 = vst [vmem:[%s3076_s23 + $0x2e0] sm:$0xff] %v309_v28  ;;  %v315_v31 = vld [vmem:[%s3071_s22 + $0xb38] sm:$0xff]  ;;  %312 = vst [vmem:[%s3076_s23 + $0x2e8] sm:$0xff] %v311_v29  ;;  %v317_v32 = vld [vmem:[%s3071_s22 + $0xc00] sm:$0xff] }
  0x3f   : > { %314 = vst [vmem:[%s3076_s23 + $0x2f0] sm:$0xff] %v313_v30  ;;  %316 = vst [vmem:[%s3076_s23 + $0x2f8] sm:$0xff] %v315_v31  ;;  %v319_v33 = vld [vmem:[%s3071_s22 + $0xc08] sm:$0xff]  ;;  %v321_v34 = vld [vmem:[%s3071_s22 + $0xc10] sm:$0xff] }
  0x40   : > { %318 = vst [vmem:[%s3076_s23 + $0x300] sm:$0xff] %v317_v32  ;;  %320 = vst [vmem:[%s3076_s23 + $0x308] sm:$0xff] %v319_v33  ;;  %v323_v35 = vld [vmem:[%s3071_s22 + $0xc18] sm:$0xff]  ;;  %v325_v36 = vld [vmem:[%s3071_s22 + $0xc20] sm:$0xff] }
  0x41   : > { %322 = vst [vmem:[%s3076_s23 + $0x310] sm:$0xff] %v321_v34  ;;  %v327_v37 = vld [vmem:[%s3071_s22 + $0xc28] sm:$0xff]  ;;  %324 = vst [vmem:[%s3076_s23 + $0x318] sm:$0xff] %v323_v35  ;;  %v329_v38 = vld [vmem:[%s3071_s22 + $0xc30] sm:$0xff] }
  0x42   : > { %326 = vst [vmem:[%s3076_s23 + $0x320] sm:$0xff] %v325_v36  ;;  %328 = vst [vmem:[%s3076_s23 + $0x328] sm:$0xff] %v327_v37  ;;  %v331_v39 = vld [vmem:[%s3071_s22 + $0xc38] sm:$0xff]  ;;  %v333_v40 = vld [vmem:[%s3071_s22 + $0xd00] sm:$0xff] }
  0x43   : > { %330 = vst [vmem:[%s3076_s23 + $0x330] sm:$0xff] %v329_v38  ;;  %332 = vst [vmem:[%s3076_s23 + $0x338] sm:$0xff] %v331_v39  ;;  %v335_v41 = vld [vmem:[%s3071_s22 + $0xd08] sm:$0xff]  ;;  %v337_v42 = vld [vmem:[%s3071_s22 + $0xd10] sm:$0xff] }
  0x44   : > { %334 = vst [vmem:[%s3076_s23 + $0x340] sm:$0xff] %v333_v40  ;;  %v339_v43 = vld [vmem:[%s3071_s22 + $0xd18] sm:$0xff]  ;;  %336 = vst [vmem:[%s3076_s23 + $0x348] sm:$0xff] %v335_v41  ;;  %v341_v44 = vld [vmem:[%s3071_s22 + $0xd20] sm:$0xff] }
  0x45   : > { %338 = vst [vmem:[%s3076_s23 + $0x350] sm:$0xff] %v337_v42  ;;  %340 = vst [vmem:[%s3076_s23 + $0x358] sm:$0xff] %v339_v43  ;;  %v343_v45 = vld [vmem:[%s3071_s22 + $0xd28] sm:$0xff]  ;;  %v345_v46 = vld [vmem:[%s3071_s22 + $0xd30] sm:$0xff] }
  0x46   : > { %342 = vst [vmem:[%s3076_s23 + $0x360] sm:$0xff] %v341_v44  ;;  %344 = vst [vmem:[%s3076_s23 + $0x368] sm:$0xff] %v343_v45  ;;  %v347_v47 = vld [vmem:[%s3071_s22 + $0xd38] sm:$0xff]  ;;  %v349_v48 = vld [vmem:[%s3071_s22 + $0xe00] sm:$0xff] }
  0x47   : > { %346 = vst [vmem:[%s3076_s23 + $0x370] sm:$0xff] %v345_v46  ;;  %v351_v49 = vld [vmem:[%s3071_s22 + $0xe08] sm:$0xff]  ;;  %348 = vst [vmem:[%s3076_s23 + $0x378] sm:$0xff] %v347_v47  ;;  %v353_v50 = vld [vmem:[%s3071_s22 + $0xe10] sm:$0xff] }
  0x48   : > { %350 = vst [vmem:[%s3076_s23 + $0x380] sm:$0xff] %v349_v48  ;;  %352 = vst [vmem:[%s3076_s23 + $0x388] sm:$0xff] %v351_v49  ;;  %v355_v51 = vld [vmem:[%s3071_s22 + $0xe18] sm:$0xff]  ;;  %v357_v52 = vld [vmem:[%s3071_s22 + $0xe20] sm:$0xff] }
  0x49   : > { %354 = vst [vmem:[%s3076_s23 + $0x390] sm:$0xff] %v353_v50  ;;  %356 = vst [vmem:[%s3076_s23 + $0x398] sm:$0xff] %v355_v51  ;;  %v359_v53 = vld [vmem:[%s3071_s22 + $0xe28] sm:$0xff]  ;;  %v361_v54 = vld [vmem:[%s3071_s22 + $0xe30] sm:$0xff] }
  0x4a   : > { %358 = vst [vmem:[%s3076_s23 + $0x3a0] sm:$0xff] %v357_v52  ;;  %v363_v55 = vld [vmem:[%s3071_s22 + $0xe38] sm:$0xff]  ;;  %360 = vst [vmem:[%s3076_s23 + $0x3a8] sm:$0xff] %v359_v53  ;;  %v365_v56 = vld [vmem:[%s3071_s22 + $0xf00] sm:$0xff] }
  0x4b   : > { %362 = vst [vmem:[%s3076_s23 + $0x3b0] sm:$0xff] %v361_v54  ;;  %364 = vst [vmem:[%s3076_s23 + $0x3b8] sm:$0xff] %v363_v55  ;;  %v367_v57 = vld [vmem:[%s3071_s22 + $0xf08] sm:$0xff]  ;;  %v369_v58 = vld [vmem:[%s3071_s22 + $0xf10] sm:$0xff] }
  0x4c   : > { %366 = vst [vmem:[%s3076_s23 + $0x3c0] sm:$0xff] %v365_v56  ;;  %368 = vst [vmem:[%s3076_s23 + $0x3c8] sm:$0xff] %v367_v57  ;;  %v371_v59 = vld [vmem:[%s3071_s22 + $0xf18] sm:$0xff]  ;;  %v373_v60 = vld [vmem:[%s3071_s22 + $0xf20] sm:$0xff] }
  0x4d   : > { %370 = vst [vmem:[%s3076_s23 + $0x3d0] sm:$0xff] %v369_v58  ;;  %v375_v61 = vld [vmem:[%s3071_s22 + $0xf28] sm:$0xff]  ;;  %372 = vst [vmem:[%s3076_s23 + $0x3d8] sm:$0xff] %v371_v59  ;;  %v377_v62 = vld [vmem:[%s3071_s22 + $0xf30] sm:$0xff] }
  0x4e   : > { %374 = vst [vmem:[%s3076_s23 + $0x3e0] sm:$0xff] %v373_v60  ;;  %376 = vst [vmem:[%s3076_s23 + $0x3e8] sm:$0xff] %v375_v61  ;;  %v379_v63 = vld [vmem:[%s3071_s22 + $0xf38] sm:$0xff]  ;;  %v381_v0 = vld [vmem:[%s3071_s22 + $0x1000] sm:$0xff] }
  0x4f   : > { %378 = vst [vmem:[%s3076_s23 + $0x3f0] sm:$0xff] %v377_v62  ;;  %380 = vst [vmem:[%s3076_s23 + $0x3f8] sm:$0xff] %v379_v63  ;;  %v383_v1 = vld [vmem:[%s3071_s22 + $0x1008] sm:$0xff]  ;;  %v385_v2 = vld [vmem:[%s3071_s22 + $0x1010] sm:$0xff] }
  0x50   : > { %382 = vst [vmem:[%s3076_s23 + $0x400] sm:$0xff] %v381_v0  ;;  %v387_v3 = vld [vmem:[%s3071_s22 + $0x1018] sm:$0xff]  ;;  %384 = vst [vmem:[%s3076_s23 + $0x408] sm:$0xff] %v383_v1  ;;  %v389_v4 = vld [vmem:[%s3071_s22 + $0x1020] sm:$0xff] }
  0x51   : > { %386 = vst [vmem:[%s3076_s23 + $0x410] sm:$0xff] %v385_v2  ;;  %388 = vst [vmem:[%s3076_s23 + $0x418] sm:$0xff] %v387_v3  ;;  %v391_v5 = vld [vmem:[%s3071_s22 + $0x1028] sm:$0xff]  ;;  %v393_v6 = vld [vmem:[%s3071_s22 + $0x1030] sm:$0xff] }
  0x52   : > { %390 = vst [vmem:[%s3076_s23 + $0x420] sm:$0xff] %v389_v4  ;;  %392 = vst [vmem:[%s3076_s23 + $0x428] sm:$0xff] %v391_v5  ;;  %v395_v7 = vld [vmem:[%s3071_s22 + $0x1038] sm:$0xff]  ;;  %v397_v8 = vld [vmem:[%s3071_s22 + $0x1100] sm:$0xff] }
  0x53   : > { %394 = vst [vmem:[%s3076_s23 + $0x430] sm:$0xff] %v393_v6  ;;  %v399_v9 = vld [vmem:[%s3071_s22 + $0x1108] sm:$0xff]  ;;  %396 = vst [vmem:[%s3076_s23 + $0x438] sm:$0xff] %v395_v7  ;;  %v401_v10 = vld [vmem:[%s3071_s22 + $0x1110] sm:$0xff] }
  0x54   : > { %398 = vst [vmem:[%s3076_s23 + $0x440] sm:$0xff] %v397_v8  ;;  %400 = vst [vmem:[%s3076_s23 + $0x448] sm:$0xff] %v399_v9  ;;  %v403_v11 = vld [vmem:[%s3071_s22 + $0x1118] sm:$0xff]  ;;  %v405_v12 = vld [vmem:[%s3071_s22 + $0x1120] sm:$0xff] }
  0x55   : > { %402 = vst [vmem:[%s3076_s23 + $0x450] sm:$0xff] %v401_v10  ;;  %404 = vst [vmem:[%s3076_s23 + $0x458] sm:$0xff] %v403_v11  ;;  %v407_v13 = vld [vmem:[%s3071_s22 + $0x1128] sm:$0xff]  ;;  %v409_v14 = vld [vmem:[%s3071_s22 + $0x1130] sm:$0xff] }
  0x56   : > { %406 = vst [vmem:[%s3076_s23 + $0x460] sm:$0xff] %v405_v12  ;;  %v411_v15 = vld [vmem:[%s3071_s22 + $0x1138] sm:$0xff]  ;;  %408 = vst [vmem:[%s3076_s23 + $0x468] sm:$0xff] %v407_v13  ;;  %v413_v16 = vld [vmem:[%s3071_s22 + $0x1200] sm:$0xff] }
  0x57   : > { %410 = vst [vmem:[%s3076_s23 + $0x470] sm:$0xff] %v409_v14  ;;  %412 = vst [vmem:[%s3076_s23 + $0x478] sm:$0xff] %v411_v15  ;;  %v415_v17 = vld [vmem:[%s3071_s22 + $0x1208] sm:$0xff]  ;;  %v417_v18 = vld [vmem:[%s3071_s22 + $0x1210] sm:$0xff] }
  0x58   : > { %414 = vst [vmem:[%s3076_s23 + $0x480] sm:$0xff] %v413_v16  ;;  %416 = vst [vmem:[%s3076_s23 + $0x488] sm:$0xff] %v415_v17  ;;  %v419_v19 = vld [vmem:[%s3071_s22 + $0x1218] sm:$0xff]  ;;  %v421_v20 = vld [vmem:[%s3071_s22 + $0x1220] sm:$0xff] }
  0x59   : > { %418 = vst [vmem:[%s3076_s23 + $0x490] sm:$0xff] %v417_v18  ;;  %v423_v21 = vld [vmem:[%s3071_s22 + $0x1228] sm:$0xff]  ;;  %420 = vst [vmem:[%s3076_s23 + $0x498] sm:$0xff] %v419_v19  ;;  %v425_v22 = vld [vmem:[%s3071_s22 + $0x1230] sm:$0xff] }
  0x5a   : > { %422 = vst [vmem:[%s3076_s23 + $0x4a0] sm:$0xff] %v421_v20  ;;  %424 = vst [vmem:[%s3076_s23 + $0x4a8] sm:$0xff] %v423_v21  ;;  %v427_v23 = vld [vmem:[%s3071_s22 + $0x1238] sm:$0xff]  ;;  %v429_v24 = vld [vmem:[%s3071_s22 + $0x1300] sm:$0xff] }
  0x5b   : > { %426 = vst [vmem:[%s3076_s23 + $0x4b0] sm:$0xff] %v425_v22  ;;  %428 = vst [vmem:[%s3076_s23 + $0x4b8] sm:$0xff] %v427_v23  ;;  %v431_v25 = vld [vmem:[%s3071_s22 + $0x1308] sm:$0xff]  ;;  %v433_v26 = vld [vmem:[%s3071_s22 + $0x1310] sm:$0xff] }
  0x5c   : > { %430 = vst [vmem:[%s3076_s23 + $0x4c0] sm:$0xff] %v429_v24  ;;  %v435_v27 = vld [vmem:[%s3071_s22 + $0x1318] sm:$0xff]  ;;  %432 = vst [vmem:[%s3076_s23 + $0x4c8] sm:$0xff] %v431_v25  ;;  %v437_v28 = vld [vmem:[%s3071_s22 + $0x1320] sm:$0xff] }
  0x5d   : > { %434 = vst [vmem:[%s3076_s23 + $0x4d0] sm:$0xff] %v433_v26  ;;  %436 = vst [vmem:[%s3076_s23 + $0x4d8] sm:$0xff] %v435_v27  ;;  %v439_v29 = vld [vmem:[%s3071_s22 + $0x1328] sm:$0xff]  ;;  %v441_v30 = vld [vmem:[%s3071_s22 + $0x1330] sm:$0xff] }
  0x5e   : > { %438 = vst [vmem:[%s3076_s23 + $0x4e0] sm:$0xff] %v437_v28  ;;  %440 = vst [vmem:[%s3076_s23 + $0x4e8] sm:$0xff] %v439_v29  ;;  %v443_v31 = vld [vmem:[%s3071_s22 + $0x1338] sm:$0xff]  ;;  %v445_v32 = vld [vmem:[%s3071_s22 + $0x1400] sm:$0xff] }
  0x5f   : > { %442 = vst [vmem:[%s3076_s23 + $0x4f0] sm:$0xff] %v441_v30  ;;  %v447_v33 = vld [vmem:[%s3071_s22 + $0x1408] sm:$0xff]  ;;  %444 = vst [vmem:[%s3076_s23 + $0x4f8] sm:$0xff] %v443_v31  ;;  %v449_v34 = vld [vmem:[%s3071_s22 + $0x1410] sm:$0xff] }
  0x60   : > { %446 = vst [vmem:[%s3076_s23 + $0x500] sm:$0xff] %v445_v32  ;;  %448 = vst [vmem:[%s3076_s23 + $0x508] sm:$0xff] %v447_v33  ;;  %v451_v35 = vld [vmem:[%s3071_s22 + $0x1418] sm:$0xff]  ;;  %v453_v36 = vld [vmem:[%s3071_s22 + $0x1420] sm:$0xff] }
  0x61   : > { %450 = vst [vmem:[%s3076_s23 + $0x510] sm:$0xff] %v449_v34  ;;  %452 = vst [vmem:[%s3076_s23 + $0x518] sm:$0xff] %v451_v35  ;;  %v455_v37 = vld [vmem:[%s3071_s22 + $0x1428] sm:$0xff]  ;;  %v457_v38 = vld [vmem:[%s3071_s22 + $0x1430] sm:$0xff] }
  0x62   : > { %454 = vst [vmem:[%s3076_s23 + $0x520] sm:$0xff] %v453_v36  ;;  %v459_v39 = vld [vmem:[%s3071_s22 + $0x1438] sm:$0xff]  ;;  %456 = vst [vmem:[%s3076_s23 + $0x528] sm:$0xff] %v455_v37  ;;  %v461_v40 = vld [vmem:[%s3071_s22 + $0x1500] sm:$0xff] }
  0x63   : > { %458 = vst [vmem:[%s3076_s23 + $0x530] sm:$0xff] %v457_v38  ;;  %460 = vst [vmem:[%s3076_s23 + $0x538] sm:$0xff] %v459_v39  ;;  %v463_v41 = vld [vmem:[%s3071_s22 + $0x1508] sm:$0xff]  ;;  %v465_v42 = vld [vmem:[%s3071_s22 + $0x1510] sm:$0xff] }
  0x64   : > { %462 = vst [vmem:[%s3076_s23 + $0x540] sm:$0xff] %v461_v40  ;;  %464 = vst [vmem:[%s3076_s23 + $0x548] sm:$0xff] %v463_v41  ;;  %v467_v43 = vld [vmem:[%s3071_s22 + $0x1518] sm:$0xff]  ;;  %v469_v44 = vld [vmem:[%s3071_s22 + $0x1520] sm:$0xff] }
  0x65   : > { %466 = vst [vmem:[%s3076_s23 + $0x550] sm:$0xff] %v465_v42  ;;  %v471_v45 = vld [vmem:[%s3071_s22 + $0x1528] sm:$0xff]  ;;  %468 = vst [vmem:[%s3076_s23 + $0x558] sm:$0xff] %v467_v43  ;;  %v473_v46 = vld [vmem:[%s3071_s22 + $0x1530] sm:$0xff] }
  0x66   : > { %470 = vst [vmem:[%s3076_s23 + $0x560] sm:$0xff] %v469_v44  ;;  %472 = vst [vmem:[%s3076_s23 + $0x568] sm:$0xff] %v471_v45  ;;  %v475_v47 = vld [vmem:[%s3071_s22 + $0x1538] sm:$0xff]  ;;  %v477_v48 = vld [vmem:[%s3071_s22 + $0x1600] sm:$0xff] }
  0x67   : > { %474 = vst [vmem:[%s3076_s23 + $0x570] sm:$0xff] %v473_v46  ;;  %476 = vst [vmem:[%s3076_s23 + $0x578] sm:$0xff] %v475_v47  ;;  %v479_v49 = vld [vmem:[%s3071_s22 + $0x1608] sm:$0xff]  ;;  %v481_v50 = vld [vmem:[%s3071_s22 + $0x1610] sm:$0xff] }
  0x68   : > { %478 = vst [vmem:[%s3076_s23 + $0x580] sm:$0xff] %v477_v48  ;;  %v483_v51 = vld [vmem:[%s3071_s22 + $0x1618] sm:$0xff]  ;;  %480 = vst [vmem:[%s3076_s23 + $0x588] sm:$0xff] %v479_v49  ;;  %v485_v52 = vld [vmem:[%s3071_s22 + $0x1620] sm:$0xff] }
  0x69   : > { %482 = vst [vmem:[%s3076_s23 + $0x590] sm:$0xff] %v481_v50  ;;  %484 = vst [vmem:[%s3076_s23 + $0x598] sm:$0xff] %v483_v51  ;;  %v487_v53 = vld [vmem:[%s3071_s22 + $0x1628] sm:$0xff]  ;;  %v489_v54 = vld [vmem:[%s3071_s22 + $0x1630] sm:$0xff] }
  0x6a   : > { %486 = vst [vmem:[%s3076_s23 + $0x5a0] sm:$0xff] %v485_v52  ;;  %488 = vst [vmem:[%s3076_s23 + $0x5a8] sm:$0xff] %v487_v53  ;;  %v491_v55 = vld [vmem:[%s3071_s22 + $0x1638] sm:$0xff]  ;;  %v493_v56 = vld [vmem:[%s3071_s22 + $0x1700] sm:$0xff] }
  0x6b   : > { %490 = vst [vmem:[%s3076_s23 + $0x5b0] sm:$0xff] %v489_v54  ;;  %v495_v57 = vld [vmem:[%s3071_s22 + $0x1708] sm:$0xff]  ;;  %492 = vst [vmem:[%s3076_s23 + $0x5b8] sm:$0xff] %v491_v55  ;;  %v497_v58 = vld [vmem:[%s3071_s22 + $0x1710] sm:$0xff] }
  0x6c   : > { %494 = vst [vmem:[%s3076_s23 + $0x5c0] sm:$0xff] %v493_v56  ;;  %496 = vst [vmem:[%s3076_s23 + $0x5c8] sm:$0xff] %v495_v57  ;;  %v499_v59 = vld [vmem:[%s3071_s22 + $0x1718] sm:$0xff]  ;;  %v501_v60 = vld [vmem:[%s3071_s22 + $0x1720] sm:$0xff] }
  0x6d   : > { %498 = vst [vmem:[%s3076_s23 + $0x5d0] sm:$0xff] %v497_v58  ;;  %500 = vst [vmem:[%s3076_s23 + $0x5d8] sm:$0xff] %v499_v59  ;;  %v503_v61 = vld [vmem:[%s3071_s22 + $0x1728] sm:$0xff]  ;;  %v505_v62 = vld [vmem:[%s3071_s22 + $0x1730] sm:$0xff] }
  0x6e   : > { %502 = vst [vmem:[%s3076_s23 + $0x5e0] sm:$0xff] %v501_v60  ;;  %v507_v63 = vld [vmem:[%s3071_s22 + $0x1738] sm:$0xff]  ;;  %504 = vst [vmem:[%s3076_s23 + $0x5e8] sm:$0xff] %v503_v61  ;;  %v509_v0 = vld [vmem:[%s3071_s22 + $0x1800] sm:$0xff] }
  0x6f   : > { %506 = vst [vmem:[%s3076_s23 + $0x5f0] sm:$0xff] %v505_v62  ;;  %508 = vst [vmem:[%s3076_s23 + $0x5f8] sm:$0xff] %v507_v63  ;;  %v511_v1 = vld [vmem:[%s3071_s22 + $0x1808] sm:$0xff]  ;;  %v513_v2 = vld [vmem:[%s3071_s22 + $0x1810] sm:$0xff] }
  0x70   : > { %510 = vst [vmem:[%s3076_s23 + $0x600] sm:$0xff] %v509_v0  ;;  %512 = vst [vmem:[%s3076_s23 + $0x608] sm:$0xff] %v511_v1  ;;  %v515_v3 = vld [vmem:[%s3071_s22 + $0x1818] sm:$0xff]  ;;  %v517_v4 = vld [vmem:[%s3071_s22 + $0x1820] sm:$0xff] }
  0x71   : > { %514 = vst [vmem:[%s3076_s23 + $0x610] sm:$0xff] %v513_v2  ;;  %v519_v5 = vld [vmem:[%s3071_s22 + $0x1828] sm:$0xff]  ;;  %516 = vst [vmem:[%s3076_s23 + $0x618] sm:$0xff] %v515_v3  ;;  %v521_v6 = vld [vmem:[%s3071_s22 + $0x1830] sm:$0xff] }
  0x72   : > { %518 = vst [vmem:[%s3076_s23 + $0x620] sm:$0xff] %v517_v4  ;;  %520 = vst [vmem:[%s3076_s23 + $0x628] sm:$0xff] %v519_v5  ;;  %v523_v7 = vld [vmem:[%s3071_s22 + $0x1838] sm:$0xff]  ;;  %v525_v8 = vld [vmem:[%s3071_s22 + $0x1900] sm:$0xff] }
  0x73   : > { %522 = vst [vmem:[%s3076_s23 + $0x630] sm:$0xff] %v521_v6  ;;  %524 = vst [vmem:[%s3076_s23 + $0x638] sm:$0xff] %v523_v7  ;;  %v527_v9 = vld [vmem:[%s3071_s22 + $0x1908] sm:$0xff]  ;;  %v529_v10 = vld [vmem:[%s3071_s22 + $0x1910] sm:$0xff] }
  0x74   : > { %526 = vst [vmem:[%s3076_s23 + $0x640] sm:$0xff] %v525_v8  ;;  %v531_v11 = vld [vmem:[%s3071_s22 + $0x1918] sm:$0xff]  ;;  %528 = vst [vmem:[%s3076_s23 + $0x648] sm:$0xff] %v527_v9  ;;  %v533_v12 = vld [vmem:[%s3071_s22 + $0x1920] sm:$0xff] }
  0x75   : > { %530 = vst [vmem:[%s3076_s23 + $0x650] sm:$0xff] %v529_v10  ;;  %532 = vst [vmem:[%s3076_s23 + $0x658] sm:$0xff] %v531_v11  ;;  %v535_v13 = vld [vmem:[%s3071_s22 + $0x1928] sm:$0xff]  ;;  %v537_v14 = vld [vmem:[%s3071_s22 + $0x1930] sm:$0xff] }
  0x76   : > { %534 = vst [vmem:[%s3076_s23 + $0x660] sm:$0xff] %v533_v12  ;;  %536 = vst [vmem:[%s3076_s23 + $0x668] sm:$0xff] %v535_v13  ;;  %v539_v15 = vld [vmem:[%s3071_s22 + $0x1938] sm:$0xff]  ;;  %v541_v16 = vld [vmem:[%s3071_s22 + $0x1a00] sm:$0xff] }
  0x77   : > { %538 = vst [vmem:[%s3076_s23 + $0x670] sm:$0xff] %v537_v14  ;;  %v543_v17 = vld [vmem:[%s3071_s22 + $0x1a08] sm:$0xff]  ;;  %540 = vst [vmem:[%s3076_s23 + $0x678] sm:$0xff] %v539_v15  ;;  %v545_v18 = vld [vmem:[%s3071_s22 + $0x1a10] sm:$0xff] }
  0x78   : > { %542 = vst [vmem:[%s3076_s23 + $0x680] sm:$0xff] %v541_v16  ;;  %544 = vst [vmem:[%s3076_s23 + $0x688] sm:$0xff] %v543_v17  ;;  %v547_v19 = vld [vmem:[%s3071_s22 + $0x1a18] sm:$0xff]  ;;  %v549_v20 = vld [vmem:[%s3071_s22 + $0x1a20] sm:$0xff] }
  0x79   : > { %546 = vst [vmem:[%s3076_s23 + $0x690] sm:$0xff] %v545_v18  ;;  %548 = vst [vmem:[%s3076_s23 + $0x698] sm:$0xff] %v547_v19  ;;  %v551_v21 = vld [vmem:[%s3071_s22 + $0x1a28] sm:$0xff]  ;;  %v553_v22 = vld [vmem:[%s3071_s22 + $0x1a30] sm:$0xff] }
  0x7a   : > { %550 = vst [vmem:[%s3076_s23 + $0x6a0] sm:$0xff] %v549_v20  ;;  %v555_v23 = vld [vmem:[%s3071_s22 + $0x1a38] sm:$0xff]  ;;  %552 = vst [vmem:[%s3076_s23 + $0x6a8] sm:$0xff] %v551_v21  ;;  %v557_v24 = vld [vmem:[%s3071_s22 + $0x1b00] sm:$0xff] }
  0x7b   : > { %554 = vst [vmem:[%s3076_s23 + $0x6b0] sm:$0xff] %v553_v22  ;;  %556 = vst [vmem:[%s3076_s23 + $0x6b8] sm:$0xff] %v555_v23  ;;  %v559_v25 = vld [vmem:[%s3071_s22 + $0x1b08] sm:$0xff]  ;;  %v561_v26 = vld [vmem:[%s3071_s22 + $0x1b10] sm:$0xff] }
  0x7c   : > { %558 = vst [vmem:[%s3076_s23 + $0x6c0] sm:$0xff] %v557_v24  ;;  %560 = vst [vmem:[%s3076_s23 + $0x6c8] sm:$0xff] %v559_v25  ;;  %v563_v27 = vld [vmem:[%s3071_s22 + $0x1b18] sm:$0xff]  ;;  %v565_v28 = vld [vmem:[%s3071_s22 + $0x1b20] sm:$0xff] }
  0x7d   : > { %562 = vst [vmem:[%s3076_s23 + $0x6d0] sm:$0xff] %v561_v26  ;;  %v567_v29 = vld [vmem:[%s3071_s22 + $0x1b28] sm:$0xff]  ;;  %564 = vst [vmem:[%s3076_s23 + $0x6d8] sm:$0xff] %v563_v27  ;;  %v569_v30 = vld [vmem:[%s3071_s22 + $0x1b30] sm:$0xff] }
  0x7e   : > { %566 = vst [vmem:[%s3076_s23 + $0x6e0] sm:$0xff] %v565_v28  ;;  %568 = vst [vmem:[%s3076_s23 + $0x6e8] sm:$0xff] %v567_v29  ;;  %v571_v31 = vld [vmem:[%s3071_s22 + $0x1b38] sm:$0xff]  ;;  %v573_v32 = vld [vmem:[%s3071_s22 + $0x1c00] sm:$0xff] }
  0x7f   : > { %570 = vst [vmem:[%s3076_s23 + $0x6f0] sm:$0xff] %v569_v30  ;;  %572 = vst [vmem:[%s3076_s23 + $0x6f8] sm:$0xff] %v571_v31  ;;  %v575_v33 = vld [vmem:[%s3071_s22 + $0x1c08] sm:$0xff]  ;;  %v577_v34 = vld [vmem:[%s3071_s22 + $0x1c10] sm:$0xff] }
  0x80   : > { %574 = vst [vmem:[%s3076_s23 + $0x700] sm:$0xff] %v573_v32  ;;  %v579_v35 = vld [vmem:[%s3071_s22 + $0x1c18] sm:$0xff]  ;;  %576 = vst [vmem:[%s3076_s23 + $0x708] sm:$0xff] %v575_v33  ;;  %v581_v36 = vld [vmem:[%s3071_s22 + $0x1c20] sm:$0xff] }
  0x81   : > { %578 = vst [vmem:[%s3076_s23 + $0x710] sm:$0xff] %v577_v34  ;;  %580 = vst [vmem:[%s3076_s23 + $0x718] sm:$0xff] %v579_v35  ;;  %v583_v37 = vld [vmem:[%s3071_s22 + $0x1c28] sm:$0xff]  ;;  %v585_v38 = vld [vmem:[%s3071_s22 + $0x1c30] sm:$0xff] }
  0x82   : > { %582 = vst [vmem:[%s3076_s23 + $0x720] sm:$0xff] %v581_v36  ;;  %584 = vst [vmem:[%s3076_s23 + $0x728] sm:$0xff] %v583_v37  ;;  %v587_v39 = vld [vmem:[%s3071_s22 + $0x1c38] sm:$0xff]  ;;  %v589_v40 = vld [vmem:[%s3071_s22 + $0x1d00] sm:$0xff] }
  0x83   : > { %586 = vst [vmem:[%s3076_s23 + $0x730] sm:$0xff] %v585_v38  ;;  %v591_v41 = vld [vmem:[%s3071_s22 + $0x1d08] sm:$0xff]  ;;  %588 = vst [vmem:[%s3076_s23 + $0x738] sm:$0xff] %v587_v39  ;;  %v593_v42 = vld [vmem:[%s3071_s22 + $0x1d10] sm:$0xff] }
  0x84   : > { %590 = vst [vmem:[%s3076_s23 + $0x740] sm:$0xff] %v589_v40  ;;  %592 = vst [vmem:[%s3076_s23 + $0x748] sm:$0xff] %v591_v41  ;;  %v595_v43 = vld [vmem:[%s3071_s22 + $0x1d18] sm:$0xff]  ;;  %v597_v44 = vld [vmem:[%s3071_s22 + $0x1d20] sm:$0xff] }
  0x85   : > { %594 = vst [vmem:[%s3076_s23 + $0x750] sm:$0xff] %v593_v42  ;;  %596 = vst [vmem:[%s3076_s23 + $0x758] sm:$0xff] %v595_v43  ;;  %v599_v45 = vld [vmem:[%s3071_s22 + $0x1d28] sm:$0xff]  ;;  %v601_v46 = vld [vmem:[%s3071_s22 + $0x1d30] sm:$0xff] }
  0x86   : > { %598 = vst [vmem:[%s3076_s23 + $0x760] sm:$0xff] %v597_v44  ;;  %v603_v47 = vld [vmem:[%s3071_s22 + $0x1d38] sm:$0xff]  ;;  %600 = vst [vmem:[%s3076_s23 + $0x768] sm:$0xff] %v599_v45  ;;  %v605_v48 = vld [vmem:[%s3071_s22 + $0x1e00] sm:$0xff] }
  0x87   : > { %602 = vst [vmem:[%s3076_s23 + $0x770] sm:$0xff] %v601_v46  ;;  %604 = vst [vmem:[%s3076_s23 + $0x778] sm:$0xff] %v603_v47  ;;  %v607_v49 = vld [vmem:[%s3071_s22 + $0x1e08] sm:$0xff]  ;;  %v609_v50 = vld [vmem:[%s3071_s22 + $0x1e10] sm:$0xff] }
  0x88   : > { %606 = vst [vmem:[%s3076_s23 + $0x780] sm:$0xff] %v605_v48  ;;  %608 = vst [vmem:[%s3076_s23 + $0x788] sm:$0xff] %v607_v49  ;;  %v611_v51 = vld [vmem:[%s3071_s22 + $0x1e18] sm:$0xff]  ;;  %v613_v52 = vld [vmem:[%s3071_s22 + $0x1e20] sm:$0xff] }
  0x89   : > { %610 = vst [vmem:[%s3076_s23 + $0x790] sm:$0xff] %v609_v50  ;;  %v615_v53 = vld [vmem:[%s3071_s22 + $0x1e28] sm:$0xff]  ;;  %612 = vst [vmem:[%s3076_s23 + $0x798] sm:$0xff] %v611_v51  ;;  %v617_v54 = vld [vmem:[%s3071_s22 + $0x1e30] sm:$0xff] }
  0x8a   : > { %614 = vst [vmem:[%s3076_s23 + $0x7a0] sm:$0xff] %v613_v52  ;;  %616 = vst [vmem:[%s3076_s23 + $0x7a8] sm:$0xff] %v615_v53  ;;  %v619_v55 = vld [vmem:[%s3071_s22 + $0x1e38] sm:$0xff]  ;;  %v621_v56 = vld [vmem:[%s3071_s22 + $0x1f00] sm:$0xff] }
  0x8b   : > { %618 = vst [vmem:[%s3076_s23 + $0x7b0] sm:$0xff] %v617_v54  ;;  %620 = vst [vmem:[%s3076_s23 + $0x7b8] sm:$0xff] %v619_v55  ;;  %v623_v57 = vld [vmem:[%s3071_s22 + $0x1f08] sm:$0xff]  ;;  %v625_v58 = vld [vmem:[%s3071_s22 + $0x1f10] sm:$0xff] }
  0x8c   : > { %622 = vst [vmem:[%s3076_s23 + $0x7c0] sm:$0xff] %v621_v56  ;;  %v627_v59 = vld [vmem:[%s3071_s22 + $0x1f18] sm:$0xff]  ;;  %624 = vst [vmem:[%s3076_s23 + $0x7c8] sm:$0xff] %v623_v57  ;;  %v629_v60 = vld [vmem:[%s3071_s22 + $0x1f20] sm:$0xff] }
  0x8d   : > { %626 = vst [vmem:[%s3076_s23 + $0x7d0] sm:$0xff] %v625_v58  ;;  %628 = vst [vmem:[%s3076_s23 + $0x7d8] sm:$0xff] %v627_v59  ;;  %v631_v61 = vld [vmem:[%s3071_s22 + $0x1f28] sm:$0xff]  ;;  %v633_v62 = vld [vmem:[%s3071_s22 + $0x1f30] sm:$0xff] }
  0x8e   : > { %630 = vst [vmem:[%s3076_s23 + $0x7e0] sm:$0xff] %v629_v60  ;;  %632 = vst [vmem:[%s3076_s23 + $0x7e8] sm:$0xff] %v631_v61  ;;  %v635_v63 = vld [vmem:[%s3071_s22 + $0x1f38] sm:$0xff] }
  0x8f   : > { %634 = vst [vmem:[%s3076_s23 + $0x7f0] sm:$0xff] %v633_v62  ;;  %636 = vst [vmem:[%s3076_s23 + $0x7f8] sm:$0xff] %v635_v63 }
  0x90 PF: > { %p2677_p5 = scmp.ge.s32.totalorder %s3020_s11, 1  ;;  %p641_p6 = scmp.lt.s32.totalorder %s3020_s11, 5 }
  0x92   : > { %p642_p7 = pnand %p2677_p5, %p641_p6 }
  0x93   : > { %s648_s24 = sand.u32 (!%p642_p7), 1, %s3012_s9   ;;  %s2679_s3 = sshll.u32 (!%p642_p7), %s2670_s12, 4 }
  0x94   : > { %645 = sbr.rel (%p642_p7) target bundleno = 627 (0x273), region = 47  ;;  %s2678_s27 = sshll.u32 (!%p642_p7), %s648_s24, 11 }
  0x95   : > { %s3599_s28 = scalar_lea.vmem (!%p642_p7), [#allocation2], %s2678_s27  ;;  %p671_p8 = scmp.lt.s32.totalorder (!%p642_p7), %s2679_s3, 63 }
  0x99   : > { %v3593_v0 = vld.sshfl [vmem:[%s3904_s1] sm:$0x33 pattern:$0x76325410]  ;;  %v790_v4 = vld [vmem:[%s3599_s28 + $0x388] sm:$0xff]  ;;  %s3910_s3 = smov (!%p671_p8, %s2679_s3), 63 }
  0x9a   : > { %v3597_v1 = vcombine.high %v3593_v0, %v3593_v0  ;;  %v789_v2 = vld [vmem:[%s3599_s28 + $0x380] sm:$0xff]  ;;  %v798_v6 = vld [vmem:[%s3599_s28 + $0x3c8] sm:$0xff]  ;;  %s2680_s4 = sshll.u32 %s3910_s3, 2 }
  0x9b   : > { %v797_v3 = vld [vmem:[%s3599_s28 + $0x3c0] sm:$0xff]  ;;  %v2797_v10 = vcombine.high %v790_v4, %v798_v6  ;;  %v2796_v11 = vcombine.low %v790_v4, %v798_v6  ;;  %v774_v13 = vld [vmem:[%s3599_s28 + $0x308] sm:$0xff]  ;;  %s3883_s7 = scalar_lea.vmem %s3905_s2, %s2680_s4 }
  0x9c   : > { %2256 = vmatprep.mubr.bf16.mxu0 %v3597_v1  ;;  %2297 = vmatprep.mubr.bf16.mxu1 %v3597_v1  ;;  %v2795_v5 = vcombine.high %v789_v2, %v797_v3  ;;  %v2794_v7 = vcombine.low %v789_v2, %v797_v3  ;;  %v773_v8 = vld [vmem:[%s3599_s28 + $0x300] sm:$0xff]  ;;  %v782_v14 = vld [vmem:[%s3599_s28 + $0x348] sm:$0xff] }
  0x9d   : > { %v781_v9 = vld [vmem:[%s3599_s28 + $0x340] sm:$0xff]  ;;  %v2781_v16 = vcombine.high %v774_v13, %v782_v14  ;;  %v758_v18 = vld [vmem:[%s3599_s28 + $0x288] sm:$0xff]  ;;  %2265 = vmatprep.subr.bf16.mxu1 %v2797_v10  ;;  %v2780_v21 = vcombine.low %v774_v13, %v782_v14 }
  0x9e   : > { %v2779_v12 = vcombine.high %v773_v8, %v781_v9  ;;  %v757_v15 = vld [vmem:[%s3599_s28 + $0x280] sm:$0xff]  ;;  %2224 = vmatprep.subr.bf16.mxu0 %v2795_v5  ;;  %v766_v19 = vld [vmem:[%s3599_s28 + $0x2c8] sm:$0xff]  ;;  %v2778_v20 = vcombine.low %v773_v8, %v781_v9  ;;  %2266 = vmatpush1.bf16.msra.mxu1 %v2796_v11 }
  0x9f   : > { %v765_v17 = vld [vmem:[%s3599_s28 + $0x2c0] sm:$0xff]  ;;  %2225 = vmatpush1.bf16.msra.mxu0 %v2794_v7  ;;  %2267 = vmatprep.subr.bf16.mxu1 %v2781_v16  ;;  %v2765_v23 = vcombine.high %v758_v18, %v766_v19  ;;  %v742_v26 = vld [vmem:[%s3599_s28 + $0x208] sm:$0xff]  ;;  %v2764_v29 = vcombine.low %v758_v18, %v766_v19 }
  0xa0   : > { %2226 = vmatprep.subr.bf16.mxu0 %v2779_v12  ;;  %v2763_v22 = vcombine.high %v757_v15, %v765_v17  ;;  %v741_v24 = vld [vmem:[%s3599_s28 + $0x200] sm:$0xff]  ;;  %v750_v27 = vld [vmem:[%s3599_s28 + $0x248] sm:$0xff]  ;;  %v2762_v28 = vcombine.low %v757_v15, %v765_v17 }
  0xa1   : > { %v749_v25 = vld [vmem:[%s3599_s28 + $0x240] sm:$0xff]  ;;  %v2749_v31 = vcombine.high %v742_v26, %v750_v27  ;;  %v726_v34 = vld [vmem:[%s3599_s28 + $0x188] sm:$0xff]  ;;  %v2748_v37 = vcombine.low %v742_v26, %v750_v27 }
  0xa2   : > { %2268 = vmatpush1.bf16.msra.mxu1 %v2780_v21  ;;  %v2747_v30 = vcombine.high %v741_v24, %v749_v25  ;;  %v725_v32 = vld [vmem:[%s3599_s28 + $0x180] sm:$0xff]  ;;  %v734_v35 = vld [vmem:[%s3599_s28 + $0x1c8] sm:$0xff]  ;;  %v2746_v36 = vcombine.low %v741_v24, %v749_v25 }
  0xa3   : > { %2227 = vmatpush1.bf16.msra.mxu0 %v2778_v20  ;;  %2269 = vmatprep.subr.bf16.mxu1 %v2765_v23  ;;  %v733_v33 = vld [vmem:[%s3599_s28 + $0x1c0] sm:$0xff]  ;;  %v2733_v39 = vcombine.high %v726_v34, %v734_v35  ;;  %v710_v42 = vld [vmem:[%s3599_s28 + $0x108] sm:$0xff]  ;;  %v2732_v45 = vcombine.low %v726_v34, %v734_v35 }
  0xa4   : > { %2228 = vmatprep.subr.bf16.mxu0 %v2763_v22  ;;  %v2731_v38 = vcombine.high %v725_v32, %v733_v33  ;;  %v709_v40 = vld [vmem:[%s3599_s28 + $0x100] sm:$0xff]  ;;  %v718_v43 = vld [vmem:[%s3599_s28 + $0x148] sm:$0xff]  ;;  %v2730_v44 = vcombine.low %v725_v32, %v733_v33 }
  0xa5   : > { %v717_v41 = vld [vmem:[%s3599_s28 + $0x140] sm:$0xff]  ;;  %v2717_v47 = vcombine.high %v710_v42, %v718_v43  ;;  %v694_v50 = vld [vmem:[%s3599_s28 + $0x88] sm:$0xff]  ;;  %v2716_v53 = vcombine.low %v710_v42, %v718_v43 }
  0xa6   : > { %2270 = vmatpush1.bf16.msra.mxu1 %v2764_v29  ;;  %v2715_v46 = vcombine.high %v709_v40, %v717_v41  ;;  %v693_v48 = vld [vmem:[%s3599_s28 + $0x80] sm:$0xff]  ;;  %v702_v51 = vld [vmem:[%s3599_s28 + $0xc8] sm:$0xff]  ;;  %v2714_v52 = vcombine.low %v709_v40, %v717_v41 }
  0xa7   : > { %2229 = vmatpush1.bf16.msra.mxu0 %v2762_v28  ;;  %2271 = vmatprep.subr.bf16.mxu1 %v2749_v31  ;;  %v701_v49 = vld [vmem:[%s3599_s28 + $0xc0] sm:$0xff]  ;;  %v2701_v55 = vcombine.high %v694_v50, %v702_v51  ;;  %v678_v58 = vld [vmem:[%s3599_s28 + $0x8] sm:$0xff]  ;;  %v2700_v61 = vcombine.low %v694_v50, %v702_v51 }
  0xa8   : > { %2230 = vmatprep.subr.bf16.mxu0 %v2747_v30  ;;  %v2699_v54 = vcombine.high %v693_v48, %v701_v49  ;;  %v677_v56 = vld [vmem:[%s3599_s28] sm:$0xff]  ;;  %v686_v59 = vld [vmem:[%s3599_s28 + $0x48] sm:$0xff]  ;;  %v2698_v60 = vcombine.low %v693_v48, %v701_v49 }
  0xa9   : > { %v685_v57 = vld [vmem:[%s3599_s28 + $0x40] sm:$0xff]  ;;  %v2685_v63 = vcombine.high %v678_v58, %v686_v59  ;;  %v918_v4 = vld [vmem:[%s3599_s28 + $0x788] sm:$0xff]  ;;  %v2684_v7 = vcombine.low %v678_v58, %v686_v59 }
  0xaa   : > { %2272 = vmatpush1.bf16.msra.mxu1 %v2748_v37  ;;  %v2683_v62 = vcombine.high %v677_v56, %v685_v57  ;;  %v917_v2 = vld [vmem:[%s3599_s28 + $0x780] sm:$0xff]  ;;  %v926_v5 = vld [vmem:[%s3599_s28 + $0x7c8] sm:$0xff]  ;;  %v2682_v6 = vcombine.low %v677_v56, %v685_v57 }
  0xab   : > { %2231 = vmatpush1.bf16.msra.mxu0 %v2746_v36  ;;  %2273 = vmatprep.subr.bf16.mxu1 %v2733_v39  ;;  %v925_v3 = vld [vmem:[%s3599_s28 + $0x7c0] sm:$0xff]  ;;  %v2925_v9 = vcombine.high %v918_v4, %v926_v5  ;;  %v902_v12 = vld [vmem:[%s3599_s28 + $0x708] sm:$0xff]  ;;  %v2924_v15 = vcombine.low %v918_v4, %v926_v5  ;;  %v791_v4 = vld [vmem:[%s3599_s28 + $0x390] sm:$0xff] }
  0xac   : > { %2232 = vmatprep.subr.bf16.mxu0 %v2731_v38  ;;  %v2923_v8 = vcombine.high %v917_v2, %v925_v3  ;;  %v901_v10 = vld [vmem:[%s3599_s28 + $0x700] sm:$0xff]  ;;  %v910_v13 = vld [vmem:[%s3599_s28 + $0x748] sm:$0xff]  ;;  %v2922_v14 = vcombine.low %v917_v2, %v925_v3  ;;  %v799_v5 = vld [vmem:[%s3599_s28 + $0x3d0] sm:$0xff] }
  0xad   : > { %v909_v11 = vld [vmem:[%s3599_s28 + $0x740] sm:$0xff]  ;;  %v2909_v17 = vcombine.high %v902_v12, %v910_v13  ;;  %v886_v20 = vld [vmem:[%s3599_s28 + $0x688] sm:$0xff]  ;;  %v2908_v23 = vcombine.low %v902_v12, %v910_v13  ;;  %v775_v12 = vld [vmem:[%s3599_s28 + $0x310] sm:$0xff] }
  0xae   : > { %2274 = vmatpush1.bf16.msra.mxu1 %v2732_v45  ;;  %v2907_v16 = vcombine.high %v901_v10, %v909_v11  ;;  %v885_v18 = vld [vmem:[%s3599_s28 + $0x680] sm:$0xff]  ;;  %v894_v21 = vld [vmem:[%s3599_s28 + $0x6c8] sm:$0xff]  ;;  %v2906_v22 = vcombine.low %v901_v10, %v909_v11  ;;  %v2799_v10 = vcombine.high %v791_v4, %v799_v5  ;;  %v783_v13 = vld [vmem:[%s3599_s28 + $0x350] sm:$0xff] }
  0xaf   : > { %2233 = vmatpush1.bf16.msra.mxu0 %v2730_v44  ;;  %2275 = vmatprep.subr.bf16.mxu1 %v2717_v47  ;;  %v893_v19 = vld [vmem:[%s3599_s28 + $0x6c0] sm:$0xff]  ;;  %v2893_v25 = vcombine.high %v886_v20, %v894_v21  ;;  %v870_v28 = vld [vmem:[%s3599_s28 + $0x608] sm:$0xff]  ;;  %v2892_v31 = vcombine.low %v886_v20, %v894_v21  ;;  %v759_v20 = vld [vmem:[%s3599_s28 + $0x290] sm:$0xff] }
  0xb0   : > { %2234 = vmatprep.subr.bf16.mxu0 %v2715_v46  ;;  %v2891_v24 = vcombine.high %v885_v18, %v893_v19  ;;  %v869_v26 = vld [vmem:[%s3599_s28 + $0x600] sm:$0xff]  ;;  %v878_v29 = vld [vmem:[%s3599_s28 + $0x648] sm:$0xff]  ;;  %v2890_v30 = vcombine.low %v885_v18, %v893_v19  ;;  %v2783_v18 = vcombine.high %v775_v12, %v783_v13  ;;  %v767_v21 = vld [vmem:[%s3599_s28 + $0x2d0] sm:$0xff] }
  0xb1   : > { %v877_v27 = vld [vmem:[%s3599_s28 + $0x640] sm:$0xff]  ;;  %v2877_v33 = vcombine.high %v870_v28, %v878_v29  ;;  %v854_v36 = vld [vmem:[%s3599_s28 + $0x588] sm:$0xff]  ;;  %v2876_v39 = vcombine.low %v870_v28, %v878_v29  ;;  %v743_v28 = vld [vmem:[%s3599_s28 + $0x210] sm:$0xff] }
  0xb2   : > { %2276 = vmatpush1.bf16.msra.mxu1 %v2716_v53  ;;  %v2875_v32 = vcombine.high %v869_v26, %v877_v27  ;;  %v853_v34 = vld [vmem:[%s3599_s28 + $0x580] sm:$0xff]  ;;  %v862_v37 = vld [vmem:[%s3599_s28 + $0x5c8] sm:$0xff]  ;;  %v2874_v38 = vcombine.low %v869_v26, %v877_v27  ;;  %v2767_v26 = vcombine.high %v759_v20, %v767_v21  ;;  %v751_v29 = vld [vmem:[%s3599_s28 + $0x250] sm:$0xff] }
  0xb3   : > { %2235 = vmatpush1.bf16.msra.mxu0 %v2714_v52  ;;  %2277 = vmatprep.subr.bf16.mxu1 %v2701_v55  ;;  %v861_v35 = vld [vmem:[%s3599_s28 + $0x5c0] sm:$0xff]  ;;  %v2861_v41 = vcombine.high %v854_v36, %v862_v37  ;;  %v838_v44 = vld [vmem:[%s3599_s28 + $0x508] sm:$0xff]  ;;  %v2860_v47 = vcombine.low %v854_v36, %v862_v37  ;;  %v727_v36 = vld [vmem:[%s3599_s28 + $0x190] sm:$0xff] }
  0xb4   : > { %2236 = vmatprep.subr.bf16.mxu0 %v2699_v54  ;;  %v2859_v40 = vcombine.high %v853_v34, %v861_v35  ;;  %v837_v42 = vld [vmem:[%s3599_s28 + $0x500] sm:$0xff]  ;;  %v846_v45 = vld [vmem:[%s3599_s28 + $0x548] sm:$0xff]  ;;  %v2858_v46 = vcombine.low %v853_v34, %v861_v35  ;;  %v2751_v34 = vcombine.high %v743_v28, %v751_v29  ;;  %v735_v37 = vld [vmem:[%s3599_s28 + $0x1d0] sm:$0xff] }
  0xb5   : > { %v845_v43 = vld [vmem:[%s3599_s28 + $0x540] sm:$0xff]  ;;  %v2845_v49 = vcombine.high %v838_v44, %v846_v45  ;;  %v822_v52 = vld [vmem:[%s3599_s28 + $0x488] sm:$0xff]  ;;  %v2844_v55 = vcombine.low %v838_v44, %v846_v45  ;;  %v711_v44 = vld [vmem:[%s3599_s28 + $0x110] sm:$0xff] }
  0xb6   : > { %2278 = vmatpush1.bf16.msra.mxu1 %v2700_v61  ;;  %v2843_v48 = vcombine.high %v837_v42, %v845_v43  ;;  %v821_v50 = vld [vmem:[%s3599_s28 + $0x480] sm:$0xff]  ;;  %v830_v53 = vld [vmem:[%s3599_s28 + $0x4c8] sm:$0xff]  ;;  %v2842_v54 = vcombine.low %v837_v42, %v845_v43  ;;  %v2735_v42 = vcombine.high %v727_v36, %v735_v37  ;;  %v719_v45 = vld [vmem:[%s3599_s28 + $0x150] sm:$0xff] }
  0xb7   : > { %2237 = vmatpush1.bf16.msra.mxu0 %v2698_v60  ;;  %2279 = vmatprep.subr.bf16.mxu1 %v2685_v63  ;;  %v829_v51 = vld [vmem:[%s3599_s28 + $0x4c0] sm:$0xff]  ;;  %v2829_v57 = vcombine.high %v822_v52, %v830_v53  ;;  %v806_v60 = vld [vmem:[%s3599_s28 + $0x408] sm:$0xff]  ;;  %v2828_v63 = vcombine.low %v822_v52, %v830_v53  ;;  %v695_v52 = vld [vmem:[%s3599_s28 + $0x90] sm:$0xff] }
  0xb8   : > { %2238 = vmatprep.subr.bf16.mxu0 %v2683_v62  ;;  %v2827_v56 = vcombine.high %v821_v50, %v829_v51  ;;  %v805_v58 = vld [vmem:[%s3599_s28 + $0x400] sm:$0xff]  ;;  %v814_v61 = vld [vmem:[%s3599_s28 + $0x448] sm:$0xff]  ;;  %v2826_v62 = vcombine.low %v821_v50, %v829_v51  ;;  %v2719_v50 = vcombine.high %v711_v44, %v719_v45  ;;  %v703_v53 = vld [vmem:[%s3599_s28 + $0xd0] sm:$0xff] }
  0xb9   : > { %v813_v59 = vld [vmem:[%s3599_s28 + $0x440] sm:$0xff]  ;;  %v2813_v3 = vcombine.high %v806_v60, %v814_v61 }
  0xba   : > { %2280 = vmatpush1.bf16.msra.mxu1 %v2684_v7  ;;  %v2811_v2 = vcombine.high %v805_v58, %v813_v59  ;;  %v800_v7 = vld [vmem:[%s3599_s28 + $0x3d8] sm:$0xff] }
  0xbb   : > { %2239 = vmatpush1.bf16.msra.mxu0 %v2682_v6  ;;  %2281 = vmatprep.subr.bf16.mxu1 %v2925_v9  ;;  %v792_v6 = vld [vmem:[%s3599_s28 + $0x398] sm:$0xff]  ;;  %v2812_v9 = vcombine.low %v806_v60, %v814_v61  ;;  %v679_v60 = vld [vmem:[%s3599_s28 + $0x10] sm:$0xff] }
  0xbc   : > { %2240 = vmatprep.subr.bf16.mxu0 %v2923_v8  ;;  %v2810_v8 = vcombine.low %v805_v58, %v813_v59  ;;  %v2801_v11 = vcombine.high %v792_v6, %v800_v7  ;;  %v2703_v58 = vcombine.high %v695_v52, %v703_v53  ;;  %v687_v61 = vld [vmem:[%s3599_s28 + $0x50] sm:$0xff] }
  0xbe   : > { %2282 = vmatpush2.bf16.msra.mxu1 %v2924_v15  ;;  %v784_v15 = vld [vmem:[%s3599_s28 + $0x358] sm:$0xff] }
  0xbf   : > { %2241 = vmatpush2.bf16.msra.mxu0 %v2922_v14  ;;  %2283 = vmatprep.subr.bf16.mxu1 %v2909_v17  ;;  %v776_v14 = vld [vmem:[%s3599_s28 + $0x318] sm:$0xff]  ;;  %v2800_v17 = vcombine.low %v792_v6, %v800_v7  ;;  %v919_v6 = vld [vmem:[%s3599_s28 + $0x790] sm:$0xff] }
  0xc0   : > { %2242 = vmatprep.subr.bf16.mxu0 %v2907_v16  ;;  %v2798_v16 = vcombine.low %v791_v4, %v799_v5  ;;  %v2785_v19 = vcombine.high %v776_v14, %v784_v15  ;;  %v2687_v4 = vcombine.high %v679_v60, %v687_v61  ;;  %v927_v7 = vld [vmem:[%s3599_s28 + $0x7d0] sm:$0xff] }
  0xc2   : > { %2284 = vmatpush2.bf16.msra.mxu1 %v2908_v23  ;;  %v768_v23 = vld [vmem:[%s3599_s28 + $0x2d8] sm:$0xff] }
  0xc3   : > { %2243 = vmatpush2.bf16.msra.mxu0 %v2906_v22  ;;  %2285 = vmatprep.subr.bf16.mxu1 %v2893_v25  ;;  %v760_v22 = vld [vmem:[%s3599_s28 + $0x298] sm:$0xff]  ;;  %v2784_v25 = vcombine.low %v776_v14, %v784_v15  ;;  %v903_v14 = vld [vmem:[%s3599_s28 + $0x710] sm:$0xff] }
  0xc4   : > { %2244 = vmatprep.subr.bf16.mxu0 %v2891_v24  ;;  %v2782_v24 = vcombine.low %v775_v12, %v783_v13  ;;  %v2769_v27 = vcombine.high %v760_v22, %v768_v23  ;;  %v2927_v12 = vcombine.high %v919_v6, %v927_v7  ;;  %v911_v15 = vld [vmem:[%s3599_s28 + $0x750] sm:$0xff] }
  0xc6   : > { %2286 = vmatpush2.bf16.msra.mxu1 %v2892_v31  ;;  %v752_v31 = vld [vmem:[%s3599_s28 + $0x258] sm:$0xff] }
  0xc7   : > { %2245 = vmatpush2.bf16.msra.mxu0 %v2890_v30  ;;  %2287 = vmatprep.subr.bf16.mxu1 %v2877_v33  ;;  %v744_v30 = vld [vmem:[%s3599_s28 + $0x218] sm:$0xff]  ;;  %v2768_v33 = vcombine.low %v760_v22, %v768_v23  ;;  %v887_v22 = vld [vmem:[%s3599_s28 + $0x690] sm:$0xff] }
  0xc8   : > { %2246 = vmatprep.subr.bf16.mxu0 %v2875_v32  ;;  %v2766_v32 = vcombine.low %v759_v20, %v767_v21  ;;  %v2753_v35 = vcombine.high %v744_v30, %v752_v31  ;;  %v2911_v20 = vcombine.high %v903_v14, %v911_v15  ;;  %v895_v23 = vld [vmem:[%s3599_s28 + $0x6d0] sm:$0xff] }
  0xca   : > { %2288 = vmatpush2.bf16.msra.mxu1 %v2876_v39  ;;  %v736_v39 = vld [vmem:[%s3599_s28 + $0x1d8] sm:$0xff] }
  0xcb   : > { %2247 = vmatpush2.bf16.msra.mxu0 %v2874_v38  ;;  %2289 = vmatprep.subr.bf16.mxu1 %v2861_v41  ;;  %v728_v38 = vld [vmem:[%s3599_s28 + $0x198] sm:$0xff]  ;;  %v2752_v41 = vcombine.low %v744_v30, %v752_v31  ;;  %v871_v30 = vld [vmem:[%s3599_s28 + $0x610] sm:$0xff] }
  0xcc   : > { %2248 = vmatprep.subr.bf16.mxu0 %v2859_v40  ;;  %v2750_v40 = vcombine.low %v743_v28, %v751_v29  ;;  %v2737_v43 = vcombine.high %v728_v38, %v736_v39  ;;  %v2895_v28 = vcombine.high %v887_v22, %v895_v23  ;;  %v879_v31 = vld [vmem:[%s3599_s28 + $0x650] sm:$0xff] }
  0xce   : > { %2290 = vmatpush2.bf16.msra.mxu1 %v2860_v47  ;;  %v720_v47 = vld [vmem:[%s3599_s28 + $0x158] sm:$0xff] }
  0xcf   : > { %2249 = vmatpush2.bf16.msra.mxu0 %v2858_v46  ;;  %2291 = vmatprep.subr.bf16.mxu1 %v2845_v49  ;;  %v712_v46 = vld [vmem:[%s3599_s28 + $0x118] sm:$0xff]  ;;  %v2736_v49 = vcombine.low %v728_v38, %v736_v39  ;;  %v855_v38 = vld [vmem:[%s3599_s28 + $0x590] sm:$0xff] }
  0xd0   : > { %2250 = vmatprep.subr.bf16.mxu0 %v2843_v48  ;;  %v2734_v48 = vcombine.low %v727_v36, %v735_v37  ;;  %v2721_v51 = vcombine.high %v712_v46, %v720_v47  ;;  %v2879_v36 = vcombine.high %v871_v30, %v879_v31  ;;  %v863_v39 = vld [vmem:[%s3599_s28 + $0x5d0] sm:$0xff] }
  0xd2   : > { %2292 = vmatpush2.bf16.msra.mxu1 %v2844_v55  ;;  %v704_v55 = vld [vmem:[%s3599_s28 + $0xd8] sm:$0xff] }
  0xd3   : > { %2251 = vmatpush2.bf16.msra.mxu0 %v2842_v54  ;;  %2293 = vmatprep.subr.bf16.mxu1 %v2829_v57  ;;  %v696_v54 = vld [vmem:[%s3599_s28 + $0x98] sm:$0xff]  ;;  %v2720_v57 = vcombine.low %v712_v46, %v720_v47  ;;  %v839_v46 = vld [vmem:[%s3599_s28 + $0x510] sm:$0xff] }
  0xd4   : > { %2252 = vmatprep.subr.bf16.mxu0 %v2827_v56  ;;  %v2718_v56 = vcombine.low %v711_v44, %v719_v45  ;;  %v2705_v59 = vcombine.high %v696_v54, %v704_v55  ;;  %v2863_v44 = vcombine.high %v855_v38, %v863_v39  ;;  %v847_v47 = vld [vmem:[%s3599_s28 + $0x550] sm:$0xff] }
  0xd6   : > { %2294 = vmatpush2.bf16.msra.mxu1 %v2828_v63  ;;  %v688_v63 = vld [vmem:[%s3599_s28 + $0x58] sm:$0xff] }
  0xd7   : > { %2253 = vmatpush2.bf16.msra.mxu0 %v2826_v62  ;;  %2295 = vmatprep.subr.bf16.mxu1 %v2813_v3  ;;  %v680_v62 = vld [vmem:[%s3599_s28 + $0x18] sm:$0xff]  ;;  %v2704_v3 = vcombine.low %v696_v54, %v704_v55  ;;  %v823_v54 = vld [vmem:[%s3599_s28 + $0x490] sm:$0xff] }
  0xd8   : > { %2254 = vmatprep.subr.bf16.mxu0 %v2811_v2  ;;  %v2702_v2 = vcombine.low %v695_v52, %v703_v53  ;;  %v2689_v5 = vcombine.high %v680_v62, %v688_v63  ;;  %v2847_v52 = vcombine.high %v839_v46, %v847_v47  ;;  %v831_v55 = vld [vmem:[%s3599_s28 + $0x4d0] sm:$0xff] }
  0xda   : > { %2296 = vmatpush2.bf16.msra.mxu1 %v2812_v9  ;;  %v928_v9 = vld [vmem:[%s3599_s28 + $0x7d8] sm:$0xff] }
  0xdb   : > { %2255 = vmatpush2.bf16.msra.mxu0 %v2810_v8  ;;  %2347 = vmatprep.subr.bf16.mxu1 %v2801_v11  ;;  %v920_v8 = vld [vmem:[%s3599_s28 + $0x798] sm:$0xff]  ;;  %v2688_v11 = vcombine.low %v680_v62, %v688_v63  ;;  %v807_v62 = vld [vmem:[%s3599_s28 + $0x410] sm:$0xff] }
  0xdc   : > { %2306 = vmatprep.subr.bf16.mxu0 %v2799_v10  ;;  %v2686_v10 = vcombine.low %v679_v60, %v687_v61  ;;  %v2929_v13 = vcombine.high %v920_v8, %v928_v9  ;;  %v2831_v60 = vcombine.high %v823_v54, %v831_v55  ;;  %v815_v63 = vld [vmem:[%s3599_s28 + $0x450] sm:$0xff] }
  0xdd   : > { %2298 = vmatmul.mubr.bf16.vlgmr.msra.gmra.mxu1 %v3593_v0 }
  0xde   : > { %2257 = vmatmul.mubr.bf16.vlgmr.msra.gmra.mxu0 %v3593_v0  ;;  %2348 = vmatpush1.bf16.msra.mxu1 %v2800_v17  ;;  %v912_v17 = vld [vmem:[%s3599_s28 + $0x758] sm:$0xff] }
  0xdf   : > { %2307 = vmatpush1.bf16.msra.mxu0 %v2798_v16  ;;  %2349 = vmatprep.subr.bf16.mxu1 %v2785_v19  ;;  %v904_v16 = vld [vmem:[%s3599_s28 + $0x718] sm:$0xff]  ;;  %v2928_v19 = vcombine.low %v920_v8, %v928_v9  ;;  %v793_v8 = vld [vmem:[%s3599_s28 + $0x3a0] sm:$0xff] }
  0xe0   : > { %2308 = vmatprep.subr.bf16.mxu0 %v2783_v18  ;;  %2338 = vmatprep.mubr.bf16.mxu0 %v3597_v1  ;;  %v2926_v18 = vcombine.low %v919_v6, %v927_v7  ;;  %v2913_v21 = vcombine.high %v904_v16, %v912_v17  ;;  %v2815_v6 = vcombine.high %v807_v62, %v815_v63  ;;  %v801_v9 = vld [vmem:[%s3599_s28 + $0x3e0] sm:$0xff] }
  0xe1   : > { %2379 = vmatprep.mubr.bf16.mxu1 %v3597_v1 }
  0xe2   : > { %2350 = vmatpush1.bf16.msra.mxu1 %v2784_v25  ;;  %v896_v25 = vld [vmem:[%s3599_s28 + $0x6d8] sm:$0xff] }
  0xe3   : > { %2309 = vmatpush1.bf16.msra.mxu0 %v2782_v24  ;;  %2351 = vmatprep.subr.bf16.mxu1 %v2769_v27  ;;  %v888_v24 = vld [vmem:[%s3599_s28 + $0x698] sm:$0xff]  ;;  %v2912_v27 = vcombine.low %v904_v16, %v912_v17  ;;  %v777_v16 = vld [vmem:[%s3599_s28 + $0x320] sm:$0xff] }
  0xe4   : > { %2310 = vmatprep.subr.bf16.mxu0 %v2767_v26  ;;  %v2910_v26 = vcombine.low %v903_v14, %v911_v15  ;;  %v2897_v29 = vcombine.high %v888_v24, %v896_v25  ;;  %v2803_v14 = vcombine.high %v793_v8, %v801_v9  ;;  %v785_v17 = vld [vmem:[%s3599_s28 + $0x360] sm:$0xff] }
  0xe6   : > { %2352 = vmatpush1.bf16.msra.mxu1 %v2768_v33  ;;  %v880_v33 = vld [vmem:[%s3599_s28 + $0x658] sm:$0xff] }
  0xe7   : > { %2311 = vmatpush1.bf16.msra.mxu0 %v2766_v32  ;;  %2353 = vmatprep.subr.bf16.mxu1 %v2753_v35  ;;  %v872_v32 = vld [vmem:[%s3599_s28 + $0x618] sm:$0xff]  ;;  %v2896_v35 = vcombine.low %v888_v24, %v896_v25  ;;  %v761_v24 = vld [vmem:[%s3599_s28 + $0x2a0] sm:$0xff] }
  0xe8   : > { %2312 = vmatprep.subr.bf16.mxu0 %v2751_v34  ;;  %v2894_v34 = vcombine.low %v887_v22, %v895_v23  ;;  %v2881_v37 = vcombine.high %v872_v32, %v880_v33  ;;  %v2787_v22 = vcombine.high %v777_v16, %v785_v17  ;;  %v769_v25 = vld [vmem:[%s3599_s28 + $0x2e0] sm:$0xff] }
  0xea   : > { %2354 = vmatpush1.bf16.msra.mxu1 %v2752_v41  ;;  %v864_v41 = vld [vmem:[%s3599_s28 + $0x5d8] sm:$0xff] }
  0xeb   : > { %2313 = vmatpush1.bf16.msra.mxu0 %v2750_v40  ;;  %2355 = vmatprep.subr.bf16.mxu1 %v2737_v43  ;;  %v856_v40 = vld [vmem:[%s3599_s28 + $0x598] sm:$0xff]  ;;  %v2880_v43 = vcombine.low %v872_v32, %v880_v33  ;;  %v745_v32 = vld [vmem:[%s3599_s28 + $0x220] sm:$0xff] }
  0xec   : > { %2314 = vmatprep.subr.bf16.mxu0 %v2735_v42  ;;  %v2878_v42 = vcombine.low %v871_v30, %v879_v31  ;;  %v2865_v45 = vcombine.high %v856_v40, %v864_v41  ;;  %v2771_v30 = vcombine.high %v761_v24, %v769_v25  ;;  %v753_v33 = vld [vmem:[%s3599_s28 + $0x260] sm:$0xff] }
  0xee   : > { %2356 = vmatpush1.bf16.msra.mxu1 %v2736_v49  ;;  %v848_v49 = vld [vmem:[%s3599_s28 + $0x558] sm:$0xff] }
  0xef   : > { %2315 = vmatpush1.bf16.msra.mxu0 %v2734_v48  ;;  %2357 = vmatprep.subr.bf16.mxu1 %v2721_v51  ;;  %v840_v48 = vld [vmem:[%s3599_s28 + $0x518] sm:$0xff]  ;;  %v2864_v51 = vcombine.low %v856_v40, %v864_v41  ;;  %v737_v40 = vld [vmem:[%s3599_s28 + $0x1e0] sm:$0xff]  ;;  %v730_v41 = vld [vmem:[%s3599_s28 + $0x1a8] sm:$0xff] }
  0xf0   : > { %2316 = vmatprep.subr.bf16.mxu0 %v2719_v50  ;;  %v2862_v50 = vcombine.low %v855_v38, %v863_v39  ;;  %v2849_v53 = vcombine.high %v840_v48, %v848_v49  ;;  %v729_v39 = vld [vmem:[%s3599_s28 + $0x1a0] sm:$0xff] }
  0xf2   : > { %2358 = vmatpush1.bf16.msra.mxu1 %v2720_v57  ;;  %v832_v57 = vld [vmem:[%s3599_s28 + $0x4d8] sm:$0xff] }
  0xf3   : > { %2317 = vmatpush1.bf16.msra.mxu0 %v2718_v56  ;;  %2359 = vmatprep.subr.bf16.mxu1 %v2705_v59  ;;  %v824_v56 = vld [vmem:[%s3599_s28 + $0x498] sm:$0xff]  ;;  %v2848_v59 = vcombine.low %v840_v48, %v848_v49  ;;  %v721_v48 = vld [vmem:[%s3599_s28 + $0x160] sm:$0xff]  ;;  %v714_v49 = vld [vmem:[%s3599_s28 + $0x128] sm:$0xff] }
  0xf4   : > { %2318 = vmatprep.subr.bf16.mxu0 %v2703_v58  ;;  %v2846_v58 = vcombine.low %v839_v46, %v847_v47  ;;  %v2833_v61 = vcombine.high %v824_v56, %v832_v57  ;;  %v713_v47 = vld [vmem:[%s3599_s28 + $0x120] sm:$0xff] }
  0xf6   : > { %2360 = vmatpush1.bf16.msra.mxu1 %v2704_v3  ;;  %v816_v3 = vld [vmem:[%s3599_s28 + $0x458] sm:$0xff] }
  0xf7   : > { %2319 = vmatpush1.bf16.msra.mxu0 %v2702_v2  ;;  %2361 = vmatprep.subr.bf16.mxu1 %v2689_v5  ;;  %v808_v2 = vld [vmem:[%s3599_s28 + $0x418] sm:$0xff]  ;;  %v2832_v5 = vcombine.low %v824_v56, %v832_v57  ;;  %v705_v56 = vld [vmem:[%s3599_s28 + $0xe0] sm:$0xff]  ;;  %v698_v57 = vld [vmem:[%s3599_s28 + $0xa8] sm:$0xff] }
  0xf8   : > { %2320 = vmatprep.subr.bf16.mxu0 %v2687_v4  ;;  %v2830_v4 = vcombine.low %v823_v54, %v831_v55  ;;  %v2817_v7 = vcombine.high %v808_v2, %v816_v3  ;;  %v697_v55 = vld [vmem:[%s3599_s28 + $0xa0] sm:$0xff] }
  0xfa   : > { %2362 = vmatpush1.bf16.msra.mxu1 %v2688_v11  ;;  %v802_v11 = vld [vmem:[%s3599_s28 + $0x3e8] sm:$0xff] }
  0xfb   : > { %2321 = vmatpush1.bf16.msra.mxu0 %v2686_v10  ;;  %2363 = vmatprep.subr.bf16.mxu1 %v2929_v13  ;;  %v794_v10 = vld [vmem:[%s3599_s28 + $0x3a8] sm:$0xff]  ;;  %v2816_v13 = vcombine.low %v808_v2, %v816_v3  ;;  %v689_v2 = vld [vmem:[%s3599_s28 + $0x60] sm:$0xff] }
  0xfc   : > { %2322 = vmatprep.subr.bf16.mxu0 %v2927_v12  ;;  %v2814_v12 = vcombine.low %v807_v62, %v815_v63  ;;  %v2805_v15 = vcombine.high %v794_v10, %v802_v11  ;;  %v681_v63 = vld [vmem:[%s3599_s28 + $0x20] sm:$0xff]  ;;  %v682_v3 = vld [vmem:[%s3599_s28 + $0x28] sm:$0xff] }
  0xfe   : > { %2364 = vmatpush2.bf16.msra.mxu1 %v2928_v19  ;;  %v786_v19 = vld [vmem:[%s3599_s28 + $0x368] sm:$0xff] }
  0xff   : > { %2323 = vmatpush2.bf16.msra.mxu0 %v2926_v18  ;;  %2365 = vmatprep.subr.bf16.mxu1 %v2913_v21  ;;  %v778_v18 = vld [vmem:[%s3599_s28 + $0x328] sm:$0xff]  ;;  %v2804_v21 = vcombine.low %v794_v10, %v802_v11  ;;  %v929_v10 = vld [vmem:[%s3599_s28 + $0x7e0] sm:$0xff] }
 0x100   : > { %2324 = vmatprep.subr.bf16.mxu0 %v2911_v20  ;;  %v2802_v20 = vcombine.low %v793_v8, %v801_v9  ;;  %v2789_v23 = vcombine.high %v778_v18, %v786_v19  ;;  %v921_v9 = vld [vmem:[%s3599_s28 + $0x7a0] sm:$0xff]  ;;  %v922_v11 = vld [vmem:[%s3599_s28 + $0x7a8] sm:$0xff] }
 0x102   : > { %2366 = vmatpush2.bf16.msra.mxu1 %v2912_v27  ;;  %v770_v27 = vld [vmem:[%s3599_s28 + $0x2e8] sm:$0xff] }
 0x103   : > { %2325 = vmatpush2.bf16.msra.mxu0 %v2910_v26  ;;  %2367 = vmatprep.subr.bf16.mxu1 %v2897_v29  ;;  %v762_v26 = vld [vmem:[%s3599_s28 + $0x2a8] sm:$0xff]  ;;  %v2788_v29 = vcombine.low %v778_v18, %v786_v19  ;;  %v913_v18 = vld [vmem:[%s3599_s28 + $0x760] sm:$0xff] }
 0x104   : > { %2326 = vmatprep.subr.bf16.mxu0 %v2895_v28  ;;  %v2786_v28 = vcombine.low %v777_v16, %v785_v17  ;;  %v2773_v31 = vcombine.high %v762_v26, %v770_v27  ;;  %v905_v17 = vld [vmem:[%s3599_s28 + $0x720] sm:$0xff]  ;;  %v906_v19 = vld [vmem:[%s3599_s28 + $0x728] sm:$0xff] }
 0x106   : > { %2368 = vmatpush2.bf16.msra.mxu1 %v2896_v35  ;;  %v754_v35 = vld [vmem:[%s3599_s28 + $0x268] sm:$0xff] }
 0x107   : > { %2327 = vmatpush2.bf16.msra.mxu0 %v2894_v34  ;;  %2369 = vmatprep.subr.bf16.mxu1 %v2881_v37  ;;  %v746_v34 = vld [vmem:[%s3599_s28 + $0x228] sm:$0xff]  ;;  %v2755_v37 = vcombine.high %v745_v32, %v753_v33 }
 0x108   : > { %2328 = vmatprep.subr.bf16.mxu0 %v2879_v36  ;;  %v2772_v36 = vcombine.low %v762_v26, %v770_v27  ;;  %v2757_v38 = vcombine.high %v746_v34, %v754_v35  ;;  %v897_v26 = vld [vmem:[%s3599_s28 + $0x6e0] sm:$0xff]  ;;  %v890_v27 = vld [vmem:[%s3599_s28 + $0x6a8] sm:$0xff] }
 0x10a   : > { %2370 = vmatpush2.bf16.msra.mxu1 %v2880_v43  ;;  %v2754_v43 = vcombine.low %v745_v32, %v753_v33  ;;  %v873_v33 = vld [vmem:[%s3599_s28 + $0x620] sm:$0xff] }
 0x10b   : > { %2329 = vmatpush2.bf16.msra.mxu0 %v2878_v42  ;;  %2371 = vmatprep.subr.bf16.mxu1 %v2865_v45  ;;  %v738_v42 = vld [vmem:[%s3599_s28 + $0x1e8] sm:$0xff]  ;;  %v2739_v45 = vcombine.high %v729_v39, %v737_v40 }
 0x10c   : > { %2330 = vmatprep.subr.bf16.mxu0 %v2863_v44  ;;  %v2756_v44 = vcombine.low %v746_v34, %v754_v35  ;;  %v2741_v46 = vcombine.high %v730_v41, %v738_v42  ;;  %v881_v34 = vld [vmem:[%s3599_s28 + $0x660] sm:$0xff]  ;;  %v874_v35 = vld [vmem:[%s3599_s28 + $0x628] sm:$0xff] }
 0x10e   : > { %2372 = vmatpush2.bf16.msra.mxu1 %v2864_v51  ;;  %v2738_v51 = vcombine.low %v729_v39, %v737_v40  ;;  %v857_v40 = vld [vmem:[%s3599_s28 + $0x5a0] sm:$0xff] }
 0x10f   : > { %2331 = vmatpush2.bf16.msra.mxu0 %v2862_v50  ;;  %2373 = vmatprep.subr.bf16.mxu1 %v2849_v53  ;;  %v722_v50 = vld [vmem:[%s3599_s28 + $0x168] sm:$0xff]  ;;  %v2723_v53 = vcombine.high %v713_v47, %v721_v48 }
 0x110   : > { %2332 = vmatprep.subr.bf16.mxu0 %v2847_v52  ;;  %v2740_v52 = vcombine.low %v730_v41, %v738_v42  ;;  %v2725_v54 = vcombine.high %v714_v49, %v722_v50  ;;  %v865_v41 = vld [vmem:[%s3599_s28 + $0x5e0] sm:$0xff]  ;;  %v858_v42 = vld [vmem:[%s3599_s28 + $0x5a8] sm:$0xff] }
 0x112   : > { %2374 = vmatpush2.bf16.msra.mxu1 %v2848_v59  ;;  %v2722_v59 = vcombine.low %v713_v47, %v721_v48  ;;  %v841_v48 = vld [vmem:[%s3599_s28 + $0x520] sm:$0xff] }
 0x113   : > { %2333 = vmatpush2.bf16.msra.mxu0 %v2846_v58  ;;  %2375 = vmatprep.subr.bf16.mxu1 %v2833_v61  ;;  %v706_v58 = vld [vmem:[%s3599_s28 + $0xe8] sm:$0xff]  ;;  %v2707_v61 = vcombine.high %v697_v55, %v705_v56 }
 0x114   : > { %2334 = vmatprep.subr.bf16.mxu0 %v2831_v60  ;;  %v2724_v60 = vcombine.low %v714_v49, %v722_v50  ;;  %v2709_v62 = vcombine.high %v698_v57, %v706_v58  ;;  %v849_v49 = vld [vmem:[%s3599_s28 + $0x560] sm:$0xff]  ;;  %v842_v50 = vld [vmem:[%s3599_s28 + $0x528] sm:$0xff] }
 0x116   : > { %2376 = vmatpush2.bf16.msra.mxu1 %v2832_v5  ;;  %v2706_v5 = vcombine.low %v697_v55, %v705_v56  ;;  %v825_v56 = vld [vmem:[%s3599_s28 + $0x4a0] sm:$0xff] }
 0x117   : > { %2335 = vmatpush2.bf16.msra.mxu0 %v2830_v4  ;;  %2377 = vmatprep.subr.bf16.mxu1 %v2817_v7  ;;  %v690_v4 = vld [vmem:[%s3599_s28 + $0x68] sm:$0xff]  ;;  %v2691_v7 = vcombine.high %v681_v63, %v689_v2 }
 0x118   : > { %2336 = vmatprep.subr.bf16.mxu0 %v2815_v6  ;;  %v2708_v6 = vcombine.low %v698_v57, %v706_v58  ;;  %v2693_v8 = vcombine.high %v682_v3, %v690_v4  ;;  %v833_v57 = vld [vmem:[%s3599_s28 + $0x4e0] sm:$0xff]  ;;  %v826_v58 = vld [vmem:[%s3599_s28 + $0x4a8] sm:$0xff] }
 0x11a   : > { %2378 = vmatpush2.bf16.msra.mxu1 %v2816_v13  ;;  %v2690_v13 = vcombine.low %v681_v63, %v689_v2  ;;  %v809_v2 = vld [vmem:[%s3599_s28 + $0x420] sm:$0xff] }
 0x11b   : > { %2337 = vmatpush2.bf16.msra.mxu0 %v2814_v12  ;;  %2429 = vmatprep.subr.bf16.mxu1 %v2805_v15  ;;  %v930_v12 = vld [vmem:[%s3599_s28 + $0x7e8] sm:$0xff]  ;;  %v2931_v15 = vcombine.high %v921_v9, %v929_v10 }
 0x11c   : > { %2388 = vmatprep.subr.bf16.mxu0 %v2803_v14  ;;  %v2692_v14 = vcombine.low %v682_v3, %v690_v4  ;;  %v2933_v16 = vcombine.high %v922_v11, %v930_v12  ;;  %v817_v3 = vld [vmem:[%s3599_s28 + $0x460] sm:$0xff]  ;;  %v810_v4 = vld [vmem:[%s3599_s28 + $0x428] sm:$0xff] }
 0x11d   : > { %2380 = vmatmul.mubr.bf16.vlgmr.msra.gmra.mxu1 %v3593_v0 }
 0x11e   : > { %2339 = vmatmul.mubr.bf16.vlgmr.msra.gmra.mxu0 %v3593_v0  ;;  %2430 = vmatpush1.bf16.msra.mxu1 %v2804_v21  ;;  %v2770_v0 = vcombine.low %v761_v24, %v769_v25  ;;  %v2930_v21 = vcombine.low %v921_v9, %v929_v10  ;;  %v889_v25 = vld [vmem:[%s3599_s28 + $0x6a0] sm:$0xff]  ;;  %v795_v10 = vld [vmem:[%s3599_s28 + $0x3b0] sm:$0xff] }
 0x11f   : > { %2389 = vmatpush1.bf16.msra.mxu0 %v2802_v20  ;;  %2431 = vmatprep.subr.bf16.mxu1 %v2789_v23  ;;  %v914_v20 = vld [vmem:[%s3599_s28 + $0x768] sm:$0xff]  ;;  %v2915_v23 = vcombine.high %v905_v17, %v913_v18 }
 0x120   : > { %2390 = vmatprep.subr.bf16.mxu0 %v2787_v22  ;;  %2420 = vmatprep.mubr.bf16.mxu0 %v3597_v1  ;;  %v2932_v22 = vcombine.low %v922_v11, %v930_v12  ;;  %v2917_v24 = vcombine.high %v906_v19, %v914_v20  ;;  %v803_v11 = vld [vmem:[%s3599_s28 + $0x3f0] sm:$0xff]  ;;  %v796_v12 = vld [vmem:[%s3599_s28 + $0x3b8] sm:$0xff] }
 0x121   : > { %2461 = vmatprep.mubr.bf16.mxu1 %v3597_v1 }
 0x122   : > { %2432 = vmatpush1.bf16.msra.mxu1 %v2788_v29  ;;  %v2914_v29 = vcombine.low %v905_v17, %v913_v18  ;;  %v779_v18 = vld [vmem:[%s3599_s28 + $0x330] sm:$0xff] }
 0x123   : > { %2391 = vmatpush1.bf16.msra.mxu0 %v2786_v28  ;;  %2433 = vmatprep.subr.bf16.mxu1 %v2773_v31  ;;  %v898_v28 = vld [vmem:[%s3599_s28 + $0x6e8] sm:$0xff]  ;;  %v2899_v31 = vcombine.high %v889_v25, %v897_v26 }
 0x124   : > { %2392 = vmatprep.subr.bf16.mxu0 %v2771_v30  ;;  %v2916_v30 = vcombine.low %v906_v19, %v914_v20  ;;  %v2901_v32 = vcombine.high %v890_v27, %v898_v28  ;;  %v787_v19 = vld [vmem:[%s3599_s28 + $0x370] sm:$0xff]  ;;  %v780_v20 = vld [vmem:[%s3599_s28 + $0x338] sm:$0xff] }
 0x126   : > { %2434 = vmatpush1.bf16.msra.mxu1 %v2772_v36  ;;  %v2898_v36 = vcombine.low %v889_v25, %v897_v26  ;;  %v763_v26 = vld [vmem:[%s3599_s28 + $0x2b0] sm:$0xff] }
 0x127   : > { %2393 = vmatpush1.bf16.msra.mxu0 %v2770_v0  ;;  %2435 = vmatprep.subr.bf16.mxu1 %v2757_v38  ;;  %v882_v0 = vld [vmem:[%s3599_s28 + $0x668] sm:$0xff]  ;;  %v2883_v38 = vcombine.high %v873_v33, %v881_v34 }
 0x128   : > { %2394 = vmatprep.subr.bf16.mxu0 %v2755_v37  ;;  %v2900_v37 = vcombine.low %v890_v27, %v898_v28  ;;  %v2885_v39 = vcombine.high %v874_v35, %v882_v0  ;;  %v771_v27 = vld [vmem:[%s3599_s28 + $0x2f0] sm:$0xff]  ;;  %v3816_v28 = vld.sshfl [vmem:[%s3904_s1] sm:$0x33 pattern:$0x76325410] }
 0x12a   : > { %2436 = vmatpush1.bf16.msra.mxu1 %v2756_v44  ;;  %v2882_v44 = vcombine.low %v873_v33, %v881_v34  ;;  %v2775_v33 = vcombine.high %v763_v26, %v771_v27 }
 0x12b   : > { %2395 = vmatpush1.bf16.msra.mxu0 %v2754_v43  ;;  %2437 = vmatprep.subr.bf16.mxu1 %v2741_v46  ;;  %v866_v43 = vld [vmem:[%s3599_s28 + $0x5e8] sm:$0xff]  ;;  %v2867_v46 = vcombine.high %v857_v40, %v865_v41 }
 0x12c   : > { %2396 = vmatprep.subr.bf16.mxu0 %v2739_v45  ;;  %v2884_v45 = vcombine.low %v874_v35, %v882_v0  ;;  %v2869_v47 = vcombine.high %v858_v42, %v866_v43  ;;  %v747_v35 = vld [vmem:[%s3599_s28 + $0x230] sm:$0xff] }
 0x12d   : > { %v755_v0 = vld [vmem:[%s3599_s28 + $0x270] sm:$0xff] }
 0x12e   : > { %2438 = vmatpush1.bf16.msra.mxu1 %v2740_v52  ;;  %v2866_v52 = vcombine.low %v857_v40, %v865_v41  ;;  %v2759_v40 = vcombine.high %v747_v35, %v755_v0 }
 0x12f   : > { %2397 = vmatpush1.bf16.msra.mxu0 %v2738_v51  ;;  %2439 = vmatprep.subr.bf16.mxu1 %v2725_v54  ;;  %v850_v51 = vld [vmem:[%s3599_s28 + $0x568] sm:$0xff]  ;;  %v2851_v54 = vcombine.high %v841_v48, %v849_v49 }
 0x130   : > { %2398 = vmatprep.subr.bf16.mxu0 %v2723_v53  ;;  %v2868_v53 = vcombine.low %v858_v42, %v866_v43  ;;  %v2853_v55 = vcombine.high %v842_v50, %v850_v51  ;;  %v731_v42 = vld [vmem:[%s3599_s28 + $0x1b0] sm:$0xff] }
 0x131   : > { %v739_v43 = vld [vmem:[%s3599_s28 + $0x1f0] sm:$0xff] }
 0x132   : > { %2440 = vmatpush1.bf16.msra.mxu1 %v2724_v60  ;;  %v2850_v60 = vcombine.low %v841_v48, %v849_v49  ;;  %v715_v49 = vld [vmem:[%s3599_s28 + $0x130] sm:$0xff] }
 0x133   : > { %2399 = vmatpush1.bf16.msra.mxu0 %v2722_v59  ;;  %2441 = vmatprep.subr.bf16.mxu1 %v2709_v62  ;;  %v834_v59 = vld [vmem:[%s3599_s28 + $0x4e8] sm:$0xff]  ;;  %v2835_v62 = vcombine.high %v825_v56, %v833_v57 }
 0x134   : > { %2400 = vmatprep.subr.bf16.mxu0 %v2707_v61  ;;  %v2852_v61 = vcombine.low %v842_v50, %v850_v51  ;;  %v2837_v63 = vcombine.high %v826_v58, %v834_v59  ;;  %v723_v50 = vld [vmem:[%s3599_s28 + $0x170] sm:$0xff]  ;;  %v716_v51 = vld [vmem:[%s3599_s28 + $0x138] sm:$0xff] }
 0x136   : > { %2442 = vmatpush1.bf16.msra.mxu1 %v2708_v6  ;;  %v2834_v6 = vcombine.low %v825_v56, %v833_v57  ;;  %v699_v57 = vld [vmem:[%s3599_s28 + $0xb0] sm:$0xff] }
 0x137   : > { %2401 = vmatpush1.bf16.msra.mxu0 %v2706_v5  ;;  %2443 = vmatprep.subr.bf16.mxu1 %v2693_v8  ;;  %v818_v5 = vld [vmem:[%s3599_s28 + $0x468] sm:$0xff]  ;;  %v2819_v8 = vcombine.high %v809_v2, %v817_v3 }
 0x138   : > { %2402 = vmatprep.subr.bf16.mxu0 %v2691_v7  ;;  %v2836_v7 = vcombine.low %v826_v58, %v834_v59  ;;  %v2821_v9 = vcombine.high %v810_v4, %v818_v5  ;;  %v707_v58 = vld [vmem:[%s3599_s28 + $0xf0] sm:$0xff]  ;;  %v700_v59 = vld [vmem:[%s3599_s28 + $0xb8] sm:$0xff] }
 0x13a   : > { %2444 = vmatpush1.bf16.msra.mxu1 %v2692_v14  ;;  %v2818_v14 = vcombine.low %v809_v2, %v817_v3  ;;  %v683_v3 = vld [vmem:[%s3599_s28 + $0x30] sm:$0xff] }
 0x13b   : > { %2403 = vmatpush1.bf16.msra.mxu0 %v2690_v13  ;;  %2445 = vmatprep.subr.bf16.mxu1 %v2933_v16  ;;  %v804_v13 = vld [vmem:[%s3599_s28 + $0x3f8] sm:$0xff]  ;;  %v2807_v16 = vcombine.high %v795_v10, %v803_v11 }
 0x13c   : > { %2404 = vmatprep.subr.bf16.mxu0 %v2931_v15  ;;  %v2820_v15 = vcombine.low %v810_v4, %v818_v5  ;;  %v2809_v17 = vcombine.high %v796_v12, %v804_v13  ;;  %v691_v4 = vld [vmem:[%s3599_s28 + $0x70] sm:$0xff]  ;;  %v684_v5 = vld [vmem:[%s3599_s28 + $0x38] sm:$0xff] }
 0x13e   : > { %2446 = vmatpush2.bf16.msra.mxu1 %v2932_v22  ;;  %v2806_v22 = vcombine.low %v795_v10, %v803_v11  ;;  %v923_v11 = vld [vmem:[%s3599_s28 + $0x7b0] sm:$0xff] }
 0x13f   : > { %2405 = vmatpush2.bf16.msra.mxu0 %v2930_v21  ;;  %2447 = vmatprep.subr.bf16.mxu1 %v2917_v24  ;;  %v788_v21 = vld [vmem:[%s3599_s28 + $0x378] sm:$0xff]  ;;  %v2791_v24 = vcombine.high %v779_v18, %v787_v19 }
 0x140   : > { %2406 = vmatprep.subr.bf16.mxu0 %v2915_v23  ;;  %v2808_v23 = vcombine.low %v796_v12, %v804_v13  ;;  %v2793_v25 = vcombine.high %v780_v20, %v788_v21  ;;  %v931_v12 = vld [vmem:[%s3599_s28 + $0x7f0] sm:$0xff]  ;;  %v924_v13 = vld [vmem:[%s3599_s28 + $0x7b8] sm:$0xff] }
 0x142   : > { %2448 = vmatpush2.bf16.msra.mxu1 %v2916_v30  ;;  %v772_v30 = vld [vmem:[%s3599_s28 + $0x2f8] sm:$0xff] }
 0x143   : > { %2407 = vmatpush2.bf16.msra.mxu0 %v2914_v29  ;;  %2449 = vmatprep.subr.bf16.mxu1 %v2901_v32  ;;  %v764_v29 = vld [vmem:[%s3599_s28 + $0x2b8] sm:$0xff]  ;;  %v2792_v32 = vcombine.low %v780_v20, %v788_v21  ;;  %v915_v20 = vld [vmem:[%s3599_s28 + $0x770] sm:$0xff] }
 0x144   : > { %2408 = vmatprep.subr.bf16.mxu0 %v2899_v31  ;;  %v2790_v31 = vcombine.low %v779_v18, %v787_v19  ;;  %v2777_v34 = vcombine.high %v764_v29, %v772_v30  ;;  %v907_v19 = vld [vmem:[%s3599_s28 + $0x730] sm:$0xff]  ;;  %v908_v21 = vld [vmem:[%s3599_s28 + $0x738] sm:$0xff] }
 0x146   : > { %2450 = vmatpush2.bf16.msra.mxu1 %v2900_v37  ;;  %v756_v37 = vld [vmem:[%s3599_s28 + $0x278] sm:$0xff] }
 0x147   : > { %2409 = vmatpush2.bf16.msra.mxu0 %v2898_v36  ;;  %2451 = vmatprep.subr.bf16.mxu1 %v2885_v39  ;;  %v748_v36 = vld [vmem:[%s3599_s28 + $0x238] sm:$0xff]  ;;  %v2776_v39 = vcombine.low %v764_v29, %v772_v30  ;;  %v899_v29 = vld [vmem:[%s3599_s28 + $0x6f0] sm:$0xff] }
 0x148   : > { %2410 = vmatprep.subr.bf16.mxu0 %v2883_v38  ;;  %v2774_v38 = vcombine.low %v763_v26, %v771_v27  ;;  %v2761_v41 = vcombine.high %v748_v36, %v756_v37  ;;  %v891_v27 = vld [vmem:[%s3599_s28 + $0x6b0] sm:$0xff]  ;;  %v892_v30 = vld [vmem:[%s3599_s28 + $0x6b8] sm:$0xff] }
 0x14a   : > { %2452 = vmatpush2.bf16.msra.mxu1 %v2884_v45  ;;  %v740_v45 = vld [vmem:[%s3599_s28 + $0x1f8] sm:$0xff] }
 0x14b   : > { %2411 = vmatpush2.bf16.msra.mxu0 %v2882_v44  ;;  %2453 = vmatprep.subr.bf16.mxu1 %v2869_v47  ;;  %v732_v44 = vld [vmem:[%s3599_s28 + $0x1b8] sm:$0xff]  ;;  %v2743_v47 = vcombine.high %v731_v42, %v739_v43 }
 0x14c   : > { %2412 = vmatprep.subr.bf16.mxu0 %v2867_v46  ;;  %v2758_v46 = vcombine.low %v747_v35, %v755_v0  ;;  %v2745_v48 = vcombine.high %v732_v44, %v740_v45  ;;  %v875_v0 = vld [vmem:[%s3599_s28 + $0x630] sm:$0xff] }
 0x14e   : > { %2454 = vmatpush2.bf16.msra.mxu1 %v2868_v53  ;;  %v2742_v53 = vcombine.low %v731_v42, %v739_v43  ;;  %v859_v43 = vld [vmem:[%s3599_s28 + $0x5b0] sm:$0xff] }
 0x14f   : > { %2413 = vmatpush2.bf16.msra.mxu0 %v2866_v52  ;;  %2455 = vmatprep.subr.bf16.mxu1 %v2853_v55  ;;  %v724_v52 = vld [vmem:[%s3599_s28 + $0x178] sm:$0xff]  ;;  %v2727_v55 = vcombine.high %v715_v49, %v723_v50 }
 0x150   : > { %2414 = vmatprep.subr.bf16.mxu0 %v2851_v54  ;;  %v2744_v54 = vcombine.low %v732_v44, %v740_v45  ;;  %v2729_v56 = vcombine.high %v716_v51, %v724_v52  ;;  %v867_v44 = vld [vmem:[%s3599_s28 + $0x5f0] sm:$0xff]  ;;  %v860_v45 = vld [vmem:[%s3599_s28 + $0x5b8] sm:$0xff] }
 0x152   : > { %2456 = vmatpush2.bf16.msra.mxu1 %v2852_v61  ;;  %v2726_v61 = vcombine.low %v715_v49, %v723_v50  ;;  %v843_v50 = vld [vmem:[%s3599_s28 + $0x530] sm:$0xff] }
 0x153   : > { %2415 = vmatpush2.bf16.msra.mxu0 %v2850_v60  ;;  %2457 = vmatprep.subr.bf16.mxu1 %v2837_v63  ;;  %v708_v60 = vld [vmem:[%s3599_s28 + $0xf8] sm:$0xff]  ;;  %v2711_v63 = vcombine.high %v699_v57, %v707_v58 }
 0x154   : > { %2416 = vmatprep.subr.bf16.mxu0 %v2835_v62  ;;  %v2728_v62 = vcombine.low %v716_v51, %v724_v52  ;;  %v2713_v2 = vcombine.high %v700_v59, %v708_v60  ;;  %v851_v51 = vld [vmem:[%s3599_s28 + $0x570] sm:$0xff]  ;;  %v844_v52 = vld [vmem:[%s3599_s28 + $0x538] sm:$0xff] }
 0x156   : > { %2458 = vmatpush2.bf16.msra.mxu1 %v2836_v7  ;;  %v2710_v7 = vcombine.low %v699_v57, %v707_v58  ;;  %v827_v58 = vld [vmem:[%s3599_s28 + $0x4b0] sm:$0xff] }
 0x157   : > { %2417 = vmatpush2.bf16.msra.mxu0 %v2834_v6  ;;  %2459 = vmatprep.subr.bf16.mxu1 %v2821_v9  ;;  %v692_v6 = vld [vmem:[%s3599_s28 + $0x78] sm:$0xff]  ;;  %v2695_v9 = vcombine.high %v683_v3, %v691_v4 }
 0x158   : > { %2418 = vmatprep.subr.bf16.mxu0 %v2819_v8  ;;  %v2712_v8 = vcombine.low %v700_v59, %v708_v60  ;;  %v2697_v10 = vcombine.high %v684_v5, %v692_v6  ;;  %v835_v59 = vld [vmem:[%s3599_s28 + $0x4f0] sm:$0xff]  ;;  %v828_v60 = vld [vmem:[%s3599_s28 + $0x4b8] sm:$0xff] }
 0x15a   : > { %2460 = vmatpush2.bf16.msra.mxu1 %v2820_v15  ;;  %v2694_v15 = vcombine.low %v683_v3, %v691_v4  ;;  %v811_v4 = vld [vmem:[%s3599_s28 + $0x430] sm:$0xff] }
 0x15b   : > { %2419 = vmatpush2.bf16.msra.mxu0 %v2818_v14  ;;  %2511 = vmatprep.subr.bf16.mxu1 %v2809_v17  ;;  %v932_v14 = vld [vmem:[%s3599_s28 + $0x7f8] sm:$0xff]  ;;  %v2935_v17 = vcombine.high %v923_v11, %v931_v12 }
 0x15c   : > { %2470 = vmatprep.subr.bf16.mxu0 %v2807_v16  ;;  %v2696_v16 = vcombine.low %v684_v5, %v692_v6  ;;  %v2937_v18 = vcombine.high %v924_v13, %v932_v14  ;;  %v819_v5 = vld [vmem:[%s3599_s28 + $0x470] sm:$0xff]  ;;  %v812_v6 = vld [vmem:[%s3599_s28 + $0x438] sm:$0xff] }
 0x15d   : > { %2462 = vmatmul.mubr.bf16.vlgmr.msra.gmra.mxu1 %v3816_v28 }
 0x15e   : > { %2421 = vmatmul.mubr.bf16.vlgmr.msra.gmra.mxu0 %v3816_v28  ;;  %2512 = vmatpush1.bf16.msra.mxu1 %v2808_v23  ;;  %v2934_v23 = vcombine.low %v923_v11, %v931_v12  ;;  %v2822_v12 = vcombine.low %v811_v4, %v819_v5 }
 0x15f   : > { %2471 = vmatpush1.bf16.msra.mxu0 %v2806_v22  ;;  %2513 = vmatprep.subr.bf16.mxu1 %v2793_v25  ;;  %v916_v22 = vld [vmem:[%s3599_s28 + $0x778] sm:$0xff]  ;;  %v2919_v25 = vcombine.high %v907_v19, %v915_v20 }
 0x160   : > { %2472 = vmatprep.subr.bf16.mxu0 %v2791_v24  ;;  %2502 = vmatprep.mubr.bf16.mxu0 %v3597_v1  ;;  %v2936_v24 = vcombine.low %v924_v13, %v932_v14  ;;  %v2921_v26 = vcombine.high %v908_v21, %v916_v22 }
 0x161   : > { %2543 = vmatprep.mubr.bf16.mxu1 %v3597_v1  ;;  %v2760_v1 = vcombine.low %v748_v36, %v756_v37  ;;  %v883_v36 = vld [vmem:[%s3599_s28 + $0x670] sm:$0xff]  ;;  %v876_v37 = vld [vmem:[%s3599_s28 + $0x638] sm:$0xff] }
 0x162   : > { %2514 = vmatpush1.bf16.msra.mxu1 %v2792_v32  ;;  %v2918_v32 = vcombine.low %v907_v19, %v915_v20 }
 0x163   : > { %2473 = vmatpush1.bf16.msra.mxu0 %v2790_v31  ;;  %2515 = vmatprep.subr.bf16.mxu1 %v2777_v34  ;;  %v900_v31 = vld [vmem:[%s3599_s28 + $0x6f8] sm:$0xff]  ;;  %v2903_v34 = vcombine.high %v891_v27, %v899_v29 }
 0x164   : > { %2474 = vmatprep.subr.bf16.mxu0 %v2775_v33  ;;  %v2920_v33 = vcombine.low %v908_v21, %v916_v22  ;;  %v2905_v35 = vcombine.high %v892_v30, %v900_v31 }
 0x166   : > { %2516 = vmatpush1.bf16.msra.mxu1 %v2776_v39  ;;  %v2902_v39 = vcombine.low %v891_v27, %v899_v29 }
 0x167   : > { %2475 = vmatpush1.bf16.msra.mxu0 %v2774_v38  ;;  %2517 = vmatprep.subr.bf16.mxu1 %v2761_v41  ;;  %v884_v38 = vld [vmem:[%s3599_s28 + $0x678] sm:$0xff]  ;;  %v2887_v41 = vcombine.high %v875_v0, %v883_v36 }
 0x168   : > { %2476 = vmatprep.subr.bf16.mxu0 %v2759_v40  ;;  %v2904_v40 = vcombine.low %v892_v30, %v900_v31  ;;  %v2889_v42 = vcombine.high %v876_v37, %v884_v38 }
 0x16a   : > { %2518 = vmatpush1.bf16.msra.mxu1 %v2760_v1  ;;  %v2886_v1 = vcombine.low %v875_v0, %v883_v36 }
 0x16b   : > { %2477 = vmatpush1.bf16.msra.mxu0 %v2758_v46  ;;  %2519 = vmatprep.subr.bf16.mxu1 %v2745_v48  ;;  %v868_v46 = vld [vmem:[%s3599_s28 + $0x5f8] sm:$0xff]  ;;  %v2871_v48 = vcombine.high %v859_v43, %v867_v44 }
 0x16c   : > { %2478 = vmatprep.subr.bf16.mxu0 %v2743_v47  ;;  %v2888_v47 = vcombine.low %v876_v37, %v884_v38  ;;  %v2873_v49 = vcombine.high %v860_v45, %v868_v46 }
 0x16e   : > { %2520 = vmatpush1.bf16.msra.mxu1 %v2744_v54  ;;  %v2870_v54 = vcombine.low %v859_v43, %v867_v44 }
 0x16f   : > { %2479 = vmatpush1.bf16.msra.mxu0 %v2742_v53  ;;  %2521 = vmatprep.subr.bf16.mxu1 %v2729_v56  ;;  %v852_v53 = vld [vmem:[%s3599_s28 + $0x578] sm:$0xff]  ;;  %v2855_v56 = vcombine.high %v843_v50, %v851_v51 }
 0x170   : > { %2480 = vmatprep.subr.bf16.mxu0 %v2727_v55  ;;  %v2872_v55 = vcombine.low %v860_v45, %v868_v46  ;;  %v2857_v57 = vcombine.high %v844_v52, %v852_v53 }
 0x172   : > { %2522 = vmatpush1.bf16.msra.mxu1 %v2728_v62  ;;  %v2854_v62 = vcombine.low %v843_v50, %v851_v51 }
 0x173   : > { %2481 = vmatpush1.bf16.msra.mxu0 %v2726_v61  ;;  %2523 = vmatprep.subr.bf16.mxu1 %v2713_v2  ;;  %v836_v61 = vld [vmem:[%s3599_s28 + $0x4f8] sm:$0xff]  ;;  %v2839_v2 = vcombine.high %v827_v58, %v835_v59 }
 0x174   : > { %2482 = vmatprep.subr.bf16.mxu0 %v2711_v63  ;;  %v2856_v63 = vcombine.low %v844_v52, %v852_v53  ;;  %v2841_v3 = vcombine.high %v828_v60, %v836_v61 }
 0x176   : > { %2524 = vmatpush1.bf16.msra.mxu1 %v2712_v8  ;;  %v2838_v8 = vcombine.low %v827_v58, %v835_v59 }
 0x177   : > { %2483 = vmatpush1.bf16.msra.mxu0 %v2710_v7  ;;  %2525 = vmatprep.subr.bf16.mxu1 %v2697_v10  ;;  %v820_v7 = vld [vmem:[%s3599_s28 + $0x478] sm:$0xff]  ;;  %v2823_v10 = vcombine.high %v811_v4, %v819_v5 }
 0x178   : > { %2484 = vmatprep.subr.bf16.mxu0 %v2695_v9  ;;  %v2840_v9 = vcombine.low %v828_v60, %v836_v61  ;;  %v2825_v11 = vcombine.high %v812_v6, %v820_v7  ;;  %v2824_v13 = vcombine.low %v812_v6, %v820_v7 }
 0x17a   : > { %2526 = vmatpush1.bf16.msra.mxu1 %v2696_v16 }
 0x17b   : > { %2485 = vmatpush1.bf16.msra.mxu0 %v2694_v15  ;;  %2527 = vmatprep.subr.bf16.mxu1 %v2937_v18 }
 0x17c   : > { %2486 = vmatprep.subr.bf16.mxu0 %v2935_v17 }
 0x17e   : > { %2528 = vmatpush2.bf16.msra.mxu1 %v2936_v24 }
 0x17f   : > { %2487 = vmatpush2.bf16.msra.mxu0 %v2934_v23  ;;  %2529 = vmatprep.subr.bf16.mxu1 %v2921_v26 }
 0x180   : > { %2488 = vmatprep.subr.bf16.mxu0 %v2919_v25 }
 0x182   : > { %2530 = vmatpush2.bf16.msra.mxu1 %v2920_v33 }
 0x183   : > { %2489 = vmatpush2.bf16.msra.mxu0 %v2918_v32  ;;  %2531 = vmatprep.subr.bf16.mxu1 %v2905_v35 }
 0x184   : > { %2490 = vmatprep.subr.bf16.mxu0 %v2903_v34 }
 0x186   : > { %2532 = vmatpush2.bf16.msra.mxu1 %v2904_v40 }
 0x187   : > { %2491 = vmatpush2.bf16.msra.mxu0 %v2902_v39  ;;  %2533 = vmatprep.subr.bf16.mxu1 %v2889_v42 }
 0x188   : > { %2492 = vmatprep.subr.bf16.mxu0 %v2887_v41 }
 0x18a   : > { %2534 = vmatpush2.bf16.msra.mxu1 %v2888_v47 }
 0x18b   : > { %2493 = vmatpush2.bf16.msra.mxu0 %v2886_v1  ;;  %2535 = vmatprep.subr.bf16.mxu1 %v2873_v49 }
 0x18c   : > { %2494 = vmatprep.subr.bf16.mxu0 %v2871_v48 }
 0x18e   : > { %2536 = vmatpush2.bf16.msra.mxu1 %v2872_v55 }
 0x18f   : > { %2495 = vmatpush2.bf16.msra.mxu0 %v2870_v54  ;;  %2537 = vmatprep.subr.bf16.mxu1 %v2857_v57 }
 0x190   : > { %2496 = vmatprep.subr.bf16.mxu0 %v2855_v56 }
 0x192   : > { %2538 = vmatpush2.bf16.msra.mxu1 %v2856_v63 }
 0x193   : > { %2497 = vmatpush2.bf16.msra.mxu0 %v2854_v62  ;;  %2539 = vmatprep.subr.bf16.mxu1 %v2841_v3 }
 0x194   : > { %2498 = vmatprep.subr.bf16.mxu0 %v2839_v2 }
 0x196   : > { %2540 = vmatpush2.bf16.msra.mxu1 %v2840_v9 }
 0x197   : > { %2499 = vmatpush2.bf16.msra.mxu0 %v2838_v8  ;;  %2541 = vmatprep.subr.bf16.mxu1 %v2825_v11 }
 0x198   : > { %2500 = vmatprep.subr.bf16.mxu0 %v2823_v10 }
 0x19a   : > { %2542 = vmatpush2.bf16.msra.mxu1 %v2824_v13 }
 0x19b   : > { %2501 = vmatpush2.bf16.msra.mxu0 %v2822_v12 }
 0x19d   : > { %v2299_v15 = vpop.f32.mrf.mxu1  ;;  %2544 = vmatmul.mubr.bf16.vlgmr.msra.gmra.mxu1 %v3816_v28 }
 0x19e   : > { %v2258_v14 = vpop.f32.mrf.mxu0  ;;  %2503 = vmatmul.mubr.bf16.vlgmr.msra.gmra.mxu0 %v3816_v28 }
 0x19f   : > { %2965 = vtanh.f32 %v2258_v14  ;;  %v2301_v17 = vpop.f32.mrf.mxu1 }
 0x1a0   : > { %2967 = vtanh.f32 %v2299_v15  ;;  %v2260_v16 = vpop.f32.mrf.mxu0 }
 0x1a1   : > { %2969 = vtanh.f32 %v2260_v16  ;;  %v2303_v19 = vpop.f32.mrf.mxu1 }
 0x1a2   : > { %2971 = vtanh.f32 %v2301_v17  ;;  %v2262_v18 = vpop.f32.mrf.mxu0 }
 0x1a3   : > { %v2304_v21 = vpop.f32.mrf.mxu1 }
 0x1a4   : > { %v2263_v20 = vpop.f32.mrf.mxu0 }
 0x1ac   : > { %v2966_v22 = vpop.eup %2965 }
 0x1ad   : > { %v2968_v23 = vpop.eup %2967 }
 0x1ae   : > { %v2970_v24 = vpop.eup %2969 }
 0x1af   : > { %v2972_v28 = vpop.eup %2971  ;;  %v2584_v25 = vcombine.low %v2966_v22, %v2970_v24 }
 0x1b0   : > { %v2585_v26 = vcombine.low %v2968_v23, %v2972_v28 }
 0x1b1   : > { %2600 = vst [vmem:[%s3883_s7] sm:$0x77] %v2584_v25 }
 0x1b2   : > { %2601 = vst [vmem:[%s3883_s7 + $0x8] sm:$0x77] %v2585_v26 }
 0x1dd   : > { %v2381_v29 = vpop.f32.mrf.mxu1 }
 0x1de   : > { %v2340_v27 = vpop.f32.mrf.mxu0 }
 0x1df   : > { %2973 = vtanh.f32 %v2340_v27  ;;  %v2383_v31 = vpop.f32.mrf.mxu1 }
 0x1e0   : > { %2975 = vtanh.f32 %v2381_v29  ;;  %v2342_v30 = vpop.f32.mrf.mxu0 }
 0x1e1   : > { %2977 = vtanh.f32 %v2342_v30  ;;  %v2385_v33 = vpop.f32.mrf.mxu1 }
 0x1e2   : > { %2979 = vtanh.f32 %v2383_v31  ;;  %v2344_v32 = vpop.f32.mrf.mxu0 }
 0x1e3   : > { %v2386_v35 = vpop.f32.mrf.mxu1 }
 0x1e4   : > { %v2345_v34 = vpop.f32.mrf.mxu0 }
 0x1ec   : > { %v2974_v0 = vpop.eup %2973 }
 0x1ed   : > { %v2976_v36 = vpop.eup %2975 }
 0x1ee   : > { %v2978_v37 = vpop.eup %2977 }
 0x1ef   : > { %v2980_v38 = vpop.eup %2979  ;;  %v2586_v39 = vcombine.low %v2974_v0, %v2978_v37 }
 0x1f0   : > { %v2587_v40 = vcombine.low %v2976_v36, %v2980_v38 }
 0x1f1   : > { %2602 = vst [vmem:[%s3883_s7 + $0x10] sm:$0x77] %v2586_v39 }
 0x1f2   : > { %2603 = vst [vmem:[%s3883_s7 + $0x18] sm:$0x77] %v2587_v40 }
 0x21d   : > { %v2463_v42 = vpop.f32.mrf.mxu1 }
 0x21e   : > { %v2422_v41 = vpop.f32.mrf.mxu0 }
 0x21f   : > { %2981 = vtanh.f32 %v2422_v41  ;;  %v2465_v44 = vpop.f32.mrf.mxu1 }
 0x220   : > { %2983 = vtanh.f32 %v2463_v42  ;;  %v2424_v43 = vpop.f32.mrf.mxu0 }
 0x221   : > { %2985 = vtanh.f32 %v2424_v43  ;;  %v2467_v46 = vpop.f32.mrf.mxu1 }
 0x222   : > { %2987 = vtanh.f32 %v2465_v44  ;;  %v2426_v45 = vpop.f32.mrf.mxu0 }
 0x223   : > { %v2468_v47 = vpop.f32.mrf.mxu1 }
 0x224   : > { %v2427_v1 = vpop.f32.mrf.mxu0 }
 0x22c   : > { %v2982_v48 = vpop.eup %2981 }
 0x22d   : > { %v2984_v49 = vpop.eup %2983 }
 0x22e   : > { %v2986_v50 = vpop.eup %2985 }
 0x22f   : > { %v2988_v51 = vpop.eup %2987  ;;  %v2588_v52 = vcombine.low %v2982_v48, %v2986_v50 }
 0x230   : > { %v2589_v53 = vcombine.low %v2984_v49, %v2988_v51 }
 0x231   : > { %2604 = vst [vmem:[%s3883_s7 + $0x20] sm:$0x77] %v2588_v52 }
 0x232   : > { %2605 = vst [vmem:[%s3883_s7 + $0x28] sm:$0x77] %v2589_v53 }
 0x25d   : > { %v2545_v55 = vpop.f32.mrf.mxu1 }
 0x25e   : > { %v2504_v54 = vpop.f32.mrf.mxu0 }
 0x25f   : > { %2989 = vtanh.f32 %v2504_v54  ;;  %v2547_v57 = vpop.f32.mrf.mxu1 }
 0x260   : > { %2991 = vtanh.f32 %v2545_v55  ;;  %v2506_v56 = vpop.f32.mrf.mxu0 }
 0x261   : > { %2993 = vtanh.f32 %v2506_v56  ;;  %v2549_v59 = vpop.f32.mrf.mxu1 }
 0x262   : > { %2995 = vtanh.f32 %v2547_v57  ;;  %v2508_v58 = vpop.f32.mrf.mxu0 }
 0x263   : > { %v2550_v61 = vpop.f32.mrf.mxu1 }
 0x264   : > { %v2509_v60 = vpop.f32.mrf.mxu0 }
 0x26c   : > { %v2990_v62 = vpop.eup %2989 }
 0x26d   : > { %v2992_v63 = vpop.eup %2991 }
 0x26e   : > { %v2994_v2 = vpop.eup %2993 }
 0x26f   : > { %v2996_v3 = vpop.eup %2995  ;;  %v2590_v4 = vcombine.low %v2990_v62, %v2994_v2 }
 0x270   : > { %v2591_v5 = vcombine.low %v2992_v63, %v2996_v3 }
 0x271   : > { %2606 = vst [vmem:[%s3883_s7 + $0x30] sm:$0x77] %v2590_v4 }
 0x272   : > { %2607 = vst [vmem:[%s3883_s7 + $0x38] sm:$0x77] %v2591_v5 }
 0x273 PF: > { %p9_p9 = scmp.ge.s32.totalorder %s3054_s13, 6   ;;  %s3906_s9 = smov %s3016_s10 }
 0x274   : > { %s3907_s10 = smov %s3063_s16  ;;  %s3908_s11 = smov %s3054_s13 }
 0x275   :  { %11 = sbr.rel (!%p9_p9) target bundleno = 2 (0x2), region = 86 }

</bundles_post_ra>
